<compile_context>
chip_gen: v6e
topology: v6e:2x2x1
jax: 0.10.0
libtpu: 0.0.40
codegen_flags: <defaults>
</compile_context>

<pallas_src>
import functools

import numpy as np

import jax
import jax.numpy as jnp
from jax.experimental import pallas as pl
from jax.experimental.pallas import tpu as pltpu

_COUT_PAD = 128  # pad the 3 RGB output channels to a full 128-lane store


def _halo_rows(W):
    """Top/bottom halo rows for the flattened (rows = batch*H*W) conv scratch.

    Rounded up to a multiple of 8 so the interior store stays sublane-aligned;
    must be >= W + 1 (max |dh*W + dw| shift).
    """
    return ((W + 1 + 7) // 8) * 8


def _choose_bt(B, cap=16):
    """Batch tile: largest divisor of B (<= cap), preferring an even grid
    length so both v7x TensorCores get work under ("parallel",) semantics."""
    divisors = [d for d in range(1, min(B, cap) + 1) if B % d == 0]
    even_grid = [d for d in divisors if (B // d) % 2 == 0]
    return max(even_grid) if even_grid else max(divisors)


@functools.lru_cache(maxsize=None)
def _tap_masks(bt, W):
    """(bt*W*W, 9) f32 validity mask per 3x3 tap for the batch-stacked rows.

    Handles both the image w/h borders and the fact that Bt images are stacked
    along the row axis (so +-W row shifts would otherwise read the neighboring
    batch element).
    """
    HW = W * W
    r = np.arange(bt * HW)
    h = (r % HW) // W
    w = r % W
    cols = []
    for dh in (-1, 0, 1):
        for dw in (-1, 0, 1):
            ok = (h + dh >= 0) & (h + dh < W) & (w + dw >= 0) & (w + dw < W)
            cols.append(ok.astype(np.float32))
    return jnp.asarray(np.stack(cols, axis=1))


def _sngan_fused_kernel(*refs, with_shift, dim_z, bw, ngf, bt):
    """Whole generator for Bt batch elements (grid iterates over batch blocks)."""
    if with_shift:
        (z_ref, s_ref, w1_ref, b1_ref, wc1_ref, bc1_ref,
         wc2_ref, bc2_ref, m_ref, o_ref, xpad_ref) = refs
    else:
        (z_ref, w1_ref, b1_ref, wc1_ref, bc1_ref,
         wc2_ref, bc2_ref, m_ref, o_ref, xpad_ref) = refs
        s_ref = None

    W = 2 * bw           # spatial width/height after the (folded) 2x upsample
    HW = W * W
    M = bt * HW          # batch-blocked row count for all matmuls
    PAD = _halo_rows(W)

    # Zero only the halo rows (interior is fully overwritten before every read;
    # masks keep halo/cross-batch rows out of the output).
    xpad_ref[:PAD, :] = jnp.zeros((PAD, ngf), jnp.float32)
    xpad_ref[PAD + M:, :] = jnp.zeros((PAD, ngf), jnp.float32)

    # ---- 1. latent (+ optional shift) -> upsample-folded linear -> ReLU ----
    zv = z_ref[0]                                    # (Bt, dim_z) f32
    if with_shift:
        zv = zv + s_ref[0]                           # fused "z + shift"
    bias0 = b1_ref[...]                              # (HW, ngf)
    accs = [bias0] * bt
    for k in range(dim_z):                           # tiny K: unrolled VPU MACs
        w1k = w1_ref[k]                              # (HW, ngf), upsample folded
        for b in range(bt):
            accs[b] = accs[b] + zv[b:b + 1, k:k + 1] * w1k
    x = jnp.maximum(jnp.concatenate(accs, axis=0), 0.0)       # (M, ngf) f32

    # ---- 2. 3x3 "same" conv: 9 shifted taps -> ONE K=9*ngf bf16 matmul -----
    def conv3x3(x_in, w_ref, b_ref):
        xpad_ref[PAD:PAD + M, :] = x_in              # single interior store
        taps = []
        t = 0
        for dh in (-1, 0, 1):
            for dw in (-1, 0, 1):
                s = dh * W + dw
                xt = xpad_ref[PAD + s:PAD + s + M, :]          # (M, ngf) f32
                if s != 0:
                    xt = xt * m_ref[:, t:t + 1]      # constant boundary mask
                taps.append(xt)
                t += 1
        # One lane-concatenated operand, one bf16 cast, one MXU matmul (K=288).
        x9 = jnp.concatenate(taps, axis=1).astype(jnp.bfloat16)   # (M, 9*ngf)
        return jnp.dot(x9, w_ref[...],
                       preferred_element_type=jnp.float32) + b_ref[...]

    h1 = jnp.maximum(conv3x3(x, wc1_ref, bc1_ref), 0.0)        # (M, ngf)
    img = jnp.tanh(conv3x3(h1, wc2_ref, bc2_ref))              # (M, 128)

    # Single lane-dense (128-wide) bf16 store -- the kernel's only HBM write.
    o_ref[...] = img.astype(jnp.bfloat16)


@functools.lru_cache(maxsize=None)
def _build_sngan_call(with_shift, B, bt, dim_z, bw, ngf, cout_pad):
    W = 2 * bw
    HW = W * W
    M = bt * HW
    PAD = _halo_rows(W)
    kernel = functools.partial(_sngan_fused_kernel, with_shift=with_shift,
                               dim_z=dim_z, bw=bw, ngf=ngf, bt=bt)

    in_specs = [pl.BlockSpec((1, bt, dim_z), lambda g: (g, 0, 0))]          # z
    if with_shift:
        in_specs.append(pl.BlockSpec((1, bt, dim_z), lambda g: (g, 0, 0)))  # shift
    in_specs += [
        pl.BlockSpec((dim_z, HW, ngf), lambda g: (0, 0, 0)),   # w1_up (resident)
        pl.BlockSpec((HW, ngf), lambda g: (0, 0)),             # b1_up
        pl.BlockSpec((9 * ngf, ngf), lambda g: (0, 0)),        # wc1 (bf16)
        pl.BlockSpec((1, ngf), lambda g: (0, 0)),              # bc1
        pl.BlockSpec((9 * ngf, cout_pad), lambda g: (0, 0)),   # wc2 (bf16, padded)
        pl.BlockSpec((1, cout_pad), lambda g: (0, 0)),         # bc2
        pl.BlockSpec((M, 9), lambda g: (0, 0)),                # per-tap masks
    ]
    return pl.pallas_call(
        kernel,
        out_shape=jax.ShapeDtypeStruct((B * HW, cout_pad), jnp.bfloat16),
        grid=(B // bt,),
        in_specs=in_specs,
        out_specs=pl.BlockSpec((M, cout_pad), lambda g: (g, 0)),
        scratch_shapes=[pltpu.VMEM((M + 2 * PAD, ngf), jnp.float32)],
        compiler_params=pltpu.CompilerParams(
            dimension_semantics=("parallel",)),    # batch blocks across cores
    )


def sngan_wrapper_forward(params, z, shift=None):
    """Equivalent of SNGANWrapper.forward: G(z if shift is None else z + shift)."""
    z = z.astype(jnp.float32)
    B, dim_z = z.shape
    ngf = params["ngf"]
    bw = params["bottom_width"]
    W = 2 * bw
    cout_pad = params["wc2"].shape[1]

    bt = _choose_bt(B)
    G = B // bt
    masks = _tap_masks(bt, W)                        # (bt*HW, 9) constant

    args = [z.reshape(G, bt, dim_z)]
    if shift is not None:
        args.append(shift.astype(jnp.float32).reshape(G, bt, dim_z))
    args += [params["w1_up"], params["b1_up"], params["wc1"], params["bc1"],
             params["wc2"], params["bc2"], masks]

    call = _build_sngan_call(shift is not None, B, bt, dim_z, bw, ngf, cout_pad)
    out = call(*args)                                # (B*HW, 128) bf16, lane-dense
    img = out[:, :3].astype(jnp.float32).reshape(B, W, W, 3)   # real RGB only
    # Tiny (B,3,H,W) tensor; keep the PyTorch NCHW output convention.
    return jnp.transpose(img, (0, 3, 1, 2))


def init_params(key, dim_z, ngf=32, bottom_width=4, cout_pad=_COUT_PAD):
    k1, k2, k3 = jax.random.split(key, 3)
    bw = bottom_width
    P = bw * bw
    W = 2 * bw
    HW = W * W

    # Linear: y[b, p, c] = sum_k z[b, k] * w1[k, p, c] + b1[p, c]
    w1 = jax.random.normal(k1, (dim_z, P, ngf), jnp.float32) * 0.1
    b1 = jnp.zeros((P, ngf), jnp.float32)
    # Fold the nearest-2x upsample into the linear weights/bias host-side.
    r = np.arange(HW)
    src = (r // W // 2) * bw + (r % W) // 2          # bottom-stage source row
    w1_up = w1[:, src, :]                            # (dim_z, HW, ngf)
    b1_up = b1[src, :]                               # (HW, ngf)

    # Conv 3x3 weights tap-major: rows [t*Cin, (t+1)*Cin) hold the (Cin, Cout)
    # matrix of tap t = kh*3 + kw.  A PyTorch (Cout, Cin, 3, 3) weight maps
    # here via transpose(2, 3, 1, 0).reshape(9*Cin, Cout).  bf16 storage:
    # peak MXU rate + half the weight DMA bytes.
    wc1 = (jax.random.normal(k2, (9 * ngf, ngf), jnp.float32) * 0.05
           ).astype(jnp.bfloat16)
    wc2 = jax.random.normal(k3, (9 * ngf, 3), jnp.float32) * 0.05
    wc2p = jnp.zeros((9 * ngf, cout_pad), jnp.float32).at[:, :3].set(wc2)

    return {
        "ngf": ngf,
        "bottom_width": bw,
        "w1": w1,                     # bottom-stage form (reference only)
        "b1": b1,
        "w1_up": w1_up,               # upsample-folded (kernel input)
        "b1_up": b1_up,
        "wc1": wc1,
        "bc1": jnp.zeros((1, ngf), jnp.float32),
        "wc2": wc2p.astype(jnp.bfloat16),   # Cout padded 3 -> 128 (lane-dense)
        "bc2": jnp.zeros((1, cout_pad), jnp.float32),
    }


def _reference_forward(params, z, shift=None):
    """Pure-JAX reference with identical semantics (f32 math)."""
    z = z.astype(jnp.float32)
    if shift is not None:
        z = z + shift.astype(jnp.float32)
    B = z.shape[0]
    ngf = params["ngf"]
    bw = params["bottom_width"]

    y = jnp.einsum("bk,kpc->bpc", z, params["w1"]) + params["b1"][None]
    y = jnp.maximum(y, 0.0).reshape(B, bw, bw, ngf)
    y = jnp.repeat(jnp.repeat(y, 2, axis=1), 2, axis=2)        # (B, W, W, ngf)

    def conv3x3(x, wmat, bias):
        Bx, H, Wx, cin = x.shape
        cout = wmat.shape[1]
        xp = jnp.pad(x, ((0, 0), (1, 1), (1, 1), (0, 0)))
        acc = jnp.zeros((Bx, H, Wx, cout), jnp.float32)
        t = 0
        for kh in range(3):
            for kw in range(3):
                patch = xp[:, kh:kh + H, kw:kw + Wx, :]
                acc = acc + jnp.einsum(
                    "bhwc,cd->bhwd", patch,
                    wmat[t * cin:(t + 1) * cin].astype(jnp.float32))
                t += 1
        return acc + bias.astype(jnp.float32).reshape(1, 1, 1, cout)

    h1 = jnp.maximum(conv3x3(y, params["wc1"], params["bc1"]), 0.0)
    img = jnp.tanh(conv3x3(h1, params["wc2"], params["bc2"]))[..., :3]
    return jnp.transpose(img, (0, 3, 1, 2))


if __name__ == "__main__":
    key = jax.random.PRNGKey(0)
    kp, kz, ks = jax.random.split(key, 3)

    B, dim_z, ngf, bw = 8, 8, 32, 4       # Bt=4 per step, grid=(2,) -> even
    params = init_params(kp, dim_z, ngf=ngf, bottom_width=bw)

    z = jax.random.normal(kz, (B, dim_z), jnp.float32)
    shift = jax.random.normal(ks, (B, dim_z), jnp.float32)

    # With shift (z + shift path) and without (shift is None path).
    out_shifted = jax.block_until_ready(sngan_wrapper_forward(params, z, shift))
    out_plain = jax.block_until_ready(sngan_wrapper_forward(params, z, None))

    assert out_shifted.shape == (B, 3, 2 * bw, 2 * bw)
    assert out_plain.shape == (B, 3, 2 * bw, 2 * bw)
    assert out_shifted.dtype == jnp.float32

    # Numerical check against the pure-JAX reference.  Conv inputs/weights and
    # the final HBM store are bf16 by design -> loose tolerance.
    ref_shifted = _reference_forward(params, z, shift)
    ref_plain = _reference_forward(params, z, None)
    assert jnp.allclose(out_shifted, ref_shifted, atol=3e-2, rtol=3e-2)
    assert jnp.allclose(out_plain, ref_plain, atol=3e-2, rtol=3e-2)

    print("KERNEL_OK")
</pallas_src>

<mosaic_0001>
module attributes {stable_mosaic.version = 11 : i64} {
  func.func @_sngan_fused_kernel(%arg0: i32, %arg1: memref<1x4x8xf32, #tpu.memory_space<vmem>>, %arg2: memref<1x4x8xf32, #tpu.memory_space<vmem>>, %arg3: memref<8x64x32xf32, #tpu.memory_space<vmem>>, %arg4: memref<64x32xf32, #tpu.memory_space<vmem>>, %arg5: memref<288x32xbf16, #tpu.memory_space<vmem>>, %arg6: memref<1x32xf32, #tpu.memory_space<vmem>>, %arg7: memref<288x128xbf16, #tpu.memory_space<vmem>>, %arg8: memref<1x128xf32, #tpu.memory_space<vmem>>, %arg9: memref<256x9xf32, #tpu.memory_space<vmem>>, %arg10: memref<256x128xbf16, #tpu.memory_space<vmem>>, %arg11: memref<288x32xf32, #tpu.memory_space<vmem>>) attributes {dimension_semantics = [#tpu.dimension_semantics<parallel>], iteration_bounds = array<i64: 2>, scalar_prefetch = 0 : i64, scratch_operands = 1 : i64, tpu.core_type = #tpu.core_type<tc>, window_params = [{transform_indices = @transform_0, window_bounds = array<i64: 1, 4, 8>}, {transform_indices = @transform_1, window_bounds = array<i64: 1, 4, 8>}, {pipeline_mode = #tpu.pipeline_mode<synchronous>, transform_indices = @transform_2, window_bounds = array<i64: 8, 64, 32>}, {pipeline_mode = #tpu.pipeline_mode<synchronous>, transform_indices = @transform_3, window_bounds = array<i64: 64, 32>}, {pipeline_mode = #tpu.pipeline_mode<synchronous>, transform_indices = @transform_4, window_bounds = array<i64: 288, 32>}, {pipeline_mode = #tpu.pipeline_mode<synchronous>, transform_indices = @transform_5, window_bounds = array<i64: 1, 32>}, {pipeline_mode = #tpu.pipeline_mode<synchronous>, transform_indices = @transform_6, window_bounds = array<i64: 288, 128>}, {pipeline_mode = #tpu.pipeline_mode<synchronous>, transform_indices = @transform_7, window_bounds = array<i64: 1, 128>}, {pipeline_mode = #tpu.pipeline_mode<synchronous>, transform_indices = @transform_8, window_bounds = array<i64: 256, 9>}, {transform_indices = @transform_9, window_bounds = array<i64: 256, 128>}]} {
    %cst = arith.constant 0.000000e+00 : f32
    %0 = vector.broadcast %cst : f32 to vector<16x32xf32>
    %c0 = arith.constant 0 : index
    %c0_0 = arith.constant 0 : index
    %1 = vector.load %arg11[%c0, %c0_0] : memref<288x32xf32, #tpu.memory_space<vmem>>, vector<16x32xf32>
    tpu.vector_store %arg11[%c0, %c0_0], %0 {strides = array<i32>} : memref<288x32xf32, #tpu.memory_space<vmem>>, vector<16x32xf32>,
    %cst_1 = arith.constant 0.000000e+00 : f32
    %2 = vector.broadcast %cst_1 : f32 to vector<16x32xf32>
    %c272 = arith.constant 272 : index
    %c0_2 = arith.constant 0 : index
    %3 = vector.load %arg11[%c272, %c0_2] : memref<288x32xf32, #tpu.memory_space<vmem>>, vector<16x32xf32>
    tpu.vector_store %arg11[%c272, %c0_2], %2 {strides = array<i32>} : memref<288x32xf32, #tpu.memory_space<vmem>>, vector<16x32xf32>,
    %c0_3 = arith.constant 0 : index
    %c0_4 = arith.constant 0 : index
    %c0_5 = arith.constant 0 : index
    %4 = vector.load %arg1[%c0_3, %c0_4, %c0_5] : memref<1x4x8xf32, #tpu.memory_space<vmem>>, vector<1x4x8xf32>
    %5 = vector.shape_cast %4 : vector<1x4x8xf32> to vector<4x8xf32>
    %c0_6 = arith.constant 0 : index
    %c0_7 = arith.constant 0 : index
    %c0_8 = arith.constant 0 : index
    %6 = vector.load %arg2[%c0_6, %c0_7, %c0_8] : memref<1x4x8xf32, #tpu.memory_space<vmem>>, vector<1x4x8xf32>
    %7 = vector.shape_cast %6 : vector<1x4x8xf32> to vector<4x8xf32>
    %8 = arith.addf %5, %7 : vector<4x8xf32>
    %c0_9 = arith.constant 0 : index
    %c0_10 = arith.constant 0 : index
    %9 = vector.load %arg4[%c0_9, %c0_10] : memref<64x32xf32, #tpu.memory_space<vmem>>, vector<64x32xf32>
    %c0_11 = arith.constant 0 : index
    %c0_12 = arith.constant 0 : index
    %c0_13 = arith.constant 0 : index
    %10 = vector.load %arg3[%c0_11, %c0_12, %c0_13] : memref<8x64x32xf32, #tpu.memory_space<vmem>>, vector<1x64x32xf32>
    %11 = vector.shape_cast %10 : vector<1x64x32xf32> to vector<64x32xf32>
    %12 = vector.extract_strided_slice %8 {offsets = [0, 0], sizes = [1, 1], strides = [1, 1]} : vector<4x8xf32> to vector<1x1xf32>
    %13 = vector.broadcast %12 : vector<1x1xf32> to vector<64x32xf32>
    %14 = arith.mulf %13, %11 : vector<64x32xf32>
    %15 = arith.addf %9, %14 : vector<64x32xf32>
    %16 = vector.extract_strided_slice %8 {offsets = [1, 0], sizes = [1, 1], strides = [1, 1]} : vector<4x8xf32> to vector<1x1xf32>
    %17 = vector.broadcast %16 : vector<1x1xf32> to vector<64x32xf32>
    %18 = arith.mulf %17, %11 : vector<64x32xf32>
    %19 = arith.addf %9, %18 : vector<64x32xf32>
    %20 = vector.extract_strided_slice %8 {offsets = [2, 0], sizes = [1, 1], strides = [1, 1]} : vector<4x8xf32> to vector<1x1xf32>
    %21 = vector.broadcast %20 : vector<1x1xf32> to vector<64x32xf32>
    %22 = arith.mulf %21, %11 : vector<64x32xf32>
    %23 = arith.addf %9, %22 : vector<64x32xf32>
    %24 = vector.extract_strided_slice %8 {offsets = [3, 0], sizes = [1, 1], strides = [1, 1]} : vector<4x8xf32> to vector<1x1xf32>
    %25 = vector.broadcast %24 : vector<1x1xf32> to vector<64x32xf32>
    %26 = arith.mulf %25, %11 : vector<64x32xf32>
    %27 = arith.addf %9, %26 : vector<64x32xf32>
    %c1 = arith.constant 1 : index
    %c0_14 = arith.constant 0 : index
    %c0_15 = arith.constant 0 : index
    %28 = vector.load %arg3[%c1, %c0_14, %c0_15] : memref<8x64x32xf32, #tpu.memory_space<vmem>>, vector<1x64x32xf32>
    %29 = vector.shape_cast %28 : vector<1x64x32xf32> to vector<64x32xf32>
    %30 = vector.extract_strided_slice %8 {offsets = [0, 1], sizes = [1, 1], strides = [1, 1]} : vector<4x8xf32> to vector<1x1xf32>
    %31 = vector.broadcast %30 : vector<1x1xf32> to vector<64x32xf32>
    %32 = arith.mulf %31, %29 : vector<64x32xf32>
    %33 = arith.addf %15, %32 : vector<64x32xf32>
    %34 = vector.extract_strided_slice %8 {offsets = [1, 1], sizes = [1, 1], strides = [1, 1]} : vector<4x8xf32> to vector<1x1xf32>
    %35 = vector.broadcast %34 : vector<1x1xf32> to vector<64x32xf32>
    %36 = arith.mulf %35, %29 : vector<64x32xf32>
    %37 = arith.addf %19, %36 : vector<64x32xf32>
    %38 = vector.extract_strided_slice %8 {offsets = [2, 1], sizes = [1, 1], strides = [1, 1]} : vector<4x8xf32> to vector<1x1xf32>
    %39 = vector.broadcast %38 : vector<1x1xf32> to vector<64x32xf32>
    %40 = arith.mulf %39, %29 : vector<64x32xf32>
    %41 = arith.addf %23, %40 : vector<64x32xf32>
    %42 = vector.extract_strided_slice %8 {offsets = [3, 1], sizes = [1, 1], strides = [1, 1]} : vector<4x8xf32> to vector<1x1xf32>
    %43 = vector.broadcast %42 : vector<1x1xf32> to vector<64x32xf32>
    %44 = arith.mulf %43, %29 : vector<64x32xf32>
    %45 = arith.addf %27, %44 : vector<64x32xf32>
    %c2 = arith.constant 2 : index
    %c0_16 = arith.constant 0 : index
    %c0_17 = arith.constant 0 : index
    %46 = vector.load %arg3[%c2, %c0_16, %c0_17] : memref<8x64x32xf32, #tpu.memory_space<vmem>>, vector<1x64x32xf32>
    %47 = vector.shape_cast %46 : vector<1x64x32xf32> to vector<64x32xf32>
    %48 = vector.extract_strided_slice %8 {offsets = [0, 2], sizes = [1, 1], strides = [1, 1]} : vector<4x8xf32> to vector<1x1xf32>
    %49 = vector.broadcast %48 : vector<1x1xf32> to vector<64x32xf32>
    %50 = arith.mulf %49, %47 : vector<64x32xf32>
    %51 = arith.addf %33, %50 : vector<64x32xf32>
    %52 = vector.extract_strided_slice %8 {offsets = [1, 2], sizes = [1, 1], strides = [1, 1]} : vector<4x8xf32> to vector<1x1xf32>
    %53 = vector.broadcast %52 : vector<1x1xf32> to vector<64x32xf32>
    %54 = arith.mulf %53, %47 : vector<64x32xf32>
    %55 = arith.addf %37, %54 : vector<64x32xf32>
    %56 = vector.extract_strided_slice %8 {offsets = [2, 2], sizes = [1, 1], strides = [1, 1]} : vector<4x8xf32> to vector<1x1xf32>
    %57 = vector.broadcast %56 : vector<1x1xf32> to vector<64x32xf32>
    %58 = arith.mulf %57, %47 : vector<64x32xf32>
    %59 = arith.addf %41, %58 : vector<64x32xf32>
    %60 = vector.extract_strided_slice %8 {offsets = [3, 2], sizes = [1, 1], strides = [1, 1]} : vector<4x8xf32> to vector<1x1xf32>
    %61 = vector.broadcast %60 : vector<1x1xf32> to vector<64x32xf32>
    %62 = arith.mulf %61, %47 : vector<64x32xf32>
    %63 = arith.addf %45, %62 : vector<64x32xf32>
    %c3 = arith.constant 3 : index
    %c0_18 = arith.constant 0 : index
    %c0_19 = arith.constant 0 : index
    %64 = vector.load %arg3[%c3, %c0_18, %c0_19] : memref<8x64x32xf32, #tpu.memory_space<vmem>>, vector<1x64x32xf32>
    %65 = vector.shape_cast %64 : vector<1x64x32xf32> to vector<64x32xf32>
    %66 = vector.extract_strided_slice %8 {offsets = [0, 3], sizes = [1, 1], strides = [1, 1]} : vector<4x8xf32> to vector<1x1xf32>
    %67 = vector.broadcast %66 : vector<1x1xf32> to vector<64x32xf32>
    %68 = arith.mulf %67, %65 : vector<64x32xf32>
    %69 = arith.addf %51, %68 : vector<64x32xf32>
    %70 = vector.extract_strided_slice %8 {offsets = [1, 3], sizes = [1, 1], strides = [1, 1]} : vector<4x8xf32> to vector<1x1xf32>
    %71 = vector.broadcast %70 : vector<1x1xf32> to vector<64x32xf32>
    %72 = arith.mulf %71, %65 : vector<64x32xf32>
    %73 = arith.addf %55, %72 : vector<64x32xf32>
    %74 = vector.extract_strided_slice %8 {offsets = [2, 3], sizes = [1, 1], strides = [1, 1]} : vector<4x8xf32> to vector<1x1xf32>
    %75 = vector.broadcast %74 : vector<1x1xf32> to vector<64x32xf32>
    %76 = arith.mulf %75, %65 : vector<64x32xf32>
    %77 = arith.addf %59, %76 : vector<64x32xf32>
    %78 = vector.extract_strided_slice %8 {offsets = [3, 3], sizes = [1, 1], strides = [1, 1]} : vector<4x8xf32> to vector<1x1xf32>
    %79 = vector.broadcast %78 : vector<1x1xf32> to vector<64x32xf32>
    %80 = arith.mulf %79, %65 : vector<64x32xf32>
    %81 = arith.addf %63, %80 : vector<64x32xf32>
    %c4 = arith.constant 4 : index
    %c0_20 = arith.constant 0 : index
    %c0_21 = arith.constant 0 : index
    %82 = vector.load %arg3[%c4, %c0_20, %c0_21] : memref<8x64x32xf32, #tpu.memory_space<vmem>>, vector<1x64x32xf32>
    %83 = vector.shape_cast %82 : vector<1x64x32xf32> to vector<64x32xf32>
    %84 = vector.extract_strided_slice %8 {offsets = [0, 4], sizes = [1, 1], strides = [1, 1]} : vector<4x8xf32> to vector<1x1xf32>
    %85 = vector.broadcast %84 : vector<1x1xf32> to vector<64x32xf32>
    %86 = arith.mulf %85, %83 : vector<64x32xf32>
    %87 = arith.addf %69, %86 : vector<64x32xf32>
    %88 = vector.extract_strided_slice %8 {offsets = [1, 4], sizes = [1, 1], strides = [1, 1]} : vector<4x8xf32> to vector<1x1xf32>
    %89 = vector.broadcast %88 : vector<1x1xf32> to vector<64x32xf32>
    %90 = arith.mulf %89, %83 : vector<64x32xf32>
    %91 = arith.addf %73, %90 : vector<64x32xf32>
    %92 = vector.extract_strided_slice %8 {offsets = [2, 4], sizes = [1, 1], strides = [1, 1]} : vector<4x8xf32> to vector<1x1xf32>
    %93 = vector.broadcast %92 : vector<1x1xf32> to vector<64x32xf32>
    %94 = arith.mulf %93, %83 : vector<64x32xf32>
    %95 = arith.addf %77, %94 : vector<64x32xf32>
    %96 = vector.extract_strided_slice %8 {offsets = [3, 4], sizes = [1, 1], strides = [1, 1]} : vector<4x8xf32> to vector<1x1xf32>
    %97 = vector.broadcast %96 : vector<1x1xf32> to vector<64x32xf32>
    %98 = arith.mulf %97, %83 : vector<64x32xf32>
    %99 = arith.addf %81, %98 : vector<64x32xf32>
    %c5 = arith.constant 5 : index
    %c0_22 = arith.constant 0 : index
    %c0_23 = arith.constant 0 : index
    %100 = vector.load %arg3[%c5, %c0_22, %c0_23] : memref<8x64x32xf32, #tpu.memory_space<vmem>>, vector<1x64x32xf32>
    %101 = vector.shape_cast %100 : vector<1x64x32xf32> to vector<64x32xf32>
    %102 = vector.extract_strided_slice %8 {offsets = [0, 5], sizes = [1, 1], strides = [1, 1]} : vector<4x8xf32> to vector<1x1xf32>
    %103 = vector.broadcast %102 : vector<1x1xf32> to vector<64x32xf32>
    %104 = arith.mulf %103, %101 : vector<64x32xf32>
    %105 = arith.addf %87, %104 : vector<64x32xf32>
    %106 = vector.extract_strided_slice %8 {offsets = [1, 5], sizes = [1, 1], strides = [1, 1]} : vector<4x8xf32> to vector<1x1xf32>
    %107 = vector.broadcast %106 : vector<1x1xf32> to vector<64x32xf32>
    %108 = arith.mulf %107, %101 : vector<64x32xf32>
    %109 = arith.addf %91, %108 : vector<64x32xf32>
    %110 = vector.extract_strided_slice %8 {offsets = [2, 5], sizes = [1, 1], strides = [1, 1]} : vector<4x8xf32> to vector<1x1xf32>
    %111 = vector.broadcast %110 : vector<1x1xf32> to vector<64x32xf32>
    %112 = arith.mulf %111, %101 : vector<64x32xf32>
    %113 = arith.addf %95, %112 : vector<64x32xf32>
    %114 = vector.extract_strided_slice %8 {offsets = [3, 5], sizes = [1, 1], strides = [1, 1]} : vector<4x8xf32> to vector<1x1xf32>
    %115 = vector.broadcast %114 : vector<1x1xf32> to vector<64x32xf32>
    %116 = arith.mulf %115, %101 : vector<64x32xf32>
    %117 = arith.addf %99, %116 : vector<64x32xf32>
    %c6 = arith.constant 6 : index
    %c0_24 = arith.constant 0 : index
    %c0_25 = arith.constant 0 : index
    %118 = vector.load %arg3[%c6, %c0_24, %c0_25] : memref<8x64x32xf32, #tpu.memory_space<vmem>>, vector<1x64x32xf32>
    %119 = vector.shape_cast %118 : vector<1x64x32xf32> to vector<64x32xf32>
    %120 = vector.extract_strided_slice %8 {offsets = [0, 6], sizes = [1, 1], strides = [1, 1]} : vector<4x8xf32> to vector<1x1xf32>
    %121 = vector.broadcast %120 : vector<1x1xf32> to vector<64x32xf32>
    %122 = arith.mulf %121, %119 : vector<64x32xf32>
    %123 = arith.addf %105, %122 : vector<64x32xf32>
    %124 = vector.extract_strided_slice %8 {offsets = [1, 6], sizes = [1, 1], strides = [1, 1]} : vector<4x8xf32> to vector<1x1xf32>
    %125 = vector.broadcast %124 : vector<1x1xf32> to vector<64x32xf32>
    %126 = arith.mulf %125, %119 : vector<64x32xf32>
    %127 = arith.addf %109, %126 : vector<64x32xf32>
    %128 = vector.extract_strided_slice %8 {offsets = [2, 6], sizes = [1, 1], strides = [1, 1]} : vector<4x8xf32> to vector<1x1xf32>
    %129 = vector.broadcast %128 : vector<1x1xf32> to vector<64x32xf32>
    %130 = arith.mulf %129, %119 : vector<64x32xf32>
    %131 = arith.addf %113, %130 : vector<64x32xf32>
    %132 = vector.extract_strided_slice %8 {offsets = [3, 6], sizes = [1, 1], strides = [1, 1]} : vector<4x8xf32> to vector<1x1xf32>
    %133 = vector.broadcast %132 : vector<1x1xf32> to vector<64x32xf32>
    %134 = arith.mulf %133, %119 : vector<64x32xf32>
    %135 = arith.addf %117, %134 : vector<64x32xf32>
    %c7 = arith.constant 7 : index
    %c0_26 = arith.constant 0 : index
    %c0_27 = arith.constant 0 : index
    %136 = vector.load %arg3[%c7, %c0_26, %c0_27] : memref<8x64x32xf32, #tpu.memory_space<vmem>>, vector<1x64x32xf32>
    %137 = vector.shape_cast %136 : vector<1x64x32xf32> to vector<64x32xf32>
    %138 = vector.extract_strided_slice %8 {offsets = [0, 7], sizes = [1, 1], strides = [1, 1]} : vector<4x8xf32> to vector<1x1xf32>
    %139 = vector.broadcast %138 : vector<1x1xf32> to vector<64x32xf32>
    %140 = arith.mulf %139, %137 : vector<64x32xf32>
    %141 = arith.addf %123, %140 : vector<64x32xf32>
    %142 = vector.extract_strided_slice %8 {offsets = [1, 7], sizes = [1, 1], strides = [1, 1]} : vector<4x8xf32> to vector<1x1xf32>
    %143 = vector.broadcast %142 : vector<1x1xf32> to vector<64x32xf32>
    %144 = arith.mulf %143, %137 : vector<64x32xf32>
    %145 = arith.addf %127, %144 : vector<64x32xf32>
    %146 = vector.extract_strided_slice %8 {offsets = [2, 7], sizes = [1, 1], strides = [1, 1]} : vector<4x8xf32> to vector<1x1xf32>
    %147 = vector.broadcast %146 : vector<1x1xf32> to vector<64x32xf32>
    %148 = arith.mulf %147, %137 : vector<64x32xf32>
    %149 = arith.addf %131, %148 : vector<64x32xf32>
    %150 = vector.extract_strided_slice %8 {offsets = [3, 7], sizes = [1, 1], strides = [1, 1]} : vector<4x8xf32> to vector<1x1xf32>
    %151 = vector.broadcast %150 : vector<1x1xf32> to vector<64x32xf32>
    %152 = arith.mulf %151, %137 : vector<64x32xf32>
    %153 = arith.addf %135, %152 : vector<64x32xf32>
    %154 = tpu.concatenate %141, %145, %149, %153 in 0 : vector<64x32xf32>, vector<64x32xf32>, vector<64x32xf32>, vector<64x32xf32> -> vector<256x32xf32>
    %cst_28 = arith.constant 0.000000e+00 : f32
    %155 = vector.broadcast %cst_28 : f32 to vector<256x32xf32>
    %156 = arith.maximumf %154, %155 : vector<256x32xf32>
    %c16 = arith.constant 16 : index
    %c0_29 = arith.constant 0 : index
    %157 = vector.load %arg11[%c16, %c0_29] : memref<288x32xf32, #tpu.memory_space<vmem>>, vector<256x32xf32>
    tpu.vector_store %arg11[%c16, %c0_29], %156 {strides = array<i32>} : memref<288x32xf32, #tpu.memory_space<vmem>>, vector<256x32xf32>,
    %c7_30 = arith.constant 7 : index
    %c0_31 = arith.constant 0 : index
    %158 = vector.load %arg11[%c7_30, %c0_31] : memref<288x32xf32, #tpu.memory_space<vmem>>, vector<256x32xf32>
    %c0_32 = arith.constant 0 : index
    %c0_33 = arith.constant 0 : index
    %159 = vector.load %arg9[%c0_32, %c0_33] : memref<256x9xf32, #tpu.memory_space<vmem>>, vector<256x1xf32>
    %160 = vector.broadcast %159 : vector<256x1xf32> to vector<256x32xf32>
    %161 = arith.mulf %158, %160 : vector<256x32xf32>
    %c8 = arith.constant 8 : index
    %c0_34 = arith.constant 0 : index
    %162 = vector.load %arg11[%c8, %c0_34] : memref<288x32xf32, #tpu.memory_space<vmem>>, vector<256x32xf32>
    %c0_35 = arith.constant 0 : index
    %c1_36 = arith.constant 1 : index
    %163 = vector.load %arg9[%c0_35, %c1_36] : memref<256x9xf32, #tpu.memory_space<vmem>>, vector<256x1xf32>
    %164 = vector.broadcast %163 : vector<256x1xf32> to vector<256x32xf32>
    %165 = arith.mulf %162, %164 : vector<256x32xf32>
    %c9 = arith.constant 9 : index
    %c0_37 = arith.constant 0 : index
    %166 = vector.load %arg11[%c9, %c0_37] : memref<288x32xf32, #tpu.memory_space<vmem>>, vector<256x32xf32>
    %c0_38 = arith.constant 0 : index
    %c2_39 = arith.constant 2 : index
    %167 = vector.load %arg9[%c0_38, %c2_39] : memref<256x9xf32, #tpu.memory_space<vmem>>, vector<256x1xf32>
    %168 = vector.broadcast %167 : vector<256x1xf32> to vector<256x32xf32>
    %169 = arith.mulf %166, %168 : vector<256x32xf32>
    %c15 = arith.constant 15 : index
    %c0_40 = arith.constant 0 : index
    %170 = vector.load %arg11[%c15, %c0_40] : memref<288x32xf32, #tpu.memory_space<vmem>>, vector<256x32xf32>
    %c0_41 = arith.constant 0 : index
    %c3_42 = arith.constant 3 : index
    %171 = vector.load %arg9[%c0_41, %c3_42] : memref<256x9xf32, #tpu.memory_space<vmem>>, vector<256x1xf32>
    %172 = vector.broadcast %171 : vector<256x1xf32> to vector<256x32xf32>
    %173 = arith.mulf %170, %172 : vector<256x32xf32>
    %c16_43 = arith.constant 16 : index
    %c0_44 = arith.constant 0 : index
    %174 = vector.load %arg11[%c16_43, %c0_44] : memref<288x32xf32, #tpu.memory_space<vmem>>, vector<256x32xf32>
    %c17 = arith.constant 17 : index
    %c0_45 = arith.constant 0 : index
    %175 = vector.load %arg11[%c17, %c0_45] : memref<288x32xf32, #tpu.memory_space<vmem>>, vector<256x32xf32>
    %c0_46 = arith.constant 0 : index
    %c5_47 = arith.constant 5 : index
    %176 = vector.load %arg9[%c0_46, %c5_47] : memref<256x9xf32, #tpu.memory_space<vmem>>, vector<256x1xf32>
    %177 = vector.broadcast %176 : vector<256x1xf32> to vector<256x32xf32>
    %178 = arith.mulf %175, %177 : vector<256x32xf32>
    %c23 = arith.constant 23 : index
    %c0_48 = arith.constant 0 : index
    %179 = vector.load %arg11[%c23, %c0_48] : memref<288x32xf32, #tpu.memory_space<vmem>>, vector<256x32xf32>
    %c0_49 = arith.constant 0 : index
    %c6_50 = arith.constant 6 : index
    %180 = vector.load %arg9[%c0_49, %c6_50] : memref<256x9xf32, #tpu.memory_space<vmem>>, vector<256x1xf32>
    %181 = vector.broadcast %180 : vector<256x1xf32> to vector<256x32xf32>
    %182 = arith.mulf %179, %181 : vector<256x32xf32>
    %c24 = arith.constant 24 : index
    %c0_51 = arith.constant 0 : index
    %183 = vector.load %arg11[%c24, %c0_51] : memref<288x32xf32, #tpu.memory_space<vmem>>, vector<256x32xf32>
    %c0_52 = arith.constant 0 : index
    %c7_53 = arith.constant 7 : index
    %184 = vector.load %arg9[%c0_52, %c7_53] : memref<256x9xf32, #tpu.memory_space<vmem>>, vector<256x1xf32>
    %185 = vector.broadcast %184 : vector<256x1xf32> to vector<256x32xf32>
    %186 = arith.mulf %183, %185 : vector<256x32xf32>
    %c25 = arith.constant 25 : index
    %c0_54 = arith.constant 0 : index
    %187 = vector.load %arg11[%c25, %c0_54] : memref<288x32xf32, #tpu.memory_space<vmem>>, vector<256x32xf32>
    %c0_55 = arith.constant 0 : index
    %c8_56 = arith.constant 8 : index
    %188 = vector.load %arg9[%c0_55, %c8_56] : memref<256x9xf32, #tpu.memory_space<vmem>>, vector<256x1xf32>
    %189 = vector.broadcast %188 : vector<256x1xf32> to vector<256x32xf32>
    %190 = arith.mulf %187, %189 : vector<256x32xf32>
    %191 = tpu.concatenate %161, %165, %169, %173, %174, %178, %182, %186, %190 in 1 : vector<256x32xf32>, vector<256x32xf32>, vector<256x32xf32>, vector<256x32xf32>, vector<256x32xf32>, vector<256x32xf32>, vector<256x32xf32>, vector<256x32xf32>, vector<256x32xf32> -> vector<256x288xf32>
    %192 = arith.truncf %191 : vector<256x288xf32> to vector<256x288xbf16>
    %c0_57 = arith.constant 0 : index
    %c0_58 = arith.constant 0 : index
    %193 = vector.load %arg5[%c0_57, %c0_58] : memref<288x32xbf16, #tpu.memory_space<vmem>>, vector<288x32xbf16>
    %cst_59 = arith.constant dense<0.000000e+00> : vector<256x32xf32>
    %194 = tpu.matmul %192, %193, %cst_59 {dimension_numbers = #tpu.dot_dimension_numbers<[1], [0], [0], [1], [0, 0, 1, 1], [], []>} : vector<256x288xbf16>, vector<288x32xbf16>, vector<256x32xf32> -> vector<256x32xf32>
    %c0_60 = arith.constant 0 : index
    %c0_61 = arith.constant 0 : index
    %195 = vector.load %arg6[%c0_60, %c0_61] : memref<1x32xf32, #tpu.memory_space<vmem>>, vector<1x32xf32>
    %196 = vector.broadcast %195 : vector<1x32xf32> to vector<256x32xf32>
    %197 = arith.addf %194, %196 : vector<256x32xf32>
    %cst_62 = arith.constant 0.000000e+00 : f32
    %198 = vector.broadcast %cst_62 : f32 to vector<256x32xf32>
    %199 = arith.maximumf %197, %198 : vector<256x32xf32>
    %c16_63 = arith.constant 16 : index
    %c0_64 = arith.constant 0 : index
    %200 = vector.load %arg11[%c16_63, %c0_64] : memref<288x32xf32, #tpu.memory_space<vmem>>, vector<256x32xf32>
    tpu.vector_store %arg11[%c16_63, %c0_64], %199 {strides = array<i32>} : memref<288x32xf32, #tpu.memory_space<vmem>>, vector<256x32xf32>,
    %c7_65 = arith.constant 7 : index
    %c0_66 = arith.constant 0 : index
    %201 = vector.load %arg11[%c7_65, %c0_66] : memref<288x32xf32, #tpu.memory_space<vmem>>, vector<256x32xf32>
    %c0_67 = arith.constant 0 : index
    %c0_68 = arith.constant 0 : index
    %202 = vector.load %arg9[%c0_67, %c0_68] : memref<256x9xf32, #tpu.memory_space<vmem>>, vector<256x1xf32>
    %203 = vector.broadcast %202 : vector<256x1xf32> to vector<256x32xf32>
    %204 = arith.mulf %201, %203 : vector<256x32xf32>
    %c8_69 = arith.constant 8 : index
    %c0_70 = arith.constant 0 : index
    %205 = vector.load %arg11[%c8_69, %c0_70] : memref<288x32xf32, #tpu.memory_space<vmem>>, vector<256x32xf32>
    %c0_71 = arith.constant 0 : index
    %c1_72 = arith.constant 1 : index
    %206 = vector.load %arg9[%c0_71, %c1_72] : memref<256x9xf32, #tpu.memory_space<vmem>>, vector<256x1xf32>
    %207 = vector.broadcast %206 : vector<256x1xf32> to vector<256x32xf32>
    %208 = arith.mulf %205, %207 : vector<256x32xf32>
    %c9_73 = arith.constant 9 : index
    %c0_74 = arith.constant 0 : index
    %209 = vector.load %arg11[%c9_73, %c0_74] : memref<288x32xf32, #tpu.memory_space<vmem>>, vector<256x32xf32>
    %c0_75 = arith.constant 0 : index
    %c2_76 = arith.constant 2 : index
    %210 = vector.load %arg9[%c0_75, %c2_76] : memref<256x9xf32, #tpu.memory_space<vmem>>, vector<256x1xf32>
    %211 = vector.broadcast %210 : vector<256x1xf32> to vector<256x32xf32>
    %212 = arith.mulf %209, %211 : vector<256x32xf32>
    %c15_77 = arith.constant 15 : index
    %c0_78 = arith.constant 0 : index
    %213 = vector.load %arg11[%c15_77, %c0_78] : memref<288x32xf32, #tpu.memory_space<vmem>>, vector<256x32xf32>
    %c0_79 = arith.constant 0 : index
    %c3_80 = arith.constant 3 : index
    %214 = vector.load %arg9[%c0_79, %c3_80] : memref<256x9xf32, #tpu.memory_space<vmem>>, vector<256x1xf32>
    %215 = vector.broadcast %214 : vector<256x1xf32> to vector<256x32xf32>
    %216 = arith.mulf %213, %215 : vector<256x32xf32>
    %c16_81 = arith.constant 16 : index
    %c0_82 = arith.constant 0 : index
    %217 = vector.load %arg11[%c16_81, %c0_82] : memref<288x32xf32, #tpu.memory_space<vmem>>, vector<256x32xf32>
    %c17_83 = arith.constant 17 : index
    %c0_84 = arith.constant 0 : index
    %218 = vector.load %arg11[%c17_83, %c0_84] : memref<288x32xf32, #tpu.memory_space<vmem>>, vector<256x32xf32>
    %c0_85 = arith.constant 0 : index
    %c5_86 = arith.constant 5 : index
    %219 = vector.load %arg9[%c0_85, %c5_86] : memref<256x9xf32, #tpu.memory_space<vmem>>, vector<256x1xf32>
    %220 = vector.broadcast %219 : vector<256x1xf32> to vector<256x32xf32>
    %221 = arith.mulf %218, %220 : vector<256x32xf32>
    %c23_87 = arith.constant 23 : index
    %c0_88 = arith.constant 0 : index
    %222 = vector.load %arg11[%c23_87, %c0_88] : memref<288x32xf32, #tpu.memory_space<vmem>>, vector<256x32xf32>
    %c0_89 = arith.constant 0 : index
    %c6_90 = arith.constant 6 : index
    %223 = vector.load %arg9[%c0_89, %c6_90] : memref<256x9xf32, #tpu.memory_space<vmem>>, vector<256x1xf32>
    %224 = vector.broadcast %223 : vector<256x1xf32> to vector<256x32xf32>
    %225 = arith.mulf %222, %224 : vector<256x32xf32>
    %c24_91 = arith.constant 24 : index
    %c0_92 = arith.constant 0 : index
    %226 = vector.load %arg11[%c24_91, %c0_92] : memref<288x32xf32, #tpu.memory_space<vmem>>, vector<256x32xf32>
    %c0_93 = arith.constant 0 : index
    %c7_94 = arith.constant 7 : index
    %227 = vector.load %arg9[%c0_93, %c7_94] : memref<256x9xf32, #tpu.memory_space<vmem>>, vector<256x1xf32>
    %228 = vector.broadcast %227 : vector<256x1xf32> to vector<256x32xf32>
    %229 = arith.mulf %226, %228 : vector<256x32xf32>
    %c25_95 = arith.constant 25 : index
    %c0_96 = arith.constant 0 : index
    %230 = vector.load %arg11[%c25_95, %c0_96] : memref<288x32xf32, #tpu.memory_space<vmem>>, vector<256x32xf32>
    %c0_97 = arith.constant 0 : index
    %c8_98 = arith.constant 8 : index
    %231 = vector.load %arg9[%c0_97, %c8_98] : memref<256x9xf32, #tpu.memory_space<vmem>>, vector<256x1xf32>
    %232 = vector.broadcast %231 : vector<256x1xf32> to vector<256x32xf32>
    %233 = arith.mulf %230, %232 : vector<256x32xf32>
    %234 = tpu.concatenate %204, %208, %212, %216, %217, %221, %225, %229, %233 in 1 : vector<256x32xf32>, vector<256x32xf32>, vector<256x32xf32>, vector<256x32xf32>, vector<256x32xf32>, vector<256x32xf32>, vector<256x32xf32>, vector<256x32xf32>, vector<256x32xf32> -> vector<256x288xf32>
    %235 = arith.truncf %234 : vector<256x288xf32> to vector<256x288xbf16>
    %c0_99 = arith.constant 0 : index
    %c0_100 = arith.constant 0 : index
    %236 = vector.load %arg7[%c0_99, %c0_100] : memref<288x128xbf16, #tpu.memory_space<vmem>>, vector<288x128xbf16>
    %cst_101 = arith.constant dense<0.000000e+00> : vector<256x128xf32>
    %237 = tpu.matmul %235, %236, %cst_101 {dimension_numbers = #tpu.dot_dimension_numbers<[1], [0], [0], [1], [0, 0, 1, 1], [], []>} : vector<256x288xbf16>, vector<288x128xbf16>, vector<256x128xf32> -> vector<256x128xf32>
    %c0_102 = arith.constant 0 : index
    %c0_103 = arith.constant 0 : index
    %238 = vector.load %arg8[%c0_102, %c0_103] : memref<1x128xf32, #tpu.memory_space<vmem>>, vector<1x128xf32>
    %239 = vector.broadcast %238 : vector<1x128xf32> to vector<256x128xf32>
    %240 = arith.addf %237, %239 : vector<256x128xf32>
    %241 = math.tanh %240 : vector<256x128xf32>
    %242 = arith.truncf %241 : vector<256x128xf32> to vector<256x128xbf16>
    %c0_104 = arith.constant 0 : index
    %c0_105 = arith.constant 0 : index
    %243 = vector.load %arg10[%c0_104, %c0_105] : memref<256x128xbf16, #tpu.memory_space<vmem>>, vector<256x128xbf16>
    tpu.vector_store %arg10[%c0_104, %c0_105], %242 {strides = array<i32>} : memref<256x128xbf16, #tpu.memory_space<vmem>>, vector<256x128xbf16>,
    return
  }
  func.func @transform_0(%arg0: i32) -> (i32, i32, i32) {
    %c0_i32 = arith.constant 0 : i32
    %c0_i32_0 = arith.constant 0 : i32
    %c0_i32_1 = arith.constant 0 : i32
    return %arg0, %c0_i32, %c0_i32_0 : i32, i32, i32
  }
  func.func @transform_1(%arg0: i32) -> (i32, i32, i32) {
    %c0_i32 = arith.constant 0 : i32
    %c0_i32_0 = arith.constant 0 : i32
    %c0_i32_1 = arith.constant 0 : i32
    return %arg0, %c0_i32, %c0_i32_0 : i32, i32, i32
  }
  func.func @transform_2(%arg0: i32) -> (i32, i32, i32) {
    %c0_i32 = arith.constant 0 : i32
    %c0_i32_0 = arith.constant 0 : i32
    %c0_i32_1 = arith.constant 0 : i32
    %c0_i32_2 = arith.constant 0 : i32
    return %c0_i32, %c0_i32_0, %c0_i32_1 : i32, i32, i32
  }
  func.func @transform_3(%arg0: i32) -> (i32, i32) {
    %c0_i32 = arith.constant 0 : i32
    %c0_i32_0 = arith.constant 0 : i32
    %c0_i32_1 = arith.constant 0 : i32
    return %c0_i32, %c0_i32_0 : i32, i32
  }
  func.func @transform_4(%arg0: i32) -> (i32, i32) {
    %c0_i32 = arith.constant 0 : i32
    %c0_i32_0 = arith.constant 0 : i32
    %c0_i32_1 = arith.constant 0 : i32
    return %c0_i32, %c0_i32_0 : i32, i32
  }
  func.func @transform_5(%arg0: i32) -> (i32, i32) {
    %c0_i32 = arith.constant 0 : i32
    %c0_i32_0 = arith.constant 0 : i32
    %c0_i32_1 = arith.constant 0 : i32
    return %c0_i32, %c0_i32_0 : i32, i32
  }
  func.func @transform_6(%arg0: i32) -> (i32, i32) {
    %c0_i32 = arith.constant 0 : i32
    %c0_i32_0 = arith.constant 0 : i32
    %c0_i32_1 = arith.constant 0 : i32
    return %c0_i32, %c0_i32_0 : i32, i32
  }
  func.func @transform_7(%arg0: i32) -> (i32, i32) {
    %c0_i32 = arith.constant 0 : i32
    %c0_i32_0 = arith.constant 0 : i32
    %c0_i32_1 = arith.constant 0 : i32
    return %c0_i32, %c0_i32_0 : i32, i32
  }
  func.func @transform_8(%arg0: i32) -> (i32, i32) {
    %c0_i32 = arith.constant 0 : i32
    %c0_i32_0 = arith.constant 0 : i32
    %c0_i32_1 = arith.constant 0 : i32
    return %c0_i32, %c0_i32_0 : i32, i32
  }
  func.func @transform_9(%arg0: i32) -> (i32, i32) {
    %c0_i32 = arith.constant 0 : i32
    %c0_i32_0 = arith.constant 0 : i32
    return %arg0, %c0_i32 : i32, i32
  }
}

</mosaic_0001>

<bundles_post_ra>
// kernel: tpu_custom_call.1
= control target key start
LH: loop header
LB: loop body
LE: loop exit
PB: predicated region body
PF: predicated region fallthrough
CT: control target
= control target key end

     0   :  { %14 = vsyncpa [#allocation4], 0  ;;  %s15794_s0 = inlined_call_operand.vmem [shape: f32[2,4,8], index: 0, kind: input, shape index: {}]   ;;  %s15795_s1 = inlined_call_operand.vmem [shape: f32[2,4,8], index: 1, kind: input, shape index: {}]   ;;  %s15796_s2 = inlined_call_operand.vmem [shape: f32[8,64,32], index: 2, kind: input, shape index: {}]   ;;  %s15797_s3 = inlined_call_operand.vmem [shape: f32[64,32], index: 3, kind: input, shape index: {}]   ;;  %s15798_s4 = inlined_call_operand.vmem [shape: bf16[288,32], index: 4, kind: input, shape index: {}]   ;;  %s15799_s5 = inlined_call_operand.vmem [shape: f32[1,32], index: 5, kind: input, shape index: {}]   ;;  %s15800_s6 = inlined_call_operand.vmem [shape: bf16[288,128], index: 6, kind: input, shape index: {}]   ;;  %s15801_s7 = inlined_call_operand.vmem [shape: f32[1,128], index: 7, kind: input, shape index: {}]   ;;  %s15802_s8 = inlined_call_operand.vmem [shape: f32[256,9], index: 8, kind: input, shape index: {}]   ;;  %s15803_s9 = inlined_call_operand.hbm [shape: bf16[512,128], index: 9, kind: output, shape index: {}]  }
   0x1   :  { %16 = vsyncpa [#allocation4 + $0x1], 0  ;;  %s9946_s30 = smov 0   ;;  %s9948_s10 = smov 0  }
   0x2   :  { %s9950_s11 = smov 0   ;;  %s9952_s12 = smov 0  }
   0x3 LB: > { %s9967_s13 = sadd.s32 4294967295, %s9873_s12   ;;  %s7834_s14 = sadd.s32 4294967294, %s9873_s12   ;;  %s9873_s12 = sphi %s9952_s12, %s16886_s12   ;;  %s9869_s11 = sphi %s9950_s11, %s16885_s11   ;;  %s9865_s10 = sphi %s9948_s10, %s16884_s10   ;;  %s9861_s30 = sphi %s9946_s30, %s16883_s30  }
   0x4   : > { %s9971_s15 = sadd.s32 1, %s9873_s12   ;;  %s228_s16 = sadd.s32 1, %s9869_s11 }
   0x5   : > { %s225_s17 = ssub.s32 %s9873_s12, %s9971_s15  ;;  %p238_p0 = scmp.ne.s32.totalorder %s9869_s11, %s9865_s10 }
   0x6   : > { %p226_p1 = scmp.eq.s32.totalorder %s225_s17, 0  ;;  %p239_p2 = scmp.eq.s32.totalorder %s9967_s13, 1 }
   0x7   : > { %p244_p3 = scmp.ne.s32.totalorder %s9865_s10, %s9861_s30  ;;  %p245_p4 = scmp.eq.s32.totalorder %s7834_s14, 1 }
   0x8   : > { %s9982_s18 = scalar_select %p226_p1, %s9869_s11, %s228_s16  }
   0x9   : > { %p9984_p5 = por %p239_p2, %p238_p0  ;;  %p9988_p6 = por %p245_p4, %p244_p3 }
   0xa   : > { %p7837_p7 = scmp.ge.s32.totalorder %s9873_s12, 1  ;;  %p298_p8 = scmp.lt.s32.totalorder %s9873_s12, 3 }
   0xc   : > { %p299_p9 = pnand %p7837_p7, %p298_p8 }
   0xe   : > { %302 = sbr.rel (%p299_p9) target bundleno = 1902 (0x76e), region = 56 }
  0x13   : > { %p337_p10 = scmp.lt.s32.totalorder %s9967_s13, 1  ;;  %v15804_v0 = vmov 1   ;;  %v15806_v1 = vmov 0   ;;  %s9877_s29 = smov 127   ;;  %v10007_v8 = vld [vmem:[%s15802_s8 + $0x8] sm:$0xff]  ;;  %v10013_v9 = vld [vmem:[%s15802_s8 + $0x20] sm:$0xff] }
  0x14   : > { %8593 = vset.pattern.permute.xlu0 %v15804_v0  ;;  %8591 = vset.pattern.permute.xlu1 %v15806_v1  ;;  %s9878_s14 = smov 126   ;;  %s9879_s16 = smov 125   ;;  %v10019_v10 = vld [vmem:[%s15802_s8 + $0x10] sm:$0xff]  ;;  %v10032_v12 = vld [vmem:[%s15802_s8 + $0x40] sm:$0xff]  ;;  %v15808_v27 = vmov 2   ;;  %v1201_v29 = vld [vmem:[%s15802_s8 + $0x18] sm:$0xff] }
  0x15   : > { %s338_s21 = scalar_select %p337_p10, %s9967_s13, 1  ;;  %15956 = vst [vmem:[#allocation6_spill] sm:$0xff] %v10019_v10  ;;  %v10025_v11 = vld [vmem:[%s15802_s8 + $0x30] sm:$0xff]  ;;  %15958 = vst [vmem:[#allocation8_spill] sm:$0xff] %v10032_v12  ;;  %v10046_v14 = vld [vmem:[%s15802_s8 + $0x60] sm:$0xff]  ;;  %vm347_vm0 = vcmask 261120  }
  0x16   : > { %s9880_s17 = smov 124   ;;  %s9883_s23 = smov 121   ;;  %15957 = vst [vmem:[#allocation7_spill] sm:$0xff] %v10025_v11  ;;  %v10039_v13 = vld [vmem:[%s15802_s8 + $0x50] sm:$0xff]  ;;  %15960 = vst [vmem:[#allocation10_spill] sm:$0xff] %v10046_v14  ;;  %v10060_v16 = vld [vmem:[%s15802_s8 + $0x80] sm:$0xff] }
  0x17   : > { %s7839_s22 = sshll.u32 %s338_s21, 2  ;;  %s9881_s21 = smov 123   ;;  %15959 = vst [vmem:[#allocation9_spill] sm:$0xff] %v10039_v13  ;;  %v10053_v15 = vld [vmem:[%s15802_s8 + $0x70] sm:$0xff]  ;;  %15962 = vst [vmem:[#allocation12_spill] sm:$0xff] %v10060_v16  ;;  %v10074_v18 = vld [vmem:[%s15802_s8 + $0xa0] sm:$0xff] }
  0x18   : > { %s340_s25 = scalar_lea.vmem %s15794_s0, %s7839_s22  ;;  %s344_s28 = scalar_lea.vmem %s15795_s1, %s7839_s22  ;;  %15961 = vst [vmem:[#allocation11_spill] sm:$0xff] %v10053_v15  ;;  %v10067_v17 = vld [vmem:[%s15802_s8 + $0x90] sm:$0xff]  ;;  %15964 = vst [vmem:[#allocation14_spill] sm:$0xff] %v10074_v18  ;;  %v1222_v20 = vld [vmem:[%s15802_s8 + $0xc0] sm:$0xff]  ;;  %vm3598_vm1 = vcmask 523264   ;;  %vm3631_vm2 = vcmask 785408  }
  0x19   : > { %v352_v2 = vld [vmem:[%s340_s25] sm:$0xf]  ;;  %s9882_s22 = smov 122   ;;  %15963 = vst [vmem:[#allocation13_spill] sm:$0xff] %v10067_v17  ;;  %v1220_v19 = vld [vmem:[%s15802_s8 + $0xb0] sm:$0xff]  ;;  %v1203_v32 = vld [vmem:[%s15802_s8 + $0x28] sm:$0xff] }
  0x1a   : > { %v353_v3 = vld [vmem:[%s344_s28] sm:$0xf]  ;;  %v1224_v21 = vld [vmem:[%s15802_s8 + $0xd0] sm:$0xff]  ;;  %v1205_v35 = vld [vmem:[%s15802_s8 + $0x38] sm:$0xff] }
  0x1b   : > { %v354_v4 = vadd.f32 %v353_v3, %v352_v2  ;;  %v1226_v22 = vld [vmem:[%s15802_s8 + $0xe0] sm:$0xff]  ;;  %v1228_v23 = vld [vmem:[%s15802_s8 + $0xf0] sm:$0xff]  ;;  %v1207_v38 = vld [vmem:[%s15802_s8 + $0x48] sm:$0xff] }
  0x1c   : > { %v1198_v25 = vld [vmem:[%s15802_s8] sm:$0xff]  ;;  %v1209_v41 = vld [vmem:[%s15802_s8 + $0x58] sm:$0xff]  ;;  %v1211_v44 = vld [vmem:[%s15802_s8 + $0x68] sm:$0xff] }
  0x1d   : > { %460 = vrot.lane.b32.xlu0 %v354_v4, %s9877_s29  ;;  %v411_v5 = vrot.slane %v354_v4, 2  ;;  %v431_v6 = vrot.slane %v354_v4, 3  ;;  %v391_v7 = vrot.slane %v354_v4, 1  ;;  %8468 = vpush %v354_v4  ;;  %v1213_v47 = vld [vmem:[%s15802_s8 + $0x78] sm:$0xff]  ;;  %v10125_v50 = vld [vmem:[%s15802_s8 + $0x88] sm:$0xff]  ;;  %v10130_v53 = vld [vmem:[%s15796_s2] sm:$0xff] }
  0x1e   : > { %v10136_v54 = vld [vmem:[%s15796_s2 + $0x8] sm:$0xff]  ;;  %v10141_v55 = vld [vmem:[%s15796_s2 + $0x10] sm:$0xff]  ;;  %v10147_v58 = vld [vmem:[%s15802_s8 + $0x98] sm:$0xff] }
  0x1f   : > { %502 = vrot.lane.b32.xlu1 %v411_v5, %s9877_s29  ;;  %8470 = vpush %v391_v7  ;;  %v10152_v59 = vld [vmem:[%s15796_s2 + $0x18] sm:$0xff]  ;;  %v10157_v60 = vld [vmem:[%s15796_s2 + $0x20] sm:$0xff]  ;;  %v10164_v63 = vld [vmem:[%s15796_s2 + $0x28] sm:$0xff] }
  0x20   : > { %8472 = vpush %v411_v5  ;;  %v10169_v2 = vld [vmem:[%s15796_s2 + $0x30] sm:$0xff]  ;;  %v10174_v3 = vld [vmem:[%s15796_s2 + $0x38] sm:$0xff] }
  0x21   : > { %553 = vrot.lane.b32.xlu0 %v354_v4, %s9878_s14  ;;  %8474 = vpush %v431_v6 }
  0x23   : > { %523 = vrot.lane.b32.xlu1 %v431_v6, %s9877_s29 }
  0x25   : > { %481 = vrot.lane.b32.xlu0 %v391_v7, %s9877_s29 }
  0x27   : > { %574 = vrot.lane.b32.xlu1 %v391_v7, %s9878_s14 }
  0x29   : > { %595 = vrot.lane.b32.xlu0 %v411_v5, %s9878_s14 }
  0x2b   : > { %616 = vrot.lane.b32.xlu1 %v431_v6, %s9878_s14 }
  0x2d   : > { %646 = vrot.lane.b32.xlu0 %v354_v4, %s9879_s16 }
  0x2f   : > { %667 = vrot.lane.b32.xlu1 %v391_v7, %s9879_s16 }
  0x31   : > { %688 = vrot.lane.b32.xlu0 %v411_v5, %s9879_s16 }
  0x33   : > { %709 = vrot.lane.b32.xlu1 %v431_v6, %s9879_s16 }
  0x35   : > { %739 = vrot.lane.b32.xlu0 %v354_v4, %s9880_s17 }
  0x37   : > { %760 = vrot.lane.b32.xlu1 %v391_v7, %s9880_s17 }
  0x39   : > { %781 = vrot.lane.b32.xlu0 %v411_v5, %s9880_s17 }
  0x3b   : > { %802 = vrot.lane.b32.xlu1 %v431_v6, %s9880_s17 }
  0x3d   : > { %832 = vrot.lane.b32.xlu0 %v354_v4, %s9881_s21 }
  0x3f   : > { %853 = vrot.lane.b32.xlu1 %v391_v7, %s9881_s21 }
  0x41   : > { %874 = vrot.lane.b32.xlu0 %v411_v5, %s9881_s21 }
  0x43   : > { %895 = vrot.lane.b32.xlu1 %v431_v6, %s9881_s21 }
  0x45   : > { %925 = vrot.lane.b32.xlu0 %v354_v4, %s9882_s22 }
  0x47   : > { %946 = vrot.lane.b32.xlu1 %v391_v7, %s9882_s22 }
  0x49   : > { %967 = vrot.lane.b32.xlu0 %v411_v5, %s9882_s22 }
  0x4b   : > { %988 = vrot.lane.b32.xlu1 %v431_v6, %s9882_s22 }
  0x4d   : > { %1018 = vrot.lane.b32.xlu0 %v354_v4, %s9883_s23 }
  0x4e   : > { %s8469_s24 = spop %8468 }
  0x4f   : > { %1039 = vrot.lane.b32.xlu1 %v391_v7, %s9883_s23  ;;  %v373_v51 = vstv %s8469_s24  ;;  %v10180_v7 = vld [vmem:[%s15797_s3] sm:$0xff] }
  0x50   : > { %s8471_s29 = spop %8470  ;;  %v375_v56 = vmul.f32 %v373_v51, %v10130_v53  ;;  %v376_v61 = vmul.f32 %v373_v51, %v10136_v54  ;;  %v377_v62 = vmul.f32 %v373_v51, %v10141_v55  ;;  %v378_v4 = vmul.f32 %v373_v51, %v10152_v59 }
  0x51   : > { %1060 = vrot.lane.b32.xlu0 %v411_v5, %s9883_s23  ;;  %v393_v5 = vstv %s8471_s29  ;;  %s8473_s25 = spop %8472 }
  0x52   : > { %s8475_s16 = spop %8474 }
  0x53   : > { %1081 = vrot.lane.b32.xlu1 %v431_v6, %s9883_s23 }
  0x55   : > { %1459 = vperm.xlu0 %8593, %v10007_v8  }
  0x57   : > { %1237 = vperm.xlu1 %8591, %v10007_v8  }
  0x59   : > { %1471 = vperm.xlu0 %8593, %v10013_v9  }
  0x5b   : > { %1242 = vperm.xlu1 %8591, %v10019_v10  }
  0x5d   : > { %1479 = vperm.xlu0 %8593, %v10025_v11  }
  0x5f   : > { %1252 = vperm.xlu1 %8591, %v10013_v9  }
  0x61   : > { %1487 = vperm.xlu0 %8593, %v10032_v12  }
  0x63   : > { %1262 = vperm.xlu1 %8591, %v10025_v11   ;;  %v10417_v11 = vld [vmem:[%s15802_s8 + $0xe8] sm:$0xff] }
  0x65   : > { %1495 = vperm.xlu0 %8593, %v10039_v13  }
  0x67   : > { %1272 = vperm.xlu1 %8591, %v10032_v12  }
  0x69   : > { %1503 = vperm.xlu0 %8593, %v10046_v14  }
  0x6b   : > { %1282 = vperm.xlu1 %8591, %v10039_v13  }
  0x6d   : > { %1511 = vperm.xlu0 %8593, %v10053_v15  }
  0x6f   : > { %1292 = vperm.xlu1 %8591, %v10046_v14  }
  0x71   : > { %1519 = vperm.xlu0 %8593, %v10060_v16  }
  0x73   : > { %1302 = vperm.xlu1 %8591, %v10053_v15  }
  0x75   : > { %1527 = vperm.xlu0 %8593, %v10067_v17  }
  0x77   : > { %1312 = vperm.xlu1 %8591, %v10060_v16  }
  0x79   : > { %1535 = vperm.xlu0 %8593, %v10074_v18  }
  0x7b   : > { %1322 = vperm.xlu1 %8591, %v10067_v17  }
  0x7d   : > { %1543 = vperm.xlu0 %8593, %v1220_v19  }
  0x7f   : > { %1332 = vperm.xlu1 %8591, %v10074_v18  }
  0x81   : > { %1551 = vperm.xlu0 %8593, %v1222_v20  }
  0x83   : > { %1342 = vperm.xlu1 %8591, %v1220_v19   ;;  %v379_v19 = vmul.f32 %v373_v51, %v10157_v60 }
  0x85   : > { %1559 = vperm.xlu0 %8593, %v1224_v21  }
  0x87   : > { %1352 = vperm.xlu1 %8591, %v1222_v20   ;;  %v380_v20 = vmul.f32 %v373_v51, %v10164_v63 }
  0x89   : > { %1567 = vperm.xlu0 %8593, %v1226_v22  }
  0x8b   : > { %1362 = vperm.xlu1 %8591, %v1224_v21   ;;  %v381_v21 = vmul.f32 %v373_v51, %v10169_v2 }
  0x8d   : > { %1575 = vperm.xlu0 %8593, %v1228_v23  }
  0x8f   : > { %v461_v24 = vpop.permute.xlu0 %460  ;;  %1372 = vperm.xlu1 %8591, %v1226_v22   ;;  %v382_v22 = vmul.f32 %v373_v51, %v10174_v3 }
  0x90   : > { %8476 = vpush %v461_v24  ;;  %v10195_v24 = vld [vmem:[%s15797_s3 + $0x10] sm:$0xff] }
  0x91   : > { %v503_v26 = vpop.permute.xlu1 %502  ;;  %8594 = vset.pattern.permute.xlu0 %v15808_v27 }
  0x92   : > { %1647 = vperm.xlu0 %8594, %v1198_v25  }
  0x93   : > { %v554_v28 = vpop.permute.xlu0 %553  ;;  %1382 = vperm.xlu1 %8591, %v1228_v23   ;;  %v10190_v23 = vld [vmem:[%s15797_s3 + $0x8] sm:$0xff] }
  0x95   : > { %v524_v30 = vpop.permute.xlu1 %523 }
  0x96   : > { %1659 = vperm.xlu0 %8594, %v1201_v29  }
  0x97   : > { %8592 = vset.pattern.permute.xlu1 %v15804_v0  ;;  %v482_v31 = vpop.permute.xlu0 %481 }
  0x98   : > { %1455 = vperm.xlu1 %8592, %v1198_v25   ;;  %8478 = vpush %v482_v31  ;;  %v10198_v25 = vadd.f32 %v375_v56, %v10180_v7  ;;  %v10216_v31 = vadd.f32 %v376_v61, %v10190_v23  ;;  %v402_v56 = vmul.f32 %v393_v5, %v10174_v3 }
  0x99   : > { %8480 = vpush %v503_v26  ;;  %v575_v33 = vpop.permute.xlu1 %574 }
  0x9a   : > { %8482 = vpush %v524_v30  ;;  %1667 = vperm.xlu0 %8594, %v1203_v32   ;;  %v10213_v30 = vld [vmem:[%s15797_s3 + $0x20] sm:$0xff] }
  0x9b   : > { %8484 = vpush %v554_v28  ;;  %v596_v34 = vpop.permute.xlu0 %595  ;;  %v10203_v28 = vld [vmem:[%s15802_s8 + $0xa8] sm:$0xff] }
  0x9c   : > { %8486 = vpush %v575_v33  ;;  %1463 = vperm.xlu1 %8592, %v10019_v10   ;;  %v395_v33 = vmul.f32 %v393_v5, %v10130_v53 }
  0x9d   : > { %8488 = vpush %v596_v34  ;;  %v617_v36 = vpop.permute.xlu1 %616  ;;  %v396_v34 = vmul.f32 %v393_v5, %v10136_v54 }
  0x9e   : > { %1675 = vperm.xlu0 %8594, %v1205_v35   ;;  %8490 = vpush %v617_v36  ;;  %v10231_v36 = vld [vmem:[%s15797_s3 + $0x30] sm:$0xff] }
  0x9f   : > { %v647_v37 = vpop.permute.xlu0 %646  ;;  %v10269_v61 = vadd.f32 %v396_v34, %v10190_v23 }
  0xa0   : > { %1467 = vperm.xlu1 %8592, %v1201_v29   ;;  %8492 = vpush %v647_v37  ;;  %v10208_v29 = vld [vmem:[%s15797_s3 + $0x18] sm:$0xff] }
  0xa1   : > { %v668_v39 = vpop.permute.xlu1 %667  ;;  %v10236_v37 = vld [vmem:[%s15797_s3 + $0x38] sm:$0xff] }
  0xa2   : > { %1683 = vperm.xlu0 %8594, %v1207_v38   ;;  %8494 = vpush %v668_v39  ;;  %v397_v39 = vmul.f32 %v393_v5, %v10141_v55 }
  0xa3   : > { %v689_v40 = vpop.permute.xlu0 %688 }
  0xa4   : > { %1475 = vperm.xlu1 %8592, %v1203_v32   ;;  %8496 = vpush %v689_v40  ;;  %v10219_v32 = vadd.f32 %v377_v62, %v10195_v24  ;;  %v398_v40 = vmul.f32 %v393_v5, %v10152_v59 }
  0xa5   : > { %v710_v42 = vpop.permute.xlu1 %709 }
  0xa6   : > { %1691 = vperm.xlu0 %8594, %v1209_v41   ;;  %8498 = vpush %v710_v42 }
  0xa7   : > { %v740_v43 = vpop.permute.xlu0 %739 }
  0xa8   : > { %1483 = vperm.xlu1 %8592, %v1205_v35   ;;  %8500 = vpush %v740_v43  ;;  %v10226_v35 = vld [vmem:[%s15797_s3 + $0x28] sm:$0xff]  ;;  %v10244_v43 = vadd.f32 %v379_v19, %v10213_v30 }
  0xa9   : > { %v761_v45 = vpop.permute.xlu1 %760 }
  0xaa   : > { %1699 = vperm.xlu0 %8594, %v1211_v44   ;;  %8502 = vpush %v761_v45  ;;  %v10250_v45 = vadd.f32 %v381_v21, %v10231_v36 }
  0xab   : > { %v782_v46 = vpop.permute.xlu0 %781 }
  0xac   : > { %1491 = vperm.xlu1 %8592, %v1207_v38   ;;  %8504 = vpush %v782_v46  ;;  %v10239_v38 = vadd.f32 %v378_v4, %v10208_v29  ;;  %v10253_v46 = vadd.f32 %v382_v22, %v10236_v37  ;;  %v10274_v4 = vadd.f32 %v397_v39, %v10195_v24 }
  0xad   : > { %v803_v48 = vpop.permute.xlu1 %802 }
  0xae   : > { %1707 = vperm.xlu0 %8594, %v1213_v47   ;;  %8506 = vpush %v803_v48  ;;  %v400_v48 = vmul.f32 %v393_v5, %v10164_v63 }
  0xaf   : > { %v833_v49 = vpop.permute.xlu0 %832 }
  0xb0   : > { %1499 = vperm.xlu1 %8592, %v1209_v41   ;;  %8508 = vpush %v833_v49  ;;  %v413_v41 = vstv %s8473_s25  ;;  %v401_v49 = vmul.f32 %v393_v5, %v10169_v2 }
  0xb1   : > { %v854_v52 = vpop.permute.xlu1 %853  ;;  %v415_v62 = vmul.f32 %v413_v41, %v10130_v53  ;;  %v416_v19 = vmul.f32 %v413_v41, %v10136_v54  ;;  %v417_v21 = vmul.f32 %v413_v41, %v10141_v55  ;;  %v418_v22 = vmul.f32 %v413_v41, %v10152_v59 }
  0xb2   : > { %1715 = vperm.xlu0 %8594, %v10125_v50   ;;  %8510 = vpush %v854_v52  ;;  %v10262_v52 = vld [vmem:[%s15802_s8 + $0xb8] sm:$0xff]  ;;  %v421_v34 = vmul.f32 %v413_v41, %v10169_v2  ;;  %v422_v39 = vmul.f32 %v413_v41, %v10174_v3  ;;  %v10299_v0 = vadd.f32 %v401_v49, %v10231_v36 }
  0xb3   : > { %v875_v57 = vpop.permute.xlu0 %874  ;;  %v10314_v49 = vadd.f32 %v417_v21, %v10195_v24 }
  0xb4   : > { %1507 = vperm.xlu1 %8592, %v1211_v44   ;;  %8512 = vpush %v875_v57  ;;  %v10247_v44 = vadd.f32 %v380_v20, %v10226_v35  ;;  %v10266_v57 = vadd.f32 %v395_v33, %v10180_v7  ;;  %v420_v33 = vmul.f32 %v413_v41, %v10164_v63 }
  0xb5   : > { %v896_v6 = vpop.permute.xlu1 %895 }
  0xb6   : > { %1723 = vperm.xlu0 %8594, %v10147_v58   ;;  %8514 = vpush %v896_v6  ;;  %v10277_v6 = vadd.f32 %v398_v40, %v10208_v29 }
  0xb7   : > { %v926_v26 = vpop.permute.xlu0 %925 }
  0xb8   : > { %1515 = vperm.xlu1 %8592, %v1213_v47   ;;  %8516 = vpush %v926_v26  ;;  %v399_v47 = vmul.f32 %v393_v5, %v10157_v60  ;;  %v433_v5 = vstv %s8475_s16  ;;  %v419_v26 = vmul.f32 %v413_v41, %v10157_v60  ;;  %v10309_v41 = vadd.f32 %v416_v19, %v10190_v23 }
  0xb9   : > { %v947_v42 = vpop.permute.xlu1 %946  ;;  %v435_v1 = vmul.f32 %v433_v5, %v10130_v53  ;;  %v9885_v19 = vmov 0.0   ;;  %v10331_v53 = vadd.f32 %v421_v34, %v10231_v36  ;;  %v437_v21 = vmul.f32 %v433_v5, %v10141_v55 }
  0xba   : > { %1731 = vperm.xlu0 %8594, %v10203_v28   ;;  %8518 = vpush %v947_v42  ;;  %v10293_v42 = vld [vmem:[%s15802_s8 + $0xc8] sm:$0xff]  ;;  %v441_v34 = vmul.f32 %v433_v5, %v10169_v2  ;;  %v442_v55 = vmul.f32 %v433_v5, %v10174_v3  ;;  %v10372_v2 = vld [vmem:[%s15796_s2 + $0x58] sm:$0xff]  ;;  %v10377_v3 = vld [vmem:[%s15796_s2 + $0x60] sm:$0xff] }
  0xbb   : > { %v968_v51 = vpop.permute.xlu0 %967  ;;  %349 = vst.msk [vmem:[#allocation2 + $0x8] sm:$0xff] %vm347_vm0, %v9885_v19  ;;  %348 = vst.msk [vmem:[#allocation2] sm:$0xff] %vm347_vm0, %v9885_v19  ;;  %v10354_v18 = vadd.f32 %v435_v1, %v10180_v7  ;;  %v10398_v14 = vadd.f32 %v437_v21, %v10195_v24 }
  0xbc   : > { %1523 = vperm.xlu1 %8592, %v10125_v50   ;;  %8520 = vpush %v968_v51  ;;  %v10286_v50 = vadd.f32 %v399_v47, %v10213_v30  ;;  %v10296_v51 = vadd.f32 %v400_v48, %v10226_v35  ;;  %v10302_v47 = vadd.f32 %v402_v56, %v10236_v37 }
  0xbd   : > { %v989_v20 = vpop.permute.xlu1 %988  ;;  %v436_v48 = vmul.f32 %v433_v5, %v10136_v54  ;;  %v10317_v56 = vadd.f32 %v418_v22, %v10208_v29  ;;  %350 = vst.msk [vmem:[#allocation2 + $0x110] sm:$0xff] %vm347_vm0, %v9885_v19  ;;  %351 = vst.msk [vmem:[#allocation2 + $0x118] sm:$0xff] %vm347_vm0, %v9885_v19  ;;  %v10334_v54 = vadd.f32 %v422_v39, %v10236_v37  ;;  %v10349_v39 = vld [vmem:[%s15796_s2 + $0x40] sm:$0xff] }
  0xbe   : > { %1739 = vperm.xlu0 %8594, %v10262_v52   ;;  %8522 = vpush %v989_v20  ;;  %v10305_v20 = vadd.f32 %v415_v62, %v10180_v7  ;;  %v10320_v62 = vadd.f32 %v419_v26, %v10213_v30  ;;  %v439_v19 = vmul.f32 %v433_v5, %v10157_v60  ;;  %v10362_v60 = vld [vmem:[%s15796_s2 + $0x48] sm:$0xff] }
  0xbf   : > { %v1019_v40 = vpop.permute.xlu0 %1018  ;;  %v10382_v7 = vld [vmem:[%s15796_s2 + $0x68] sm:$0xff]  ;;  %v10420_v24 = vadd.f32 %v441_v34, %v10231_v36 }
  0xc0   : > { %1531 = vperm.xlu1 %8592, %v10147_v58   ;;  %8524 = vpush %v1019_v40  ;;  %v10323_v58 = vadd.f32 %v420_v33, %v10226_v35  ;;  %v10340_v33 = vld [vmem:[%s15802_s8 + $0xd8] sm:$0xff]  ;;  %v438_v40 = vmul.f32 %v433_v5, %v10152_v59  ;;  %v10357_v59 = vadd.f32 %v436_v48, %v10190_v23  ;;  %v10387_v23 = vld [vmem:[%s15796_s2 + $0x70] sm:$0xff] }
  0xc1   : > { %v1040_v27 = vpop.permute.xlu1 %1039  ;;  %s8477_s23 = spop %8476  ;;  %v10404_v10 = vadd.f32 %v439_v19, %v10213_v30 }
  0xc2   : > { %1747 = vperm.xlu0 %8594, %v10293_v42   ;;  %8526 = vpush %v1040_v27  ;;  %v463_v22 = vstv %s8477_s23  ;;  %v440_v27 = vmul.f32 %v433_v5, %v10164_v63  ;;  %v10367_v63 = vld [vmem:[%s15796_s2 + $0x50] sm:$0xff]  ;;  %v10401_v13 = vadd.f32 %v438_v40, %v10208_v29  ;;  %v10423_v29 = vadd.f32 %v442_v55, %v10236_v37 }
  0xc3   : > { %v1061_v26 = vpop.permute.xlu0 %1060  ;;  %v466_v5 = vmul.f32 %v10362_v60, %v463_v22  ;;  %v467_v48 = vmul.f32 %v10367_v63, %v463_v22  ;;  %v469_v17 = vmul.f32 %v10377_v3, %v463_v22  ;;  %v470_v16 = vmul.f32 %v10382_v7, %v463_v22 }
  0xc4   : > { %1539 = vperm.xlu1 %8592, %v10203_v28   ;;  %8528 = vpush %v1061_v26  ;;  %v465_v28 = vmul.f32 %v10349_v39, %v463_v22  ;;  %v468_v26 = vmul.f32 %v10372_v2, %v463_v22  ;;  %v471_v15 = vmul.f32 %v10387_v23, %v463_v22 }
  0xc5   : > { %v1082_v1 = vpop.permute.xlu1 %1081  ;;  %v10407_v12 = vadd.f32 %v440_v27, %v10226_v35  ;;  %v10431_v21 = vadd.f32 %v466_v5, %v10216_v31  ;;  %v10434_v40 = vadd.f32 %v467_v48, %v10219_v32  ;;  %v10440_v36 = vadd.f32 %v469_v17, %v10244_v43 }
  0xc6   : > { %1755 = vperm.xlu0 %8594, %v10340_v33   ;;  %8530 = vpush %v1082_v1  ;;  %v10412_v1 = vld [vmem:[%s15796_s2 + $0x78] sm:$0xff]  ;;  %v10428_v35 = vadd.f32 %v465_v28, %v10198_v25  ;;  %v10437_v19 = vadd.f32 %v468_v26, %v10239_v38  ;;  %v10443_v37 = vadd.f32 %v470_v16, %v10247_v44 }
  0xc7   : > { %v472_v30 = vmul.f32 %v10412_v1, %v463_v22  ;;  %v10456_v16 = vld [vmem:[%s15802_s8 + $0xf8] sm:$0xff] }
  0xc8   : > { %1547 = vperm.xlu1 %8592, %v10262_v52   ;;  %v10446_v52 = vadd.f32 %v471_v15, %v10250_v45 }
  0xc9   : > { %s8479_s17 = spop %8478  ;;  %v10464_v45 = vadd.f32 %v472_v30, %v10253_v46 }
  0xca   : > { %v484_v25 = vstv %s8479_s17  ;;  %s8481_s21 = spop %8480  ;;  %1763 = vperm.xlu0 %8594, %v10417_v11  }
  0xcb   : > { %v486_v31 = vmul.f32 %v10349_v39, %v484_v25  ;;  %v487_v32 = vmul.f32 %v10362_v60, %v484_v25  ;;  %v488_v38 = vmul.f32 %v10367_v63, %v484_v25  ;;  %v489_v22 = vmul.f32 %v10372_v2, %v484_v25  ;;  %s8483_s22 = spop %8482 }
  0xcc   : > { %v490_v15 = vmul.f32 %v10377_v3, %v484_v25  ;;  %v491_v17 = vmul.f32 %v10382_v7, %v484_v25  ;;  %v492_v43 = vmul.f32 %v10387_v23, %v484_v25  ;;  %v493_v44 = vmul.f32 %v10412_v1, %v484_v25  ;;  %s8485_s26 = spop %8484  ;;  %1555 = vperm.xlu1 %8592, %v10293_v42  }
  0xcd   : > { %v10467_v27 = vadd.f32 %v486_v31, %v10266_v57  ;;  %v10470_v34 = vadd.f32 %v487_v32, %v10269_v61  ;;  %v10473_v55 = vadd.f32 %v488_v38, %v10274_v4  ;;  %v10476_v28 = vadd.f32 %v489_v22, %v10277_v6  ;;  %s8487_s29 = spop %8486 }
  0xce   : > { %v10479_v5 = vadd.f32 %v490_v15, %v10286_v50  ;;  %v10482_v42 = vadd.f32 %v491_v17, %v10296_v51  ;;  %v10485_v46 = vadd.f32 %v492_v43, %v10299_v0  ;;  %1771 = vperm.xlu0 %8594, %v10456_v16   ;;  %v10489_v57 = vadd.f32 %v493_v44, %v10302_v47  ;;  %s8489_s25 = spop %8488 }
  0xcf   : > { %v505_v61 = vstv %s8481_s21  ;;  %v526_v4 = vstv %s8483_s22  ;;  %v556_v48 = vstv %s8485_s26  ;;  %v10501_v31 = vstv %s8487_s29  ;;  %s8491_s17 = spop %8490 }
  0xd0   : > { %v507_v6 = vmul.f32 %v10349_v39, %v505_v61  ;;  %v508_v50 = vmul.f32 %v10362_v60, %v505_v61  ;;  %v509_v26 = vmul.f32 %v10367_v63, %v505_v61  ;;  %v510_v51 = vmul.f32 %v10372_v2, %v505_v61  ;;  %1563 = vperm.xlu1 %8592, %v10340_v33   ;;  %v10496_v0 = vpop.permute.xlu0 %1459 }
  0xd1   : > { %15965 = vst [vmem:[#allocation15_spill] sm:$0xff] %v10496_v0  ;;  %v511_v30 = vmul.f32 %v10377_v3, %v505_v61  ;;  %v512_v47 = vmul.f32 %v10382_v7, %v505_v61  ;;  %v513_v25 = vmul.f32 %v10387_v23, %v505_v61  ;;  %v514_v32 = vmul.f32 %v10412_v1, %v505_v61  ;;  %s8493_s21 = spop %8492  ;;  %v11161_v0 = vld [vmem:[%s15802_s8 + $0xa0] sm:$0xff] }
  0xd2   : > { %v10505_v38 = vadd.f32 %v507_v6, %v10305_v20  ;;  %v10508_v22 = vadd.f32 %v508_v50, %v10309_v41  ;;  %v10511_v33 = vadd.f32 %v509_v26, %v10314_v49  ;;  %v10513_v15 = vpop.permute.xlu1 %1237  ;;  %v15823_v17 = vmov 3   ;;  %16008 = vst [vmem:[#allocation39_spill] sm:$0xff] %v11161_v0 }
  0xd3   : > { %15966 = vst [vmem:[#allocation16_spill] sm:$0xff] %v10513_v15  ;;  %8597 = vset.pattern.permute.xlu0 %v15823_v17  ;;  %v10517_v43 = vadd.f32 %v510_v51, %v10317_v56  ;;  %v10520_v44 = vadd.f32 %v511_v30, %v10320_v62  ;;  %v10523_v20 = vadd.f32 %v512_v47, %v10323_v58  ;;  %s8495_s22 = spop %8494 }
  0xd4   : > { %v10526_v41 = vadd.f32 %v513_v25, %v10331_v53  ;;  %1843 = vperm.xlu0 %8597, %v10007_v8   ;;  %v528_v49 = vmul.f32 %v10349_v39, %v526_v4  ;;  %v529_v61 = vmul.f32 %v10362_v60, %v526_v4  ;;  %v530_v6 = vmul.f32 %v10367_v63, %v526_v4  ;;  %v10534_v62 = vpop.permute.xlu0 %1471 }
  0xd5   : > { %v531_v56 = vmul.f32 %v10372_v2, %v526_v4  ;;  %1571 = vperm.xlu1 %8592, %v10417_v11   ;;  %15967 = vst [vmem:[#allocation17_spill] sm:$0xff] %v10534_v62  ;;  %v532_v58 = vmul.f32 %v10377_v3, %v526_v4  ;;  %v533_v50 = vmul.f32 %v10382_v7, %v526_v4  ;;  %v10555_v2 = vld [vmem:[%s15796_s2 + $0x80] sm:$0xff]  ;;  %s8497_s27 = spop %8496 }
  0xd6   : > { %v534_v53 = vmul.f32 %v10387_v23, %v526_v4  ;;  %v535_v26 = vmul.f32 %v10412_v1, %v526_v4  ;;  %v10541_v39 = vadd.f32 %v514_v32, %v10334_v54  ;;  %v10544_v60 = vadd.f32 %v528_v49, %v10354_v18  ;;  %v10557_v3 = vpop.permute.xlu1 %1242  ;;  %v10579_v23 = vld [vmem:[%s15796_s2 + $0x90] sm:$0xff]  ;;  %v10615_v32 = vld [vmem:[%s15796_s2 + $0xb8] sm:$0xff] }
  0xd7   : > { %v10547_v63 = vadd.f32 %v529_v61, %v10357_v59  ;;  %v10550_v11 = vadd.f32 %v530_v6, %v10398_v14  ;;  %15968 = vst [vmem:[#allocation18_spill] sm:$0xff] %v10557_v3  ;;  %v10560_v7 = vadd.f32 %v531_v56, %v10401_v13  ;;  %v10563_v54 = vadd.f32 %v532_v58, %v10404_v10  ;;  %v10574_v14 = vld [vmem:[%s15796_s2 + $0x88] sm:$0xff]  ;;  %v10584_v10 = vld [vmem:[%s15796_s2 + $0x98] sm:$0xff]  ;;  %v10600_v1 = vld [vmem:[%s15796_s2 + $0xb0] sm:$0xff]  ;;  %s8499_s28 = spop %8498 }
  0xd8   : > { %v10566_v18 = vadd.f32 %v533_v50, %v10407_v12  ;;  %v10569_v59 = vadd.f32 %v534_v53, %v10420_v24  ;;  %1855 = vperm.xlu0 %8597, %v10013_v9   ;;  %v10590_v12 = vld [vmem:[%s15796_s2 + $0xa0] sm:$0xff]  ;;  %v10595_v13 = vld [vmem:[%s15796_s2 + $0xa8] sm:$0xff]  ;;  %v558_v24 = vmul.f32 %v10555_v2, %v556_v48  ;;  %v559_v4 = vmul.f32 %v10574_v14, %v556_v48  ;;  %v10607_v47 = vpop.permute.xlu0 %1479 }
  0xd9   : > { %v560_v51 = vmul.f32 %v10579_v23, %v556_v48  ;;  %v561_v30 = vmul.f32 %v10584_v10, %v556_v48  ;;  %1579 = vperm.xlu1 %8592, %v10456_v16   ;;  %15969 = vst [vmem:[#allocation19_spill] sm:$0xff] %v10607_v47  ;;  %v10610_v25 = vadd.f32 %v535_v26, %v10423_v29  ;;  %s8501_s14 = spop %8500 }
  0xda   : > { %v562_v49 = vmul.f32 %v10590_v12, %v556_v48  ;;  %v563_v61 = vmul.f32 %v10595_v13, %v556_v48  ;;  %v564_v6 = vmul.f32 %v10600_v1, %v556_v48  ;;  %v565_v56 = vmul.f32 %v10615_v32, %v556_v48  ;;  %v10630_v50 = vpop.permute.xlu1 %1252 }
  0xdb   : > { %v10622_v16 = vadd.f32 %v558_v24, %v10428_v35  ;;  %v10625_v58 = vadd.f32 %v559_v4, %v10431_v21  ;;  %v10628_v29 = vadd.f32 %v560_v51, %v10434_v40  ;;  %15970 = vst [vmem:[#allocation20_spill] sm:$0xff] %v10630_v50  ;;  %v10633_v53 = vadd.f32 %v561_v30, %v10437_v19  ;;  %v15971_v21 = vld [vmem:[#allocation7_spill] sm:$0xff]  ;;  %s8503_s16 = spop %8502 }
  0xdc   : > { %v10636_v26 = vadd.f32 %v562_v49, %v10440_v36  ;;  %v10639_v17 = vadd.f32 %v563_v61, %v10443_v37  ;;  %v10642_v35 = vadd.f32 %v564_v6, %v10446_v52  ;;  %1863 = vperm.xlu0 %8597, %v15971_v21   ;;  %v579_v40 = vmul.f32 %v10555_v2, %v10501_v31  ;;  %v10654_v52 = vpop.permute.xlu0 %1487 }
  0xdd   : > { %v580_v48 = vmul.f32 %v10574_v14, %v10501_v31  ;;  %v581_v19 = vmul.f32 %v10579_v23, %v10501_v31  ;;  %v582_v36 = vmul.f32 %v10584_v10, %v10501_v31  ;;  %v15972_v37 = vmov 2   ;;  %15973 = vst [vmem:[#allocation7_spill] sm:$0xff] %v10654_v52  ;;  %v15979_v52 = vld [vmem:[#allocation9_spill] sm:$0xff] }
  0xde   : > { %8595 = vset.pattern.permute.xlu1 %v15972_v37  ;;  %v583_v24 = vmul.f32 %v10590_v12, %v10501_v31  ;;  %v584_v4 = vmul.f32 %v10595_v13, %v10501_v31  ;;  %v585_v51 = vmul.f32 %v10600_v1, %v10501_v31  ;;  %v586_v30 = vmul.f32 %v10615_v32, %v10501_v31  ;;  %v10677_v50 = vpop.permute.xlu1 %1262 }
  0xdf   : > { %1651 = vperm.xlu1 %8595, %v10007_v8   ;;  %v10666_v49 = vadd.f32 %v565_v56, %v10464_v45  ;;  %v10669_v61 = vadd.f32 %v579_v40, %v10467_v27  ;;  %v10672_v6 = vadd.f32 %v580_v48, %v10470_v34  ;;  %v10675_v37 = vadd.f32 %v581_v19, %v10473_v55  ;;  %v15975_v27 = vld [vmem:[#allocation8_spill] sm:$0xff]  ;;  %v15977_v19 = vld [vmem:[#allocation6_spill] sm:$0xff] }
  0xe0   : > { %15974 = vst [vmem:[#allocation21_spill] sm:$0xff] %v10677_v50  ;;  %v10680_v3 = vadd.f32 %v582_v36, %v10476_v28  ;;  %v10683_v31 = vadd.f32 %v583_v24, %v10479_v5  ;;  %v10686_v8 = vadd.f32 %v584_v4, %v10482_v42  ;;  %v10689_v45 = vadd.f32 %v585_v51, %v10485_v46  ;;  %v10695_v28 = vpop.permute.xlu0 %1495 }
  0xe1   : > { %1871 = vperm.xlu0 %8597, %v15975_v27   ;;  %v10693_v34 = vadd.f32 %v586_v30, %v10489_v57  ;;  %v598_v55 = vstv %s8489_s25  ;;  %v619_v56 = vstv %s8491_s17  ;;  %v649_v40 = vstv %s8493_s21  ;;  %15976 = vst [vmem:[#allocation8_spill] sm:$0xff] %v10695_v28 }
  0xe2   : > { %v600_v5 = vmul.f32 %v10555_v2, %v598_v55  ;;  %v601_v48 = vmul.f32 %v10574_v14, %v598_v55  ;;  %v602_v42 = vmul.f32 %v10579_v23, %v598_v55  ;;  %v603_v46 = vmul.f32 %v10584_v10, %v598_v55  ;;  %v10707_v51 = vpop.permute.xlu1 %1272 }
  0xe3   : > { %1655 = vperm.xlu1 %8595, %v15977_v19   ;;  %v604_v36 = vmul.f32 %v10590_v12, %v598_v55  ;;  %v605_v57 = vmul.f32 %v10595_v13, %v598_v55  ;;  %v606_v24 = vmul.f32 %v10600_v1, %v598_v55  ;;  %v10705_v4 = vstv %s8495_s22  ;;  %15978 = vst [vmem:[#allocation6_spill] sm:$0xff] %v10707_v51 }
  0xe4   : > { %v607_v30 = vmul.f32 %v10615_v32, %v598_v55  ;;  %v10711_v50 = vadd.f32 %v600_v5, %v10505_v38  ;;  %v10714_v15 = vadd.f32 %v601_v48, %v10508_v22  ;;  %v10717_v19 = vadd.f32 %v602_v42, %v10511_v33  ;;  %v10732_v55 = vpop.permute.xlu0 %1503 }
  0xe5   : > { %1879 = vperm.xlu0 %8597, %v15979_v52   ;;  %v10721_v62 = vadd.f32 %v603_v46, %v10517_v43  ;;  %v10724_v28 = vadd.f32 %v604_v36, %v10520_v44  ;;  %v10727_v51 = vadd.f32 %v605_v57, %v10523_v20  ;;  %v10730_v38 = vadd.f32 %v606_v24, %v10526_v41 }
  0xe6   : > { %15980 = vst [vmem:[#allocation9_spill] sm:$0xff] %v10732_v55  ;;  %v621_v22 = vmul.f32 %v10555_v2, %v619_v56  ;;  %v622_v33 = vmul.f32 %v10574_v14, %v619_v56  ;;  %v623_v5 = vmul.f32 %v10579_v23, %v619_v56  ;;  %v624_v43 = vmul.f32 %v10584_v10, %v619_v56  ;;  %v10743_v42 = vpop.permute.xlu1 %1282  ;;  %v10760_v10 = vld [vmem:[%s15796_s2 + $0xc0] sm:$0xff] }
  0xe7   : > { %1663 = vperm.xlu1 %8595, %v10013_v9   ;;  %v625_v44 = vmul.f32 %v10590_v12, %v619_v56  ;;  %v626_v20 = vmul.f32 %v10595_v13, %v619_v56  ;;  %v627_v48 = vmul.f32 %v10600_v1, %v619_v56  ;;  %v628_v41 = vmul.f32 %v10615_v32, %v619_v56  ;;  %v15982_v12 = vld [vmem:[#allocation10_spill] sm:$0xff]  ;;  %v10783_v1 = vld [vmem:[%s15796_s2 + $0xd0] sm:$0xff] }
  0xe8   : > { %15981 = vst [vmem:[#allocation22_spill] sm:$0xff] %v10743_v42  ;;  %v10746_v2 = vadd.f32 %v607_v30, %v10541_v39  ;;  %v10749_v14 = vadd.f32 %v621_v22, %v10544_v60  ;;  %v10752_v23 = vadd.f32 %v622_v33, %v10547_v63  ;;  %v10755_v9 = vadd.f32 %v623_v5, %v10550_v11  ;;  %v10778_v11 = vld [vmem:[%s15796_s2 + $0xc8] sm:$0xff]  ;;  %v10805_v32 = vld [vmem:[%s15796_s2 + $0xf0] sm:$0xff]  ;;  %v10818_v30 = vld [vmem:[%s15796_s2 + $0xf8] sm:$0xff] }
  0xe9   : > { %1887 = vperm.xlu0 %8597, %v15982_v12   ;;  %v10764_v13 = vadd.f32 %v624_v43, %v10560_v7  ;;  %v10767_v39 = vadd.f32 %v625_v44, %v10563_v54  ;;  %v10770_v60 = vadd.f32 %v626_v20, %v10566_v18  ;;  %v10773_v63 = vadd.f32 %v627_v48, %v10569_v59  ;;  %v10788_v7 = vld [vmem:[%s15796_s2 + $0xd8] sm:$0xff]  ;;  %v10790_v54 = vpop.permute.xlu0 %1511  ;;  %v10795_v18 = vld [vmem:[%s15796_s2 + $0xe0] sm:$0xff]  ;;  %v10800_v59 = vld [vmem:[%s15796_s2 + $0xe8] sm:$0xff] }
  0xea   : > { %15983 = vst [vmem:[#allocation10_spill] sm:$0xff] %v10790_v54  ;;  %v651_v56 = vmul.f32 %v10760_v10, %v649_v40  ;;  %v652_v46 = vmul.f32 %v10778_v11, %v649_v40  ;;  %v653_v36 = vmul.f32 %v10783_v1, %v649_v40  ;;  %v654_v57 = vmul.f32 %v10788_v7, %v649_v40  ;;  %v10823_v43 = vpop.permute.xlu1 %1292  ;;  %v15985_v48 = vld [vmem:[#allocation11_spill] sm:$0xff] }
  0xeb   : > { %1671 = vperm.xlu1 %8595, %v15971_v21   ;;  %v10813_v24 = vadd.f32 %v628_v41, %v10610_v25  ;;  %v655_v22 = vmul.f32 %v10795_v18, %v649_v40  ;;  %v656_v33 = vmul.f32 %v10800_v59, %v649_v40  ;;  %v657_v5 = vmul.f32 %v10805_v32, %v649_v40 }
  0xec   : > { %15984 = vst [vmem:[#allocation23_spill] sm:$0xff] %v10823_v43  ;;  %v658_v44 = vmul.f32 %v10818_v30, %v649_v40  ;;  %v10827_v21 = vadd.f32 %v651_v56, %v10622_v16  ;;  %v10830_v25 = vadd.f32 %v652_v46, %v10625_v58  ;;  %v10833_v20 = vadd.f32 %v653_v36, %v10628_v29 }
  0xed   : > { %1895 = vperm.xlu0 %8597, %v15985_v48   ;;  %v10837_v41 = vadd.f32 %v654_v57, %v10633_v53  ;;  %v10840_v42 = vadd.f32 %v655_v22, %v10636_v26  ;;  %v10843_v43 = vadd.f32 %v656_v33, %v10639_v17  ;;  %v10846_v16 = vadd.f32 %v657_v5, %v10642_v35  ;;  %v10848_v58 = vpop.permute.xlu0 %1519  ;;  %v15988_v5 = vld [vmem:[#allocation12_spill] sm:$0xff] }
  0xee   : > { %15986 = vst [vmem:[#allocation11_spill] sm:$0xff] %v10848_v58  ;;  %v672_v29 = vmul.f32 %v10760_v10, %v10705_v4  ;;  %v673_v40 = vmul.f32 %v10778_v11, %v10705_v4  ;;  %v674_v53 = vmul.f32 %v10783_v1, %v10705_v4  ;;  %v675_v26 = vmul.f32 %v10788_v7, %v10705_v4  ;;  %v10867_v36 = vpop.permute.xlu1 %1302 }
  0xef   : > { %1679 = vperm.xlu1 %8595, %v15975_v27   ;;  %v676_v17 = vmul.f32 %v10795_v18, %v10705_v4  ;;  %v677_v35 = vmul.f32 %v10800_v59, %v10705_v4  ;;  %v678_v56 = vmul.f32 %v10805_v32, %v10705_v4  ;;  %v679_v46 = vmul.f32 %v10818_v30, %v10705_v4 }
  0xf0   : > { %15987 = vst [vmem:[#allocation24_spill] sm:$0xff] %v10867_v36  ;;  %v10870_v57 = vadd.f32 %v658_v44, %v10666_v49  ;;  %v10873_v27 = vadd.f32 %v672_v29, %v10669_v61  ;;  %v10876_v22 = vadd.f32 %v673_v40, %v10672_v6  ;;  %v10879_v33 = vadd.f32 %v674_v53, %v10675_v37 }
  0xf1   : > { %1903 = vperm.xlu0 %8597, %v15988_v5   ;;  %v10883_v48 = vadd.f32 %v675_v26, %v10680_v3  ;;  %v10886_v4 = vadd.f32 %v676_v17, %v10683_v31  ;;  %v10889_v49 = vadd.f32 %v677_v35, %v10686_v8  ;;  %v10892_v61 = vadd.f32 %v678_v56, %v10689_v45  ;;  %v10894_v6 = vpop.permute.xlu0 %1527  ;;  %v15991_v56 = vld [vmem:[#allocation13_spill] sm:$0xff] }
  0xf2   : > { %15989 = vst [vmem:[#allocation12_spill] sm:$0xff] %v10894_v6  ;;  %v10897_v37 = vadd.f32 %v679_v46, %v10693_v34  ;;  %v691_v44 = vstv %s8497_s27  ;;  %v712_v29 = vstv %s8499_s28  ;;  %v742_v40 = vstv %s8501_s14  ;;  %v10904_v53 = vpop.permute.xlu1 %1312  ;;  %s8505_s27 = spop %8504 }
  0xf3   : > { %1687 = vperm.xlu1 %8595, %v15979_v52   ;;  %v693_v3 = vmul.f32 %v10760_v10, %v691_v44  ;;  %v694_v31 = vmul.f32 %v10778_v11, %v691_v44  ;;  %v695_v8 = vmul.f32 %v10783_v1, %v691_v44  ;;  %v696_v45 = vmul.f32 %v10788_v7, %v691_v44 }
  0xf4   : > { %15990 = vst [vmem:[#allocation25_spill] sm:$0xff] %v10904_v53  ;;  %v697_v26 = vmul.f32 %v10795_v18, %v691_v44  ;;  %v698_v34 = vmul.f32 %v10800_v59, %v691_v44  ;;  %v699_v17 = vmul.f32 %v10805_v32, %v691_v44  ;;  %v10909_v35 = vstv %s8503_s16  ;;  %s8507_s16 = spop %8506 }
  0xf5   : > { %1911 = vperm.xlu0 %8597, %v15991_v56   ;;  %v700_v52 = vmul.f32 %v10818_v30, %v691_v44  ;;  %v10914_v46 = vadd.f32 %v693_v3, %v10711_v50  ;;  %v10917_v5 = vadd.f32 %v694_v31, %v10714_v15  ;;  %v10920_v53 = vadd.f32 %v695_v8, %v10717_v19  ;;  %v10922_v36 = vpop.permute.xlu0 %1535  ;;  %v15994_v8 = vld [vmem:[#allocation14_spill] sm:$0xff]  ;;  %s8509_s25 = spop %8508 }
  0xf6   : > { %15992 = vst [vmem:[#allocation13_spill] sm:$0xff] %v10922_v36  ;;  %v10925_v58 = vadd.f32 %v696_v45, %v10721_v62  ;;  %v10928_v55 = vadd.f32 %v697_v26, %v10724_v28  ;;  %v10931_v56 = vadd.f32 %v698_v34, %v10727_v51  ;;  %v10934_v50 = vadd.f32 %v699_v17, %v10730_v38  ;;  %v10941_v3 = vpop.permute.xlu1 %1322  ;;  %s8511_s22 = spop %8510 }
  0xf7   : > { %1695 = vperm.xlu1 %8595, %v15982_v12   ;;  %v714_v15 = vmul.f32 %v10760_v10, %v712_v29  ;;  %v715_v19 = vmul.f32 %v10778_v11, %v712_v29  ;;  %v716_v44 = vmul.f32 %v10783_v1, %v712_v29  ;;  %v717_v62 = vmul.f32 %v10788_v7, %v712_v29  ;;  %v10963_v7 = vld [vmem:[%s15796_s2 + $0x100] sm:$0xff]  ;;  %s8513_s26 = spop %8512 }
  0xf8   : > { %15993 = vst [vmem:[#allocation26_spill] sm:$0xff] %v10941_v3  ;;  %v718_v28 = vmul.f32 %v10795_v18, %v712_v29  ;;  %v719_v51 = vmul.f32 %v10800_v59, %v712_v29  ;;  %v720_v31 = vmul.f32 %v10805_v32, %v712_v29  ;;  %v721_v38 = vmul.f32 %v10818_v30, %v712_v29  ;;  %v10987_v32 = vld [vmem:[%s15796_s2 + $0x110] sm:$0xff]  ;;  %s8515_s29 = spop %8514 }
  0xf9   : > { %1919 = vperm.xlu0 %8597, %v15994_v8   ;;  %v10949_v10 = vadd.f32 %v700_v52, %v10746_v2  ;;  %v10952_v12 = vadd.f32 %v714_v15, %v10749_v14  ;;  %v10955_v11 = vadd.f32 %v715_v19, %v10752_v23  ;;  %v10958_v1 = vadd.f32 %v716_v44, %v10755_v9  ;;  %v10965_v18 = vpop.permute.xlu0 %1543  ;;  %v10982_v9 = vld [vmem:[%s15796_s2 + $0x108] sm:$0xff]  ;;  %v11013_v30 = vld [vmem:[%s15796_s2 + $0x130] sm:$0xff]  ;;  %v11027_v15 = vld [vmem:[%s15796_s2 + $0x138] sm:$0xff] }
  0xfa   : > { %15995 = vst [vmem:[#allocation14_spill] sm:$0xff] %v10965_v18  ;;  %v10968_v59 = vadd.f32 %v717_v62, %v10764_v13  ;;  %v10971_v2 = vadd.f32 %v718_v28, %v10767_v39  ;;  %v10974_v14 = vadd.f32 %v719_v51, %v10770_v60  ;;  %v10977_v23 = vadd.f32 %v720_v31, %v10773_v63  ;;  %v10992_v13 = vld [vmem:[%s15796_s2 + $0x118] sm:$0xff]  ;;  %v10997_v39 = vld [vmem:[%s15802_s8 + $0x70] sm:$0xff]  ;;  %v11003_v60 = vld [vmem:[%s15796_s2 + $0x120] sm:$0xff]  ;;  %v11019_v17 = vpop.permute.xlu1 %1332 }
  0xfb   : > { %15996 = vst [vmem:[#allocation27_spill] sm:$0xff] %v10997_v39  ;;  %1703 = vperm.xlu1 %8595, %v10997_v39   ;;  %v11008_v63 = vld [vmem:[%s15796_s2 + $0x128] sm:$0xff]  ;;  %v744_v29 = vmul.f32 %v10963_v7, %v742_v40  ;;  %v745_v45 = vmul.f32 %v10982_v9, %v742_v40  ;;  %v746_v26 = vmul.f32 %v10987_v32, %v742_v40  ;;  %15997 = vst [vmem:[#allocation28_spill] sm:$0xff] %v11019_v17  ;;  %v11035_v28 = vld [vmem:[%s15802_s8 + $0xb0] sm:$0xff] }
  0xfc   : > { %v747_v34 = vmul.f32 %v10992_v13, %v742_v40  ;;  %v11022_v52 = vadd.f32 %v721_v38, %v10813_v24  ;;  %v748_v19 = vmul.f32 %v11003_v60, %v742_v40  ;;  %v749_v44 = vmul.f32 %v11008_v63, %v742_v40  ;;  %15998 = vst [vmem:[#allocation29_spill] sm:$0xff] %v11035_v28 }
  0xfd   : > { %v750_v62 = vmul.f32 %v11013_v30, %v742_v40  ;;  %1927 = vperm.xlu0 %8597, %v11035_v28   ;;  %v751_v24 = vmul.f32 %v11027_v15, %v742_v40  ;;  %v11040_v51 = vadd.f32 %v744_v29, %v10827_v21  ;;  %v11043_v31 = vadd.f32 %v745_v45, %v10830_v25  ;;  %v11048_v8 = vpop.permute.xlu0 %1551  ;;  %v11065_v25 = vld [vmem:[%s15802_s8 + $0x80] sm:$0xff] }
  0xfe   : > { %v11046_v38 = vadd.f32 %v746_v26, %v10833_v20  ;;  %15999 = vst [vmem:[#allocation30_spill] sm:$0xff] %v11048_v8  ;;  %v11051_v17 = vadd.f32 %v747_v34, %v10837_v41  ;;  %v11054_v3 = vadd.f32 %v748_v19, %v10840_v42  ;;  %v11057_v36 = vadd.f32 %v749_v44, %v10843_v43  ;;  %v11089_v34 = vld [vmem:[%s15802_s8 + $0xc0] sm:$0xff] }
  0xff   : > { %v11060_v21 = vadd.f32 %v750_v62, %v10846_v16  ;;  %16000 = vst [vmem:[#allocation31_spill] sm:$0xff] %v11065_v25  ;;  %1711 = vperm.xlu1 %8595, %v11065_v25   ;;  %v765_v20 = vmul.f32 %v10963_v7, %v10909_v35  ;;  %v766_v42 = vmul.f32 %v10982_v9, %v10909_v35  ;;  %v11076_v16 = vpop.permute.xlu1 %1342  ;;  %16002 = vst [vmem:[#allocation33_spill] sm:$0xff] %v11089_v34 }
 0x100   : > { %v767_v43 = vmul.f32 %v10987_v32, %v10909_v35  ;;  %v768_v41 = vmul.f32 %v10992_v13, %v10909_v35  ;;  %16001 = vst [vmem:[#allocation32_spill] sm:$0xff] %v11076_v16  ;;  %v769_v40 = vmul.f32 %v11003_v60, %v10909_v35  ;;  %v770_v29 = vmul.f32 %v11008_v63, %v10909_v35 }
 0x101   : > { %v771_v45 = vmul.f32 %v11013_v30, %v10909_v35  ;;  %v772_v26 = vmul.f32 %v11027_v15, %v10909_v35  ;;  %1935 = vperm.xlu0 %8597, %v11089_v34   ;;  %v11093_v19 = vadd.f32 %v751_v24, %v10870_v57  ;;  %v11096_v44 = vadd.f32 %v765_v20, %v10873_v27  ;;  %v11104_v35 = vpop.permute.xlu0 %1559 }
 0x102   : > { %v11099_v62 = vadd.f32 %v766_v42, %v10876_v22  ;;  %v11102_v16 = vadd.f32 %v767_v43, %v10879_v33  ;;  %16003 = vst [vmem:[#allocation34_spill] sm:$0xff] %v11104_v35  ;;  %v11107_v8 = vadd.f32 %v768_v41, %v10883_v48  ;;  %v11110_v18 = vadd.f32 %v769_v40, %v10886_v4  ;;  %v11121_v22 = vld [vmem:[%s15802_s8 + $0x90] sm:$0xff] }
 0x103   : > { %v11113_v57 = vadd.f32 %v770_v29, %v10889_v49  ;;  %v11116_v27 = vadd.f32 %v771_v45, %v10892_v61  ;;  %16004 = vst [vmem:[#allocation35_spill] sm:$0xff] %v11121_v22  ;;  %1719 = vperm.xlu1 %8595, %v11121_v22   ;;  %v11125_v33 = vadd.f32 %v772_v26, %v10897_v37  ;;  %v784_v48 = vstv %s8505_s27  ;;  %v11129_v49 = vpop.permute.xlu1 %1352  ;;  %v11138_v41 = vld [vmem:[%s15802_s8 + $0xd0] sm:$0xff]  ;;  %s8517_s27 = spop %8516 }
 0x104   : > { %v805_v4 = vstv %s8507_s16  ;;  %v11127_v24 = vstv %s8509_s25  ;;  %16005 = vst [vmem:[#allocation36_spill] sm:$0xff] %v11129_v49  ;;  %v786_v61 = vmul.f32 %v10963_v7, %v784_v48  ;;  %v787_v20 = vmul.f32 %v10982_v9, %v784_v48  ;;  %16006 = vst [vmem:[#allocation37_spill] sm:$0xff] %v11138_v41  ;;  %s8519_s28 = spop %8518 }
 0x105   : > { %v788_v42 = vmul.f32 %v10987_v32, %v784_v48  ;;  %v789_v43 = vmul.f32 %v10992_v13, %v784_v48  ;;  %1943 = vperm.xlu0 %8597, %v11138_v41   ;;  %v790_v37 = vmul.f32 %v11003_v60, %v784_v48  ;;  %v791_v40 = vmul.f32 %v11008_v63, %v784_v48  ;;  %v11146_v26 = vpop.permute.xlu0 %1567  ;;  %s8521_s23 = spop %8520 }
 0x106   : > { %v792_v29 = vmul.f32 %v11013_v30, %v784_v48  ;;  %v11144_v45 = vstv %s8511_s22  ;;  %16007 = vst [vmem:[#allocation38_spill] sm:$0xff] %v11146_v26  ;;  %v793_v49 = vmul.f32 %v11027_v15, %v784_v48  ;;  %v11150_v35 = vadd.f32 %v786_v61, %v10914_v46  ;;  %s8523_s24 = spop %8522 }
 0x107   : > { %v11153_v6 = vadd.f32 %v787_v20, %v10917_v5  ;;  %v11156_v54 = vadd.f32 %v788_v42, %v10920_v53  ;;  %1727 = vperm.xlu1 %8595, %v11161_v0   ;;  %v11165_v26 = vadd.f32 %v789_v43, %v10925_v58  ;;  %v11168_v48 = vadd.f32 %v790_v37, %v10928_v55  ;;  %v11176_v53 = vpop.permute.xlu1 %1362  ;;  %v11185_v55 = vld [vmem:[%s15802_s8 + $0xe0] sm:$0xff] }
 0x108   : > { %v11171_v46 = vadd.f32 %v791_v40, %v10931_v56  ;;  %v11174_v5 = vadd.f32 %v792_v29, %v10934_v50  ;;  %16009 = vst [vmem:[#allocation40_spill] sm:$0xff] %v11176_v53  ;;  %v807_v61 = vmul.f32 %v10963_v7, %v805_v4  ;;  %v808_v20 = vmul.f32 %v10982_v9, %v805_v4 }
 0x109   : > { %v809_v42 = vmul.f32 %v10987_v32, %v805_v4  ;;  %v810_v58 = vmul.f32 %v10992_v13, %v805_v4  ;;  %16010 = vst [vmem:[#allocation41_spill] sm:$0xff] %v11185_v55  ;;  %1951 = vperm.xlu0 %8597, %v11185_v55   ;;  %v811_v56 = vmul.f32 %v11003_v60, %v805_v4  ;;  %v11192_v9 = vpop.permute.xlu0 %1575  ;;  %v11209_v60 = vld [vmem:[%s15796_s2 + $0x140] sm:$0xff] }
 0x10a   : > { %v812_v50 = vmul.f32 %v11008_v63, %v805_v4  ;;  %v813_v43 = vmul.f32 %v11013_v30, %v805_v4  ;;  %v814_v7 = vmul.f32 %v11027_v15, %v805_v4  ;;  %16011 = vst [vmem:[#allocation42_spill] sm:$0xff] %v11192_v9  ;;  %v11195_v32 = vadd.f32 %v793_v49, %v10949_v10  ;;  %v11232_v30 = vld [vmem:[%s15796_s2 + $0x150] sm:$0xff] }
 0x10b   : > { %v11198_v13 = vadd.f32 %v807_v61, %v10952_v12  ;;  %v11201_v37 = vadd.f32 %v808_v20, %v10955_v11  ;;  %v11204_v40 = vadd.f32 %v809_v42, %v10958_v1  ;;  %1735 = vperm.xlu1 %8595, %v11035_v28   ;;  %v11213_v63 = vadd.f32 %v810_v58, %v10968_v59  ;;  %v11227_v1 = vld [vmem:[%s15796_s2 + $0x148] sm:$0xff]  ;;  %v11237_v59 = vld [vmem:[%s15796_s2 + $0x158] sm:$0xff]  ;;  %v11254_v15 = vld [vmem:[%s15796_s2 + $0x170] sm:$0xff] }
 0x10c   : > { %v11216_v10 = vadd.f32 %v811_v56, %v10971_v2  ;;  %v11219_v12 = vadd.f32 %v812_v50, %v10974_v14  ;;  %v11222_v11 = vadd.f32 %v813_v43, %v10977_v23  ;;  %v11239_v2 = vpop.permute.xlu1 %1372  ;;  %v11244_v14 = vld [vmem:[%s15796_s2 + $0x160] sm:$0xff]  ;;  %v11249_v23 = vld [vmem:[%s15796_s2 + $0x168] sm:$0xff]  ;;  %v837_v4 = vmul.f32 %v11209_v60, %v11127_v24  ;;  %v11267_v20 = vld [vmem:[%s15802_s8 + $0xf0] sm:$0xff] }
 0x10d   : > { %16012 = vst [vmem:[#allocation43_spill] sm:$0xff] %v11239_v2  ;;  %v838_v49 = vmul.f32 %v11227_v1, %v11127_v24  ;;  %v839_v29 = vmul.f32 %v11232_v30, %v11127_v24  ;;  %v840_v61 = vmul.f32 %v11237_v59, %v11127_v24  ;;  %16013 = vst [vmem:[#allocation44_spill] sm:$0xff] %v11267_v20  ;;  %1959 = vperm.xlu0 %8597, %v11267_v20   ;;  %v11276_v58 = vld [vmem:[%s15796_s2 + $0x178] sm:$0xff]  ;;  %v11296_v9 = vpop.permute.xlu0 %1647 }
 0x10e   : > { %v11271_v42 = vadd.f32 %v814_v7, %v11022_v52  ;;  %v841_v56 = vmul.f32 %v11244_v14, %v11127_v24  ;;  %v842_v50 = vmul.f32 %v11249_v23, %v11127_v24  ;;  %v843_v43 = vmul.f32 %v11254_v15, %v11127_v24  ;;  %16014 = vst [vmem:[#allocation45_spill] sm:$0xff] %v11296_v9 }
 0x10f   : > { %v844_v2 = vmul.f32 %v11276_v58, %v11127_v24  ;;  %v11287_v52 = vadd.f32 %v837_v4, %v11040_v51  ;;  %v11290_v7 = vadd.f32 %v838_v49, %v11043_v31  ;;  %v11293_v53 = vadd.f32 %v839_v29, %v11046_v38  ;;  %1743 = vperm.xlu1 %8595, %v11089_v34  }
 0x110   : > { %v11299_v47 = vadd.f32 %v840_v61, %v11051_v17  ;;  %v11302_v28 = vadd.f32 %v841_v56, %v11054_v3  ;;  %v11305_v24 = vadd.f32 %v842_v50, %v11057_v36  ;;  %v11308_v51 = vadd.f32 %v843_v43, %v11060_v21  ;;  %v11310_v31 = vpop.permute.xlu1 %1382 }
 0x111   : > { %16015 = vst [vmem:[#allocation46_spill] sm:$0xff] %v11310_v31  ;;  %v858_v38 = vmul.f32 %v11209_v60, %v11144_v45  ;;  %v859_v4 = vmul.f32 %v11227_v1, %v11144_v45  ;;  %v860_v17 = vmul.f32 %v11232_v30, %v11144_v45  ;;  %v861_v3 = vmul.f32 %v11237_v59, %v11144_v45  ;;  %v11341_v31 = vpop.permute.xlu0 %1659 }
 0x112   : > { %v862_v36 = vmul.f32 %v11244_v14, %v11144_v45  ;;  %v863_v21 = vmul.f32 %v11249_v23, %v11144_v45  ;;  %v864_v49 = vmul.f32 %v11254_v15, %v11144_v45  ;;  %v865_v29 = vmul.f32 %v11276_v58, %v11144_v45  ;;  %16016 = vst [vmem:[#allocation47_spill] sm:$0xff] %v11341_v31 }
 0x113   : > { %v11329_v61 = vadd.f32 %v844_v2, %v11093_v19  ;;  %v11332_v56 = vadd.f32 %v858_v38, %v11096_v44  ;;  %v11335_v50 = vadd.f32 %v859_v4, %v11099_v62  ;;  %v11338_v43 = vadd.f32 %v860_v17, %v11102_v16  ;;  %1751 = vperm.xlu1 %8595, %v11138_v41  }
 0x114   : > { %v11344_v9 = vadd.f32 %v861_v3, %v11107_v8  ;;  %v11347_v45 = vadd.f32 %v862_v36, %v11110_v18  ;;  %v11350_v19 = vadd.f32 %v863_v21, %v11113_v57  ;;  %v11353_v44 = vadd.f32 %v864_v49, %v11116_v27  ;;  %v11358_v4 = vpop.permute.xlu1 %1455 }
 0x115   : > { %v11356_v16 = vadd.f32 %v865_v29, %v11125_v33  ;;  %v877_v62 = vstv %s8513_s26  ;;  %v898_v2 = vstv %s8515_s29  ;;  %v928_v38 = vstv %s8517_s27  ;;  %16017 = vst [vmem:[#allocation48_spill] sm:$0xff] %v11358_v4  ;;  %v11370_v21 = vpop.permute.xlu0 %1667  ;;  %s8525_s26 = spop %8524  ;;  %s9891_s27 = smov 32  }
 0x116   : > { %v879_v8 = vmul.f32 %v11209_v60, %v877_v62  ;;  %v880_v18 = vmul.f32 %v11227_v1, %v877_v62  ;;  %v881_v17 = vmul.f32 %v11232_v30, %v877_v62  ;;  %v882_v57 = vmul.f32 %v11237_v59, %v877_v62  ;;  %16018 = vst [vmem:[#allocation49_spill] sm:$0xff] %v11370_v21  ;;  %v11499_v21 = vld [vmem:[%s15802_s8] sm:$0xff] }
 0x117   : > { %v883_v27 = vmul.f32 %v11244_v14, %v877_v62  ;;  %v884_v3 = vmul.f32 %v11249_v23, %v877_v62  ;;  %v885_v33 = vmul.f32 %v11254_v15, %v877_v62  ;;  %v11367_v36 = vstv %s8519_s28  ;;  %1759 = vperm.xlu1 %8595, %v11185_v55   ;;  %s8527_s28 = spop %8526 }
 0x118   : > { %v886_v49 = vmul.f32 %v11276_v58, %v877_v62  ;;  %v11374_v29 = vadd.f32 %v879_v8, %v11150_v35  ;;  %v11377_v31 = vadd.f32 %v880_v18, %v11153_v6  ;;  %v11380_v4 = vadd.f32 %v881_v17, %v11156_v54  ;;  %v11394_v35 = vpop.permute.xlu1 %1463  ;;  %s8529_s14 = spop %8528 }
 0x119   : > { %v11383_v41 = vadd.f32 %v882_v57, %v11165_v26  ;;  %v11386_v34 = vadd.f32 %v883_v27, %v11168_v48  ;;  %v11389_v55 = vadd.f32 %v884_v3, %v11171_v46  ;;  %v11392_v62 = vadd.f32 %v885_v33, %v11174_v5  ;;  %16019 = vst [vmem:[#allocation50_spill] sm:$0xff] %v11394_v35  ;;  %v11405_v5 = vpop.permute.xlu0 %1675  ;;  %s8531_s16 = spop %8530 }
 0x11a   : > { %v900_v6 = vmul.f32 %v11209_v60, %v898_v2  ;;  %v901_v8 = vmul.f32 %v11227_v1, %v898_v2  ;;  %v902_v54 = vmul.f32 %v11232_v30, %v898_v2  ;;  %v903_v26 = vmul.f32 %v11237_v59, %v898_v2  ;;  %16020 = vst [vmem:[#allocation51_spill] sm:$0xff] %v11405_v5 }
 0x11b   : > { %v904_v18 = vmul.f32 %v11244_v14, %v898_v2  ;;  %v905_v48 = vmul.f32 %v11249_v23, %v898_v2  ;;  %v906_v46 = vmul.f32 %v11254_v15, %v898_v2  ;;  %v907_v17 = vmul.f32 %v11276_v58, %v898_v2  ;;  %1767 = vperm.xlu1 %8595, %v11267_v20   ;;  %v11422_v14 = vld [vmem:[%s15796_s2 + $0x180] sm:$0xff]  ;;  %v11444_v15 = vld [vmem:[%s15796_s2 + $0x190] sm:$0xff] }
 0x11c   : > { %v11408_v60 = vadd.f32 %v886_v49, %v11195_v32  ;;  %v11411_v1 = vadd.f32 %v900_v6, %v11198_v13  ;;  %v11414_v30 = vadd.f32 %v901_v8, %v11201_v37  ;;  %v11417_v59 = vadd.f32 %v902_v54, %v11204_v40  ;;  %v11439_v40 = vld [vmem:[%s15796_s2 + $0x188] sm:$0xff]  ;;  %v11466_v58 = vld [vmem:[%s15796_s2 + $0x1b0] sm:$0xff]  ;;  %v11478_v49 = vld [vmem:[%s15796_s2 + $0x1b8] sm:$0xff] }
 0x11d   : > { %v11425_v23 = vadd.f32 %v903_v26, %v11213_v63  ;;  %v11428_v32 = vadd.f32 %v904_v18, %v11216_v10  ;;  %v11431_v13 = vadd.f32 %v905_v48, %v11219_v12  ;;  %v11434_v37 = vadd.f32 %v906_v46, %v11222_v11  ;;  %v11449_v63 = vld [vmem:[%s15796_s2 + $0x198] sm:$0xff]  ;;  %v11451_v10 = vpop.permute.xlu1 %1467  ;;  %v11456_v12 = vld [vmem:[%s15796_s2 + $0x1a0] sm:$0xff]  ;;  %v11461_v11 = vld [vmem:[%s15796_s2 + $0x1a8] sm:$0xff]  ;;  %v11484_v18 = vpop.permute.xlu0 %1683 }
 0x11e   : > { %16021 = vst [vmem:[#allocation52_spill] sm:$0xff] %v11451_v10  ;;  %v930_v2 = vmul.f32 %v11422_v14, %v928_v38  ;;  %v931_v57 = vmul.f32 %v11439_v40, %v928_v38  ;;  %v932_v27 = vmul.f32 %v11444_v15, %v928_v38  ;;  %v933_v3 = vmul.f32 %v11449_v63, %v928_v38 }
 0x11f   : > { %v11473_v33 = vadd.f32 %v907_v17, %v11271_v42  ;;  %v934_v6 = vmul.f32 %v11456_v12, %v928_v38  ;;  %v935_v8 = vmul.f32 %v11461_v11, %v928_v38  ;;  %v936_v54 = vmul.f32 %v11466_v58, %v928_v38  ;;  %16023 = vst [vmem:[#allocation53_spill] sm:$0xff] %v11484_v18 }
 0x120   : > { %v16022_v26 = vmov 3   ;;  %v937_v48 = vmul.f32 %v11478_v49, %v928_v38  ;;  %v11488_v42 = vadd.f32 %v930_v2, %v11287_v52  ;;  %v11491_v46 = vadd.f32 %v931_v57, %v11290_v7 }
 0x121   : > { %8596 = vset.pattern.permute.xlu1 %v16022_v26  ;;  %v11494_v17 = vadd.f32 %v932_v27, %v11293_v53  ;;  %v11503_v26 = vadd.f32 %v933_v3, %v11299_v47  ;;  %v11506_v38 = vadd.f32 %v934_v6, %v11302_v28  ;;  %v11509_v52 = vadd.f32 %v935_v8, %v11305_v24  ;;  %v11514_v53 = vpop.permute.xlu1 %1475  ;;  %v11532_v6 = vpop.permute.xlu0 %1691 }
 0x122   : > { %1839 = vperm.xlu1 %8596, %v11499_v21   ;;  %v11512_v7 = vadd.f32 %v936_v54, %v11308_v51  ;;  %16024 = vst [vmem:[#allocation54_spill] sm:$0xff] %v11514_v53  ;;  %v951_v2 = vmul.f32 %v11422_v14, %v11367_v36  ;;  %v952_v57 = vmul.f32 %v11439_v40, %v11367_v36  ;;  %16025 = vst [vmem:[#allocation55_spill] sm:$0xff] %v11532_v6  ;;  %v11549_v53 = vld [vmem:[%s15802_s8 + $0x10] sm:$0xff] }
 0x123   : > { %v953_v47 = vmul.f32 %v11444_v15, %v11367_v36  ;;  %v954_v28 = vmul.f32 %v11449_v63, %v11367_v36  ;;  %v955_v24 = vmul.f32 %v11456_v12, %v11367_v36  ;;  %v956_v51 = vmul.f32 %v11461_v11, %v11367_v36  ;;  %16026 = vst [vmem:[#allocation56_spill] sm:$0xff] %v11549_v53 }
 0x124   : > { %v957_v27 = vmul.f32 %v11466_v58, %v11367_v36  ;;  %v958_v3 = vmul.f32 %v11478_v49, %v11367_v36  ;;  %v11535_v8 = vadd.f32 %v937_v48, %v11329_v61  ;;  %v11538_v54 = vadd.f32 %v951_v2, %v11332_v56 }
 0x125   : > { %v11541_v18 = vadd.f32 %v952_v57, %v11335_v50  ;;  %v11544_v5 = vadd.f32 %v953_v47, %v11338_v43  ;;  %v11553_v36 = vadd.f32 %v954_v28, %v11344_v9  ;;  %v11556_v61 = vadd.f32 %v955_v24, %v11347_v45  ;;  %v11564_v43 = vpop.permute.xlu1 %1483  ;;  %v11573_v24 = vpop.permute.xlu0 %1699 }
 0x126   : > { %1847 = vperm.xlu1 %8596, %v11549_v53   ;;  %v11559_v56 = vadd.f32 %v956_v51, %v11350_v19  ;;  %v11562_v50 = vadd.f32 %v957_v27, %v11353_v44  ;;  %16027 = vst [vmem:[#allocation57_spill] sm:$0xff] %v11564_v43  ;;  %v11567_v48 = vadd.f32 %v958_v3, %v11356_v16  ;;  %v970_v2 = vstv %s8521_s23  ;;  %v11582_v3 = vld [vmem:[%s15802_s8 + $0x18] sm:$0xff]  ;;  %s9894_s23 = smov [#allocation3]  }
 0x127   : > { %v991_v57 = vstv %s8523_s24  ;;  %v1021_v47 = vstv %s8525_s26  ;;  %v972_v9 = vmul.f32 %v11422_v14, %v970_v2  ;;  %v973_v45 = vmul.f32 %v11439_v40, %v970_v2  ;;  %16028 = vst [vmem:[#allocation58_spill] sm:$0xff] %v11573_v24  ;;  %s334_s24 = sand.u32 1, %s9865_s10  }
 0x128   : > { %v974_v28 = vmul.f32 %v11444_v15, %v970_v2  ;;  %v975_v19 = vmul.f32 %v11449_v63, %v970_v2  ;;  %v976_v44 = vmul.f32 %v11456_v12, %v970_v2  ;;  %v977_v51 = vmul.f32 %v11461_v11, %v970_v2  ;;  %s7838_s26 = sshll.u32 %s334_s24, 7 }
 0x129   : > { %v978_v16 = vmul.f32 %v11466_v58, %v970_v2  ;;  %v979_v27 = vmul.f32 %v11478_v49, %v970_v2  ;;  %v11586_v6 = vadd.f32 %v972_v9, %v11374_v29  ;;  %v11589_v24 = vadd.f32 %v973_v45, %v11377_v31  ;;  %v11596_v10 = vpop.permute.xlu1 %1491  ;;  %s15695_s29 = scalar_lea.vmem [#allocation3], %s7838_s26 }
 0x12a   : > { %1851 = vperm.xlu1 %8596, %v11582_v3   ;;  %v11592_v43 = vadd.f32 %v974_v28, %v11380_v4  ;;  %v11594_v35 = vstv %s8527_s28  ;;  %16029 = vst [vmem:[#allocation59_spill] sm:$0xff] %v11596_v10  ;;  %v11599_v2 = vadd.f32 %v975_v19, %v11383_v41  ;;  %v11602_v20 = vadd.f32 %v976_v44, %v11386_v34  ;;  %v11617_v41 = vld [vmem:[%s15796_s2 + $0x1c0] sm:$0xff]  ;;  %v11622_v34 = vld [vmem:[%s15796_s2 + $0x1c8] sm:$0xff]  ;;  %v11640_v28 = vld [vmem:[%s15796_s2 + $0x1d8] sm:$0xff]  ;;  %s9892_s28 = smov 64   ;;  %s7760_s25 = sshll.u32 %s15695_s29, 4  ;;  %s15747_s25 = int_to_ptr.vmem [resolvable:$true] %s7760_s25 }
 0x12b   : > { %v11605_v0 = vadd.f32 %v977_v51, %v11389_v55  ;;  %v11608_v29 = vadd.f32 %v978_v16, %v11392_v62  ;;  %v993_v31 = vmul.f32 %v11422_v14, %v991_v57  ;;  %v994_v4 = vmul.f32 %v11439_v40, %v991_v57  ;;  %v11624_v55 = vpop.permute.xlu0 %1707  ;;  %v11668_v51 = vld [vmem:[%s15796_s2 + $0x1e8] sm:$0xff]  ;;  %v11673_v16 = vld [vmem:[%s15796_s2 + $0x1f0] sm:$0xff] }
 0x12c   : > { %v995_v9 = vmul.f32 %v11444_v15, %v991_v57  ;;  %v996_v45 = vmul.f32 %v11449_v63, %v991_v57  ;;  %16030 = vst [vmem:[#allocation60_spill] sm:$0xff] %v11624_v55  ;;  %v11627_v62 = vadd.f32 %v979_v27, %v11408_v60  ;;  %v997_v14 = vmul.f32 %v11456_v12, %v991_v57  ;;  %v11635_v63 = vld [vmem:[%s15796_s2 + $0x1d0] sm:$0xff]  ;;  %v11645_v60 = vld [vmem:[%s15796_s2 + $0x1e0] sm:$0xff]  ;;  %v11650_v12 = vld [vmem:[%s15802_s8 + $0x28] sm:$0xff] }
 0x12d   : > { %v998_v40 = vmul.f32 %v11461_v11, %v991_v57  ;;  %v999_v15 = vmul.f32 %v11466_v58, %v991_v57  ;;  %16031 = vst [vmem:[#allocation61_spill] sm:$0xff] %v11650_v12  ;;  %v11654_v11 = vmul.f32 %v11478_v49, %v991_v57  ;;  %v11657_v58 = vadd.f32 %v993_v31, %v11411_v1  ;;  %v11678_v1 = vld [vmem:[%s15796_s2 + $0x1f8] sm:$0xff] }
 0x12e   : > { %1859 = vperm.xlu1 %8596, %v11650_v12   ;;  %v11660_v19 = vadd.f32 %v994_v4, %v11414_v30  ;;  %v11663_v44 = vadd.f32 %v995_v9, %v11417_v59  ;;  %v11680_v30 = vpop.permute.xlu1 %1499  ;;  %v11683_v59 = vadd.f32 %v996_v45, %v11425_v23  ;;  %v11686_v49 = vadd.f32 %v997_v14, %v11428_v32 }
 0x12f   : > { %16032 = vst [vmem:[#allocation62_spill] sm:$0xff] %v11680_v30  ;;  %v11689_v57 = vadd.f32 %v998_v40, %v11431_v13  ;;  %v11692_v27 = vadd.f32 %v999_v15, %v11434_v37  ;;  %v1023_v31 = vmul.f32 %v11617_v41, %v1021_v47  ;;  %v1024_v4 = vmul.f32 %v11622_v34, %v1021_v47  ;;  %v11698_v10 = vpop.permute.xlu0 %1715  ;;  %v11707_v37 = vld [vmem:[%s15802_s8 + $0x38] sm:$0xff] }
 0x130   : > { %v1025_v9 = vmul.f32 %v11635_v63, %v1021_v47  ;;  %v1026_v55 = vmul.f32 %v11640_v28, %v1021_v47  ;;  %16033 = vst [vmem:[#allocation63_spill] sm:$0xff] %v11698_v10  ;;  %v1027_v23 = vmul.f32 %v11645_v60, %v1021_v47  ;;  %v1028_v32 = vmul.f32 %v11668_v51, %v1021_v47 }
 0x131   : > { %v1029_v13 = vmul.f32 %v11673_v16, %v1021_v47  ;;  %v1030_v45 = vmul.f32 %v11678_v1, %v1021_v47  ;;  %16034 = vst [vmem:[#allocation64_spill] sm:$0xff] %v11707_v37  ;;  %v1031_v14 = vadd.f32 %v1023_v31, %v11488_v42  ;;  %v1032_v40 = vadd.f32 %v1024_v4, %v11491_v46 }
 0x132   : > { %1867 = vperm.xlu1 %8596, %v11707_v37   ;;  %v1033_v15 = vadd.f32 %v1025_v9, %v11494_v17  ;;  %v1034_v10 = vadd.f32 %v1026_v55, %v11503_v26  ;;  %v11714_v30 = vpop.permute.xlu1 %1507  ;;  %v1035_v22 = vadd.f32 %v1027_v23, %v11506_v38  ;;  %v1036_v47 = vadd.f32 %v1028_v32, %v11509_v52  ;;  %v11725_v26 = vld [vmem:[%s15802_s8 + $0x48] sm:$0xff] }
 0x133   : > { %v1037_v25 = vadd.f32 %v1029_v13, %v11512_v7  ;;  %v1038_v39 = vadd.f32 %v1030_v45, %v11535_v8  ;;  %v1102_v53 = vmax.f32 %v1031_v14, 0.0  ;;  %v1103_v37 = vmax.f32 %v1032_v40, 0.0  ;;  %v11720_v9 = vpop.permute.xlu0 %1723 }
 0x134   : > { %v1104_v12 = vmax.f32 %v1033_v15, 0.0  ;;  %v1105_v42 = vmax.f32 %v1034_v10, 0.0  ;;  %v1106_v31 = vmax.f32 %v1035_v22, 0.0  ;;  %v1107_v46 = vmax.f32 %v1036_v47, 0.0 }
 0x135   : > { %v1108_v4 = vmax.f32 %v1037_v25, 0.0  ;;  %v1109_v17 = vmax.f32 %v1038_v39, 0.0  ;;  %1134 = vst.msk [vmem:[#allocation2 + $0x10] sm:$0xff] %vm347_vm0, %v1102_v53  ;;  %1135 = vst.msk [vmem:[#allocation2 + $0x18] sm:$0xff] %vm347_vm0, %v1103_v37  ;;  %v1044_v39 = vmul.f32 %v11617_v41, %v11594_v35  ;;  %v1045_v25 = vmul.f32 %v11622_v34, %v11594_v35 }
 0x136   : > { %1875 = vperm.xlu1 %8596, %v11725_v26   ;;  %1136 = vst.msk [vmem:[#allocation2 + $0x20] sm:$0xff] %vm347_vm0, %v1104_v12  ;;  %1137 = vst.msk [vmem:[#allocation2 + $0x28] sm:$0xff] %vm347_vm0, %v1105_v42  ;;  %v1046_v22 = vmul.f32 %v11635_v63, %v11594_v35  ;;  %v1047_v10 = vmul.f32 %v11640_v28, %v11594_v35  ;;  %v11740_v38 = vpop.permute.xlu1 %1515  ;;  %v1048_v52 = vmul.f32 %v11645_v60, %v11594_v35 }
 0x137   : > { %1138 = vst.msk [vmem:[#allocation2 + $0x30] sm:$0xff] %vm347_vm0, %v1106_v31  ;;  %1139 = vst.msk [vmem:[#allocation2 + $0x38] sm:$0xff] %vm347_vm0, %v1107_v46  ;;  %v1049_v7 = vmul.f32 %v11668_v51, %v11594_v35  ;;  %v1050_v53 = vmul.f32 %v11673_v16, %v11594_v35  ;;  %v1051_v8 = vmul.f32 %v11678_v1, %v11594_v35  ;;  %v11765_v35 = vld [vmem:[%s15802_s8 + $0x58] sm:$0xff]  ;;  %v11770_v47 = vpop.permute.xlu0 %1731  ;;  %v1063_v42 = vstv %s8529_s14  ;;  %s9893_s14 = smov 96  }
 0x138   : > { %1140 = vst.msk [vmem:[#allocation2 + $0x40] sm:$0xff] %vm347_vm0, %v1108_v4  ;;  %1141 = vst.msk [vmem:[#allocation2 + $0x48] sm:$0xff] %vm347_vm0, %v1109_v17  ;;  %v1052_v55 = vadd.f32 %v1044_v39, %v11538_v54  ;;  %v1053_v12 = vadd.f32 %v1045_v25, %v11541_v18  ;;  %v1054_v23 = vadd.f32 %v1046_v22, %v11544_v5  ;;  %v1084_v31 = vstv %s8531_s16  ;;  %s8036_s16 = sshll.u32 %s9967_s13, 11  ;;  %s15752_s13 = scalar_lea.sflag [#allocation4], %s334_s24 }
 0x139   : > { %v1055_v32 = vadd.f32 %v1047_v10, %v11553_v36  ;;  %v1056_v13 = vadd.f32 %v1048_v52, %v11556_v61  ;;  %v1057_v45 = vadd.f32 %v1049_v7, %v11559_v56  ;;  %v1058_v37 = vadd.f32 %v1050_v53, %v11562_v50  ;;  %s15744_s22 = scalar_lea.hbm %s15803_s9, %s8036_s16 }
 0x13a   : > { %v1059_v14 = vadd.f32 %v1051_v8, %v11567_v48  ;;  %1883 = vperm.xlu1 %8596, %v11765_v35   ;;  %v1110_v5 = vmax.f32 %v1052_v55, 0.0  ;;  %v1111_v18 = vmax.f32 %v1053_v12, 0.0  ;;  %v1112_v54 = vmax.f32 %v1054_v23, 0.0  ;;  %v11768_v40 = vpop.permute.xlu1 %1523  ;;  %v11803_v12 = vld [vmem:[%s15802_s8 + $0x68] sm:$0xff] }
 0x13b   : > { %v1113_v36 = vmax.f32 %v1055_v32, 0.0  ;;  %v1114_v61 = vmax.f32 %v1056_v13, 0.0  ;;  %v1115_v56 = vmax.f32 %v1057_v45, 0.0  ;;  %v1116_v15 = vmax.f32 %v1058_v37, 0.0 }
 0x13c   : > { %v1117_v50 = vmax.f32 %v1059_v14, 0.0  ;;  %v11774_v48 = vadd.f32 %v11654_v11, %v11473_v33  ;;  %1142 = vst.msk [vmem:[#allocation2 + $0x50] sm:$0xff] %vm347_vm0, %v1110_v5  ;;  %1143 = vst.msk [vmem:[#allocation2 + $0x58] sm:$0xff] %vm347_vm0, %v1111_v18  ;;  %v1065_v33 = vmul.f32 %v11617_v41, %v1063_v42  ;;  %v1066_v11 = vmul.f32 %v11622_v34, %v1063_v42 }
 0x13d   : > { %1144 = vst.msk [vmem:[#allocation2 + $0x60] sm:$0xff] %vm347_vm0, %v1112_v54  ;;  %1145 = vst.msk [vmem:[#allocation2 + $0x68] sm:$0xff] %vm347_vm0, %v1113_v36  ;;  %v1067_v46 = vmul.f32 %v11635_v63, %v1063_v42  ;;  %v1068_v4 = vmul.f32 %v11640_v28, %v1063_v42  ;;  %v15847_v17 = vmov 5   ;;  %v1069_v39 = vmul.f32 %v11645_v60, %v1063_v42 }
 0x13e   : > { %1146 = vst.msk [vmem:[#allocation2 + $0x70] sm:$0xff] %vm347_vm0, %v1114_v61  ;;  %1147 = vst.msk [vmem:[#allocation2 + $0x78] sm:$0xff] %vm347_vm0, %v1115_v56  ;;  %8598 = vset.pattern.permute.xlu0 %v15847_v17  ;;  %v1070_v25 = vmul.f32 %v11668_v51, %v1063_v42  ;;  %v1071_v22 = vmul.f32 %v11673_v16, %v1063_v42  ;;  %v1072_v10 = vmul.f32 %v11678_v1, %v1063_v42  ;;  %v11794_v52 = vpop.permute.xlu1 %1531  ;;  %v11826_v61 = vld [vmem:[%s15802_s8 + $0x78] sm:$0xff] }
 0x13f   : > { %1148 = vst.msk [vmem:[#allocation2 + $0x80] sm:$0xff] %vm347_vm0, %v1116_v15  ;;  %1149 = vst.msk [vmem:[#allocation2 + $0x88] sm:$0xff] %vm347_vm0, %v1117_v50  ;;  %2063 = vperm.xlu0 %8598, %v11499_v21   ;;  %v1073_v7 = vadd.f32 %v1065_v33, %v11586_v6  ;;  %v1074_v53 = vadd.f32 %v1066_v11, %v11589_v24  ;;  %v1075_v8 = vadd.f32 %v1067_v46, %v11592_v43  ;;  %v16035_v46 = vld [vmem:[#allocation61_spill] sm:$0xff] }
 0x140   : > { %v1076_v55 = vadd.f32 %v1068_v4, %v11599_v2  ;;  %1891 = vperm.xlu1 %8596, %v11803_v12   ;;  %v1077_v23 = vadd.f32 %v1069_v39, %v11602_v20  ;;  %v1078_v32 = vadd.f32 %v1070_v25, %v11605_v0  ;;  %v1079_v13 = vadd.f32 %v1071_v22, %v11608_v29  ;;  %v11810_v2 = vpop.permute.xlu0 %1739  ;;  %v11870_v25 = vld [vmem:[%s15802_s8 + $0x98] sm:$0xff] }
 0x141   : > { %v1080_v6 = vadd.f32 %v1072_v10, %v11627_v62  ;;  %v1118_v24 = vmax.f32 %v1073_v7, 0.0  ;;  %v1119_v45 = vmax.f32 %v1074_v53, 0.0  ;;  %v1120_v43 = vmax.f32 %v1075_v8, 0.0  ;;  %v11881_v7 = vld [vmem:[%s15802_s8 + $0xa8] sm:$0xff] }
 0x142   : > { %v1121_v37 = vmax.f32 %v1076_v55, 0.0  ;;  %v1122_v14 = vmax.f32 %v1077_v23, 0.0  ;;  %v1123_v5 = vmax.f32 %v1078_v32, 0.0  ;;  %v1124_v18 = vmax.f32 %v1079_v13, 0.0  ;;  %v11813_v36 = vpop.permute.xlu1 %1539  ;;  %v11892_v55 = vld [vmem:[%s15802_s8 + $0xb8] sm:$0xff]  ;;  %v11901_v32 = vld [vmem:[%s15802_s8 + $0xc8] sm:$0xff] }
 0x143   : > { %v1125_v54 = vmax.f32 %v1080_v6, 0.0  ;;  %2075 = vperm.xlu0 %8598, %v11582_v3   ;;  %1150 = vst.msk [vmem:[#allocation2 + $0x90] sm:$0xff] %vm347_vm0, %v1118_v24  ;;  %1151 = vst.msk [vmem:[#allocation2 + $0x98] sm:$0xff] %vm347_vm0, %v1119_v45  ;;  %v1086_v0 = vmul.f32 %v11617_v41, %v1084_v31  ;;  %v1087_v20 = vmul.f32 %v11622_v34, %v1084_v31  ;;  %v11910_v6 = vld [vmem:[%s15802_s8 + $0xd8] sm:$0xff] }
 0x144   : > { %1152 = vst.msk [vmem:[#allocation2 + $0xa0] sm:$0xff] %vm347_vm0, %v1120_v43  ;;  %1153 = vst.msk [vmem:[#allocation2 + $0xa8] sm:$0xff] %vm347_vm0, %v1121_v37  ;;  %v1088_v29 = vmul.f32 %v11635_v63, %v1084_v31  ;;  %v1089_v62 = vmul.f32 %v11640_v28, %v1084_v31  ;;  %1899 = vperm.xlu1 %8596, %v11826_v61   ;;  %v1090_v41 = vmul.f32 %v11645_v60, %v1084_v31  ;;  %v11848_v4 = vpop.permute.xlu0 %1747  ;;  %v11921_v43 = vld [vmem:[%s15802_s8 + $0xe8] sm:$0xff] }
 0x145   : > { %1154 = vst.msk [vmem:[#allocation2 + $0xb0] sm:$0xff] %vm347_vm0, %v1122_v14  ;;  %1155 = vst.msk [vmem:[#allocation2 + $0xb8] sm:$0xff] %vm347_vm0, %v1123_v5  ;;  %v1091_v34 = vmul.f32 %v11668_v51, %v1084_v31  ;;  %v1092_v63 = vmul.f32 %v11673_v16, %v1084_v31  ;;  %v1093_v28 = vmul.f32 %v11678_v1, %v1084_v31  ;;  %v11930_v14 = vld [vmem:[%s15802_s8 + $0xf8] sm:$0xff] }
 0x146   : > { %1156 = vst.msk [vmem:[#allocation2 + $0xc0] sm:$0xff] %vm347_vm0, %v1124_v18  ;;  %1157 = vst.msk [vmem:[#allocation2 + $0xc8] sm:$0xff] %vm347_vm0, %v1125_v54  ;;  %v1094_v56 = vadd.f32 %v1086_v0, %v11657_v58  ;;  %v1095_v15 = vadd.f32 %v1087_v20, %v11660_v19  ;;  %v1096_v50 = vadd.f32 %v1088_v29, %v11663_v44  ;;  %v11846_v16 = vpop.permute.xlu1 %1547  ;;  %v11853_v44 = vld [vmem:[%s15802_s8 + $0x88] sm:$0xff] }
 0x147   : > { %v1097_v42 = vadd.f32 %v1089_v62, %v11683_v59  ;;  %v1098_v33 = vadd.f32 %v1090_v41, %v11686_v49  ;;  %v1099_v11 = vadd.f32 %v1091_v34, %v11689_v57  ;;  %v1100_v60 = vadd.f32 %v1092_v63, %v11692_v27  ;;  %2083 = vperm.xlu0 %8598, %v16035_v46   ;;  %v11944_v0 = vld [vmem:[%s15802_s8 + $0x8] sm:$0xff]  ;;  %v16043_v62 = vld [vmem:[#allocation56_spill] sm:$0xff]  ;;  %v11959_v34 = vld [vmem:[%s15802_s8 + $0x20] sm:$0xff] }
 0x148   : > { %v1101_v51 = vadd.f32 %v1093_v28, %v11774_v48  ;;  %v1126_v1 = vmax.f32 %v1094_v56, 0.0  ;;  %v1127_v58 = vmax.f32 %v1095_v15, 0.0  ;;  %v1128_v31 = vmax.f32 %v1096_v50, 0.0  ;;  %16036 = vst [vmem:[#allocation61_spill] sm:$0xff] %v11848_v4  ;;  %1907 = vperm.xlu1 %8596, %v11853_v44   ;;  %v16037_v48 = vld [vmem:[#allocation64_spill] sm:$0xff]  ;;  %v11873_v22 = vpop.permute.xlu0 %1755 }
 0x149   : > { %v1129_v19 = vmax.f32 %v1097_v42, 0.0  ;;  %v1130_v59 = vmax.f32 %v1098_v33, 0.0  ;;  %v1131_v49 = vmax.f32 %v1099_v11, 0.0  ;;  %v1132_v57 = vmax.f32 %v1100_v60, 0.0  ;;  %v11970_v56 = vld [vmem:[%s15802_s8 + $0x30] sm:$0xff]  ;;  %v11981_v42 = vld [vmem:[%s15802_s8 + $0x40] sm:$0xff] }
 0x14a   : > { %v1133_v27 = vmax.f32 %v1101_v51, 0.0  ;;  %1158 = vst.msk [vmem:[#allocation2 + $0xd0] sm:$0xff] %vm347_vm0, %v1126_v1  ;;  %1159 = vst.msk [vmem:[#allocation2 + $0xd8] sm:$0xff] %vm347_vm0, %v1127_v58  ;;  %v11865_v39 = vpop.permute.xlu1 %1555  ;;  %v11990_v11 = vld [vmem:[%s15802_s8 + $0x50] sm:$0xff]  ;;  %v15849_v51 = vmov 6   ;;  %v12002_v58 = vld [vmem:[%s15802_s8 + $0x60] sm:$0xff] }
 0x14b   : > { %1160 = vst.msk [vmem:[#allocation2 + $0xe0] sm:$0xff] %vm347_vm0, %v1128_v31  ;;  %1161 = vst.msk [vmem:[#allocation2 + $0xe8] sm:$0xff] %vm347_vm0, %v1129_v19  ;;  %2091 = vperm.xlu0 %8598, %v16037_v48  }
 0x14c   : > { %1162 = vst.msk [vmem:[#allocation2 + $0xf0] sm:$0xff] %vm347_vm0, %v1130_v59  ;;  %1163 = vst.msk [vmem:[#allocation2 + $0xf8] sm:$0xff] %vm347_vm0, %v1131_v49  ;;  %1915 = vperm.xlu1 %8596, %v11870_v25   ;;  %v11887_v8 = vpop.permute.xlu0 %1763  ;;  %v16048_v59 = vld [vmem:[#allocation27_spill] sm:$0xff] }
 0x14d   : > { %1164 = vst.msk [vmem:[#allocation2 + $0x100] sm:$0xff] %vm347_vm0, %v1132_v57  ;;  %1165 = vst.msk [vmem:[#allocation2 + $0x108] sm:$0xff] %vm347_vm0, %v1133_v27  ;;  %v16049_v57 = vld [vmem:[#allocation31_spill] sm:$0xff] }
 0x14e   : > { %v11876_v10 = vpop.permute.xlu1 %1563  ;;  %16038 = vst [vmem:[#allocation64_spill] sm:$0xff] %v11887_v8  ;;  %v16060_v8 = vld [vmem:[#allocation37_spill] sm:$0xff] }
 0x14f   : > { %2099 = vperm.xlu0 %8598, %v11725_v26  }
 0x150   : > { %1923 = vperm.xlu1 %8596, %v11881_v7   ;;  %v11904_v13 = vpop.permute.xlu0 %1771 }
 0x151   : > { %16039 = vst [vmem:[#allocation65_spill] sm:$0xff] %v11904_v13 }
 0x152   : > { %v11885_v53 = vpop.permute.xlu1 %1571 }
 0x153   : > { %2107 = vperm.xlu0 %8598, %v11765_v35  }
 0x154   : > { %1931 = vperm.xlu1 %8596, %v11892_v55   ;;  %v11916_v45 = vpop.permute.xlu0 %1843 }
 0x155   : > { %16040 = vst [vmem:[#allocation66_spill] sm:$0xff] %v11916_v45  ;;  %v16058_v45 = vld [vmem:[#allocation33_spill] sm:$0xff] }
 0x156   : > { %v11896_v23 = vpop.permute.xlu1 %1579 }
 0x157   : > { %2115 = vperm.xlu0 %8598, %v11803_v12  }
 0x158   : > { %1939 = vperm.xlu1 %8596, %v11901_v32   ;;  %v11935_v18 = vpop.permute.xlu0 %1855 }
 0x159   : > { %16041 = vst [vmem:[#allocation67_spill] sm:$0xff] %v11935_v18  ;;  %v16056_v18 = vld [vmem:[#allocation29_spill] sm:$0xff] }
 0x15a   : > { %v11913_v24 = vpop.permute.xlu1 %1651 }
 0x15b   : > { %2123 = vperm.xlu0 %8598, %v11826_v61  }
 0x15c   : > { %1947 = vperm.xlu1 %8596, %v11910_v6   ;;  %v11948_v20 = vpop.permute.xlu0 %1863 }
 0x15d   : > { %16042 = vst [vmem:[#allocation68_spill] sm:$0xff] %v11948_v20 }
 0x15e   : > { %v11924_v37 = vpop.permute.xlu1 %1655 }
 0x15f   : > { %2131 = vperm.xlu0 %8598, %v11853_v44  }
 0x160   : > { %1955 = vperm.xlu1 %8596, %v11921_v43   ;;  %v11962_v63 = vpop.permute.xlu0 %1871 }
 0x161   : > { %16044 = vst [vmem:[#allocation56_spill] sm:$0xff] %v11962_v63 }
 0x162   : > { %v11933_v5 = vpop.permute.xlu1 %1663 }
 0x163   : > { %2139 = vperm.xlu0 %8598, %v11870_v25  }
 0x164   : > { %1963 = vperm.xlu1 %8596, %v11930_v14   ;;  %v11974_v15 = vpop.permute.xlu0 %1879 }
 0x165   : > { %16045 = vst [vmem:[#allocation69_spill] sm:$0xff] %v11974_v15  ;;  %v12036_v15 = vld [vmem:[%s15802_s8 + $0x70] sm:$0xff] }
 0x166   : > { %v11939_v54 = vpop.permute.xlu1 %1671 }
 0x167   : > { %2147 = vperm.xlu0 %8598, %v11881_v7  }
 0x168   : > { %8599 = vset.pattern.permute.xlu1 %v15847_v17  ;;  %v11993_v60 = vpop.permute.xlu0 %1887 }
 0x169   : > { %2067 = vperm.xlu1 %8599, %v11944_v0   ;;  %16046 = vst [vmem:[#allocation70_spill] sm:$0xff] %v11993_v60 }
 0x16a   : > { %v11950_v29 = vpop.permute.xlu1 %1679 }
 0x16b   : > { %2155 = vperm.xlu0 %8598, %v11892_v55  }
 0x16c   : > { %v12006_v31 = vpop.permute.xlu0 %1895 }
 0x16d   : > { %2071 = vperm.xlu1 %8599, %v16043_v62   ;;  %16047 = vst [vmem:[#allocation71_spill] sm:$0xff] %v12006_v31 }
 0x16e   : > { %v11954_v41 = vpop.permute.xlu1 %1687 }
 0x16f   : > { %2163 = vperm.xlu0 %8598, %v11901_v32  }
 0x170   : > { %v12015_v27 = vpop.permute.xlu0 %1903 }
 0x171   : > { %2079 = vperm.xlu1 %8599, %v11959_v34   ;;  %16050 = vst [vmem:[#allocation27_spill] sm:$0xff] %v12015_v27 }
 0x172   : > { %v11965_v28 = vpop.permute.xlu1 %1695 }
 0x173   : > { %2171 = vperm.xlu0 %8598, %v11910_v6  }
 0x174   : > { %v12022_v60 = vpop.permute.xlu0 %1911 }
 0x175   : > { %2087 = vperm.xlu1 %8599, %v11970_v56  }
 0x176   : > { %v11976_v50 = vpop.permute.xlu1 %1703 }
 0x177   : > { %2179 = vperm.xlu0 %8598, %v11921_v43  }
 0x178   : > { %v12031_v27 = vpop.permute.xlu0 %1919 }
 0x179   : > { %2095 = vperm.xlu1 %8599, %v11981_v42   ;;  %16057 = vst [vmem:[#allocation29_spill] sm:$0xff] %v12031_v27  ;;  %v16062_v27 = vld [vmem:[#allocation41_spill] sm:$0xff] }
 0x17a   : > { %v11985_v33 = vpop.permute.xlu1 %1711 }
 0x17b   : > { %2187 = vperm.xlu0 %8598, %v11930_v14  }
 0x17c   : > { %v12043_v20 = vpop.permute.xlu0 %1927 }
 0x17d   : > { %2103 = vperm.xlu1 %8599, %v11990_v11   ;;  %16059 = vst [vmem:[#allocation33_spill] sm:$0xff] %v12043_v20  ;;  %v16067_v20 = vmov 6  }
 0x17e   : > { %v11997_v1 = vpop.permute.xlu1 %1719 }
 0x17f   : > { %8601 = vset.pattern.permute.xlu0 %v15849_v51  ;;  %v16052_v51 = vld [vmem:[#allocation35_spill] sm:$0xff] }
 0x180   : > { %2259 = vperm.xlu0 %8601, %v11944_v0   ;;  %16053 = vst [vmem:[#allocation35_spill] sm:$0xff] %v12022_v60  ;;  %v12052_v4 = vpop.permute.xlu0 %1935 }
 0x181   : > { %2111 = vperm.xlu1 %8599, %v12002_v58   ;;  %16064 = vst [vmem:[#allocation72_spill] sm:$0xff] %v12052_v4 }
 0x182   : > { %v12008_v19 = vpop.permute.xlu1 %1727 }
 0x184   : > { %2271 = vperm.xlu0 %8601, %v11959_v34  }
 0x185   : > { %2119 = vperm.xlu1 %8599, %v16048_v59   ;;  %v16054_v59 = vld [vmem:[#allocation39_spill] sm:$0xff] }
 0x186   : > { %v12012_v49 = vpop.permute.xlu1 %1735 }
 0x188   : > { %2279 = vperm.xlu0 %8601, %v11970_v56  }
 0x189   : > { %2127 = vperm.xlu1 %8599, %v16049_v57  }
 0x18a   : > { %v12018_v17 = vpop.permute.xlu1 %1743 }
 0x18b   : > { %16051 = vst [vmem:[#allocation31_spill] sm:$0xff] %v12018_v17  ;;  %v16065_v17 = vld [vmem:[#allocation44_spill] sm:$0xff] }
 0x18c   : > { %2287 = vperm.xlu0 %8601, %v11981_v42  }
 0x18d   : > { %2135 = vperm.xlu1 %8599, %v16052_v51  }
 0x18e   : > { %v12024_v63 = vpop.permute.xlu1 %1751 }
 0x190   : > { %2295 = vperm.xlu0 %8601, %v11990_v11  }
 0x191   : > { %2143 = vperm.xlu1 %8599, %v16054_v59  }
 0x192   : > { %v12028_v31 = vpop.permute.xlu1 %1759 }
 0x193   : > { %16055 = vst [vmem:[#allocation39_spill] sm:$0xff] %v12028_v31 }
 0x194   : > { %2303 = vperm.xlu0 %8601, %v12002_v58  }
 0x195   : > { %2151 = vperm.xlu1 %8599, %v16056_v18  }
 0x196   : > { %v12039_v60 = vpop.permute.xlu1 %1767 }
 0x198   : > { %2311 = vperm.xlu0 %8601, %v12036_v15  }
 0x199   : > { %2159 = vperm.xlu1 %8599, %v16058_v45  }
 0x19c   : > { %2319 = vperm.xlu0 %8601, %v16049_v57   ;;  %v12061_v57 = vld [vmem:[%s15802_s8 + $0xb0] sm:$0xff] }
 0x19d   : > { %2167 = vperm.xlu1 %8599, %v16060_v8   ;;  %v12046_v18 = vpop.permute.xlu1 %1839 }
 0x19e   : > { %16061 = vst [vmem:[#allocation37_spill] sm:$0xff] %v12046_v18 }
 0x1a0   : > { %2327 = vperm.xlu0 %8601, %v16052_v51   ;;  %v12064_v51 = vpop.permute.xlu0 %1943 }
 0x1a1   : > { %2175 = vperm.xlu1 %8599, %v16062_v27   ;;  %v12050_v31 = vpop.permute.xlu1 %1847  ;;  %16066 = vst [vmem:[#allocation44_spill] sm:$0xff] %v12064_v51 }
 0x1a2   : > { %16063 = vst [vmem:[#allocation41_spill] sm:$0xff] %v12050_v31 }
 0x1a4   : > { %2335 = vperm.xlu0 %8601, %v16054_v59   ;;  %v12073_v4 = vpop.permute.xlu0 %1951 }
 0x1a5   : > { %2183 = vperm.xlu1 %8599, %v16065_v17   ;;  %v12056_v13 = vpop.permute.xlu1 %1851  ;;  %16068 = vst [vmem:[#allocation73_spill] sm:$0xff] %v12073_v4 }
 0x1a8   : > { %2343 = vperm.xlu0 %8601, %v12061_v57  }
 0x1a9   : > { %8600 = vset.pattern.permute.xlu1 %v16067_v20  ;;  %v12067_v18 = vpop.permute.xlu1 %1859  ;;  %v12081_v20 = vpop.permute.xlu0 %1959 }
 0x1aa   : > { %2255 = vperm.xlu1 %8600, %v11499_v21   ;;  %16070 = vst [vmem:[#allocation75_spill] sm:$0xff] %v12081_v20 }
 0x1ac   : > { %2351 = vperm.xlu0 %8601, %v16058_v45  }
 0x1ad   : > { %v12071_v59 = vpop.permute.xlu1 %1867 }
 0x1ae   : > { %2263 = vperm.xlu1 %8600, %v16043_v62  }
 0x1b0   : > { %2359 = vperm.xlu0 %8601, %v16060_v8   ;;  %v15851_v8 = vmov 7  }
 0x1b1   : > { %v12077_v31 = vpop.permute.xlu1 %1875 }
 0x1b2   : > { %16069 = vst [vmem:[#allocation74_spill] sm:$0xff] %v12077_v31  ;;  %2267 = vperm.xlu1 %8600, %v11582_v3  }
 0x1b4   : > { %2367 = vperm.xlu0 %8601, %v16062_v27  }
 0x1b5   : > { %v12083_v51 = vpop.permute.xlu1 %1883 }
 0x1b6   : > { %2275 = vperm.xlu1 %8600, %v16035_v46  }
 0x1b8   : > { %2375 = vperm.xlu0 %8601, %v16065_v17  }
 0x1ba   : > { %v12087_v45 = vpop.permute.xlu0 %2063  ;;  %2283 = vperm.xlu1 %8600, %v16037_v48  }
 0x1bb   : > { %16071 = vst [vmem:[#allocation76_spill] sm:$0xff] %v12087_v45  ;;  %v12090_v4 = vpop.permute.xlu1 %1891 }
 0x1bc   : > { %16072 = vst [vmem:[#allocation77_spill] sm:$0xff] %v12090_v4  ;;  %8602 = vset.pattern.permute.xlu0 %v15851_v8 }
 0x1bd   : > { %2447 = vperm.xlu0 %8602, %v11499_v21  }
 0x1be   : > { %v12094_v27 = vpop.permute.xlu0 %2075  ;;  %2291 = vperm.xlu1 %8600, %v11725_v26  }
 0x1bf   : > { %16073 = vst [vmem:[#allocation78_spill] sm:$0xff] %v12094_v27  ;;  %v12097_v20 = vpop.permute.xlu1 %1899 }
 0x1c1   : > { %2459 = vperm.xlu0 %8602, %v11582_v3  }
 0x1c2   : > { %v12100_v17 = vpop.permute.xlu0 %2083  ;;  %2299 = vperm.xlu1 %8600, %v11765_v35  }
 0x1c3   : > { %16074 = vst [vmem:[#allocation79_spill] sm:$0xff] %v12100_v17  ;;  %v12103_v45 = vpop.permute.xlu1 %1907 }
 0x1c4   : > { %16075 = vst [vmem:[#allocation80_spill] sm:$0xff] %v12103_v45 }
 0x1c5   : > { %2467 = vperm.xlu0 %8602, %v16035_v46  }
 0x1c6   : > { %v12106_v4 = vpop.permute.xlu0 %2091  ;;  %2307 = vperm.xlu1 %8600, %v11803_v12  }
 0x1c7   : > { %16076 = vst [vmem:[#allocation81_spill] sm:$0xff] %v12106_v4  ;;  %v12109_v8 = vpop.permute.xlu1 %1915 }
 0x1c8   : > { %16077 = vst [vmem:[#allocation82_spill] sm:$0xff] %v12109_v8 }
 0x1c9   : > { %2475 = vperm.xlu0 %8602, %v16037_v48  }
 0x1ca   : > { %v12112_v27 = vpop.permute.xlu0 %2099  ;;  %2315 = vperm.xlu1 %8600, %v11826_v61  }
 0x1cb   : > { %16078 = vst [vmem:[#allocation83_spill] sm:$0xff] %v12112_v27  ;;  %v12115_v31 = vpop.permute.xlu1 %1923 }
 0x1cc   : > { %16079 = vst [vmem:[#allocation84_spill] sm:$0xff] %v12115_v31 }
 0x1cd   : > { %2483 = vperm.xlu0 %8602, %v11725_v26  }
 0x1ce   : > { %v12118_v17 = vpop.permute.xlu0 %2107  ;;  %2323 = vperm.xlu1 %8600, %v11853_v44  }
 0x1cf   : > { %16080 = vst [vmem:[#allocation85_spill] sm:$0xff] %v12118_v17  ;;  %v12121_v45 = vpop.permute.xlu1 %1931 }
 0x1d0   : > { %16081 = vst [vmem:[#allocation86_spill] sm:$0xff] %v12121_v45 }
 0x1d1   : > { %2491 = vperm.xlu0 %8602, %v11765_v35  }
 0x1d2   : > { %v12124_v4 = vpop.permute.xlu0 %2115  ;;  %2331 = vperm.xlu1 %8600, %v11870_v25  }
 0x1d3   : > { %16082 = vst [vmem:[#allocation87_spill] sm:$0xff] %v12124_v4  ;;  %v12127_v8 = vpop.permute.xlu1 %1939 }
 0x1d4   : > { %16083 = vst [vmem:[#allocation88_spill] sm:$0xff] %v12127_v8 }
 0x1d5   : > { %2499 = vperm.xlu0 %8602, %v11803_v12  }
 0x1d6   : > { %v12130_v27 = vpop.permute.xlu0 %2123  ;;  %2339 = vperm.xlu1 %8600, %v11881_v7  }
 0x1d7   : > { %16084 = vst [vmem:[#allocation89_spill] sm:$0xff] %v12130_v27  ;;  %v12133_v31 = vpop.permute.xlu1 %1947 }
 0x1d8   : > { %16085 = vst [vmem:[#allocation90_spill] sm:$0xff] %v12133_v31 }
 0x1d9   : > { %2507 = vperm.xlu0 %8602, %v11826_v61  }
 0x1da   : > { %v12136_v17 = vpop.permute.xlu0 %2131  ;;  %2347 = vperm.xlu1 %8600, %v11892_v55  }
 0x1db   : > { %16086 = vst [vmem:[#allocation91_spill] sm:$0xff] %v12136_v17  ;;  %v12139_v45 = vpop.permute.xlu1 %1955 }
 0x1dc   : > { %16087 = vst [vmem:[#allocation92_spill] sm:$0xff] %v12139_v45 }
 0x1dd   : > { %2515 = vperm.xlu0 %8602, %v11853_v44  }
 0x1de   : > { %v12142_v4 = vpop.permute.xlu0 %2139  ;;  %2355 = vperm.xlu1 %8600, %v11901_v32  }
 0x1df   : > { %16088 = vst [vmem:[#allocation93_spill] sm:$0xff] %v12142_v4  ;;  %v12145_v8 = vpop.permute.xlu1 %1963 }
 0x1e0   : > { %16089 = vst [vmem:[#allocation94_spill] sm:$0xff] %v12145_v8 }
 0x1e1   : > { %2523 = vperm.xlu0 %8602, %v11870_v25  }
 0x1e2   : > { %v12148_v27 = vpop.permute.xlu0 %2147  ;;  %2363 = vperm.xlu1 %8600, %v11910_v6  }
 0x1e3   : > { %16090 = vst [vmem:[#allocation95_spill] sm:$0xff] %v12148_v27 }
 0x1e4   : > { %v12151_v31 = vpop.permute.xlu1 %2067 }
 0x1e5   : > { %16091 = vst [vmem:[#allocation96_spill] sm:$0xff] %v12151_v31  ;;  %2531 = vperm.xlu0 %8602, %v11881_v7   ;;  %v16097_v31 = vmov 7  }
 0x1e6   : > { %v12154_v17 = vpop.permute.xlu0 %2155  ;;  %2371 = vperm.xlu1 %8600, %v11921_v43  }
 0x1e7   : > { %16092 = vst [vmem:[#allocation97_spill] sm:$0xff] %v12154_v17 }
 0x1e8   : > { %v12157_v45 = vpop.permute.xlu1 %2071 }
 0x1e9   : > { %16093 = vst [vmem:[#allocation98_spill] sm:$0xff] %v12157_v45  ;;  %2539 = vperm.xlu0 %8602, %v11892_v55  }
 0x1ea   : > { %v12160_v4 = vpop.permute.xlu0 %2163  ;;  %2379 = vperm.xlu1 %8600, %v11930_v14  }
 0x1eb   : > { %16094 = vst [vmem:[#allocation99_spill] sm:$0xff] %v12160_v4 }
 0x1ec   : > { %v12163_v8 = vpop.permute.xlu1 %2079 }
 0x1ed   : > { %16095 = vst [vmem:[#allocation100_spill] sm:$0xff] %v12163_v8  ;;  %2547 = vperm.xlu0 %8602, %v11901_v32  }
 0x1ee   : > { %v12166_v27 = vpop.permute.xlu0 %2171  ;;  %8603 = vset.pattern.permute.xlu1 %v16097_v31 }
 0x1ef   : > { %16096 = vst [vmem:[#allocation101_spill] sm:$0xff] %v12166_v27  ;;  %2451 = vperm.xlu1 %8603, %v11944_v0  }
 0x1f0   : > { %v12170_v17 = vpop.permute.xlu1 %2087 }
 0x1f1   : > { %16098 = vst [vmem:[#allocation102_spill] sm:$0xff] %v12170_v17  ;;  %2555 = vperm.xlu0 %8602, %v11910_v6  }
 0x1f2   : > { %v12173_v45 = vpop.permute.xlu0 %2179 }
 0x1f3   : > { %16099 = vst [vmem:[#allocation103_spill] sm:$0xff] %v12173_v45  ;;  %2455 = vperm.xlu1 %8603, %v16043_v62   ;;  %v15853_v45 = vmov 8  }
 0x1f4   : > { %v12176_v4 = vpop.permute.xlu1 %2095 }
 0x1f5   : > { %16100 = vst [vmem:[#allocation104_spill] sm:$0xff] %v12176_v4  ;;  %2563 = vperm.xlu0 %8602, %v11921_v43  }
 0x1f6   : > { %v12179_v8 = vpop.permute.xlu0 %2187 }
 0x1f7   : > { %16101 = vst [vmem:[#allocation105_spill] sm:$0xff] %v12179_v8  ;;  %2463 = vperm.xlu1 %8603, %v11959_v34  }
 0x1f8   : > { %v12182_v27 = vpop.permute.xlu1 %2103 }
 0x1f9   : > { %16102 = vst [vmem:[#allocation106_spill] sm:$0xff] %v12182_v27  ;;  %2571 = vperm.xlu0 %8602, %v11930_v14  }
 0x1fb   : > { %v12185_v31 = vpop.permute.xlu0 %2259  ;;  %2471 = vperm.xlu1 %8603, %v11970_v56  }
 0x1fc   : > { %16103 = vst [vmem:[#allocation107_spill] sm:$0xff] %v12185_v31  ;;  %v12188_v17 = vpop.permute.xlu1 %2111 }
 0x1fd   : > { %16104 = vst [vmem:[#allocation108_spill] sm:$0xff] %v12188_v17  ;;  %8605 = vset.pattern.permute.xlu0 %v15853_v45 }
 0x1fe   : > { %2643 = vperm.xlu0 %8605, %v11944_v0  }
 0x1ff   : > { %v12192_v4 = vpop.permute.xlu0 %2271  ;;  %2479 = vperm.xlu1 %8603, %v11981_v42  }
 0x200   : > { %16105 = vst [vmem:[#allocation109_spill] sm:$0xff] %v12192_v4  ;;  %v12195_v8 = vpop.permute.xlu1 %2119 }
 0x202   : > { %2655 = vperm.xlu0 %8605, %v11959_v34  }
 0x203   : > { %v12198_v27 = vpop.permute.xlu0 %2279  ;;  %2487 = vperm.xlu1 %8603, %v11990_v11  }
 0x204   : > { %16106 = vst [vmem:[#allocation110_spill] sm:$0xff] %v12198_v27  ;;  %v12201_v31 = vpop.permute.xlu1 %2127 }
 0x205   : > { %16107 = vst [vmem:[#allocation111_spill] sm:$0xff] %v12201_v31 }
 0x206   : > { %2663 = vperm.xlu0 %8605, %v11970_v56   ;;  %v9716_v56 = vld [vmem:[%s15802_s8 + $0x80] sm:$0xff] }
 0x207   : > { %v12204_v17 = vpop.permute.xlu0 %2287  ;;  %2495 = vperm.xlu1 %8603, %v12002_v58  }
 0x208   : > { %16108 = vst [vmem:[#allocation112_spill] sm:$0xff] %v12204_v17  ;;  %v12207_v0 = vpop.permute.xlu1 %2135 }
 0x20a   : > { %2671 = vperm.xlu0 %8605, %v11981_v42  }
 0x20b   : > { %v12210_v45 = vpop.permute.xlu0 %2295  ;;  %2503 = vperm.xlu1 %8603, %v12036_v15  }
 0x20c   : > { %16109 = vst [vmem:[#allocation113_spill] sm:$0xff] %v12210_v45  ;;  %v12213_v34 = vpop.permute.xlu1 %2143  ;;  %v9717_v45 = vld [vmem:[%s15802_s8 + $0x90] sm:$0xff] }
 0x20d   : > { %16110 = vst [vmem:[#allocation114_spill] sm:$0xff] %v12213_v34 }
 0x20e   : > { %2679 = vperm.xlu0 %8605, %v11990_v11  }
 0x20f   : > { %v12216_v4 = vpop.permute.xlu0 %2303  ;;  %2511 = vperm.xlu1 %8603, %v9716_v56  }
 0x210   : > { %16111 = vst [vmem:[#allocation115_spill] sm:$0xff] %v12216_v4  ;;  %v12221_v17 = vpop.permute.xlu1 %2151  ;;  %v9718_v4 = vld [vmem:[%s15802_s8 + $0xa0] sm:$0xff] }
 0x212   : > { %2687 = vperm.xlu0 %8605, %v12002_v58  }
 0x213   : > { %v12224_v42 = vpop.permute.xlu0 %2311  ;;  %2519 = vperm.xlu1 %8603, %v9717_v45  }
 0x214   : > { %16112 = vst [vmem:[#allocation116_spill] sm:$0xff] %v12224_v42  ;;  %v12229_v27 = vpop.permute.xlu1 %2159 }
 0x215   : > { %16113 = vst [vmem:[#allocation117_spill] sm:$0xff] %v12229_v27 }
 0x216   : > { %2695 = vperm.xlu0 %8605, %v12036_v15   ;;  %v9719_v15 = vld [vmem:[%s15802_s8 + $0xc0] sm:$0xff] }
 0x217   : > { %v12232_v11 = vpop.permute.xlu0 %2319  ;;  %2527 = vperm.xlu1 %8603, %v9718_v4  }
 0x218   : > { %16114 = vst [vmem:[#allocation118_spill] sm:$0xff] %v12232_v11  ;;  %v12237_v34 = vpop.permute.xlu1 %2167 }
 0x21a   : > { %2703 = vperm.xlu0 %8605, %v9716_v56   ;;  %v9720_v56 = vld [vmem:[%s15802_s8 + $0xd0] sm:$0xff] }
 0x21b   : > { %v12239_v58 = vpop.permute.xlu0 %2327  ;;  %2535 = vperm.xlu1 %8603, %v12061_v57  }
 0x21c   : > { %16115 = vst [vmem:[#allocation119_spill] sm:$0xff] %v12239_v58  ;;  %v12242_v42 = vpop.permute.xlu1 %2175 }
 0x21d   : > { %16116 = vst [vmem:[#allocation120_spill] sm:$0xff] %v12242_v42 }
 0x21e   : > { %2711 = vperm.xlu0 %8605, %v9717_v45  }
 0x21f   : > { %v12244_v27 = vpop.permute.xlu0 %2335  ;;  %2543 = vperm.xlu1 %8603, %v9719_v15  }
 0x220   : > { %16117 = vst [vmem:[#allocation121_spill] sm:$0xff] %v12244_v27  ;;  %v12249_v11 = vpop.permute.xlu1 %2183  ;;  %v9721_v27 = vld [vmem:[%s15802_s8 + $0xe0] sm:$0xff] }
 0x221   : > { %16118 = vst [vmem:[#allocation122_spill] sm:$0xff] %v12249_v11 }
 0x222   : > { %2719 = vperm.xlu0 %8605, %v9718_v4  }
 0x223   : > { %v12251_v31 = vpop.permute.xlu0 %2343  ;;  %2551 = vperm.xlu1 %8603, %v9720_v56  }
 0x224   : > { %16119 = vst [vmem:[#allocation123_spill] sm:$0xff] %v12251_v31  ;;  %v9722_v31 = vld [vmem:[%s15802_s8 + $0xf0] sm:$0xff] }
 0x225   : > { %v12256_v58 = vpop.permute.xlu1 %2255 }
 0x226   : > { %16120 = vst [vmem:[#allocation124_spill] sm:$0xff] %v12256_v58  ;;  %2727 = vperm.xlu0 %8605, %v12061_v57  }
 0x227   : > { %v12259_v45 = vpop.permute.xlu0 %2351  ;;  %2559 = vperm.xlu1 %8603, %v9721_v27  }
 0x228   : > { %16121 = vst [vmem:[#allocation125_spill] sm:$0xff] %v12259_v45  ;;  %v16126_v45 = vmov 8  }
 0x229   : > { %v12264_v42 = vpop.permute.xlu1 %2263 }
 0x22a   : > { %16122 = vst [vmem:[#allocation126_spill] sm:$0xff] %v12264_v42  ;;  %2735 = vperm.xlu0 %8605, %v9719_v15  }
 0x22b   : > { %v12266_v4 = vpop.permute.xlu0 %2359  ;;  %2567 = vperm.xlu1 %8603, %v9722_v31  }
 0x22c   : > { %16123 = vst [vmem:[#allocation127_spill] sm:$0xff] %v12266_v4 }
 0x22d   : > { %v12271_v58 = vpop.permute.xlu1 %2267 }
 0x22e   : > { %16124 = vst [vmem:[#allocation128_spill] sm:$0xff] %v12271_v58  ;;  %2743 = vperm.xlu0 %8605, %v9720_v56   ;;  %v12611_v58 = vld [vmem:[#allocation2 + $0x27] sm:$0xff] }
 0x22f   : > { %v12273_v57 = vpop.permute.xlu0 %2367  ;;  %8604 = vset.pattern.permute.xlu1 %v16126_v45 }
 0x230   : > { %16125 = vst [vmem:[#allocation129_spill] sm:$0xff] %v12273_v57  ;;  %2639 = vperm.xlu1 %8604, %v11499_v21   ;;  %v16132_v57 = vmov 0  }
 0x231   : > { %v12277_v11 = vpop.permute.xlu1 %2275 }
 0x232   : > { %16127 = vst [vmem:[#allocation130_spill] sm:$0xff] %v12277_v11  ;;  %2751 = vperm.xlu0 %8605, %v9721_v27  }
 0x233   : > { %v12279_v15 = vpop.permute.xlu0 %2375 }
 0x234   : > { %16128 = vst [vmem:[#allocation131_spill] sm:$0xff] %v12279_v15  ;;  %2647 = vperm.xlu1 %8604, %v16043_v62  }
 0x235   : > { %v12282_v4 = vpop.permute.xlu1 %2283 }
 0x236   : > { %16129 = vst [vmem:[#allocation132_spill] sm:$0xff] %v12282_v4  ;;  %2759 = vperm.xlu0 %8605, %v9722_v31  }
 0x238   : > { %v12284_v42 = vpop.permute.xlu0 %2447  ;;  %2651 = vperm.xlu1 %8604, %v11582_v3  }
 0x239   : > { %16130 = vst [vmem:[#allocation133_spill] sm:$0xff] %v12284_v42  ;;  %v12287_v56 = vpop.permute.xlu1 %2291 }
 0x23a   : > { %16131 = vst [vmem:[#allocation134_spill] sm:$0xff] %v12287_v56  ;;  %8606 = vset.pattern.permute.xlu0 %v16132_v57  ;;  %v1436_v56 = vld [vmem:[#allocation2 + $0x78] sm:$0xff] }
 0x23b   : > { %1232 = vperm.xlu0 %8606, %v11499_v21  }
 0x23c   : > { %v12291_v45 = vpop.permute.xlu0 %2459  ;;  %2659 = vperm.xlu1 %8604, %v16035_v46  }
 0x23d   : > { %16133 = vst [vmem:[#allocation135_spill] sm:$0xff] %v12291_v45  ;;  %v12294_v27 = vpop.permute.xlu1 %2299 }
 0x23e   : > { %16134 = vst [vmem:[#allocation136_spill] sm:$0xff] %v12294_v27  ;;  %v12600_v27 = vld [vmem:[#allocation2 + $0x101] sm:$0xff] }
 0x23f   : > { %1247 = vperm.xlu0 %8606, %v11582_v3  }
 0x240   : > { %v12297_v62 = vpop.permute.xlu0 %2467  ;;  %2667 = vperm.xlu1 %8604, %v16037_v48  }
 0x241   : > { %16135 = vst [vmem:[#allocation137_spill] sm:$0xff] %v12297_v62  ;;  %v12300_v31 = vpop.permute.xlu1 %2307 }
 0x242   : > { %16136 = vst [vmem:[#allocation138_spill] sm:$0xff] %v12300_v31  ;;  %v1433_v31 = vld [vmem:[#allocation2 + $0x60] sm:$0xff] }
 0x243   : > { %1257 = vperm.xlu0 %8606, %v16035_v46  }
 0x244   : > { %v12303_v42 = vpop.permute.xlu0 %2475  ;;  %2675 = vperm.xlu1 %8604, %v11725_v26  }
 0x245   : > { %16137 = vst [vmem:[#allocation139_spill] sm:$0xff] %v12303_v42  ;;  %v12306_v21 = vpop.permute.xlu1 %2315 }
 0x246   : > { %16138 = vst [vmem:[#allocation140_spill] sm:$0xff] %v12306_v21 }
 0x247   : > { %1267 = vperm.xlu0 %8606, %v16037_v48  }
 0x248   : > { %v12309_v45 = vpop.permute.xlu0 %2483  ;;  %2683 = vperm.xlu1 %8604, %v11765_v35  }
 0x249   : > { %16139 = vst [vmem:[#allocation141_spill] sm:$0xff] %v12309_v45  ;;  %v12312_v3 = vpop.permute.xlu1 %2323 }
 0x24a   : > { %16140 = vst [vmem:[#allocation142_spill] sm:$0xff] %v12312_v3 }
 0x24b   : > { %1277 = vperm.xlu0 %8606, %v11725_v26  }
 0x24c   : > { %v12315_v62 = vpop.permute.xlu0 %2491  ;;  %2691 = vperm.xlu1 %8604, %v11803_v12  }
 0x24d   : > { %16141 = vst [vmem:[#allocation143_spill] sm:$0xff] %v12315_v62  ;;  %v12318_v46 = vpop.permute.xlu1 %2331 }
 0x24e   : > { %16142 = vst [vmem:[#allocation144_spill] sm:$0xff] %v12318_v46 }
 0x24f   : > { %1287 = vperm.xlu0 %8606, %v11765_v35   ;;  %v9582_v35 = vld [vmem:[%s15798_s4 + $0x88] sm:$0xff]  }
 0x250   : > { %v12321_v42 = vpop.permute.xlu0 %2499  ;;  %2699 = vperm.xlu1 %8604, %v11826_v61   ;;  %8392 = vmatprep.subr.bf16.mxu1 %v9582_v35 }
 0x251   : > { %16143 = vst [vmem:[#allocation145_spill] sm:$0xff] %v12321_v42  ;;  %v12324_v48 = vpop.permute.xlu1 %2339  ;;  %8393 = vmatpush3.bf16.msra.mxu1 %v9582_v35 }
 0x252   : > { %16144 = vst [vmem:[#allocation146_spill] sm:$0xff] %v12324_v48  ;;  %v1422_v48 = vld [vmem:[#allocation2 + $0x8] sm:$0xff] }
 0x253   : > { %1297 = vperm.xlu0 %8606, %v11803_v12   ;;  %v9583_v12 = vld [vmem:[%s15798_s4 + $0x80] sm:$0xff]  }
 0x254   : > { %v12327_v45 = vpop.permute.xlu0 %2507  ;;  %2707 = vperm.xlu1 %8604, %v11853_v44   ;;  %8394 = vmatprep.subr.bf16.mxu1 %v9583_v12 }
 0x255   : > { %16145 = vst [vmem:[#allocation147_spill] sm:$0xff] %v12327_v45  ;;  %v12330_v26 = vpop.permute.xlu1 %2347  ;;  %8395 = vmatpush3.bf16.msra.mxu1 %v9583_v12 }
 0x256   : > { %16146 = vst [vmem:[#allocation148_spill] sm:$0xff] %v12330_v26 }
 0x257   : > { %1307 = vperm.xlu0 %8606, %v11826_v61  }
 0x258   : > { %v12336_v62 = vpop.permute.xlu0 %2515  ;;  %2715 = vperm.xlu1 %8604, %v11870_v25  }
 0x259   : > { %16147 = vst [vmem:[#allocation149_spill] sm:$0xff] %v12336_v62  ;;  %v12339_v42 = vpop.permute.xlu1 %2355 }
 0x25a   : > { %16148 = vst [vmem:[#allocation150_spill] sm:$0xff] %v12339_v42 }
 0x25b   : > { %1317 = vperm.xlu0 %8606, %v11853_v44  }
 0x25c   : > { %v12345_v45 = vpop.permute.xlu0 %2523  ;;  %2723 = vperm.xlu1 %8604, %v11881_v7  }
 0x25d   : > { %16149 = vst [vmem:[#allocation151_spill] sm:$0xff] %v12345_v45  ;;  %v12348_v61 = vpop.permute.xlu1 %2363 }
 0x25e   : > { %16150 = vst [vmem:[#allocation152_spill] sm:$0xff] %v12348_v61  ;;  %v16162_v61 = vld [vmem:[#allocation57_spill] sm:$0xff] }
 0x25f   : > { %1327 = vperm.xlu0 %8606, %v11870_v25  }
 0x260   : > { %v12351_v62 = vpop.permute.xlu0 %2531  ;;  %2731 = vperm.xlu1 %8604, %v11892_v55  }
 0x261   : > { %16151 = vst [vmem:[#allocation153_spill] sm:$0xff] %v12351_v62  ;;  %v12354_v35 = vpop.permute.xlu1 %2371  ;;  %v1425_v62 = vld [vmem:[#allocation2 + $0x20] sm:$0xff] }
 0x262   : > { %16152 = vst [vmem:[#allocation154_spill] sm:$0xff] %v12354_v35 }
 0x263   : > { %1337 = vperm.xlu0 %8606, %v11881_v7   ;;  %v1424_v7 = vld [vmem:[#allocation2 + $0x18] sm:$0xff] }
 0x264   : > { %v12357_v44 = vpop.permute.xlu0 %2539  ;;  %2739 = vperm.xlu1 %8604, %v11901_v32  }
 0x265   : > { %16153 = vst [vmem:[#allocation155_spill] sm:$0xff] %v12357_v44  ;;  %v12360_v45 = vpop.permute.xlu1 %2379  ;;  %v16158_v44 = vld [vmem:[#allocation52_spill] sm:$0xff] }
 0x266   : > { %16154 = vst [vmem:[#allocation156_spill] sm:$0xff] %v12360_v45  ;;  %v1585_v35 = vmul.f32 %v16158_v44, %v1425_v62  ;;  %v1423_v62 = vld [vmem:[#allocation2 + $0x10] sm:$0xff]  ;;  %v16164_v44 = vld [vmem:[#allocation19_spill] sm:$0xff] }
 0x267   : > { %1347 = vperm.xlu0 %8606, %v11892_v55   ;;  %v16160_v55 = vld [vmem:[#allocation50_spill] sm:$0xff] }
 0x268   : > { %v12363_v42 = vpop.permute.xlu0 %2547  ;;  %2747 = vperm.xlu1 %8604, %v11910_v6  }
 0x269   : > { %16155 = vst [vmem:[#allocation157_spill] sm:$0xff] %v12363_v42  ;;  %v1584_v42 = vmul.f32 %v16160_v55, %v1424_v7  ;;  %v16166_v7 = vld [vmem:[#allocation48_spill] sm:$0xff] }
 0x26a   : > { %v12366_v25 = vpop.permute.xlu1 %2451  ;;  %v1582_v55 = vmul.f32 %v16166_v7, %v1422_v48 }
 0x26b   : > { %16156 = vst [vmem:[#allocation158_spill] sm:$0xff] %v12366_v25  ;;  %1357 = vperm.xlu0 %8606, %v11901_v32   ;;  %v1428_v25 = vld [vmem:[#allocation2 + $0x38] sm:$0xff]  ;;  %v1429_v32 = vld [vmem:[#allocation2 + $0x40] sm:$0xff] }
 0x26c   : > { %v12369_v12 = vpop.permute.xlu0 %2555  ;;  %2755 = vperm.xlu1 %8604, %v11921_v43   ;;  %v1589_v3 = vmul.f32 %v16162_v61, %v1429_v32  ;;  %v16167_v61 = vld [vmem:[#allocation62_spill] sm:$0xff] }
 0x26d   : > { %16157 = vst [vmem:[#allocation159_spill] sm:$0xff] %v12369_v12  ;;  %v8612_v12 = vpack.i.bf16 %v1585_v35, %v1584_v42  ;;  %v1593_v35 = vmul.f32 %v16167_v61, %v1433_v31 }
 0x26e   : > { %v12373_v15 = vpop.permute.xlu1 %2455 }
 0x26f   : > { %16159 = vst [vmem:[#allocation52_spill] sm:$0xff] %v12373_v15  ;;  %1367 = vperm.xlu0 %8606, %v11910_v6   ;;  %v1588_v15 = vmul.f32 %v16164_v44, %v1428_v25  ;;  %v1426_v25 = vld [vmem:[#allocation2 + $0x28] sm:$0xff]  ;;  %v1427_v44 = vld [vmem:[#allocation2 + $0x30] sm:$0xff] }
 0x270   : > { %v12377_v45 = vpop.permute.xlu0 %2563  ;;  %2763 = vperm.xlu1 %8604, %v11930_v14  }
 0x271   : > { %16161 = vst [vmem:[#allocation50_spill] sm:$0xff] %v12377_v45  ;;  %v1432_v45 = vld [vmem:[#allocation2 + $0x58] sm:$0xff]  ;;  %v8622_v42 = vpack.i.bf16 %v1589_v3, %v1588_v15 }
 0x272   : > { %v12381_v26 = vpop.permute.xlu1 %2463 }
 0x273   : > { %16163 = vst [vmem:[#allocation57_spill] sm:$0xff] %v12381_v26  ;;  %1377 = vperm.xlu0 %8606, %v11921_v43   ;;  %v16169_v43 = vld [vmem:[#allocation15_spill] sm:$0xff] }
 0x274   : > { %v12385_v6 = vpop.permute.xlu0 %2571  ;;  %8613 = vrot.lane.b32.xlu1 %v8612_v12, %s9891_s27  ;;  %v1583_v26 = vmul.f32 %v16169_v43, %v1423_v62  ;;  %v16171_v12 = vld [vmem:[#allocation54_spill] sm:$0xff]  ;;  %v16173_v62 = vld [vmem:[#allocation17_spill] sm:$0xff]  ;;  %v1430_v43 = vld [vmem:[#allocation2 + $0x48] sm:$0xff] }
 0x275   : > { %16165 = vst [vmem:[#allocation19_spill] sm:$0xff] %v12385_v6  ;;  %9087 = vset.pattern.permute.xlu1 %v16132_v57  ;;  %v16170_v6 = vld [vmem:[#allocation8_spill] sm:$0xff]  ;;  %v1587_v7 = vmul.f32 %v16171_v12, %v1427_v44  ;;  %v1437_v57 = vld [vmem:[#allocation2 + $0x80] sm:$0xff]  ;;  %v1440_v12 = vld [vmem:[#allocation2 + $0x98] sm:$0xff] }
 0x276   : > { %v12391_v32 = vpop.permute.xlu1 %2471  ;;  %v1592_v46 = vmul.f32 %v16170_v6, %v1432_v45  ;;  %v8607_v48 = vpack.i.bf16 %v1583_v26, %v1582_v55  ;;  %v1597_v3 = vmul.f32 %v11740_v38, %v1437_v57  ;;  %v1431_v45 = vld [vmem:[#allocation2 + $0x50] sm:$0xff]  ;;  %v16174_v6 = vld [vmem:[#allocation10_spill] sm:$0xff]  ;;  %v16175_v55 = vld [vmem:[#allocation59_spill] sm:$0xff] }
 0x277   : > { %16168 = vst [vmem:[#allocation48_spill] sm:$0xff] %v12391_v32  ;;  %1387 = vperm.xlu0 %8606, %v11930_v14   ;;  %v1586_v14 = vmul.f32 %v16173_v62, %v1426_v25  ;;  %v1591_v44 = vmul.f32 %v16175_v55, %v1431_v45  ;;  %v1441_v32 = vld [vmem:[#allocation2 + $0xa0] sm:$0xff]  ;;  %v16177_v25 = vld [vmem:[#allocation7_spill] sm:$0xff] }
 0x278   : > { %8623 = vrot.lane.b32.xlu1 %v8622_v42, %s9891_s27  ;;  %v8632_v31 = vpack.i.bf16 %v1593_v35, %v1592_v46  ;;  %v1596_v42 = vmul.f32 %v16174_v6, %v1436_v56  ;;  %v1601_v35 = vmul.f32 %v11794_v52, %v1441_v32  ;;  %v1434_v62 = vld [vmem:[#allocation2 + $0x68] sm:$0xff]  ;;  %v1435_v56 = vld [vmem:[#allocation2 + $0x70] sm:$0xff]  ;;  %v1445_v55 = vld [vmem:[#allocation2 + $0xc0] sm:$0xff] }
 0x279   : > { %v12398_v15 = vpop.permute.xlu0 %2643  ;;  %v8617_v26 = vpack.i.bf16 %v1587_v7, %v1586_v14  ;;  %v16178_v6 = vld [vmem:[#allocation12_spill] sm:$0xff]  ;;  %v1444_v7 = vld [vmem:[#allocation2 + $0xb8] sm:$0xff]  ;;  %v1595_v45 = vmul.f32 %v11714_v30, %v1435_v56  ;;  %v1605_v32 = vmul.f32 %v11846_v16, %v1445_v55  ;;  %v1449_v56 = vld [vmem:[#allocation2 + $0xe0] sm:$0xff] }
 0x27a   : > { %v12401_v61 = vpop.permute.xlu1 %2479  ;;  %v8642_v38 = vpack.i.bf16 %v1597_v3, %v1596_v42 }
 0x27b   : > { %16172 = vst [vmem:[#allocation62_spill] sm:$0xff] %v12401_v61  ;;  %8608 = vrot.lane.b32.xlu0 %v8607_v48, %s9891_s27  ;;  %v1590_v48 = vmul.f32 %v16177_v25, %v1430_v43  ;;  %v16180_v43 = vld [vmem:[#allocation9_spill] sm:$0xff]  ;;  %v16181_v25 = vld [vmem:[#allocation14_spill] sm:$0xff] }
 0x27c   : > { %8633 = vrot.lane.b32.xlu1 %v8632_v31, %s9891_s27  ;;  %v1600_v31 = vmul.f32 %v16178_v6, %v1440_v12  ;;  %v1604_v12 = vmul.f32 %v16181_v25, %v1444_v7  ;;  %v1438_v6 = vld [vmem:[#allocation2 + $0x88] sm:$0xff]  ;;  %v16184_v7 = vld [vmem:[#allocation34_spill] sm:$0xff] }
 0x27d   : > { %v12408_v46 = vpop.permute.xlu0 %2655  ;;  %v8627_v14 = vpack.i.bf16 %v1591_v44, %v1590_v48  ;;  %v1448_v44 = vld [vmem:[#allocation2 + $0xd8] sm:$0xff]  ;;  %v1442_v25 = vld [vmem:[#allocation2 + $0xa8] sm:$0xff] }
 0x27e   : > { %v12411_v57 = vpop.permute.xlu1 %2487  ;;  %v8652_v52 = vpack.i.bf16 %v1601_v35, %v1600_v31  ;;  %v8662_v16 = vpack.i.bf16 %v1605_v32, %v1604_v12  ;;  %v1609_v31 = vmul.f32 %v11876_v10, %v1449_v56  ;;  %v16186_v56 = vld [vmem:[#allocation13_spill] sm:$0xff] }
 0x27f   : > { %16176 = vst [vmem:[#allocation15_spill] sm:$0xff] %v12411_v57  ;;  %8618 = vrot.lane.b32.xlu0 %v8617_v26, %s9891_s27  ;;  %v1594_v26 = vmul.f32 %v16180_v43, %v1434_v62  ;;  %v16183_v62 = vld [vmem:[#allocation11_spill] sm:$0xff]  ;;  %v1608_v43 = vmul.f32 %v16184_v7, %v1448_v44 }
 0x280   : > { %8643 = vrot.lane.b32.xlu1 %v8642_v38, %s9891_s27  ;;  %v1439_v38 = vld [vmem:[#allocation2 + $0x90] sm:$0xff]  ;;  %v1446_v44 = vld [vmem:[#allocation2 + $0xc8] sm:$0xff] }
 0x281   : > { %v12418_v3 = vpop.permute.xlu0 %2663  ;;  %v8637_v30 = vpack.i.bf16 %v1595_v45, %v1594_v26  ;;  %v1599_v48 = vmul.f32 %v11768_v40, %v1439_v38  ;;  %v1453_v26 = vld [vmem:[#allocation2 + $0x100] sm:$0xff]  ;;  %v8672_v32 = vpack.i.bf16 %v1609_v31, %v1608_v43 }
 0x282   : > { %v12421_v42 = vpop.permute.xlu1 %2495  ;;  %v1613_v10 = vmul.f32 %v11896_v23, %v1453_v26 }
 0x283   : > { %16179 = vst [vmem:[#allocation8_spill] sm:$0xff] %v12421_v42  ;;  %8628 = vrot.lane.b32.xlu0 %v8627_v14, %s9891_s27  ;;  %v1598_v14 = vmul.f32 %v16183_v62, %v1438_v6  ;;  %v1452_v6 = vld [vmem:[#allocation2 + $0xf8] sm:$0xff]  ;;  %v16187_v62 = vld [vmem:[#allocation42_spill] sm:$0xff] }
 0x284   : > { %8653 = vrot.lane.b32.xlu1 %v8652_v52, %s9891_s27  ;;  %v1443_v52 = vld [vmem:[#allocation2 + $0xb0] sm:$0xff]  ;;  %v1612_v7 = vmul.f32 %v16187_v62, %v1452_v6  ;;  %v16190_v6 = vld [vmem:[#allocation47_spill] sm:$0xff] }
 0x285   : > { %v12428_v35 = vpop.permute.xlu0 %2671  ;;  %v8647_v45 = vpack.i.bf16 %v1599_v48, %v1598_v14  ;;  %v1603_v40 = vmul.f32 %v11813_v36, %v1443_v52  ;;  %v12447_v36 = vld [vmem:[#allocation2 + $0x21] sm:$0xff]  ;;  %v12450_v14 = vld [vmem:[#allocation2 + $0x19] sm:$0xff]  ;;  %16210 = vst [vmem:[#allocation47_spill] sm:$0xff] %v12600_v27 }
 0x286   : > { %v12431_v55 = vpop.permute.xlu1 %2503  ;;  %v8682_v43 = vpack.i.bf16 %v1613_v10, %v1612_v7  ;;  %v12464_v10 = vld [vmem:[#allocation2 + $0x39] sm:$0xff]  ;;  %v12514_v42 = vld [vmem:[#allocation2 + $0x81] sm:$0xff] }
 0x287   : > { %16182 = vst [vmem:[#allocation54_spill] sm:$0xff] %v12431_v55  ;;  %8638 = vrot.lane.b32.xlu0 %v8637_v30, %s9891_s27  ;;  %v1602_v30 = vmul.f32 %v16186_v56, %v1442_v25  ;;  %v1776_v25 = vmul.f32 %v11924_v37, %v12450_v14  ;;  %v1451_v56 = vld [vmem:[#allocation2 + $0xf0] sm:$0xff] }
 0x288   : > { %8663 = vrot.lane.b32.xlu1 %v8662_v16, %s9891_s27  ;;  %v1447_v16 = vld [vmem:[#allocation2 + $0xd0] sm:$0xff] }
 0x289   : > { %v12438_v38 = vpop.permute.xlu0 %2679  ;;  %v8657_v48 = vpack.i.bf16 %v1603_v40, %v1602_v30  ;;  %v1607_v31 = vmul.f32 %v11865_v39, %v1447_v16  ;;  %v1777_v40 = vmul.f32 %v16190_v6, %v12447_v36  ;;  %v1611_v30 = vmul.f32 %v11885_v53, %v1451_v56  ;;  %v16192_v16 = vld [vmem:[#allocation38_spill] sm:$0xff] }
 0x28a   : > { %v12441_v12 = vpop.permute.xlu1 %2511  ;;  %v12483_v6 = vld [vmem:[#allocation2 + $0x59] sm:$0xff]  ;;  %16213 = vst [vmem:[#allocation38_spill] sm:$0xff] %v12611_v58 }
 0x28b   : > { %16185 = vst [vmem:[#allocation17_spill] sm:$0xff] %v12441_v12  ;;  %8648 = vrot.lane.b32.xlu0 %v8647_v45, %s9891_s27  ;;  %v16189_v45 = vld [vmem:[#allocation30_spill] sm:$0xff]  ;;  %v8692_v37 = vpack.i.bf16 %v1777_v40, %v1776_v25  ;;  %v1784_v56 = vmul.f32 %v11954_v41, %v12483_v6 }
 0x28c   : > { %8673 = vrot.lane.b32.xlu1 %v8672_v32, %s9891_s27  ;;  %v1606_v26 = vmul.f32 %v16189_v45, %v1446_v44  ;;  %v1450_v32 = vld [vmem:[#allocation2 + $0xe8] sm:$0xff]  ;;  %v1780_v44 = vmul.f32 %v11939_v54, %v12464_v10 }
 0x28d   : > { %v12452_v23 = vpop.permute.xlu0 %2687  ;;  %v12473_v45 = vld [vmem:[#allocation2 + $0x41] sm:$0xff] }
 0x28e   : > { %v12456_v52 = vpop.permute.xlu1 %2519  ;;  %v8667_v39 = vpack.i.bf16 %v1607_v31, %v1606_v26  ;;  %v16193_v31 = vld [vmem:[#allocation51_spill] sm:$0xff]  ;;  %v12478_v26 = vld [vmem:[#allocation2 + $0x11] sm:$0xff] }
 0x28f   : > { %16188 = vst [vmem:[#allocation10_spill] sm:$0xff] %v12456_v52  ;;  %8658 = vrot.lane.b32.xlu0 %v8657_v48, %s9891_s27  ;;  %v1610_v48 = vmul.f32 %v16192_v16, %v1450_v32  ;;  %v1781_v53 = vmul.f32 %v16193_v31, %v12473_v45  ;;  %v1775_v54 = vmul.f32 %v11913_v24, %v12478_v26  ;;  %v16195_v16 = vld [vmem:[#allocation45_spill] sm:$0xff]  ;;  %v16196_v24 = vld [vmem:[#allocation55_spill] sm:$0xff] }
 0x290   : > { %8683 = vrot.lane.b32.xlu1 %v8682_v43, %s9891_s27  ;;  %v1614_v43 = vld [vmem:[#allocation2 + $0x9] sm:$0xff] }
 0x291   : > { %v12466_v62 = vpop.permute.xlu0 %2695  ;;  %v8677_v25 = vpack.i.bf16 %v1611_v30, %v1610_v48  ;;  %v8702_v40 = vpack.i.bf16 %v1781_v53, %v1780_v44  ;;  %v1774_v31 = vmul.f32 %v16195_v16, %v1614_v43  ;;  %v12495_v30 = vld [vmem:[#allocation2 + $0x31] sm:$0xff]  ;;  %v12499_v48 = vld [vmem:[#allocation2 + $0x29] sm:$0xff]  ;;  %v12504_v53 = vld [vmem:[#allocation2 + $0x79] sm:$0xff] }
 0x292   : > { %v12470_v7 = vpop.permute.xlu1 %2527  ;;  %v1778_v41 = vmul.f32 %v11933_v5, %v12499_v48 }
 0x293   : > { %16191 = vst [vmem:[#allocation59_spill] sm:$0xff] %v12470_v7  ;;  %8668 = vrot.lane.b32.xlu0 %v8667_v39, %s9891_s27  ;;  %v12492_v7 = vld [vmem:[#allocation2 + $0x61] sm:$0xff]  ;;  %v8687_v44 = vpack.i.bf16 %v1775_v54, %v1774_v31  ;;  %v16199_v54 = vld [vmem:[#allocation60_spill] sm:$0xff]  ;;  %v12524_v31 = vld [vmem:[#allocation2 + $0x99] sm:$0xff] }
 0x294   : > { %8693 = vrot.lane.b32.xlu1 %v8692_v37, %s9892_s28  ;;  %v1785_v37 = vmul.f32 %v16196_v24, %v12492_v7  ;;  %v16198_v24 = vld [vmem:[#allocation49_spill] sm:$0xff]  ;;  %v1789_v5 = vmul.f32 %v16199_v54, %v12514_v42 }
 0x295   : > { %v12485_v32 = vpop.permute.xlu0 %2703  ;;  %v16201_v54 = vld [vmem:[#allocation53_spill] sm:$0xff] }
 0x296   : > { %v12489_v39 = vpop.permute.xlu1 %2535  ;;  %v8712_v16 = vpack.i.bf16 %v1785_v37, %v1784_v56 }
 0x297   : > { %16194 = vst [vmem:[#allocation7_spill] sm:$0xff] %v12489_v39  ;;  %8678 = vrot.lane.b32.xlu0 %v8677_v25, %s9891_s27  ;;  %v1788_v25 = vmul.f32 %v11976_v50, %v12504_v53  ;;  %v1779_v39 = vmul.f32 %v16198_v24, %v12495_v30  ;;  %v12528_v24 = vld [vmem:[#allocation2 + $0x51] sm:$0xff] }
 0x298   : > { %8703 = vrot.lane.b32.xlu1 %v8702_v40, %s9892_s28  ;;  %v12519_v40 = vld [vmem:[#allocation2 + $0x49] sm:$0xff]  ;;  %v1783_v61 = vmul.f32 %v16201_v54, %v12528_v24  ;;  %v12550_v54 = vld [vmem:[#allocation2 + $0x71] sm:$0xff] }
 0x299   : > { %v12506_v43 = vpop.permute.xlu0 %2711  ;;  %v8697_v56 = vpack.i.bf16 %v1779_v39, %v1778_v41  ;;  %v1782_v50 = vmul.f32 %v11950_v29, %v12519_v40  ;;  %v12541_v39 = vld [vmem:[#allocation2 + $0x69] sm:$0xff] }
 0x29a   : > { %v12510_v12 = vpop.permute.xlu1 %2543 }
 0x29b   : > { %16197 = vst [vmem:[#allocation12_spill] sm:$0xff] %v12510_v12  ;;  %8688 = vrot.lane.b32.xlu0 %v8687_v44, %s9892_s28  ;;  %v8722_v12 = vpack.i.bf16 %v1789_v5, %v1788_v25  ;;  %v1792_v44 = vmul.f32 %v11997_v1, %v12524_v31  ;;  %v8707_v41 = vpack.i.bf16 %v1783_v61, %v1782_v50  ;;  %v12546_v25 = vld [vmem:[#allocation2 + $0xb9] sm:$0xff]  ;;  %v12563_v61 = vld [vmem:[#allocation2 + $0x89] sm:$0xff] }
 0x29c   : > { %8713 = vrot.lane.b32.xlu1 %v8712_v16, %s9892_s28  ;;  %v12536_v16 = vld [vmem:[#allocation2 + $0xa1] sm:$0xff]  ;;  %v1786_v1 = vmul.f32 %v11965_v28, %v12541_v39  ;;  %16202 = vst [vmem:[#allocation14_spill] sm:$0xff] %v12546_v25 }
 0x29d   : > { %v12526_v37 = vpop.permute.xlu0 %2719  ;;  %v1793_v29 = vmul.f32 %v11720_v9, %v12536_v16  ;;  %v16204_v9 = vld [vmem:[#allocation58_spill] sm:$0xff] }
 0x29e   : > { %v12532_v52 = vpop.permute.xlu1 %2551  ;;  %v1787_v57 = vmul.f32 %v16204_v9, %v12550_v54  ;;  %v12572_v9 = vld [vmem:[#allocation2 + $0x91] sm:$0xff] }
 0x29f   : > { %16200 = vst [vmem:[#allocation9_spill] sm:$0xff] %v12532_v52  ;;  %8698 = vrot.lane.b32.xlu0 %v8697_v56, %s9892_s28  ;;  %v8732_v52 = vpack.i.bf16 %v1793_v29, %v1792_v44  ;;  %v1796_v56 = vmul.f32 %v12012_v49, %v12546_v25  ;;  %v1790_v49 = vmul.f32 %v11985_v33, %v12563_v61  ;;  %v12568_v44 = vld [vmem:[#allocation2 + $0xd9] sm:$0xff] }
 0x2a0   : > { %8723 = vrot.lane.b32.xlu1 %v8722_v12, %s9892_s28  ;;  %v12558_v12 = vld [vmem:[#allocation2 + $0xc1] sm:$0xff]  ;;  %v8717_v50 = vpack.i.bf16 %v1787_v57, %v1786_v1  ;;  %16205 = vst [vmem:[#allocation34_spill] sm:$0xff] %v12568_v44  ;;  %v12585_v57 = vld [vmem:[#allocation2 + $0xa9] sm:$0xff] }
 0x2a1   : > { %v12548_v5 = vpop.permute.xlu0 %2727  ;;  %v1797_v28 = vmul.f32 %v11810_v2, %v12558_v12  ;;  %v16207_v2 = vld [vmem:[#allocation63_spill] sm:$0xff] }
 0x2a2   : > { %v12554_v55 = vpop.permute.xlu1 %2559  ;;  %v1791_v11 = vmul.f32 %v16207_v2, %v12572_v9  ;;  %v12594_v2 = vld [vmem:[#allocation2 + $0xb1] sm:$0xff] }
 0x2a3   : > { %16203 = vst [vmem:[#allocation11_spill] sm:$0xff] %v12554_v55  ;;  %8708 = vrot.lane.b32.xlu0 %v8707_v41, %s9892_s28  ;;  %v8742_v55 = vpack.i.bf16 %v1797_v28, %v1796_v56  ;;  %v1800_v41 = vmul.f32 %v12024_v63, %v12568_v44  ;;  %v1794_v63 = vmul.f32 %v12008_v19, %v12585_v57  ;;  %v12590_v56 = vld [vmem:[#allocation2 + $0xf9] sm:$0xff]  ;;  %16209 = vst [vmem:[#allocation30_spill] sm:$0xff] %v12594_v2  ;;  %v12605_v44 = vld [vmem:[#allocation2 + $0xc9] sm:$0xff] }
 0x2a4   : > { %8733 = vrot.lane.b32.xlu1 %v8732_v52, %s9892_s28  ;;  %v12580_v52 = vld [vmem:[#allocation2 + $0xe1] sm:$0xff]  ;;  %v8727_v1 = vpack.i.bf16 %v1791_v11, %v1790_v49  ;;  %16208 = vst [vmem:[#allocation42_spill] sm:$0xff] %v12590_v56  ;;  %v2606_v19 = vld [vmem:[#allocation2 + $0x19] sm:$0xff] }
 0x2a5   : > { %v12570_v29 = vpop.permute.xlu0 %2735  ;;  %v1801_v33 = vmul.f32 %v11873_v22, %v12580_v52  ;;  %v1795_v22 = vmul.f32 %v11770_v47, %v12594_v2  ;;  %v16211_v49 = vld [vmem:[#allocation65_spill] sm:$0xff]  ;;  %v16212_v47 = vld [vmem:[#allocation31_spill] sm:$0xff] }
 0x2a6   : > { %v12576_v21 = vpop.permute.xlu1 %2567  ;;  %v1805_v4 = vmul.f32 %v16211_v49, %v12600_v27  ;;  %v1969_v49 = vmul.f32 %v12056_v13, %v12611_v58  ;;  %v16220_v13 = vld [vmem:[#allocation39_spill] sm:$0xff] }
 0x2a7   : > { %16206 = vst [vmem:[#allocation13_spill] sm:$0xff] %v12576_v21  ;;  %8718 = vrot.lane.b32.xlu0 %v8717_v50, %s9892_s28  ;;  %v8752_v21 = vpack.i.bf16 %v1801_v33, %v1800_v41  ;;  %v1804_v50 = vmul.f32 %v12039_v60, %v12590_v56  ;;  %v8737_v60 = vpack.i.bf16 %v1795_v22, %v1794_v63  ;;  %v12624_v63 = vld [vmem:[#allocation2 + $0xe9] sm:$0xff]  ;;  %v16219_v22 = vld [vmem:[#allocation41_spill] sm:$0xff] }
 0x2a8   : > { %8743 = vrot.lane.b32.xlu1 %v8742_v55, %s9892_s28  ;;  %v2607_v55 = vld [vmem:[#allocation2 + $0x21] sm:$0xff]  ;;  %v1798_v56 = vmul.f32 %v16212_v47, %v12605_v44  ;;  %16218 = vst [vmem:[#allocation49_spill] sm:$0xff] %v12624_v63  ;;  %v12636_v47 = vld [vmem:[#allocation2 + $0xf1] sm:$0xff] }
 0x2a9   : > { %v12592_v28 = vpop.permute.xlu0 %2743  ;;  %v2767_v41 = vmul.f32 %v12398_v15, %v2607_v55  ;;  %v8762_v2 = vpack.i.bf16 %v1805_v4, %v1804_v50  ;;  %v16216_v15 = vld [vmem:[#allocation61_spill] sm:$0xff]  ;;  %v1802_v50 = vmul.f32 %v16220_v13, %v12624_v63  ;;  %16223 = vst [vmem:[#allocation58_spill] sm:$0xff] %v12636_v47  ;;  %v16226_v13 = vld [vmem:[#allocation68_spill] sm:$0xff] }
 0x2ab   : > { %8728 = vrot.lane.b32.xlu0 %v8727_v1, %s9892_s28  ;;  %v2640_v11 = vpop.permute.xlu1 %2639  ;;  %v12615_v1 = vld [vmem:[#allocation2 + $0xd1] sm:$0xff] }
 0x2ac   : > { %v2766_v33 = vmul.f32 %v2640_v11, %v2606_v19  ;;  %8753 = vrot.lane.b32.xlu1 %v8752_v21, %s9892_s28  ;;  %16215 = vst [vmem:[#allocation45_spill] sm:$0xff] %v12615_v1  ;;  %v1799_v55 = vmul.f32 %v16216_v15, %v12615_v1  ;;  %v12621_v11 = vld [vmem:[#allocation2 + $0x1f] sm:$0xff]  ;;  %v1806_v1 = vld [vmem:[#allocation2 + $0xf] sm:$0xff] }
 0x2ad   : > { %v12613_v25 = vpop.permute.xlu0 %2751  ;;  %16217 = vst [vmem:[#allocation55_spill] sm:$0xff] %v12621_v11  ;;  %v1968_v19 = vmul.f32 %v16219_v22, %v12621_v11  ;;  %v16224_v22 = vld [vmem:[#allocation64_spill] sm:$0xff] }
 0x2ae   : > { %16214 = vst [vmem:[#allocation51_spill] sm:$0xff] %v12613_v25  ;;  %v3762_v27 = vpack.c.bf16 %v2767_v41, %v2766_v33  ;;  %v8747_v4 = vpack.i.bf16 %v1799_v55, %v1798_v56  ;;  %v12632_v41 = vld [vmem:[#allocation2 + $0x47] sm:$0xff]  ;;  %v1803_v11 = vmul.f32 %v16224_v22, %v12636_v47  ;;  %v2609_v55 = vld [vmem:[#allocation2 + $0x31] sm:$0xff] }
 0x2af   : > { %8738 = vrot.lane.b32.xlu0 %v8737_v60, %s9892_s28  ;;  %v2648_v21 = vpop.permute.xlu1 %2647  ;;  %16221 = vst [vmem:[#allocation60_spill] sm:$0xff] %v12632_v41  ;;  %v8772_v60 = vpack.i.bf16 %v1969_v49, %v1968_v19  ;;  %v1973_v15 = vmul.f32 %v12071_v59, %v12632_v41  ;;  %v2608_v56 = vld [vmem:[#allocation2 + $0x29] sm:$0xff]  ;;  %v16227_v49 = vld [vmem:[#allocation37_spill] sm:$0xff] }
 0x2b0   : > { %8396 = vmatprep.mubr.msk.bf16.mxu1 %vm347_vm0, %v3762_v27  ;;  %8763 = vrot.lane.b32.xlu1 %v8762_v2, %s9892_s28  ;;  %v12642_v27 = vld [vmem:[#allocation2 + $0x3f] sm:$0xff]  ;;  %v8757_v59 = vpack.i.bf16 %v1803_v11, %v1802_v50  ;;  %v1966_v19 = vmul.f32 %v16227_v49, %v1806_v1  ;;  %v12649_v22 = vld [vmem:[#allocation2 + $0x67] sm:$0xff]  ;;  %v12651_v41 = vld [vmem:[#allocation2 + $0x17] sm:$0xff] }
 0x2b1   : > { %v12634_v33 = vpop.permute.xlu0 %2759  ;;  %16225 = vst [vmem:[#allocation63_spill] sm:$0xff] %v12642_v27  ;;  %v1972_v58 = vmul.f32 %v16226_v13, %v12642_v27  ;;  %16228 = vst [vmem:[#allocation65_spill] sm:$0xff] %v12649_v22  ;;  %v1977_v47 = vmul.f32 %v12083_v51, %v12649_v22  ;;  %v2611_v11 = vld [vmem:[#allocation2 + $0x41] sm:$0xff]  ;;  %v16232_v50 = vld [vmem:[#allocation69_spill] sm:$0xff] }
 0x2b2   : > { %16222 = vst [vmem:[#allocation53_spill] sm:$0xff] %v12634_v33  ;;  %v2768_v33 = vmul.f32 %v2648_v21, %v2608_v56  ;;  %v16230_v21 = vld [vmem:[#allocation66_spill] sm:$0xff] }
 0x2b3   : > { %8748 = vrot.lane.b32.xlu0 %v8747_v4, %s9892_s28  ;;  %v2652_v2 = vpop.permute.xlu1 %2651  ;;  %v8782_v4 = vpack.i.bf16 %v1973_v15, %v1972_v58  ;;  %v1967_v56 = vmul.f32 %v16230_v21, %v12651_v41  ;;  %v12664_v58 = vld [vmem:[#allocation2 + $0x37] sm:$0xff]  ;;  %v12671_v49 = vld [vmem:[#allocation2 + $0x87] sm:$0xff] }
 0x2b4   : > { %v2769_v25 = vmul.f32 %v2652_v2, %v2609_v55  ;;  %8773 = vrot.lane.b32.xlu1 %v8772_v60, %s9893_s14  ;;  %v12659_v2 = vld [vmem:[#allocation2 + $0x5f] sm:$0xff]  ;;  %16233 = vst [vmem:[#allocation41_spill] sm:$0xff] %v12664_v58  ;;  %16234 = vst [vmem:[#allocation39_spill] sm:$0xff] %v12671_v49 }
 0x2b5   : > { %16231 = vst [vmem:[#allocation61_spill] sm:$0xff] %v12659_v2  ;;  %v2610_v60 = vld [vmem:[#allocation2 + $0x39] sm:$0xff]  ;;  %v1976_v55 = vmul.f32 %v16232_v50, %v12659_v2  ;;  %v1981_v50 = vmul.f32 %v12097_v20, %v12671_v49 }
 0x2b6   : > { %v12655_v63 = vpop.permute.xlu0 %1232  ;;  %v3765_v13 = vpack.c.bf16 %v2769_v25, %v2768_v33  ;;  %v2770_v51 = vmul.f32 %v12408_v46, %v2610_v60  ;;  %v8767_v25 = vpack.i.bf16 %v1967_v56, %v1966_v19  ;;  %v1971_v33 = vmul.f32 %v12067_v18, %v12664_v58  ;;  %v16236_v60 = vld [vmem:[#allocation67_spill] sm:$0xff]  ;;  %v16241_v49 = vld [vmem:[#allocation82_spill] sm:$0xff] }
 0x2b7   : > { %16229 = vst [vmem:[#allocation31_spill] sm:$0xff] %v12655_v63  ;;  %8758 = vrot.lane.b32.xlu0 %v8757_v59, %s9892_s28  ;;  %v2660_v1 = vpop.permute.xlu1 %2659  ;;  %v12673_v59 = vld [vmem:[#allocation2 + $0x2f] sm:$0xff]  ;;  %v8792_v21 = vpack.i.bf16 %v1977_v47, %v1976_v55  ;;  %v12686_v47 = vld [vmem:[#allocation2 + $0x57] sm:$0xff] }
 0x2b8   : > { %v2771_v15 = vmul.f32 %v2660_v1, %v2611_v11  ;;  %8397 = vmatmul.mubr.msk.bf16.vlgmr.msra.gmra.mxu1 %vm347_vm0, %v3765_v13  ;;  %8783 = vrot.lane.b32.xlu1 %v8782_v4, %s9893_s14  ;;  %v1970_v13 = vmul.f32 %v16236_v60, %v12673_v59  ;;  %v12681_v1 = vld [vmem:[#allocation2 + $0x7f] sm:$0xff]  ;;  %v2612_v19 = vld [vmem:[#allocation2 + $0x49] sm:$0xff]  ;;  %v2613_v4 = vld [vmem:[#allocation2 + $0x51] sm:$0xff]  ;;  %16239 = vst [vmem:[#allocation37_spill] sm:$0xff] %v12686_v47 }
 0x2b9   : > { %16237 = vst [vmem:[#allocation68_spill] sm:$0xff] %v12681_v1  ;;  %v16238_v56 = vld [vmem:[#allocation71_spill] sm:$0xff]  ;;  %v2772_v20 = vmul.f32 %v12418_v3, %v2612_v19  ;;  %v16240_v60 = vld [vmem:[#allocation74_spill] sm:$0xff]  ;;  %v16243_v3 = vld [vmem:[#allocation56_spill] sm:$0xff] }
 0x2ba   : > { %v12677_v63 = vpop.permute.xlu0 %1247  ;;  %v3768_v46 = vpack.c.bf16 %v2771_v15, %v2770_v51  ;;  %v1980_v11 = vmul.f32 %v16238_v56, %v12681_v1  ;;  %v1186_v51 = vld [vmem:[#allocation2 + $0xa7] sm:$0xff]  ;;  %v8777_v15 = vpack.i.bf16 %v1971_v33, %v1970_v13 }
 0x2bb   : > { %16235 = vst [vmem:[#allocation64_spill] sm:$0xff] %v12677_v63  ;;  %8768 = vrot.lane.b32.xlu0 %v8767_v25, %s9893_s14  ;;  %v2668_v18 = vpop.permute.xlu1 %2667  ;;  %v1975_v63 = vmul.f32 %v16240_v60, %v12686_v47  ;;  %v12693_v25 = vld [vmem:[#allocation2 + $0x4f] sm:$0xff]  ;;  %v1985_v58 = vmul.f32 %v16241_v49, %v1186_v51  ;;  %v12705_v60 = vld [vmem:[#allocation2 + $0x77] sm:$0xff] }
 0x2bc   : > { %v2773_v55 = vmul.f32 %v2668_v18, %v2613_v4  ;;  %8400 = vmatprep.mubr.msk.bf16.mxu1 %vm347_vm0, %v3768_v46  ;;  %8793 = vrot.lane.b32.xlu1 %v8792_v21, %s9893_s14  ;;  %v8802_v2 = vpack.i.bf16 %v1981_v50, %v1980_v11  ;;  %v1974_v19 = vmul.f32 %v16243_v3, %v12693_v25  ;;  %v12700_v18 = vld [vmem:[#allocation2 + $0x9f] sm:$0xff]  ;;  %v16245_v13 = vld [vmem:[#allocation35_spill] sm:$0xff] }
 0x2bd   : > { %16244 = vst [vmem:[#allocation69_spill] sm:$0xff] %v12700_v18  ;;  %v2614_v46 = vld [vmem:[#allocation2 + $0x59] sm:$0xff]  ;;  %v2615_v21 = vld [vmem:[#allocation2 + $0x61] sm:$0xff]  ;;  %v1984_v4 = vmul.f32 %v16245_v13, %v12700_v18  ;;  %16246 = vst [vmem:[#allocation67_spill] sm:$0xff] %v12705_v60 }
 0x2be   : > { %v12696_v56 = vpop.permute.xlu0 %1257  ;;  %v3771_v1 = vpack.c.bf16 %v2773_v55, %v2772_v20  ;;  %v2774_v49 = vmul.f32 %v12428_v35, %v2614_v46  ;;  %v1190_v11 = vld [vmem:[#allocation2 + $0xc7] sm:$0xff]  ;;  %v8787_v20 = vpack.i.bf16 %v1975_v63, %v1974_v19  ;;  %v16247_v55 = vld [vmem:[#allocation77_spill] sm:$0xff] }
 0x2bf   : > { %16242 = vst [vmem:[#allocation66_spill] sm:$0xff] %v12696_v56  ;;  %8778 = vrot.lane.b32.xlu0 %v8777_v15, %s9893_s14  ;;  %v2676_v33 = vpop.permute.xlu1 %2675  ;;  %v1979_v51 = vmul.f32 %v16247_v55, %v12705_v60  ;;  %v12712_v15 = vld [vmem:[#allocation2 + $0x6f] sm:$0xff]  ;;  %v8812_v3 = vpack.i.bf16 %v1985_v58, %v1984_v4  ;;  %v16248_v56 = vld [vmem:[#allocation86_spill] sm:$0xff]  ;;  %v1184_v19 = vld [vmem:[#allocation2 + $0x97] sm:$0xff] }
 0x2c0   : > { %v2775_v50 = vmul.f32 %v2676_v33, %v2615_v21  ;;  %8401 = vmatmul.mubr.msk.bf16.gmra.mxu1 %vm347_vm0, %v3771_v1  ;;  %8803 = vrot.lane.b32.xlu1 %v8802_v2, %s9893_s14  ;;  %v1989_v47 = vmul.f32 %v16248_v56, %v1190_v11  ;;  %v16250_v35 = vld [vmem:[#allocation70_spill] sm:$0xff]  ;;  %v2616_v1 = vld [vmem:[#allocation2 + $0x69] sm:$0xff]  ;;  %v2617_v2 = vld [vmem:[#allocation2 + $0x71] sm:$0xff] }
 0x2c1   : > { %v1978_v46 = vmul.f32 %v16250_v35, %v12712_v15  ;;  %v12719_v33 = vld [vmem:[#allocation2 + $0xbf] sm:$0xff]  ;;  %v2776_v58 = vmul.f32 %v12438_v38, %v2616_v1  ;;  %v1194_v4 = vld [vmem:[#allocation2 + $0xe7] sm:$0xff]  ;;  %v12728_v35 = vld [vmem:[#allocation2 + $0x8f] sm:$0xff] }
 0x2c2   : > { %v12715_v13 = vpop.permute.xlu0 %1267  ;;  %v3774_v18 = vpack.c.bf16 %v2775_v50, %v2774_v49  ;;  %v16251_v21 = vld [vmem:[#allocation33_spill] sm:$0xff]  ;;  %v16252_v50 = vld [vmem:[#allocation80_spill] sm:$0xff] }
 0x2c3   : > { %16249 = vst [vmem:[#allocation71_spill] sm:$0xff] %v12715_v13  ;;  %8788 = vrot.lane.b32.xlu0 %v8787_v20, %s9893_s14  ;;  %v2684_v63 = vpop.permute.xlu1 %2683  ;;  %v1988_v55 = vmul.f32 %v16251_v21, %v12719_v33  ;;  %v8797_v49 = vpack.i.bf16 %v1979_v51, %v1978_v46  ;;  %v1983_v11 = vmul.f32 %v16252_v50, %v1184_v19  ;;  %v16253_v13 = vld [vmem:[#allocation90_spill] sm:$0xff]  ;;  %v16255_v21 = vld [vmem:[#allocation27_spill] sm:$0xff]  ;;  %v1188_v46 = vld [vmem:[#allocation2 + $0xb7] sm:$0xff] }
 0x2c4   : > { %v2777_v56 = vmul.f32 %v2684_v63, %v2617_v2  ;;  %8404 = vmatprep.mubr.msk.bf16.mxu1 %vm347_vm0, %v3774_v18  ;;  %8813 = vrot.lane.b32.xlu1 %v8812_v3, %s9893_s14  ;;  %v1993_v60 = vmul.f32 %v16253_v13, %v1194_v4  ;;  %v1982_v38 = vmul.f32 %v16255_v21, %v12728_v35  ;;  %v12735_v1 = vld [vmem:[#allocation2 + $0xdf] sm:$0xff]  ;;  %v16257_v63 = vld [vmem:[#allocation44_spill] sm:$0xff] }
 0x2c5   : > { %v8822_v20 = vpack.i.bf16 %v1989_v47, %v1988_v55  ;;  %16256 = vst [vmem:[#allocation82_spill] sm:$0xff] %v12735_v1  ;;  %v2618_v18 = vld [vmem:[#allocation2 + $0x79] sm:$0xff]  ;;  %v2619_v51 = vld [vmem:[#allocation2 + $0x81] sm:$0xff]  ;;  %v1992_v2 = vmul.f32 %v16257_v63, %v12735_v1  ;;  %v16258_v55 = vld [vmem:[#allocation84_spill] sm:$0xff] }
 0x2c6   : > { %v12731_v27 = vpop.permute.xlu0 %1277  ;;  %v3777_v22 = vpack.c.bf16 %v2777_v56, %v2776_v58  ;;  %v2778_v47 = vmul.f32 %v12452_v23, %v2618_v18  ;;  %v8807_v19 = vpack.i.bf16 %v1983_v11, %v1982_v38  ;;  %v1987_v58 = vmul.f32 %v16258_v55, %v1188_v46  ;;  %v12744_v56 = vld [vmem:[#allocation2 + $0x107] sm:$0xff]  ;;  %v12746_v4 = vld [vmem:[#allocation2 + $0xaf] sm:$0xff]  ;;  %v16262_v23 = vld [vmem:[#allocation29_spill] sm:$0xff] }
 0x2c7   : > { %16254 = vst [vmem:[#allocation74_spill] sm:$0xff] %v12731_v27  ;;  %8798 = vrot.lane.b32.xlu0 %v8797_v49, %s9893_s14  ;;  %v2692_v3 = vpop.permute.xlu1 %2691  ;;  %16259 = vst [vmem:[#allocation56_spill] sm:$0xff] %v12744_v56  ;;  %v8832_v49 = vpack.i.bf16 %v1993_v60, %v1992_v2  ;;  %v16260_v50 = vld [vmem:[#allocation94_spill] sm:$0xff]  ;;  %v1986_v18 = vmul.f32 %v16262_v23, %v12746_v4  ;;  %v2621_v38 = vld [vmem:[#allocation2 + $0x91] sm:$0xff] }
 0x2c8   : > { %v2779_v13 = vmul.f32 %v2692_v3, %v2619_v51  ;;  %8405 = vmatmul.mubr.msk.bf16.gmra.mxu1 %vm347_vm0, %v3777_v22  ;;  %8823 = vrot.lane.b32.xlu1 %v8822_v20, %s9893_s14  ;;  %v1997_v21 = vmul.f32 %v16260_v50, %v12744_v56  ;;  %v12754_v22 = vld [vmem:[#allocation2 + $0xff] sm:$0xff]  ;;  %v2620_v20 = vld [vmem:[#allocation2 + $0x89] sm:$0xff]  ;;  %v1192_v3 = vld [vmem:[#allocation2 + $0xd7] sm:$0xff] }
 0x2c9   : > { %v16263_v51 = vld [vmem:[#allocation75_spill] sm:$0xff]  ;;  %v2780_v46 = vmul.f32 %v12466_v62, %v2620_v20  ;;  %v2622_v20 = vld [vmem:[#allocation2 + $0x99] sm:$0xff] }
 0x2ca   : > { %v12750_v27 = vpop.permute.xlu0 %1287  ;;  %v3780_v63 = vpack.c.bf16 %v2779_v13, %v2778_v47  ;;  %v1996_v60 = vmul.f32 %v16263_v51, %v12754_v22  ;;  %v8817_v47 = vpack.i.bf16 %v1987_v58, %v1986_v18  ;;  %v16264_v13 = vld [vmem:[#allocation88_spill] sm:$0xff]  ;;  %v16268_v18 = vld [vmem:[#allocation78_spill] sm:$0xff] }
 0x2cb   : > { %16261 = vst [vmem:[#allocation35_spill] sm:$0xff] %v12750_v27  ;;  %8808 = vrot.lane.b32.xlu0 %v8807_v19, %s9893_s14  ;;  %v2700_v11 = vpop.permute.xlu1 %2699  ;;  %v1991_v55 = vmul.f32 %v16264_v13, %v1192_v3  ;;  %v12763_v50 = vld [vmem:[#allocation2 + $0xcf] sm:$0xff]  ;;  %v16265_v19 = vld [vmem:[#allocation98_spill] sm:$0xff]  ;;  %v1196_v58 = vld [vmem:[#allocation2 + $0xf7] sm:$0xff] }
 0x2cc   : > { %v2781_v2 = vmul.f32 %v2700_v11, %v2621_v38  ;;  %8408 = vmatprep.mubr.msk.bf16.mxu1 %vm347_vm0, %v3780_v63  ;;  %8833 = vrot.lane.b32.xlu1 %v8832_v49, %s9893_s14  ;;  %v8842_v23 = vpack.i.bf16 %v1997_v21, %v1996_v60  ;;  %v2192_v27 = vmul.f32 %v16265_v19, %v12447_v36  ;;  %v16267_v51 = vld [vmem:[#allocation72_spill] sm:$0xff]  ;;  %v2623_v49 = vld [vmem:[#allocation2 + $0xa1] sm:$0xff] }
 0x2cd   : > { %v1990_v62 = vmul.f32 %v16267_v51, %v12763_v50  ;;  %v2193_v11 = vmul.f32 %v16268_v18, %v12499_v48  ;;  %v2782_v21 = vmul.f32 %v12485_v32, %v2622_v20  ;;  %v16269_v3 = vld [vmem:[#allocation92_spill] sm:$0xff]  ;;  %v16272_v48 = vld [vmem:[#allocation73_spill] sm:$0xff] }
 0x2ce   : > { %v12767_v1 = vpop.permute.xlu0 %1297  ;;  %v3783_v56 = vpack.c.bf16 %v2781_v2, %v2780_v46  ;;  %v1995_v60 = vmul.f32 %v16269_v3, %v1196_v58  ;;  %v12778_v46 = vld [vmem:[#allocation2 + $0xef] sm:$0xff] }
 0x2cf   : > { %16266 = vst [vmem:[#allocation77_spill] sm:$0xff] %v12767_v1  ;;  %8818 = vrot.lane.b32.xlu0 %v8817_v47, %s9893_s14  ;;  %v2708_v63 = vpop.permute.xlu1 %2707  ;;  %v8827_v36 = vpack.i.bf16 %v1991_v55, %v1990_v62  ;;  %v8852_v2 = vpack.i.bf16 %v2193_v11, %v2192_v27  ;;  %v16270_v47 = vld [vmem:[#allocation102_spill] sm:$0xff]  ;;  %v1994_v32 = vmul.f32 %v16272_v48, %v12778_v46  ;;  %v2624_v20 = vld [vmem:[#allocation2 + $0xa9] sm:$0xff]  ;;  %v16273_v55 = vld [vmem:[#allocation81_spill] sm:$0xff]  ;;  %v16459_v1 = vmov 1  }
 0x2d0   : > { %v2783_v38 = vmul.f32 %v2708_v63, %v2623_v49  ;;  %8409 = vmatmul.mubr.msk.bf16.gmra.mxu1 %vm347_vm0, %v3783_v56  ;;  %8843 = vrot.lane.b32.xlu1 %v8842_v23, %s9893_s14  ;;  %v2196_v13 = vmul.f32 %v16270_v47, %v12473_v45  ;;  %v2625_v23 = vld [vmem:[#allocation2 + $0xb1] sm:$0xff]  ;;  %v2197_v62 = vmul.f32 %v16273_v55, %v12519_v40  ;;  %v16275_v11 = vld [vmem:[#allocation106_spill] sm:$0xff] }
 0x2d1   : > { %v2784_v63 = vmul.f32 %v12506_v43, %v2624_v20  ;;  %v8837_v45 = vpack.i.bf16 %v1995_v60, %v1994_v32  ;;  %v16274_v49 = vld [vmem:[#allocation96_spill] sm:$0xff]  ;;  %v2626_v43 = vld [vmem:[#allocation2 + $0xb9] sm:$0xff]  ;;  %v2204_v20 = vmul.f32 %v12195_v8, %v12514_v42 }
 0x2d2   : > { %v12782_v19 = vpop.permute.xlu0 %1307  ;;  %v3786_v51 = vpack.c.bf16 %v2783_v38, %v2782_v21  ;;  %v2191_v58 = vmul.f32 %v16274_v49, %v12450_v14  ;;  %v8862_v18 = vpack.i.bf16 %v2197_v62, %v2196_v13  ;;  %v2200_v21 = vmul.f32 %v16275_v11, %v12492_v7  ;;  %v16277_v40 = vld [vmem:[#allocation76_spill] sm:$0xff]  ;;  %v16278_v60 = vld [vmem:[#allocation85_spill] sm:$0xff] }
 0x2d3   : > { %16271 = vst [vmem:[#allocation86_spill] sm:$0xff] %v12782_v19  ;;  %8828 = vrot.lane.b32.xlu0 %v8827_v36, %s9893_s14  ;;  %v2716_v56 = vpop.permute.xlu1 %2715  ;;  %v2190_v3 = vmul.f32 %v16277_v40, %v12478_v26  ;;  %v2786_v14 = vmul.f32 %v12526_v37, %v2626_v43  ;;  %v16279_v48 = vld [vmem:[#allocation100_spill] sm:$0xff]  ;;  %v16286_v43 = vld [vmem:[#allocation93_spill] sm:$0xff] }
 0x2d4   : > { %v2785_v27 = vmul.f32 %v2716_v56, %v2625_v23  ;;  %8412 = vmatprep.mubr.msk.bf16.mxu1 %vm347_vm0, %v3786_v51  ;;  %8853 = vrot.lane.b32.xlu1 %v8852_v2, %s9891_s27  ;;  %v2627_v51 = vld [vmem:[#allocation2 + $0xc1] sm:$0xff]  ;;  %v2201_v2 = vmul.f32 %v16278_v60, %v12541_v39  ;;  %v2194_v32 = vmul.f32 %v16279_v48, %v12495_v30  ;;  %v2628_v37 = vld [vmem:[#allocation2 + $0xc9] sm:$0xff] }
 0x2d5   : > { %v8847_v7 = vpack.i.bf16 %v2191_v58, %v2190_v3  ;;  %v16281_v39 = vld [vmem:[#allocation79_spill] sm:$0xff]  ;;  %v2788_v30 = vmul.f32 %v12548_v5, %v2628_v37  ;;  %v16283_v42 = vld [vmem:[#allocation104_spill] sm:$0xff]  ;;  %v2630_v5 = vld [vmem:[#allocation2 + $0xd9] sm:$0xff] }
 0x2d6   : > { %v12796_v38 = vpop.permute.xlu0 %1317  ;;  %v3789_v36 = vpack.c.bf16 %v2785_v27, %v2784_v63  ;;  %v8872_v26 = vpack.i.bf16 %v2201_v2, %v2200_v21  ;;  %v2195_v55 = vmul.f32 %v16281_v39, %v12464_v10  ;;  %v2629_v63 = vld [vmem:[#allocation2 + $0xd1] sm:$0xff]  ;;  %v2198_v58 = vmul.f32 %v16283_v42, %v12528_v24  ;;  %v2631_v3 = vld [vmem:[#allocation2 + $0xe1] sm:$0xff] }
 0x2d7   : > { %16276 = vst [vmem:[#allocation70_spill] sm:$0xff] %v12796_v38  ;;  %8838 = vrot.lane.b32.xlu0 %v8837_v45, %s9893_s14  ;;  %v2724_v47 = vpop.permute.xlu1 %2723  ;;  %v16282_v27 = vld [vmem:[#allocation89_spill] sm:$0xff]  ;;  %v2790_v24 = vmul.f32 %v12570_v29, %v2630_v5  ;;  %v2212_v2 = vmul.f32 %v12221_v17, %v12558_v12  ;;  %v2632_v29 = vld [vmem:[#allocation2 + $0xe9] sm:$0xff] }
 0x2d8   : > { %v2787_v13 = vmul.f32 %v2724_v47, %v2627_v51  ;;  %8413 = vmatmul.mubr.msk.bf16.gmra.mxu1 %vm347_vm0, %v3789_v36  ;;  %8863 = vrot.lane.b32.xlu1 %v8862_v18, %s9891_s27  ;;  %v2205_v45 = vmul.f32 %v16282_v27, %v12563_v61  ;;  %v8857_v8 = vpack.i.bf16 %v2195_v55, %v2194_v32  ;;  %v16285_v61 = vld [vmem:[#allocation83_spill] sm:$0xff]  ;;  %v2633_v32 = vld [vmem:[#allocation2 + $0xf1] sm:$0xff] }
 0x2d9   : > { %v2208_v18 = vmul.f32 %v12207_v0, %v12536_v16  ;;  %v2199_v36 = vmul.f32 %v16285_v61, %v12483_v6  ;;  %v2209_v47 = vmul.f32 %v16286_v43, %v12585_v57  ;;  %v16287_v16 = vld [vmem:[#allocation108_spill] sm:$0xff]  ;;  %v16289_v57 = vld [vmem:[#allocation87_spill] sm:$0xff]  ;;  %v2216_v55 = vmul.f32 %v12237_v34, %v12580_v52  ;;  %v16297_v52 = vld [vmem:[#allocation30_spill] sm:$0xff] }
 0x2da   : > { %v12810_v56 = vpop.permute.xlu0 %1327  ;;  %v3792_v23 = vpack.c.bf16 %v2787_v13, %v2786_v14  ;;  %v8882_v10 = vpack.i.bf16 %v2205_v45, %v2204_v20  ;;  %v2202_v60 = vmul.f32 %v16287_v16, %v12550_v54  ;;  %v2792_v54 = vmul.f32 %v12592_v28, %v2632_v29  ;;  %v16291_v12 = vld [vmem:[#allocation111_spill] sm:$0xff]  ;;  %v2634_v28 = vld [vmem:[#allocation2 + $0xf9] sm:$0xff] }
 0x2db   : > { %16280 = vst [vmem:[#allocation33_spill] sm:$0xff] %v12810_v56  ;;  %8848 = vrot.lane.b32.xlu0 %v8847_v7, %s9891_s27  ;;  %v2732_v62 = vpop.permute.xlu1 %2731  ;;  %v8867_v0 = vpack.i.bf16 %v2199_v36, %v2198_v58  ;;  %v8892_v6 = vpack.i.bf16 %v2209_v47, %v2208_v18  ;;  %v2203_v7 = vmul.f32 %v16289_v57, %v12504_v53  ;;  %v2635_v45 = vld [vmem:[#allocation2 + $0x101] sm:$0xff]  ;;  %v16304_v16 = vld [vmem:[#allocation105_spill] sm:$0xff] }
 0x2dc   : > { %v2789_v49 = vmul.f32 %v2732_v62, %v2629_v63  ;;  %8416 = vmatprep.mubr.msk.bf16.mxu1 %vm347_vm0, %v3792_v23  ;;  %8873 = vrot.lane.b32.xlu1 %v8872_v26, %s9891_s27  ;;  %v16290_v26 = vld [vmem:[#allocation97_spill] sm:$0xff]  ;;  %v2206_v39 = vmul.f32 %v16291_v12, %v12572_v9  ;;  %v16296_v42 = vld [vmem:[#allocation51_spill] sm:$0xff]  ;;  %v16300_v36 = vld [vmem:[#allocation122_spill] sm:$0xff] }
 0x2dd   : > { %v2213_v20 = vmul.f32 %v16290_v26, %v12605_v44  ;;  %v8877_v17 = vpack.i.bf16 %v2203_v7, %v2202_v60  ;;  %v16293_v44 = vld [vmem:[#allocation91_spill] sm:$0xff]  ;;  %v2794_v9 = vmul.f32 %v16296_v42, %v2634_v28  ;;  %v16302_v43 = vld [vmem:[#allocation14_spill] sm:$0xff]  ;;  %v16306_v7 = vld [vmem:[#allocation45_spill] sm:$0xff] }
 0x2de   : > { %v12824_v11 = vpop.permute.xlu0 %1337  ;;  %v3795_v21 = vpack.c.bf16 %v2789_v49, %v2788_v30  ;;  %v2207_v63 = vmul.f32 %v16293_v44, %v12524_v31  ;;  %v16294_v30 = vld [vmem:[#allocation49_spill] sm:$0xff]  ;;  %v16299_v61 = vld [vmem:[#allocation47_spill] sm:$0xff]  ;;  %v16308_v26 = vld [vmem:[#allocation128_spill] sm:$0xff] }
 0x2df   : > { %16284 = vst [vmem:[#allocation80_spill] sm:$0xff] %v12824_v11  ;;  %8858 = vrot.lane.b32.xlu0 %v8857_v8, %s9891_s27  ;;  %v2740_v40 = vpop.permute.xlu1 %2739  ;;  %v8902_v53 = vpack.i.bf16 %v2213_v20, %v2212_v2  ;;  %v16295_v49 = vld [vmem:[#allocation101_spill] sm:$0xff]  ;;  %v2220_v5 = vmul.f32 %v16300_v36, %v16299_v61  ;;  %v16303_v47 = vld [vmem:[#allocation95_spill] sm:$0xff]  ;;  %v2385_v20 = vmul.f32 %v16308_v26, %v12673_v59  ;;  %v16314_v28 = vld [vmem:[#allocation58_spill] sm:$0xff] }
 0x2e0   : > { %v2791_v51 = vmul.f32 %v2740_v40, %v2631_v3  ;;  %8417 = vmatmul.mubr.msk.bf16.gmra.mxu1 %vm347_vm0, %v3795_v21  ;;  %8883 = vrot.lane.b32.xlu1 %v8882_v10, %s9891_s27  ;;  %v2217_v8 = vmul.f32 %v16295_v49, %v16294_v30  ;;  %v8887_v34 = vpack.i.bf16 %v2207_v63, %v2206_v39  ;;  %v16298_v10 = vld [vmem:[#allocation114_spill] sm:$0xff]  ;;  %v2637_v31 = vld [vmem:[#allocation2 + $0x111] sm:$0xff]  ;;  %v16311_v12 = vld [vmem:[#allocation99_spill] sm:$0xff] }
 0x2e1   : > { %v2210_v18 = vmul.f32 %v16298_v10, %v16297_v52  ;;  %v16307_v29 = vld [vmem:[#allocation117_spill] sm:$0xff]  ;;  %v16315_v59 = vld [vmem:[#allocation120_spill] sm:$0xff]  ;;  %v16318_v42 = vld [vmem:[#allocation42_spill] sm:$0xff] }
 0x2e2   : > { %v12838_v14 = vpop.permute.xlu0 %1347  ;;  %v3798_v13 = vpack.c.bf16 %v2791_v51, %v2790_v24  ;;  %v8912_v21 = vpack.i.bf16 %v2217_v8, %v2216_v55  ;;  %v2211_v24 = vmul.f32 %v16303_v47, %v16302_v43  ;;  %v2061_v51 = vld [vmem:[#allocation2 + $0x109] sm:$0xff]  ;;  %v16312_v55 = vld [vmem:[#allocation38_spill] sm:$0xff] }
 0x2e3   : > { %16288 = vst [vmem:[#allocation90_spill] sm:$0xff] %v12838_v14  ;;  %8868 = vrot.lane.b32.xlu0 %v8867_v0, %s9891_s27  ;;  %v2748_v48 = vpop.permute.xlu1 %2747  ;;  %v2221_v60 = vmul.f32 %v16304_v16, %v2061_v51  ;;  %v16316_v30 = vld [vmem:[#allocation132_spill] sm:$0xff]  ;;  %v16321_v10 = vld [vmem:[#allocation110_spill] sm:$0xff]  ;;  %v16324_v43 = vld [vmem:[#allocation55_spill] sm:$0xff] }
 0x2e4   : > { %v2793_v23 = vmul.f32 %v2748_v48, %v2633_v32  ;;  %8420 = vmatprep.mubr.msk.bf16.mxu1 %vm347_vm0, %v3798_v13  ;;  %8893 = vrot.lane.b32.xlu1 %v8892_v6, %s9891_s27  ;;  %v16305_v6 = vld [vmem:[#allocation53_spill] sm:$0xff]  ;;  %v8897_v57 = vpack.i.bf16 %v2211_v24, %v2210_v18  ;;  %v2214_v48 = vmul.f32 %v16307_v29, %v16306_v7  ;;  %v16320_v52 = vld [vmem:[#allocation60_spill] sm:$0xff]  ;;  %v16325_v47 = vld [vmem:[#allocation107_spill] sm:$0xff] }
 0x2e5   : > { %v2796_v2 = vmul.f32 %v16305_v6, %v2061_v51  ;;  %v8922_v32 = vpack.i.bf16 %v2221_v60, %v2220_v5  ;;  %v2389_v49 = vmul.f32 %v16316_v30, %v12693_v25  ;;  %v2388_v18 = vmul.f32 %v16321_v10, %v16320_v52  ;;  %v16323_v25 = vld [vmem:[#allocation136_spill] sm:$0xff]  ;;  %v16328_v16 = vld [vmem:[#allocation113_spill] sm:$0xff]  ;;  %v16343_v52 = vld [vmem:[#allocation119_spill] sm:$0xff] }
 0x2e6   : > { %v12852_v37 = vpop.permute.xlu0 %1357  ;;  %v3801_v62 = vpack.c.bf16 %v2793_v23, %v2792_v54  ;;  %v2393_v5 = vmul.f32 %v16323_v25, %v12712_v15  ;;  %v2383_v24 = vmul.f32 %v16325_v47, %v16324_v43  ;;  %v16331_v15 = vld [vmem:[#allocation140_spill] sm:$0xff]  ;;  %v16340_v30 = vld [vmem:[#allocation37_spill] sm:$0xff] }
 0x2e7   : > { %16292 = vst [vmem:[#allocation27_spill] sm:$0xff] %v12852_v37  ;;  %8878 = vrot.lane.b32.xlu0 %v8877_v17, %s9891_s27  ;;  %v2756_v27 = vpop.permute.xlu1 %2755  ;;  %v16310_v17 = vld [vmem:[#allocation34_spill] sm:$0xff]  ;;  %v8942_v36 = vpack.i.bf16 %v2389_v49, %v2388_v18  ;;  %v2397_v7 = vmul.f32 %v16331_v15, %v12728_v35  ;;  %v9585_v35 = vld [vmem:[%s15798_s4 + $0x38] sm:$0xff]   ;;  %v16341_v49 = vld [vmem:[#allocation112_spill] sm:$0xff] }
 0x2e8   : > { %v2795_v58 = vmul.f32 %v2756_v27, %v2635_v45  ;;  %8421 = vmatmul.mubr.msk.bf16.gmra.mxu1 %vm347_vm0, %v3801_v62  ;;  %8903 = vrot.lane.b32.xlu1 %v8902_v53, %s9891_s27  ;;  %v2215_v39 = vmul.f32 %v16311_v12, %v16310_v17  ;;  %v16313_v62 = vld [vmem:[#allocation126_spill] sm:$0xff]  ;;  %v2218_v27 = vmul.f32 %v16315_v59, %v16314_v28  ;;  %v16336_v17 = vld [vmem:[#allocation116_spill] sm:$0xff]  ;;  %v16352_v15 = vld [vmem:[#allocation69_spill] sm:$0xff] }
 0x2e9   : > { %v2384_v44 = vmul.f32 %v16313_v62, %v16312_v55  ;;  %v16337_v62 = vld [vmem:[#allocation61_spill] sm:$0xff]  ;;  %v16339_v59 = vld [vmem:[#allocation144_spill] sm:$0xff]  ;;  %v13260_v37 = vld [vmem:[%s15802_s8 + $0x80] sm:$0xff] }
 0x2ea   : > { %v12866_v40 = vpop.permute.xlu0 %1367  ;;  %v3804_v3 = vpack.c.bf16 %v2795_v58, %v2794_v9  ;;  %v8907_v63 = vpack.i.bf16 %v2215_v39, %v2214_v48  ;;  %v16319_v9 = vld [vmem:[#allocation103_spill] sm:$0xff]  ;;  %v16332_v48 = vld [vmem:[#allocation41_spill] sm:$0xff]  ;;  %v9587_v18 = vld [vmem:[%s15798_s4 + $0x30] sm:$0xff]  }
 0x2eb   : > { %16301 = vst [vmem:[#allocation44_spill] sm:$0xff] %v12866_v40  ;;  %8888 = vrot.lane.b32.xlu0 %v8887_v34, %s9891_s27  ;;  %v2764_v0 = vpop.permute.xlu1 %2763  ;;  %v8932_v45 = vpack.i.bf16 %v2385_v20, %v2384_v44  ;;  %v2219_v58 = vmul.f32 %v16319_v9, %v16318_v42  ;;  %v9584_v39 = vld [vmem:[%s15798_s4 + $0x78] sm:$0xff]   ;;  %v16338_v44 = vld [vmem:[#allocation134_spill] sm:$0xff]  ;;  %v2390_v42 = vmul.f32 %v16341_v49, %v16340_v30  ;;  %v2253_v49 = vld [vmem:[#allocation2 + $0x10f] sm:$0xff] }
 0x2ec   : > { %v2797_v13 = vmul.f32 %v2764_v0, %v2637_v31  ;;  %8424 = vmatprep.mubr.msk.bf16.mxu1 %vm347_vm0, %v3804_v3  ;;  %8913 = vrot.lane.b32.xlu1 %v8912_v21, %s9891_s27  ;;  %v16322_v21 = vld [vmem:[#allocation124_spill] sm:$0xff]  ;;  %v16327_v0 = vld [vmem:[#allocation65_spill] sm:$0xff]  ;;  %v2240_v9 = vld [vmem:[#allocation2 + $0xa7] sm:$0xff] }
 0x2ed   : > { %v8917_v31 = vpack.i.bf16 %v2219_v58, %v2218_v27  ;;  %v2382_v61 = vmul.f32 %v16322_v21, %v12651_v41  ;;  %v2392_v60 = vmul.f32 %v16328_v16, %v16327_v0  ;;  %v16329_v41 = vld [vmem:[#allocation63_spill] sm:$0xff]  ;;  %v2401_v27 = vmul.f32 %v16339_v59, %v12746_v4  ;;  %8132 = vmatprep.subr.bf16.mxu0 %v9584_v39  ;;  %v9586_v4 = vld [vmem:[%s15798_s4 + $0x70] sm:$0xff]   ;;  %v16356_v39 = vld [vmem:[#allocation118_spill] sm:$0xff] }
 0x2ee   : > { %v12879_v54 = vpop.permute.xlu0 %1377  ;;  %v3807_v23 = vpack.c.bf16 %v2797_v13, %v2796_v2  ;;  %v16330_v2 = vld [vmem:[#allocation130_spill] sm:$0xff]  ;;  %8133 = vmatpush3.bf16.msra.mxu0 %v9585_v35  ;;  %v2400_v10 = vmul.f32 %v16343_v52, %v2240_v9  ;;  %v16344_v21 = vld [vmem:[#allocation68_spill] sm:$0xff]  ;;  %v16349_v0 = vld [vmem:[#allocation115_spill] sm:$0xff] }
 0x2ef   : > { %16309 = vst [vmem:[#allocation84_spill] sm:$0xff] %v12879_v54  ;;  %8898 = vrot.lane.b32.xlu0 %v8897_v57, %s9891_s27  ;;  %v12884_v53 = vpop.permute.xlu1 %8613  ;;  %v8927_v6 = vpack.i.bf16 %v2383_v24, %v2382_v61  ;;  %v2387_v13 = vmul.f32 %v16330_v2, %v16329_v41  ;;  %v8952_v57 = vpack.i.bf16 %v2393_v5, %v2392_v60  ;;  %v16345_v61 = vld [vmem:[#allocation138_spill] sm:$0xff]  ;;  %v16346_v5 = vld [vmem:[#allocation148_spill] sm:$0xff]  ;;  %v16348_v24 = vld [vmem:[#allocation67_spill] sm:$0xff] }
 0x2f0   : > { %8425 = vmatmul.mubr.msk.bf16.gmra.mxu1 %vm347_vm0, %v3807_v23  ;;  %8923 = vrot.lane.b32.xlu1 %v8922_v32, %s9891_s27  ;;  %v16333_v32 = vld [vmem:[#allocation109_spill] sm:$0xff]  ;;  %v16335_v23 = vld [vmem:[#allocation39_spill] sm:$0xff]  ;;  %v8972_v25 = vpack.i.bf16 %v2401_v27, %v2400_v10  ;;  %v2405_v43 = vmul.f32 %v16346_v5, %v12763_v50  ;;  %v2394_v16 = vmul.f32 %v16349_v0, %v16348_v24  ;;  %v16359_v27 = vld [vmem:[#allocation146_spill] sm:$0xff] }
 0x2f1   : > { %v2386_v26 = vmul.f32 %v16333_v32, %v16332_v48  ;;  %v2396_v12 = vmul.f32 %v16336_v17, %v16335_v23  ;;  %8134 = vmatprep.subr.bf16.mxu0 %v9586_v4  ;;  %v2244_v60 = vld [vmem:[#allocation2 + $0xc7] sm:$0xff]  ;;  %v2238_v32 = vld [vmem:[#allocation2 + $0x97] sm:$0xff]  ;;  %v2403_v30 = vmul.f32 %v16359_v27, %v12719_v33 }
 0x2f2   : > { %v12894_v8 = vpop.permute.xlu0 %1387  ;;  %8135 = vmatpush3.bf16.msra.mxu0 %v9587_v18  ;;  %v16351_v41 = vld [vmem:[#allocation123_spill] sm:$0xff]  ;;  %v16354_v23 = vld [vmem:[#allocation152_spill] sm:$0xff]  ;;  %v2398_v35 = vmul.f32 %v16356_v39, %v2238_v32  ;;  %v16362_v18 = vld [vmem:[#allocation121_spill] sm:$0xff] }
 0x2f3   : > { %16317 = vst [vmem:[#allocation94_spill] sm:$0xff] %v12894_v8  ;;  %8908 = vrot.lane.b32.xlu0 %v8907_v63, %s9891_s27  ;;  %v12899_v34 = vpop.permute.xlu1 %8623  ;;  %v8937_v55 = vpack.i.bf16 %v2387_v13, %v2386_v26  ;;  %v2391_v63 = vmul.f32 %v16338_v44, %v16337_v62  ;;  %v8962_v28 = vpack.i.bf16 %v2397_v7, %v2396_v12  ;;  %v9588_v50 = vld [vmem:[%s15798_s4 + $0x68] sm:$0xff]   ;;  %v16353_v7 = vld [vmem:[#allocation142_spill] sm:$0xff]  ;;  %v16360_v52 = vld [vmem:[#allocation156_spill] sm:$0xff] }
 0x2f4   : > { %8933 = vrot.lane.b32.xlu1 %v8932_v45, %s9892_s28  ;;  %v2404_v2 = vmul.f32 %v16351_v41, %v2244_v60  ;;  %v9589_v13 = vld [vmem:[%s15798_s4 + $0x28] sm:$0xff]   ;;  %v2399_v48 = vmul.f32 %v16353_v7, %v16352_v15  ;;  %v2409_v17 = vmul.f32 %v16354_v23, %v12778_v46  ;;  %8136 = vmatprep.subr.bf16.mxu0 %v9588_v50  ;;  %v9591_v46 = vld [vmem:[%s15798_s4 + $0x20] sm:$0xff]   ;;  %v9592_v33 = vld [vmem:[%s15798_s4 + $0x58] sm:$0xff]  }
 0x2f5   : > { %v16358_v44 = vld [vmem:[#allocation127_spill] sm:$0xff]  ;;  %v2413_v10 = vmul.f32 %v16360_v52, %v2253_v49  ;;  %v9593_v5 = vld [vmem:[%s15798_s4 + $0x18] sm:$0xff]   ;;  %v16366_v24 = vld [vmem:[#allocation82_spill] sm:$0xff] }
 0x2f6   : > { %v12908_v3 = vpop.permute.xlu0 %8608  ;;  %v8982_v26 = vpack.i.bf16 %v2405_v43, %v2404_v2  ;;  %8137 = vmatpush3.bf16.msra.mxu0 %v9589_v13  ;;  %v8967_v59 = vpack.i.bf16 %v2399_v48, %v2398_v35  ;;  %v16367_v0 = vld [vmem:[#allocation150_spill] sm:$0xff]  ;;  %v2416_v60 = vld [vmem:[#allocation2 + $0x28] sm:$0xff]  ;;  %v2246_v41 = vld [vmem:[#allocation2 + $0xd7] sm:$0xff] }
 0x2f7   : > { %8918 = vrot.lane.b32.xlu0 %v8917_v31, %s9891_s27  ;;  %v12913_v51 = vpop.permute.xlu1 %8633  ;;  %v8947_v31 = vpack.i.bf16 %v2391_v63, %v2390_v42  ;;  %v2242_v42 = vld [vmem:[#allocation2 + $0xb7] sm:$0xff]  ;;  %v13228_v54 = vld [vmem:[%s15802_s8 + $0x60] sm:$0xff] }
 0x2f8   : > { %16326 = vst [vmem:[#allocation29_spill] sm:$0xff] %v12913_v51  ;;  %8943 = vrot.lane.b32.xlu1 %v8942_v36, %s9892_s28  ;;  %v2395_v36 = vmul.f32 %v16345_v61, %v16344_v21  ;;  %v16364_v61 = vld [vmem:[#allocation56_spill] sm:$0xff]  ;;  %v16370_v15 = vld [vmem:[#allocation125_spill] sm:$0xff]  ;;  %16438 = vst [vmem:[#allocation120_spill] sm:$0xff] %v13228_v54 }
 0x2f9   : > { %v16368_v50 = vld [vmem:[#allocation52_spill] sm:$0xff]  ;;  %v2406_v7 = vmul.f32 %v16370_v15, %v2246_v41  ;;  %v16375_v49 = vld [vmem:[#allocation129_spill] sm:$0xff]  ;;  %v16381_v15 = vld [vmem:[#allocation143_spill] sm:$0xff] }
 0x2fa   : > { %v12922_v29 = vpop.permute.xlu0 %8618  ;;  %v2576_v13 = vmul.f32 %v16368_v50, %v2416_v60  ;;  %v2417_v48 = vld [vmem:[#allocation2 + $0x30] sm:$0xff]  ;;  %v16379_v41 = vld [vmem:[#allocation133_spill] sm:$0xff] }
 0x2fb   : > { %8928 = vrot.lane.b32.xlu0 %v8927_v6, %s9892_s28  ;;  %v12927_v20 = vpop.permute.xlu1 %8643  ;;  %v9595_v39 = vld [vmem:[%s15798_s4 + $0x10] sm:$0xff]   ;;  %v13206_v8 = vld [vmem:[%s15802_s8 + $0x38] sm:$0xff] }
 0x2fc   : > { %16334 = vst [vmem:[#allocation75_spill] sm:$0xff] %v12927_v20  ;;  %8953 = vrot.lane.b32.xlu1 %v8952_v57, %s9892_s28  ;;  %v8957_v57 = vpack.i.bf16 %v2395_v36, %v2394_v16  ;;  %v16365_v36 = vld [vmem:[#allocation131_spill] sm:$0xff]  ;;  %v2407_v16 = vmul.f32 %v16367_v0, %v16366_v24  ;;  %v2425_v50 = vld [vmem:[#allocation2 + $0x70] sm:$0xff]  ;;  %16433 = vst [vmem:[#allocation34_spill] sm:$0xff] %v13206_v8 }
 0x2fd   : > { %v16378_v0 = vld [vmem:[#allocation15_spill] sm:$0xff]  ;;  %v13244_v40 = vld [vmem:[%s15802_s8 + $0x70] sm:$0xff]  ;;  %v13356_v20 = vld [vmem:[%s15802_s8 + $0xe0] sm:$0xff] }
 0x2fe   : > { %v12942_v45 = vpop.permute.xlu0 %8628  ;;  %v8987_v35 = vpack.i.bf16 %v2407_v16, %v2406_v7  ;;  %v2585_v7 = vmul.f32 %v16381_v15, %v2425_v50  ;;  %v16392_v15 = vld [vmem:[#allocation151_spill] sm:$0xff]  ;;  %16442 = vst [vmem:[#allocation60_spill] sm:$0xff] %v13244_v40 }
 0x2ff   : > { %8938 = vrot.lane.b32.xlu0 %v8937_v55, %s9892_s28  ;;  %v12947_v58 = vpop.permute.xlu1 %8653  ;;  %v2248_v55 = vld [vmem:[#allocation2 + $0xe7] sm:$0xff] }
 0x300   : > { %16342 = vst [vmem:[#allocation88_spill] sm:$0xff] %v12947_v58  ;;  %8963 = vrot.lane.b32.xlu1 %v8962_v28, %s9892_s28  ;;  %v2408_v63 = vmul.f32 %v16358_v44, %v2248_v55  ;;  %v9590_v28 = vld [vmem:[%s15798_s4 + $0x60] sm:$0xff]  }
 0x301   : > { %8138 = vmatprep.subr.bf16.mxu0 %v9590_v28  ;;  %v16372_v55 = vld [vmem:[#allocation154_spill] sm:$0xff]  ;;  %v2250_v28 = vld [vmem:[#allocation2 + $0xf7] sm:$0xff] }
 0x302   : > { %v12961_v47 = vpop.permute.xlu0 %8638  ;;  %v8992_v9 = vpack.i.bf16 %v2409_v17, %v2408_v63  ;;  %8139 = vmatpush3.bf16.msra.mxu0 %v9591_v46  ;;  %v9594_v17 = vld [vmem:[%s15798_s4 + $0x50] sm:$0xff]   ;;  %v2411_v44 = vmul.f32 %v16372_v55, %v12754_v22  ;;  %v2420_v63 = vld [vmem:[#allocation2 + $0x48] sm:$0xff] }
 0x303   : > { %16347 = vst [vmem:[#allocation98_spill] sm:$0xff] %v12961_v47  ;;  %8948 = vrot.lane.b32.xlu0 %v8947_v31, %s9892_s28  ;;  %v12966_v6 = vpop.permute.xlu1 %8663  ;;  %v2402_v31 = vmul.f32 %v16362_v18, %v2242_v42  ;;  %8140 = vmatprep.subr.bf16.mxu0 %v9592_v33  ;;  %v2410_v42 = vmul.f32 %v16375_v49, %v2250_v28  ;;  %v9596_v22 = vld [vmem:[%s15798_s4 + $0x48] sm:$0xff]   ;;  %v16383_v28 = vld [vmem:[#allocation54_spill] sm:$0xff] }
 0x304   : > { %16350 = vst [vmem:[#allocation72_spill] sm:$0xff] %v12966_v6  ;;  %8973 = vrot.lane.b32.xlu1 %v8972_v25, %s9892_s28  ;;  %v2412_v25 = vmul.f32 %v16365_v36, %v16364_v61  ;;  %v9597_v61 = vld [vmem:[%s15798_s4 + $0x8] sm:$0xff]   ;;  %v13276_v6 = vld [vmem:[%s15802_s8 + $0x90] sm:$0xff] }
 0x305   : > { %v8977_v43 = vpack.i.bf16 %v2403_v30, %v2402_v31  ;;  %v2415_v31 = vld [vmem:[#allocation2 + $0x20] sm:$0xff]  ;;  %v8997_v36 = vpack.i.bf16 %v2411_v44, %v2410_v42  ;;  %v2428_v55 = vld [vmem:[#allocation2 + $0x88] sm:$0xff]  ;;  %v2429_v42 = vld [vmem:[#allocation2 + $0x90] sm:$0xff] }
 0x306   : > { %v12980_v12 = vpop.permute.xlu0 %8648  ;;  %v9002_v2 = vpack.i.bf16 %v2413_v10, %v2412_v25  ;;  %8141 = vmatpush3.bf16.msra.mxu0 %v9593_v5  ;;  %v16376_v10 = vld [vmem:[#allocation139_spill] sm:$0xff]  ;;  %v16377_v25 = vld [vmem:[#allocation158_spill] sm:$0xff] }
 0x307   : > { %16355 = vst [vmem:[#allocation78_spill] sm:$0xff] %v12980_v12  ;;  %8958 = vrot.lane.b32.xlu0 %v8957_v57, %s9892_s28  ;;  %v12984_v62 = vpop.permute.xlu1 %8673  ;;  %8142 = vmatprep.subr.bf16.mxu0 %v9594_v17  ;;  %v2575_v33 = vmul.f32 %v16377_v25, %v2415_v31  ;;  %v2424_v5 = vld [vmem:[#allocation2 + $0x68] sm:$0xff]  ;;  %v2419_v44 = vld [vmem:[#allocation2 + $0x40] sm:$0xff]  ;;  %v13074_v31 = vld [vmem:[#allocation2 + $0x58] sm:$0xff] }
 0x308   : > { %16357 = vst [vmem:[#allocation92_spill] sm:$0xff] %v12984_v62  ;;  %8983 = vrot.lane.b32.xlu1 %v8982_v26, %s9892_s28  ;;  %v16371_v26 = vld [vmem:[#allocation135_spill] sm:$0xff]  ;;  %v2584_v16 = vmul.f32 %v16378_v0, %v2424_v5 }
 0x309   : > { %v2577_v23 = vmul.f32 %v16371_v26, %v2417_v48  ;;  %v13055_v48 = vld [vmem:[#allocation2 + $0x38] sm:$0xff]  ;;  %v9598_v26 = vld [vmem:[%s15798_s4 + $0x40] sm:$0xff]   ;;  %v2432_v25 = vld [vmem:[#allocation2 + $0xa8] sm:$0xff] }
 0x30a   : > { %v12997_v4 = vpop.permute.xlu0 %8658  ;;  %8143 = vmatpush3.bf16.msra.mxu0 %v9595_v39  ;;  %v16382_v39 = vld [vmem:[#allocation57_spill] sm:$0xff] }
 0x30b   : > { %16361 = vst [vmem:[#allocation102_spill] sm:$0xff] %v12997_v4  ;;  %8968 = vrot.lane.b32.xlu0 %v8967_v59, %s9892_s28  ;;  %v13001_v21 = vpop.permute.xlu1 %8683  ;;  %v9012_v46 = vpack.i.bf16 %v2577_v23, %v2576_v13  ;;  %v16373_v59 = vld [vmem:[#allocation48_spill] sm:$0xff]  ;;  %8144 = vmatprep.subr.bf16.mxu0 %v9596_v22  ;;  %v9599_v23 = vld [vmem:[%s15798_s4] sm:$0xff]  }
 0x30c   : > { %16363 = vst [vmem:[#allocation73_spill] sm:$0xff] %v13001_v21  ;;  %8993 = vrot.lane.b32.xlu1 %v8992_v9, %s9892_s28  ;;  %v2580_v27 = vmul.f32 %v16373_v59, %v2420_v63  ;;  %v2421_v9 = vld [vmem:[#allocation2 + $0x50] sm:$0xff]  ;;  %v9032_v63 = vpack.i.bf16 %v2585_v7, %v2584_v16  ;;  %v16390_v16 = vld [vmem:[#allocation141_spill] sm:$0xff] }
 0x30d   : > { %v2581_v18 = vmul.f32 %v16376_v10, %v2421_v9  ;;  %v16386_v10 = vld [vmem:[#allocation147_spill] sm:$0xff] }
 0x30e   : > { %v13015_v57 = vpop.permute.xlu0 %8668  ;;  %8145 = vmatpush3.bf16.msra.mxu0 %v9597_v61  ;;  %v16387_v61 = vld [vmem:[#allocation62_spill] sm:$0xff] }
 0x30f   : > { %16369 = vst [vmem:[#allocation81_spill] sm:$0xff] %v13015_v57  ;;  %8978 = vrot.lane.b32.xlu0 %v8977_v43, %s9892_s28  ;;  %v13019_v32 = vpop.permute.xlu1 %8693  ;;  %v2414_v43 = vld [vmem:[#allocation2 + $0x18] sm:$0xff]  ;;  %v9022_v24 = vpack.i.bf16 %v2581_v18, %v2580_v27  ;;  %8146 = vmatprep.subr.bf16.mxu0 %v9598_v26  ;;  %v2589_v18 = vmul.f32 %v16386_v10, %v2429_v42  ;;  %v2437_v42 = vld [vmem:[#allocation2 + $0xd0] sm:$0xff] }
 0x310   : > { %9003 = vrot.lane.b32.xlu1 %v9002_v2, %s9892_s28  ;;  %v2574_v2 = vmul.f32 %v16379_v41, %v2414_v43  ;;  %v16384_v27 = vld [vmem:[#allocation137_spill] sm:$0xff]  ;;  %v16388_v43 = vld [vmem:[#allocation10_spill] sm:$0xff] }
 0x311   : > { %v2579_v49 = vmul.f32 %v16384_v27, %v2419_v44  ;;  %v13087_v26 = vld [vmem:[#allocation2 + $0x78] sm:$0xff] }
 0x312   : > { %v13032_v30 = vpop.permute.xlu0 %8678  ;;  %v9007_v17 = vpack.i.bf16 %v2575_v33, %v2574_v2  ;;  %8147 = vmatpush3.bf16.msra.mxu0 %v9599_v23  ;;  %v2423_v33 = vld [vmem:[#allocation2 + $0x60] sm:$0xff]  ;;  %v2433_v2 = vld [vmem:[#allocation2 + $0xb0] sm:$0xff]  ;;  %16393 = vst [vmem:[#allocation79_spill] sm:$0xff] %v13087_v26  ;;  %v16397_v27 = vld [vmem:[#allocation145_spill] sm:$0xff] }
 0x313   : > { %16374 = vst [vmem:[#allocation96_spill] sm:$0xff] %v13032_v30  ;;  %8988 = vrot.lane.b32.xlu0 %v8987_v35, %s9892_s28  ;;  %v13036_v52 = vpop.permute.xlu1 %8703  ;;  %v2578_v35 = vmul.f32 %v16382_v39, %v13055_v48  ;;  %v2583_v41 = vmul.f32 %v16390_v16, %v2423_v33  ;;  %v2593_v7 = vmul.f32 %v16392_v15, %v2433_v2  ;;  %v16402_v16 = vld [vmem:[#allocation9_spill] sm:$0xff]  ;;  %v13222_v30 = vld [vmem:[%s15802_s8 + $0x48] sm:$0xff] }
 0x314   : > { %9013 = vrot.lane.b32.xlu1 %v9012_v46, %s9893_s14  ;;  %v2588_v46 = vmul.f32 %v16383_v28, %v2428_v55  ;;  %v2427_v55 = vld [vmem:[#allocation2 + $0x80] sm:$0xff]  ;;  %v16404_v15 = vld [vmem:[#allocation149_spill] sm:$0xff]  ;;  %16437 = vst [vmem:[#allocation58_spill] sm:$0xff] %v13222_v30 }
 0x315   : > { %v9017_v22 = vpack.i.bf16 %v2579_v49, %v2578_v35  ;;  %v2436_v35 = vld [vmem:[#allocation2 + $0xc8] sm:$0xff]  ;;  %v2587_v49 = vmul.f32 %v16397_v27, %v2427_v55 }
 0x316   : > { %v13048_v60 = vpop.permute.xlu0 %8688  ;;  %v9042_v5 = vpack.i.bf16 %v2589_v18, %v2588_v46  ;;  %v16399_v18 = vld [vmem:[#allocation155_spill] sm:$0xff] }
 0x317   : > { %8998 = vrot.lane.b32.xlu0 %v8997_v36, %s9892_s28  ;;  %v13052_v13 = vpop.permute.xlu1 %8713  ;;  %v2582_v36 = vmul.f32 %v16387_v61, %v13074_v31  ;;  %v13100_v61 = vld [vmem:[#allocation2 + $0x98] sm:$0xff]  ;;  %v16407_v27 = vld [vmem:[#allocation59_spill] sm:$0xff] }
 0x318   : > { %16380 = vst [vmem:[#allocation106_spill] sm:$0xff] %v13052_v13  ;;  %9023 = vrot.lane.b32.xlu1 %v9022_v24, %s9893_s14  ;;  %v2592_v24 = vmul.f32 %v16388_v43, %v2432_v25  ;;  %16400 = vst [vmem:[#allocation83_spill] sm:$0xff] %v13100_v61  ;;  %v16401_v25 = vld [vmem:[#allocation17_spill] sm:$0xff]  ;;  %v2431_v43 = vld [vmem:[#allocation2 + $0xa0] sm:$0xff] }
 0x319   : > { %v9027_v23 = vpack.i.bf16 %v2583_v41, %v2582_v36  ;;  %v2590_v33 = vmul.f32 %v16401_v25, %v13100_v61  ;;  %v13340_v61 = vld [vmem:[%s15802_s8 + $0xd0] sm:$0xff] }
 0x31a   : > { %v13067_v59 = vpop.permute.xlu0 %8698  ;;  %v9052_v44 = vpack.i.bf16 %v2593_v7, %v2592_v24  ;;  %v2591_v7 = vmul.f32 %v16404_v15, %v2431_v43  ;;  %v16410_v43 = vld [vmem:[#allocation153_spill] sm:$0xff]  ;;  %v16412_v15 = vld [vmem:[#allocation19_spill] sm:$0xff] }
 0x31b   : > { %9008 = vrot.lane.b32.xlu0 %v9007_v17, %s9893_s14  ;;  %v13071_v9 = vpop.permute.xlu1 %8723  ;;  %v16394_v17 = vld [vmem:[#allocation8_spill] sm:$0xff] }
 0x31c   : > { %16385 = vst [vmem:[#allocation76_spill] sm:$0xff] %v13071_v9  ;;  %9033 = vrot.lane.b32.xlu1 %v9032_v63, %s9893_s14  ;;  %v2586_v39 = vmul.f32 %v16394_v17, %v13087_v26  ;;  %v16395_v63 = vld [vmem:[#allocation7_spill] sm:$0xff] }
 0x31d   : > { %v2596_v28 = vmul.f32 %v16395_v63, %v2436_v35  ;;  %v16406_v35 = vld [vmem:[#allocation159_spill] sm:$0xff]  ;;  %v9047_v63 = vpack.i.bf16 %v2591_v7, %v2590_v33  ;;  %v16413_v7 = vld [vmem:[#allocation12_spill] sm:$0xff] }
 0x31e   : > { %v13080_v0 = vpop.permute.xlu0 %8708  ;;  %v9037_v36 = vpack.i.bf16 %v2587_v49, %v2586_v39  ;;  %v2434_v39 = vld [vmem:[#allocation2 + $0xb8] sm:$0xff]  ;;  %v2444_v49 = vld [vmem:[#allocation2 + $0x108] sm:$0xff] }
 0x31f   : > { %16389 = vst [vmem:[#allocation85_spill] sm:$0xff] %v13080_v0  ;;  %9018 = vrot.lane.b32.xlu0 %v9017_v22, %s9893_s14  ;;  %v13084_v50 = vpop.permute.xlu1 %8733  ;;  %v2597_v22 = vmul.f32 %v16399_v18, %v2437_v42  ;;  %v2435_v42 = vld [vmem:[#allocation2 + $0xc0] sm:$0xff] }
 0x320   : > { %16391 = vst [vmem:[#allocation100_spill] sm:$0xff] %v13084_v50  ;;  %9043 = vrot.lane.b32.xlu1 %v9042_v5, %s9893_s14  ;;  %v2440_v5 = vld [vmem:[#allocation2 + $0xe8] sm:$0xff]  ;;  %v13308_v50 = vld [vmem:[%s15802_s8 + $0xb0] sm:$0xff] }
 0x321   : > { %v9062_v24 = vpack.i.bf16 %v2597_v22, %v2596_v28  ;;  %v2600_v41 = vmul.f32 %v16402_v16, %v2440_v5  ;;  %v2594_v28 = vmul.f32 %v16407_v27, %v2434_v39  ;;  %v16408_v22 = vld [vmem:[#allocation13_spill] sm:$0xff]  ;;  %v2439_v39 = vld [vmem:[#allocation2 + $0xe0] sm:$0xff] }
 0x322   : > { %v13093_v46 = vpop.permute.xlu0 %8718  ;;  %v2604_v25 = vmul.f32 %v16408_v22, %v2444_v49  ;;  %v16415_v27 = vld [vmem:[#allocation157_spill] sm:$0xff]  ;;  %v16416_v22 = vld [vmem:[#allocation11_spill] sm:$0xff] }
 0x323   : > { %16396 = vst [vmem:[#allocation89_spill] sm:$0xff] %v13093_v46  ;;  %9028 = vrot.lane.b32.xlu0 %v9027_v23, %s9893_s14  ;;  %v13097_v10 = vpop.permute.xlu1 %8743  ;;  %v2441_v23 = vld [vmem:[#allocation2 + $0xf0] sm:$0xff]  ;;  %v2599_v49 = vmul.f32 %v16415_v27, %v2439_v39  ;;  %v13158_v39 = vld [vmem:[%s15802_s8] sm:$0xff] }
 0x324   : > { %16398 = vst [vmem:[#allocation104_spill] sm:$0xff] %v13097_v10  ;;  %9053 = vrot.lane.b32.xlu1 %v9052_v44, %s9893_s14  ;;  %v2601_v55 = vmul.f32 %v16406_v35, %v2441_v23  ;;  %v2445_v44 = vld [vmem:[#allocation2 + $0x110] sm:$0xff]  ;;  %16422 = vst [vmem:[#allocation30_spill] sm:$0xff] %v13158_v39  ;;  %v13270_v10 = vld [vmem:[%s15802_s8 + $0x78] sm:$0xff] }
 0x325   : > { %v2605_v23 = vmul.f32 %v16412_v15, %v2445_v44 }
 0x326   : > { %v13106_v2 = vpop.permute.xlu0 %8728  ;;  %v9072_v18 = vpack.i.bf16 %v2601_v55, %v2600_v41 }
 0x327   : > { %16403 = vst [vmem:[#allocation93_spill] sm:$0xff] %v13106_v2  ;;  %9038 = vrot.lane.b32.xlu0 %v9037_v36, %s9893_s14  ;;  %v13110_v17 = vpop.permute.xlu1 %8753  ;;  %v2595_v36 = vmul.f32 %v16410_v43, %v2435_v42  ;;  %v9082_v41 = vpack.i.bf16 %v2605_v23, %v2604_v25  ;;  %v13324_v2 = vld [vmem:[%s15802_s8 + $0xc0] sm:$0xff] }
 0x328   : > { %16405 = vst [vmem:[#allocation108_spill] sm:$0xff] %v13110_v17  ;;  %9063 = vrot.lane.b32.xlu1 %v9062_v24, %s9893_s14  ;;  %v2438_v24 = vld [vmem:[#allocation2 + $0xd8] sm:$0xff] }
 0x329   : > { %v9057_v33 = vpack.i.bf16 %v2595_v36, %v2594_v28  ;;  %v2598_v35 = vmul.f32 %v16413_v7, %v2438_v24  ;;  %v13136_v28 = vld [vmem:[%s15802_s8 + $0x8] sm:$0xff]  ;;  %v16419_v36 = vld [vmem:[#allocation50_spill] sm:$0xff] }
 0x32a   : > { %v13116_v5 = vpop.permute.xlu0 %8738  ;;  %16417 = vst [vmem:[#allocation91_spill] sm:$0xff] %v13136_v28 }
 0x32b   : > { %16409 = vst [vmem:[#allocation87_spill] sm:$0xff] %v13116_v5  ;;  %9048 = vrot.lane.b32.xlu0 %v9047_v63, %s9893_s14  ;;  %v13120_v16 = vpop.permute.xlu1 %8763  ;;  %v2442_v63 = vld [vmem:[#allocation2 + $0xf8] sm:$0xff]  ;;  %v9067_v44 = vpack.i.bf16 %v2599_v49, %v2598_v35  ;;  %v13292_v5 = vld [vmem:[%s15802_s8 + $0xa0] sm:$0xff] }
 0x32c   : > { %16411 = vst [vmem:[#allocation97_spill] sm:$0xff] %v13120_v16  ;;  %9073 = vrot.lane.b32.xlu1 %v9072_v18, %s9893_s14  ;;  %v2602_v43 = vmul.f32 %v16416_v22, %v2442_v63  ;;  %v2443_v18 = vld [vmem:[#allocation2 + $0x100] sm:$0xff]  ;;  %v13174_v63 = vld [vmem:[%s15802_s8 + $0x18] sm:$0xff]  ;;  %v13212_v16 = vld [vmem:[%s15802_s8 + $0x50] sm:$0xff] }
 0x32d   : > { %v2603_v15 = vmul.f32 %v16419_v36, %v2443_v18  ;;  %16425 = vst [vmem:[#allocation122_spill] sm:$0xff] %v13174_v63  ;;  %v13190_v18 = vld [vmem:[%s15802_s8 + $0x28] sm:$0xff]  ;;  %v13196_v36 = vld [vmem:[%s15802_s8 + $0x40] sm:$0xff]  ;;  %16434 = vst [vmem:[#allocation99_spill] sm:$0xff] %v13212_v16 }
 0x32e   : > { %v13125_v55 = vpop.permute.xlu0 %8748  ;;  %16429 = vst [vmem:[#allocation53_spill] sm:$0xff] %v13190_v18  ;;  %16430 = vst [vmem:[#allocation45_spill] sm:$0xff] %v13196_v36 }
 0x32f   : > { %16414 = vst [vmem:[#allocation111_spill] sm:$0xff] %v13125_v55  ;;  %9058 = vrot.lane.b32.xlu0 %v9057_v33, %s9893_s14  ;;  %v13129_v42 = vpop.permute.xlu1 %8773  ;;  %v9077_v24 = vpack.i.bf16 %v2603_v15, %v2602_v43  ;;  %v13148_v33 = vld [vmem:[%s15802_s8 + $0x10] sm:$0xff] }
 0x330   : > { %9083 = vrot.lane.b32.xlu1 %v9082_v41, %s9893_s14  ;;  %16420 = vst [vmem:[#allocation101_spill] sm:$0xff] %v13148_v33  ;;  %v13164_v41 = vld [vmem:[%s15802_s8 + $0x20] sm:$0xff] }
 0x331   : > { %16423 = vst [vmem:[#allocation114_spill] sm:$0xff] %v13164_v41 }
 0x332   : > { %v13138_v25 = vpop.permute.xlu0 %8758 }
 0x333   : > { %16418 = vst [vmem:[#allocation49_spill] sm:$0xff] %v13138_v25  ;;  %9068 = vrot.lane.b32.xlu0 %v9067_v44, %s9893_s14  ;;  %v13142_v23 = vpop.permute.xlu1 %8783  ;;  %v13180_v44 = vld [vmem:[%s15802_s8 + $0x30] sm:$0xff] }
 0x334   : > { %4464 = vperm.xlu1 %9087, %v13136_v28   ;;  %16426 = vst [vmem:[#allocation14_spill] sm:$0xff] %v13180_v44 }
 0x336   : > { %v13150_v7 = vpop.permute.xlu0 %8768 }
 0x337   : > { %9078 = vrot.lane.b32.xlu0 %v9077_v24, %s9893_s14  ;;  %v13153_v35 = vpop.permute.xlu1 %8793 }
 0x338   : > { %16421 = vst [vmem:[#allocation51_spill] sm:$0xff] %v13153_v35  ;;  %4469 = vperm.xlu1 %9087, %v13148_v33  }
 0x33a   : > { %v13166_v27 = vpop.permute.xlu0 %8778 }
 0x33b   : > { %4459 = vperm.xlu0 %8606, %v13158_v39   ;;  %v13169_v49 = vpop.permute.xlu1 %8803 }
 0x33c   : > { %16424 = vst [vmem:[#allocation47_spill] sm:$0xff] %v13169_v49  ;;  %4479 = vperm.xlu1 %9087, %v13164_v41  }
 0x33e   : > { %v13182_v22 = vpop.permute.xlu0 %8788 }
 0x33f   : > { %16427 = vst [vmem:[#allocation95_spill] sm:$0xff] %v13182_v22  ;;  %4474 = vperm.xlu0 %8606, %v13174_v63   ;;  %v13185_v43 = vpop.permute.xlu1 %8813 }
 0x340   : > { %16428 = vst [vmem:[#allocation105_spill] sm:$0xff] %v13185_v43  ;;  %4489 = vperm.xlu1 %9087, %v13180_v44   ;;  %v13302_v43 = vld [vmem:[%s15802_s8 + $0x98] sm:$0xff] }
 0x342   : > { %v13198_v15 = vpop.permute.xlu0 %8798 }
 0x343   : > { %16431 = vst [vmem:[#allocation117_spill] sm:$0xff] %v13198_v15  ;;  %4484 = vperm.xlu0 %8606, %v13190_v18   ;;  %v13201_v24 = vpop.permute.xlu1 %8823 }
 0x344   : > { %16432 = vst [vmem:[#allocation128_spill] sm:$0xff] %v13201_v24  ;;  %4499 = vperm.xlu1 %9087, %v13196_v36  }
 0x346   : > { %v13214_v21 = vpop.permute.xlu0 %8808 }
 0x347   : > { %16435 = vst [vmem:[#allocation38_spill] sm:$0xff] %v13214_v21  ;;  %4494 = vperm.xlu0 %8606, %v13206_v8   ;;  %v13217_v25 = vpop.permute.xlu1 %8833  ;;  %v13318_v21 = vld [vmem:[%s15802_s8 + $0xa8] sm:$0xff] }
 0x348   : > { %16436 = vst [vmem:[#allocation126_spill] sm:$0xff] %v13217_v25  ;;  %4509 = vperm.xlu1 %9087, %v13212_v16   ;;  %v13238_v25 = vld [vmem:[%s15802_s8 + $0x58] sm:$0xff] }
 0x349   : > { %16441 = vst [vmem:[#allocation103_spill] sm:$0xff] %v13238_v25 }
 0x34a   : > { %v13230_v17 = vpop.permute.xlu0 %8818 }
 0x34b   : > { %16439 = vst [vmem:[#allocation132_spill] sm:$0xff] %v13230_v17  ;;  %4504 = vperm.xlu0 %8606, %v13222_v30   ;;  %v13233_v62 = vpop.permute.xlu1 %8843  ;;  %v13286_v17 = vld [vmem:[%s15802_s8 + $0x88] sm:$0xff] }
 0x34c   : > { %16440 = vst [vmem:[#allocation42_spill] sm:$0xff] %v13233_v62  ;;  %4519 = vperm.xlu1 %9087, %v13228_v54   ;;  %v13254_v62 = vld [vmem:[%s15802_s8 + $0x68] sm:$0xff] }
 0x34d   : > { %16444 = vst [vmem:[#allocation124_spill] sm:$0xff] %v13254_v62 }
 0x34e   : > { %v13246_v55 = vpop.permute.xlu0 %8828 }
 0x34f   : > { %16443 = vst [vmem:[#allocation110_spill] sm:$0xff] %v13246_v55  ;;  %4514 = vperm.xlu0 %8606, %v13238_v25   ;;  %v13249_v57 = vpop.permute.xlu1 %8853 }
 0x350   : > { %4529 = vperm.xlu1 %9087, %v13244_v40  }
 0x352   : > { %v13262_v24 = vpop.permute.xlu0 %8838 }
 0x353   : > { %16445 = vst [vmem:[#allocation136_spill] sm:$0xff] %v13262_v24  ;;  %4524 = vperm.xlu0 %8606, %v13254_v62   ;;  %v13265_v55 = vpop.permute.xlu1 %8863 }
 0x354   : > { %4539 = vperm.xlu1 %9087, %v13260_v37  }
 0x356   : > { %v13278_v14 = vpop.permute.xlu0 %8848 }
 0x357   : > { %4534 = vperm.xlu0 %8606, %v13270_v10   ;;  %v13281_v24 = vpop.permute.xlu1 %8873 }
 0x358   : > { %16446 = vst [vmem:[#allocation55_spill] sm:$0xff] %v13281_v24  ;;  %4549 = vperm.xlu1 %9087, %v13276_v6  }
 0x35a   : > { %v13294_v4 = vpop.permute.xlu0 %8858 }
 0x35b   : > { %4544 = vperm.xlu0 %8606, %v13286_v17   ;;  %v13297_v11 = vpop.permute.xlu1 %8883 }
 0x35c   : > { %16447 = vst [vmem:[#allocation107_spill] sm:$0xff] %v13297_v11  ;;  %4559 = vperm.xlu1 %9087, %v13292_v5   ;;  %v13372_v11 = vld [vmem:[%s15802_s8 + $0xf0] sm:$0xff] }
 0x35d   : > { %16455 = vst [vmem:[#allocation39_spill] sm:$0xff] %v13372_v11 }
 0x35e   : > { %v13310_v58 = vpop.permute.xlu0 %8868 }
 0x35f   : > { %4554 = vperm.xlu0 %8606, %v13302_v43   ;;  %v13313_v56 = vpop.permute.xlu1 %8893 }
 0x360   : > { %16448 = vst [vmem:[#allocation65_spill] sm:$0xff] %v13313_v56  ;;  %4569 = vperm.xlu1 %9087, %v13308_v50   ;;  %v13334_v56 = vld [vmem:[%s15802_s8 + $0xb8] sm:$0xff] }
 0x362   : > { %v13326_v12 = vpop.permute.xlu0 %8878 }
 0x363   : > { %16449 = vst [vmem:[#allocation113_spill] sm:$0xff] %v13326_v12  ;;  %4564 = vperm.xlu0 %8606, %v13318_v21   ;;  %v13329_v38 = vpop.permute.xlu1 %8903 }
 0x364   : > { %16450 = vst [vmem:[#allocation63_spill] sm:$0xff] %v13329_v38  ;;  %4579 = vperm.xlu1 %9087, %v13324_v2   ;;  %v13350_v38 = vld [vmem:[%s15802_s8 + $0xc8] sm:$0xff] }
 0x366   : > { %v13342_v49 = vpop.permute.xlu0 %8888 }
 0x367   : > { %16451 = vst [vmem:[#allocation130_spill] sm:$0xff] %v13342_v49  ;;  %4574 = vperm.xlu0 %8606, %v13334_v56   ;;  %v13345_v9 = vpop.permute.xlu1 %8913 }
 0x368   : > { %16452 = vst [vmem:[#allocation140_spill] sm:$0xff] %v13345_v9  ;;  %4589 = vperm.xlu1 %9087, %v13340_v61   ;;  %v13366_v9 = vld [vmem:[%s15802_s8 + $0xd8] sm:$0xff] }
 0x36a   : > { %v13358_v19 = vpop.permute.xlu0 %8898 }
 0x36b   : > { %16453 = vst [vmem:[#allocation41_spill] sm:$0xff] %v13358_v19  ;;  %4584 = vperm.xlu0 %8606, %v13350_v38   ;;  %v13361_v49 = vpop.permute.xlu1 %8923 }
 0x36c   : > { %16454 = vst [vmem:[#allocation109_spill] sm:$0xff] %v13361_v49  ;;  %4599 = vperm.xlu1 %9087, %v13356_v20   ;;  %v13382_v49 = vld [vmem:[%s15802_s8 + $0xe8] sm:$0xff] }
 0x36e   : > { %v13374_v15 = vpop.permute.xlu0 %8908 }
 0x36f   : > { %16456 = vst [vmem:[#allocation116_spill] sm:$0xff] %v13374_v15  ;;  %4594 = vperm.xlu0 %8606, %v13366_v9   ;;  %v13377_v19 = vpop.permute.xlu1 %8933  ;;  %v13393_v15 = vld [vmem:[%s15802_s8 + $0xf8] sm:$0xff] }
 0x370   : > { %4609 = vperm.xlu1 %9087, %v13372_v11   ;;  %16458 = vst [vmem:[#allocation134_spill] sm:$0xff] %v13393_v15  ;;  %v2001_v11 = vld [vmem:[#allocation2 + $0x28] sm:$0xff] }
 0x372   : > { %v13385_v46 = vpop.permute.xlu0 %8918 }
 0x373   : > { %16457 = vst [vmem:[#allocation61_spill] sm:$0xff] %v13385_v46  ;;  %4604 = vperm.xlu0 %8606, %v13382_v49   ;;  %v13388_v47 = vpop.permute.xlu1 %8943 }
 0x374   : > { %9088 = vset.pattern.permute.xlu1 %v16459_v1 }
 0x375   : > { %4682 = vperm.xlu1 %9088, %v13158_v39  }
 0x376   : > { %v13397_v26 = vpop.permute.xlu0 %8928 }
 0x377   : > { %4614 = vperm.xlu0 %8606, %v13393_v15   ;;  %v13400_v12 = vpop.permute.xlu1 %8953 }
 0x378   : > { %16460 = vst [vmem:[#allocation144_spill] sm:$0xff] %v13400_v12 }
 0x379   : > { %4690 = vperm.xlu1 %9088, %v13148_v33  }
 0x37a   : > { %v13403_v46 = vpop.permute.xlu0 %8938 }
 0x37b   : > { %9089 = vset.pattern.permute.xlu0 %v16459_v1  ;;  %v13406_v35 = vpop.permute.xlu1 %8963 }
 0x37c   : > { %16461 = vst [vmem:[#allocation37_spill] sm:$0xff] %v13406_v35  ;;  %4686 = vperm.xlu0 %9089, %v13136_v28  }
 0x37d   : > { %4694 = vperm.xlu1 %9088, %v13174_v63   ;;  %v8610_v63 = vunpack.i.l.bf16 %v12908_v3 }
 0x37e   : > { %v13410_v13 = vpop.permute.xlu0 %8948 }
 0x37f   : > { %v13412_v51 = vpop.permute.xlu1 %8973 }
 0x380   : > { %16462 = vst [vmem:[#allocation112_spill] sm:$0xff] %v13412_v51  ;;  %4698 = vperm.xlu0 %9089, %v13164_v41   ;;  %v1166_v41 = vld [vmem:[#allocation2 + $0x7] sm:$0xff] }
 0x381   : > { %4702 = vperm.xlu1 %9088, %v13190_v18  }
 0x382   : > { %v13416_v39 = vpop.permute.xlu0 %8958 }
 0x383   : > { %16463 = vst [vmem:[#allocation119_spill] sm:$0xff] %v13416_v39  ;;  %v13418_v33 = vpop.permute.xlu1 %8983  ;;  %v16471_v39 = vld [vmem:[#allocation16_spill] sm:$0xff] }
 0x384   : > { %16464 = vst [vmem:[#allocation68_spill] sm:$0xff] %v13418_v33  ;;  %4706 = vperm.xlu0 %9089, %v13180_v44   ;;  %v1167_v33 = vld [vmem:[#allocation2 + $0xf] sm:$0xff]  ;;  %v1168_v44 = vld [vmem:[#allocation2 + $0x17] sm:$0xff] }
 0x385   : > { %4710 = vperm.xlu1 %9088, %v13206_v8  }
 0x386   : > { %v13422_v1 = vpop.permute.xlu0 %8968 }
 0x387   : > { %16465 = vst [vmem:[#allocation138_spill] sm:$0xff] %v13422_v1  ;;  %v13424_v35 = vpop.permute.xlu1 %8993  ;;  %v16469_v1 = vld [vmem:[#allocation31_spill] sm:$0xff] }
 0x388   : > { %16466 = vst [vmem:[#allocation148_spill] sm:$0xff] %v13424_v35  ;;  %4714 = vperm.xlu0 %9089, %v13196_v36   ;;  %v1390_v8 = vmul.f32 %v16469_v1, %v1166_v41  ;;  %v8611_v36 = vunpack.i.h.bf16 %v12908_v3  ;;  %v8856_v41 = vunpack.i.h.bf16 %v13249_v57  ;;  %v8855_v1 = vunpack.i.l.bf16 %v13249_v57 }
 0x389   : > { %4718 = vperm.xlu1 %9088, %v13222_v30   ;;  %v8851_v3 = vunpack.i.h.bf16 %v13278_v14  ;;  %v8771_v57 = vunpack.i.h.bf16 %v13150_v7 }
 0x38a   : > { %v13428_v51 = vpop.permute.xlu0 %8978  ;;  %v3566_v28 = vsel %vm347_vm0, %v1390_v8, %v8610_v63  ;;  %v8850_v8 = vunpack.i.l.bf16 %v13278_v14  ;;  %v8935_v63 = vunpack.i.l.bf16 %v13377_v19  ;;  %v8930_v14 = vunpack.i.l.bf16 %v13397_v26 }
 0x38b   : > { %16467 = vst [vmem:[#allocation67_spill] sm:$0xff] %v13428_v51  ;;  %v13430_v18 = vpop.permute.xlu1 %9003  ;;  %v1391_v51 = vmul.f32 %v16471_v39, %v1167_v33  ;;  %v8936_v39 = vunpack.i.h.bf16 %v13377_v19  ;;  %v3667_v19 = vsel %vm347_vm0, %v2001_v11, %v8856_v41 }
 0x38c   : > { %16468 = vst [vmem:[#allocation115_spill] sm:$0xff] %v13430_v18  ;;  %4722 = vperm.xlu0 %9089, %v13212_v16   ;;  %v16472_v18 = vld [vmem:[#allocation18_spill] sm:$0xff]  ;;  %v8691_v16 = vunpack.i.h.bf16 %v13048_v60 }
 0x38d   : > { %4726 = vperm.xlu1 %9088, %v13238_v25   ;;  %v13442_v15 = vmul.f32 %v16472_v18, %v1168_v44  ;;  %v8690_v25 = vunpack.i.l.bf16 %v13048_v60  ;;  %v3567_v44 = vsel %vm347_vm0, %v1391_v51, %v8611_v36  ;;  %v1998_v36 = vld [vmem:[#allocation2 + $0x10] sm:$0xff] }
 0x38e   : > { %v13436_v35 = vpop.permute.xlu0 %8988  ;;  %v3600_v24 = vsel %vm3598_vm1, %v3567_v44, %v8691_v16  ;;  %v3664_v22 = vsel %vm347_vm0, %v1998_v36, %v8850_v8  ;;  %v1169_v16 = vld [vmem:[#allocation2 + $0x1f] sm:$0xff]  ;;  %v8776_v36 = vunpack.i.h.bf16 %v13129_v42 }
 0x38f   : > { %16470 = vst [vmem:[#allocation123_spill] sm:$0xff] %v13436_v35  ;;  %v9014_v30 = vpop.permute.xlu1 %9013  ;;  %v3599_v12 = vsel %vm3598_vm1, %v3566_v28, %v8690_v25  ;;  %v3696_v25 = vsel %vm3598_vm1, %v3664_v22, %v8930_v14  ;;  %v8696_v22 = vunpack.i.h.bf16 %v13019_v32 }
 0x390   : > { %4730 = vperm.xlu0 %9089, %v13228_v54   ;;  %v9016_v60 = vunpack.i.h.bf16 %v9014_v30  ;;  %v9015_v18 = vunpack.i.l.bf16 %v9014_v30  ;;  %v8770_v54 = vunpack.i.l.bf16 %v13150_v7  ;;  %v1999_v30 = vld [vmem:[#allocation2 + $0x18] sm:$0xff] }
 0x391   : > { %4734 = vperm.xlu1 %9088, %v13254_v62   ;;  %v8931_v62 = vunpack.i.h.bf16 %v13397_v26  ;;  %v3665_v26 = vsel %vm347_vm0, %v1999_v30, %v8851_v3  ;;  %v8775_v30 = vunpack.i.l.bf16 %v13129_v42 }
 0x392   : > { %v13452_v33 = vpop.permute.xlu0 %8998  ;;  %v3632_v3 = vsel %vm3631_vm2, %v3599_v12, %v8770_v54  ;;  %v8695_v54 = vunpack.i.l.bf16 %v13019_v32  ;;  %v8861_v12 = vunpack.i.h.bf16 %v13294_v4 }
 0x393   : > { %16473 = vst [vmem:[#allocation69_spill] sm:$0xff] %v13452_v33  ;;  %v13457_v35 = vpop.permute.xlu1 %9023  ;;  %v2000_v33 = vld [vmem:[#allocation2 + $0x20] sm:$0xff]  ;;  %v3697_v8 = vsel %vm3598_vm1, %v3665_v26, %v8931_v62 }
 0x394   : > { %4738 = vperm.xlu0 %9089, %v13244_v40   ;;  %v3666_v51 = vsel %vm347_vm0, %v2000_v33, %v8855_v1  ;;  %v3699_v40 = vsel %vm3598_vm1, %v3667_v19, %v8936_v39  ;;  %v16474_v39 = vld [vmem:[#allocation64_spill] sm:$0xff]  ;;  %v8616_v19 = vunpack.i.h.bf16 %v12884_v53 }
 0x395   : > { %4742 = vperm.xlu1 %9088, %v13270_v10   ;;  %v3698_v0 = vsel %vm3598_vm1, %v3666_v51, %v8935_v63  ;;  %v3731_v33 = vsel %vm3631_vm2, %v3699_v40, %v9016_v60  ;;  %v3633_v63 = vsel %vm3631_vm2, %v3600_v24, %v8771_v57  ;;  %v1393_v44 = vmul.f32 %v16474_v39, %v1169_v16 }
 0x396   : > { %v9009_v7 = vpop.permute.xlu0 %9008  ;;  %v3730_v1 = vsel %vm3631_vm2, %v3698_v0, %v9015_v18  ;;  %v8615_v60 = vunpack.i.l.bf16 %v12884_v53  ;;  %v8860_v24 = vunpack.i.l.bf16 %v13294_v4  ;;  %v3760_v57 = vpack.c.bf16 %v3633_v63, %v3632_v3  ;;  %v1170_v4 = vld [vmem:[#allocation2 + $0x27] sm:$0xff]  ;;  %v1171_v3 = vld [vmem:[#allocation2 + $0x2f] sm:$0xff] }
 0x397   : > { %v9011_v11 = vunpack.i.h.bf16 %v9009_v7  ;;  %v9010_v41 = vunpack.i.l.bf16 %v9009_v7  ;;  %v13475_v28 = vpop.permute.xlu1 %9033  ;;  %v3764_v14 = vpack.c.bf16 %v3731_v33, %v3730_v1  ;;  %v8941_v53 = vunpack.i.h.bf16 %v13403_v46  ;;  %v2002_v1 = vld [vmem:[#allocation2 + $0x30] sm:$0xff] }
 0x398   : > { %4746 = vperm.xlu0 %9089, %v13260_v37   ;;  %v8940_v7 = vunpack.i.l.bf16 %v13403_v46  ;;  %v3669_v46 = vsel %vm347_vm0, %v13055_v48, %v8861_v12  ;;  %v3668_v33 = vsel %vm347_vm0, %v2002_v1, %v8860_v24  ;;  %v16475_v48 = vld [vmem:[#allocation66_spill] sm:$0xff]  ;;  %v8781_v24 = vunpack.i.h.bf16 %v13166_v27  ;;  %v2005_v1 = vld [vmem:[#allocation2 + $0x48] sm:$0xff] }
 0x399   : > { %v3728_v0 = vsel %vm3631_vm2, %v3696_v25, %v9010_v41  ;;  %v3729_v40 = vsel %vm3631_vm2, %v3697_v8, %v9011_v11  ;;  %4750 = vperm.xlu1 %9088, %v13286_v17   ;;  %v3568_v11 = vsel %vm347_vm0, %v13442_v15, %v8615_v60  ;;  %v3569_v41 = vsel %vm347_vm0, %v1393_v44, %v8616_v19 }
 0x39a   : > { %v9019_v18 = vpop.permute.xlu0 %9018  ;;  %v3761_v62 = vpack.c.bf16 %v3729_v40, %v3728_v0  ;;  %v3601_v16 = vsel %vm3598_vm1, %v3568_v11, %v8695_v54  ;;  %v3602_v25 = vsel %vm3598_vm1, %v3569_v41, %v8696_v22  ;;  %v3700_v39 = vsel %vm3598_vm1, %v3668_v33, %v8940_v7  ;;  %v16476_v0 = vld [vmem:[#allocation20_spill] sm:$0xff] }
 0x39b   : > { %v13492_v51 = vpop.permute.xlu1 %9043  ;;  %v9021_v26 = vunpack.i.h.bf16 %v9019_v18  ;;  %v9020_v32 = vunpack.i.l.bf16 %v9019_v18  ;;  %v3634_v15 = vsel %vm3631_vm2, %v3601_v16, %v8775_v30  ;;  %v3635_v63 = vsel %vm3631_vm2, %v3602_v25, %v8776_v36  ;;  %v1172_v41 = vld [vmem:[#allocation2 + $0x37] sm:$0xff]  ;;  %v1173_v25 = vld [vmem:[#allocation2 + $0x3f] sm:$0xff] }
 0x39c   : > { %4754 = vperm.xlu0 %9089, %v13276_v6   ;;  %4039 = vmatprep.mubr.bf16.mxu0 %v3761_v62  ;;  %v3701_v44 = vsel %vm3598_vm1, %v3669_v46, %v8941_v53  ;;  %v1395_v19 = vmul.f32 %v16475_v48, %v1171_v3  ;;  %v1394_v40 = vmul.f32 %v16476_v0, %v1170_v4  ;;  %v8621_v18 = vunpack.i.h.bf16 %v12922_v29 }
 0x39d   : > { %4040 = vmatmul.mubr.bf16.vlgmr.msra.gmra.mxu0 %v3760_v57  ;;  %4758 = vperm.xlu1 %9088, %v13302_v43   ;;  %v3732_v60 = vsel %vm3631_vm2, %v3700_v39, %v9020_v32  ;;  %v3733_v22 = vsel %vm3631_vm2, %v3701_v44, %v9021_v26  ;;  %v8620_v62 = vunpack.i.l.bf16 %v12922_v29  ;;  %v8700_v54 = vunpack.i.l.bf16 %v13067_v59  ;;  %v16477_v44 = vld [vmem:[#allocation71_spill] sm:$0xff] }
 0x39e   : > { %v13503_v42 = vpop.permute.xlu0 %9028  ;;  %4047 = vmatprep.mubr.bf16.mxu0 %v3764_v14  ;;  %v8701_v14 = vunpack.i.h.bf16 %v13067_v59  ;;  %v8866_v57 = vunpack.i.h.bf16 %v13265_v55  ;;  %v8865_v36 = vunpack.i.l.bf16 %v13265_v55  ;;  %v3763_v30 = vpack.c.bf16 %v3635_v63, %v3634_v15 }
 0x39f   : > { %v13510_v8 = vpop.permute.xlu1 %9053  ;;  %v8780_v7 = vunpack.i.l.bf16 %v13166_v27  ;;  %v8946_v26 = vunpack.i.h.bf16 %v13388_v47  ;;  %v8945_v29 = vunpack.i.l.bf16 %v13388_v47  ;;  %v3767_v59 = vpack.c.bf16 %v3733_v22, %v3732_v60  ;;  %v2004_v27 = vld [vmem:[#allocation2 + $0x40] sm:$0xff] }
 0x3a0   : > { %4762 = vperm.xlu0 %9089, %v13292_v5   ;;  %v9026_v32 = vunpack.i.h.bf16 %v13457_v35  ;;  %v9025_v4 = vunpack.i.l.bf16 %v13457_v35  ;;  %v3571_v55 = vsel %vm347_vm0, %v1395_v19, %v8621_v18  ;;  %v3570_v11 = vsel %vm347_vm0, %v1394_v40, %v8620_v62  ;;  %v16478_v19 = vld [vmem:[#allocation21_spill] sm:$0xff] }
 0x3a1   : > { %4766 = vperm.xlu1 %9088, %v13318_v21   ;;  %v3671_v47 = vsel %vm347_vm0, %v2005_v1, %v8866_v57  ;;  %v3603_v33 = vsel %vm3598_vm1, %v3570_v11, %v8700_v54  ;;  %v3604_v35 = vsel %vm3598_vm1, %v3571_v55, %v8701_v14  ;;  %v1397_v48 = vmul.f32 %v16477_v44, %v1173_v25 }
 0x3a2   : > { %v13526_v12 = vpop.permute.xlu0 %9038  ;;  %v3636_v3 = vsel %vm3631_vm2, %v3603_v33, %v8780_v7  ;;  %v3637_v15 = vsel %vm3631_vm2, %v3604_v35, %v8781_v24  ;;  %v3703_v39 = vsel %vm3598_vm1, %v3671_v47, %v8946_v26  ;;  %v1396_v0 = vmul.f32 %v16478_v19, %v1172_v41  ;;  %v16481_v33 = vld [vmem:[#allocation6_spill] sm:$0xff]  ;;  %v1176_v19 = vld [vmem:[#allocation2 + $0x57] sm:$0xff] }
 0x3a3   : > { %v13531_v53 = vpop.permute.xlu1 %9063  ;;  %v3735_v60 = vsel %vm3631_vm2, %v3703_v39, %v9026_v32  ;;  %v8625_v22 = vunpack.i.l.bf16 %v12899_v34  ;;  %v8706_v18 = vunpack.i.h.bf16 %v13036_v52  ;;  %v8705_v62 = vunpack.i.l.bf16 %v13036_v52 }
 0x3a4   : > { %4770 = vperm.xlu0 %9089, %v13308_v50   ;;  %v3670_v50 = vsel %vm347_vm0, %v2004_v27, %v8865_v36  ;;  %v8786_v54 = vunpack.i.h.bf16 %v13142_v23  ;;  %v8871_v24 = vunpack.i.h.bf16 %v13310_v58  ;;  %v8870_v57 = vunpack.i.l.bf16 %v13310_v58  ;;  %v1174_v58 = vld [vmem:[#allocation2 + $0x47] sm:$0xff] }
 0x3a5   : > { %4048 = vmatmul.mubr.bf16.gmra.mxu0 %v3763_v30  ;;  %4774 = vperm.xlu1 %9088, %v13334_v56   ;;  %v3702_v63 = vsel %vm3598_vm1, %v3670_v50, %v8945_v29  ;;  %v3766_v36 = vpack.c.bf16 %v3637_v15, %v3636_v3  ;;  %v8951_v7 = vunpack.i.h.bf16 %v13410_v13  ;;  %v9031_v26 = vunpack.i.h.bf16 %v13503_v42 }
 0x3a6   : > { %v13542_v46 = vpop.permute.xlu0 %9048  ;;  %4055 = vmatprep.mubr.bf16.mxu0 %v3767_v59  ;;  %v3734_v40 = vsel %vm3631_vm2, %v3702_v63, %v9025_v4  ;;  %v9030_v29 = vunpack.i.l.bf16 %v13503_v42  ;;  %v3572_v32 = vsel %vm347_vm0, %v1396_v0, %v8625_v22  ;;  %v1398_v35 = vmul.f32 %v16481_v33, %v1174_v58  ;;  %v16482_v63 = vld [vmem:[#allocation85_spill] sm:$0xff]  ;;  %v16483_v0 = vld [vmem:[#allocation95_spill] sm:$0xff] }
 0x3a7   : > { %v13548_v16 = vpop.permute.xlu1 %9073  ;;  %v3770_v52 = vpack.c.bf16 %v3735_v60, %v3734_v40  ;;  %v3605_v55 = vsel %vm3598_vm1, %v3572_v32, %v8705_v62  ;;  %v8630_v15 = vunpack.i.l.bf16 %v12942_v45  ;;  %v8711_v39 = vunpack.i.h.bf16 %v16482_v63  ;;  %v16484_v60 = vld [vmem:[#allocation55_spill] sm:$0xff] }
 0x3a8   : > { %4778 = vperm.xlu0 %9089, %v13324_v2   ;;  %v8626_v2 = vunpack.i.h.bf16 %v12899_v34  ;;  %v8950_v34 = vunpack.i.l.bf16 %v13410_v13  ;;  %v3673_v13 = vsel %vm347_vm0, %v13074_v31, %v8871_v24  ;;  %v16480_v31 = vld [vmem:[#allocation74_spill] sm:$0xff]  ;;  %v8710_v44 = vunpack.i.l.bf16 %v16482_v63  ;;  %v2009_v32 = vld [vmem:[#allocation2 + $0x68] sm:$0xff] }
 0x3a9   : > { %4782 = vperm.xlu1 %9088, %v13350_v38   ;;  %v8785_v38 = vunpack.i.l.bf16 %v13142_v23  ;;  %v2006_v23 = vld [vmem:[#allocation2 + $0x50] sm:$0xff]  ;;  %v3705_v47 = vsel %vm3598_vm1, %v3673_v13, %v8951_v7  ;;  %v8791_v40 = vunpack.i.h.bf16 %v16483_v0  ;;  %v8875_v22 = vunpack.i.l.bf16 %v16484_v60 }
 0x3aa   : > { %v13564_v14 = vpop.permute.xlu0 %9058  ;;  %v3573_v59 = vsel %vm347_vm0, %v1397_v48, %v8626_v2  ;;  %v3737_v3 = vsel %vm3631_vm2, %v3705_v47, %v9031_v26  ;;  %v8876_v2 = vunpack.i.h.bf16 %v16484_v60  ;;  %v9035_v7 = vunpack.i.l.bf16 %v13475_v28  ;;  %v16499_v60 = vld [vmem:[#allocation51_spill] sm:$0xff] }
 0x3ab   : > { %v13569_v30 = vpop.permute.xlu1 %9083  ;;  %v3606_v42 = vsel %vm3598_vm1, %v3573_v59, %v8706_v18  ;;  %v3638_v41 = vsel %vm3631_vm2, %v3605_v55, %v8785_v38  ;;  %v9036_v38 = vunpack.i.h.bf16 %v13475_v28  ;;  %v3574_v26 = vsel %vm347_vm0, %v1398_v35, %v8630_v15  ;;  %v2008_v59 = vld [vmem:[#allocation2 + $0x60] sm:$0xff] }
 0x3ac   : > { %4786 = vperm.xlu0 %9089, %v13340_v61   ;;  %v3672_v61 = vsel %vm347_vm0, %v2006_v23, %v8870_v57  ;;  %v3639_v27 = vsel %vm3631_vm2, %v3606_v42, %v8786_v54  ;;  %v16486_v54 = vld [vmem:[#allocation144_spill] sm:$0xff]  ;;  %v16487_v57 = vld [vmem:[#allocation39_spill] sm:$0xff]  ;;  %v3675_v13 = vsel %vm347_vm0, %v2009_v32, %v8876_v2  ;;  %v3607_v28 = vsel %vm3598_vm1, %v3574_v26, %v8710_v44  ;;  %v16494_v35 = vld [vmem:[#allocation30_spill] sm:$0xff] }
 0x3ad   : > { %4056 = vmatmul.mubr.bf16.gmra.mxu0 %v3766_v36  ;;  %4790 = vperm.xlu1 %9088, %v13366_v9   ;;  %v1175_v9 = vld [vmem:[#allocation2 + $0x4f] sm:$0xff]  ;;  %v3704_v1 = vsel %vm3598_vm1, %v3672_v61, %v8950_v34  ;;  %v3769_v18 = vpack.c.bf16 %v3639_v27, %v3638_v41  ;;  %v8955_v24 = vunpack.i.l.bf16 %v16486_v54  ;;  %v16488_v34 = vld [vmem:[#allocation134_spill] sm:$0xff]  ;;  %v3674_v61 = vsel %vm347_vm0, %v2008_v59, %v8875_v22  ;;  %v16500_v22 = vld [vmem:[#allocation113_spill] sm:$0xff] }
 0x3ae   : > { %v13580_v4 = vpop.permute.xlu0 %9068  ;;  %4063 = vmatprep.mubr.bf16.mxu0 %v3770_v52  ;;  %v1399_v50 = vmul.f32 %v16480_v31, %v1175_v9  ;;  %v3736_v25 = vsel %vm3631_vm2, %v3704_v1, %v9030_v29  ;;  %v16489_v29 = vld [vmem:[#allocation22_spill] sm:$0xff]  ;;  %v16492_v41 = vmov 2   ;;  %v8796_v2 = vunpack.i.h.bf16 %v16499_v60 }
 0x3af   : > { %v13587_v11 = vpop.permute.xlu1 %4464  ;;  %v3773_v36 = vpack.c.bf16 %v3737_v3, %v3736_v25  ;;  %v1400_v58 = vmul.f32 %v16489_v29, %v1176_v19  ;;  %v1177_v9 = vld [vmem:[#allocation2 + $0x5f] sm:$0xff]  ;;  %v3706_v47 = vsel %vm3598_vm1, %v3674_v61, %v8955_v24  ;;  %v8795_v24 = vunpack.i.l.bf16 %v16499_v60  ;;  %v1178_v29 = vld [vmem:[#allocation2 + $0x67] sm:$0xff] }
 0x3b0   : > { %16479 = vst [vmem:[#allocation142_spill] sm:$0xff] %v13587_v11  ;;  %4794 = vperm.xlu0 %9089, %v13356_v20   ;;  %v8631_v20 = vunpack.i.h.bf16 %v12942_v45  ;;  %v8956_v45 = vunpack.i.h.bf16 %v16486_v54  ;;  %v3738_v25 = vsel %vm3631_vm2, %v3706_v47, %v9035_v7  ;;  %v16503_v26 = vld [vmem:[#allocation122_spill] sm:$0xff]  ;;  %v1179_v47 = vld [vmem:[#allocation2 + $0x6f] sm:$0xff]  ;;  %v16512_v60 = vld [vmem:[#allocation89_spill] sm:$0xff] }
 0x3b1   : > { %4798 = vperm.xlu1 %9088, %v13382_v49   ;;  %v8790_v49 = vunpack.i.l.bf16 %v16483_v0 }
 0x3b2   : > { %v13603_v48 = vpop.permute.xlu0 %9078  ;;  %v3575_v52 = vsel %vm347_vm0, %v1399_v50, %v8631_v20  ;;  %v3707_v31 = vsel %vm3598_vm1, %v3675_v13, %v8956_v45  ;;  %v16493_v50 = vld [vmem:[#allocation35_spill] sm:$0xff]  ;;  %v16495_v20 = vld [vmem:[#allocation29_spill] sm:$0xff]  ;;  %v2010_v13 = vld [vmem:[#allocation2 + $0x70] sm:$0xff] }
 0x3b3   : > { %v13608_v62 = vpop.permute.xlu1 %4469  ;;  %v3608_v55 = vsel %vm3598_vm1, %v3575_v52, %v8711_v39  ;;  %v3640_v27 = vsel %vm3631_vm2, %v3607_v28, %v8790_v49  ;;  %v1401_v33 = vmul.f32 %v16493_v50, %v1177_v9  ;;  %v3739_v3 = vsel %vm3631_vm2, %v3707_v31, %v9036_v38  ;;  %v16496_v39 = vld [vmem:[#allocation106_spill] sm:$0xff]  ;;  %v16505_v28 = vld [vmem:[#allocation101_spill] sm:$0xff] }
 0x3b4   : > { %16485 = vst [vmem:[#allocation152_spill] sm:$0xff] %v13608_v62  ;;  %4802 = vperm.xlu0 %9089, %v16487_v57   ;;  %v3641_v1 = vsel %vm3631_vm2, %v3608_v55, %v8791_v40  ;;  %v8636_v15 = vunpack.i.h.bf16 %v16495_v20  ;;  %v8635_v63 = vunpack.i.l.bf16 %v16495_v20  ;;  %v8716_v44 = vunpack.i.h.bf16 %v16496_v39  ;;  %v16498_v40 = vld [vmem:[#allocation91_spill] sm:$0xff] }
 0x3b5   : > { %4064 = vmatmul.mubr.bf16.gmra.mxu0 %v3769_v18  ;;  %4806 = vperm.xlu1 %9088, %v16488_v34   ;;  %v8715_v19 = vunpack.i.l.bf16 %v16496_v39  ;;  %v8881_v18 = vunpack.i.h.bf16 %v16500_v22  ;;  %v8880_v49 = vunpack.i.l.bf16 %v16500_v22  ;;  %v3772_v54 = vpack.c.bf16 %v3641_v1, %v3640_v27  ;;  %v16502_v57 = vld [vmem:[#allocation119_spill] sm:$0xff] }
 0x3b6   : > { %v13620_v23 = vpop.permute.xlu0 %4459  ;;  %4071 = vmatprep.mubr.bf16.mxu0 %v3773_v36  ;;  %v8961_v36 = vunpack.i.h.bf16 %v16502_v57  ;;  %v8960_v38 = vunpack.i.l.bf16 %v16502_v57  ;;  %v3776_v7 = vpack.c.bf16 %v3739_v3, %v3738_v25  ;;  %v9041_v34 = vunpack.i.h.bf16 %v13526_v12  ;;  %v16506_v55 = vld [vmem:[#allocation79_spill] sm:$0xff] }
 0x3b7   : > { %16490 = vst [vmem:[#allocation118_spill] sm:$0xff] %v13620_v23  ;;  %v13626_v42 = vpop.permute.xlu1 %4479  ;;  %v9040_v52 = vunpack.i.l.bf16 %v13526_v12  ;;  %v3577_v59 = vsel %vm347_vm0, %v1401_v33, %v8636_v15  ;;  %v3576_v32 = vsel %vm347_vm0, %v1400_v58, %v8635_v63  ;;  %v3677_v9 = vsel %vm347_vm0, %v16506_v55, %v8881_v18  ;;  %v16509_v3 = vld [vmem:[#allocation23_spill] sm:$0xff]  ;;  %v16510_v15 = vld [vmem:[#allocation53_spill] sm:$0xff]  ;;  %v16519_v55 = vld [vmem:[#allocation34_spill] sm:$0xff] }
 0x3b8   : > { %16491 = vst [vmem:[#allocation127_spill] sm:$0xff] %v13626_v42  ;;  %9090 = vset.pattern.permute.xlu0 %v16492_v41  ;;  %v3609_v12 = vsel %vm3598_vm1, %v3576_v32, %v8715_v19  ;;  %v3610_v27 = vsel %vm3598_vm1, %v3577_v59, %v8716_v44  ;;  %v3709_v33 = vsel %vm3598_vm1, %v3677_v9, %v8961_v36  ;;  %v16511_v44 = vld [vmem:[#allocation98_spill] sm:$0xff]  ;;  %v8720_v22 = vunpack.i.l.bf16 %v16512_v60  ;;  %v16516_v57 = vld [vmem:[#allocation107_spill] sm:$0xff] }
 0x3b9   : > { %4874 = vperm.xlu0 %9090, %v16494_v35   ;;  %9091 = vset.pattern.permute.xlu1 %v16492_v41  ;;  %v3676_v41 = vsel %vm347_vm0, %v2010_v13, %v8880_v49  ;;  %v3642_v58 = vsel %vm3631_vm2, %v3609_v12, %v8795_v24  ;;  %v3643_v31 = vsel %vm3631_vm2, %v3610_v27, %v8796_v2  ;;  %v16508_v35 = vld [vmem:[#allocation77_spill] sm:$0xff]  ;;  %v8641_v19 = vunpack.i.h.bf16 %v16511_v44  ;;  %v16514_v49 = vld [vmem:[#allocation114_spill] sm:$0xff] }
 0x3ba   : > { %v13642_v0 = vpop.permute.xlu0 %4474  ;;  %4878 = vperm.xlu1 %9091, %v16498_v40   ;;  %v3708_v50 = vsel %vm3598_vm1, %v3676_v41, %v8960_v38  ;;  %v1403_v25 = vmul.f32 %v16508_v35, %v1179_v47  ;;  %v1402_v20 = vmul.f32 %v16509_v3, %v1178_v29  ;;  %v3741_v39 = vsel %vm3631_vm2, %v3709_v33, %v9041_v34  ;;  %v1180_v12 = vld [vmem:[#allocation2 + $0x77] sm:$0xff]  ;;  %v2012_v27 = vld [vmem:[#allocation2 + $0x80] sm:$0xff]  ;;  %v2013_v47 = vld [vmem:[#allocation2 + $0x88] sm:$0xff] }
 0x3bb   : > { %16497 = vst [vmem:[#allocation146_spill] sm:$0xff] %v13642_v0  ;;  %v13648_v45 = vpop.permute.xlu1 %4489  ;;  %v3740_v63 = vsel %vm3631_vm2, %v3708_v50, %v9040_v52  ;;  %v8640_v40 = vunpack.i.l.bf16 %v16511_v44  ;;  %v8721_v2 = vunpack.i.h.bf16 %v16512_v60  ;;  %v8886_v36 = vunpack.i.h.bf16 %v16516_v57  ;;  %v16523_v44 = vld [vmem:[#allocation86_spill] sm:$0xff]  ;;  %v14242_v0 = vld [vmem:[%s15802_s8 + $0xb8] sm:$0xff] }
 0x3bc   : > { %16501 = vst [vmem:[#allocation156_spill] sm:$0xff] %v13648_v45  ;;  %v8885_v38 = vunpack.i.l.bf16 %v16516_v57  ;;  %v3779_v32 = vpack.c.bf16 %v3741_v39, %v3740_v63  ;;  %v9046_v13 = vunpack.i.h.bf16 %v13492_v51  ;;  %v3579_v9 = vsel %vm347_vm0, %v1403_v25, %v8641_v19  ;;  %v1181_v25 = vld [vmem:[#allocation2 + $0x7f] sm:$0xff]  ;;  %v14231_v45 = vld [vmem:[%s15802_s8 + $0xa8] sm:$0xff] }
 0x3bd   : > { %4886 = vperm.xlu0 %9090, %v16503_v26   ;;  %4072 = vmatmul.mubr.bf16.gmra.mxu0 %v3772_v54  ;;  %v16515_v54 = vld [vmem:[#allocation117_spill] sm:$0xff]  ;;  %v3578_v41 = vsel %vm347_vm0, %v1402_v20, %v8640_v40  ;;  %v3679_v50 = vsel %vm347_vm0, %v2013_v47, %v8886_v36  ;;  %v3612_v35 = vsel %vm3598_vm1, %v3579_v9, %v8721_v2  ;;  %v16524_v40 = vld [vmem:[#allocation24_spill] sm:$0xff]  ;;  %v16639_v62 = vmov 5  }
 0x3be   : > { %v13658_v61 = vpop.permute.xlu0 %4484  ;;  %4079 = vmatprep.mubr.bf16.mxu0 %v3776_v7  ;;  %4882 = vperm.xlu1 %9091, %v16505_v28   ;;  %v8801_v24 = vunpack.i.h.bf16 %v16515_v54  ;;  %v3775_v7 = vpack.c.bf16 %v3643_v31, %v3642_v58  ;;  %v8800_v52 = vunpack.i.l.bf16 %v16515_v54  ;;  %v16518_v26 = vld [vmem:[#allocation37_spill] sm:$0xff]  ;;  %v9045_v28 = vunpack.i.l.bf16 %v13492_v51  ;;  %v16521_v31 = vld [vmem:[#allocation14_spill] sm:$0xff]  ;;  %v16526_v54 = vld [vmem:[#allocation75_spill] sm:$0xff] }
 0x3bf   : > { %16504 = vst [vmem:[#allocation121_spill] sm:$0xff] %v13658_v61  ;;  %v13666_v1 = vpop.permute.xlu1 %4499  ;;  %v8966_v29 = vunpack.i.h.bf16 %v16518_v26  ;;  %v8965_v59 = vunpack.i.l.bf16 %v16518_v26  ;;  %v3678_v33 = vsel %vm347_vm0, %v2012_v27, %v8885_v38  ;;  %v3611_v51 = vsel %vm3598_vm1, %v3578_v41, %v8720_v22  ;;  %v16527_v38 = vld [vmem:[#allocation76_spill] sm:$0xff]  ;;  %v16529_v26 = vld [vmem:[#allocation45_spill] sm:$0xff] }
 0x3c0   : > { %16507 = vst [vmem:[#allocation56_spill] sm:$0xff] %v13666_v1  ;;  %v3644_v20 = vsel %vm3631_vm2, %v3611_v51, %v8800_v52  ;;  %v1405_v19 = vmul.f32 %v16523_v44, %v1181_v25  ;;  %v1404_v60 = vmul.f32 %v16524_v40, %v1180_v12  ;;  %v8646_v57 = vunpack.i.h.bf16 %v16526_v54  ;;  %v16533_v12 = vld [vmem:[#allocation138_spill] sm:$0xff]  ;;  %v16534_v51 = vld [vmem:[#allocation103_spill] sm:$0xff] }
 0x3c1   : > { %4894 = vperm.xlu0 %9090, %v16510_v15   ;;  %v3645_v15 = vsel %vm3631_vm2, %v3612_v35, %v8801_v24  ;;  %v3710_v63 = vsel %vm3598_vm1, %v3678_v33, %v8965_v59  ;;  %v3711_v39 = vsel %vm3598_vm1, %v3679_v50, %v8966_v29  ;;  %v8645_v36 = vunpack.i.l.bf16 %v16526_v54  ;;  %v16530_v29 = vld [vmem:[#allocation47_spill] sm:$0xff] }
 0x3c2   : > { %v13681_v18 = vpop.permute.xlu0 %4494  ;;  %4890 = vperm.xlu1 %9091, %v16514_v49   ;;  %v16525_v49 = vld [vmem:[#allocation58_spill] sm:$0xff]  ;;  %v3742_v22 = vsel %vm3631_vm2, %v3710_v63, %v9045_v28  ;;  %v3743_v2 = vsel %vm3631_vm2, %v3711_v39, %v9046_v13  ;;  %v8726_v24 = vunpack.i.h.bf16 %v16527_v38  ;;  %v8806_v59 = vunpack.i.h.bf16 %v16530_v29  ;;  %v16536_v39 = vld [vmem:[#allocation99_spill] sm:$0xff] }
 0x3c3   : > { %16513 = vst [vmem:[#allocation131_spill] sm:$0xff] %v13681_v18  ;;  %v13687_v34 = vpop.permute.xlu1 %4509  ;;  %v3778_v9 = vpack.c.bf16 %v3645_v15, %v3644_v20  ;;  %v8805_v41 = vunpack.i.l.bf16 %v16530_v29  ;;  %v8971_v27 = vunpack.i.h.bf16 %v16533_v12  ;;  %v8970_v47 = vunpack.i.l.bf16 %v16533_v12  ;;  %v1182_v35 = vld [vmem:[#allocation2 + $0x87] sm:$0xff]  ;;  %v2014_v15 = vld [vmem:[#allocation2 + $0x90] sm:$0xff]  ;;  %v16540_v29 = vld [vmem:[#allocation25_spill] sm:$0xff] }
 0x3c4   : > { %16517 = vst [vmem:[#allocation82_spill] sm:$0xff] %v13687_v34  ;;  %v9051_v50 = vunpack.i.h.bf16 %v13542_v46  ;;  %v9050_v33 = vunpack.i.l.bf16 %v13542_v46  ;;  %v3581_v25 = vsel %vm347_vm0, %v1405_v19, %v8646_v57  ;;  %v3580_v20 = vsel %vm347_vm0, %v1404_v60, %v8645_v36  ;;  %v16537_v44 = vld [vmem:[#allocation83_spill] sm:$0xff]  ;;  %v16543_v12 = vld [vmem:[#allocation93_spill] sm:$0xff] }
 0x3c5   : > { %4902 = vperm.xlu0 %9090, %v16519_v55   ;;  %4080 = vmatmul.mubr.bf16.gmra.mxu0 %v3775_v7  ;;  %v8725_v7 = vunpack.i.l.bf16 %v16527_v38  ;;  %v1183_v19 = vld [vmem:[#allocation2 + $0x8f] sm:$0xff]  ;;  %v16539_v38 = vld [vmem:[#allocation70_spill] sm:$0xff] }
 0x3c6   : > { %v13697_v58 = vpop.permute.xlu0 %4504  ;;  %4087 = vmatprep.mubr.bf16.mxu0 %v3779_v32  ;;  %4898 = vperm.xlu1 %9091, %v16521_v31   ;;  %v16531_v32 = vld [vmem:[#allocation130_spill] sm:$0xff]  ;;  %v3782_v31 = vpack.c.bf16 %v3743_v2, %v3742_v22  ;;  %v3614_v22 = vsel %vm3598_vm1, %v3581_v25, %v8726_v24  ;;  %v16547_v25 = vld [vmem:[#allocation65_spill] sm:$0xff] }
 0x3c7   : > { %16520 = vst [vmem:[#allocation150_spill] sm:$0xff] %v13697_v58  ;;  %v13704_v3 = vpop.permute.xlu1 %4519  ;;  %v8891_v55 = vunpack.i.h.bf16 %v16531_v32  ;;  %v8890_v28 = vunpack.i.l.bf16 %v16531_v32  ;;  %v3613_v46 = vsel %vm3598_vm1, %v3580_v20, %v8725_v7  ;;  %v3647_v54 = vsel %vm3631_vm2, %v3614_v22, %v8806_v59  ;;  %v14220_v58 = vld [vmem:[%s15802_s8 + $0x98] sm:$0xff] }
 0x3c8   : > { %16522 = vst [vmem:[#allocation52_spill] sm:$0xff] %v13704_v3  ;;  %v3646_v60 = vsel %vm3631_vm2, %v3613_v46, %v8805_v41  ;;  %v1406_v32 = vmul.f32 %v16540_v29, %v1182_v35  ;;  %v8731_v59 = vunpack.i.h.bf16 %v16543_v12  ;;  %v8896_v20 = vunpack.i.h.bf16 %v16547_v25  ;;  %v16551_v29 = vld [vmem:[#allocation60_spill] sm:$0xff]  ;;  %v14209_v3 = vld [vmem:[%s15802_s8 + $0x88] sm:$0xff] }
 0x3c9   : > { %4910 = vperm.xlu0 %9090, %v16525_v49   ;;  %v3681_v40 = vsel %vm347_vm0, %v16537_v44, %v8891_v55  ;;  %v3680_v49 = vsel %vm347_vm0, %v2014_v15, %v8890_v28  ;;  %v16541_v55 = vld [vmem:[#allocation124_spill] sm:$0xff]  ;;  %v16542_v28 = vld [vmem:[#allocation78_spill] sm:$0xff]  ;;  %v3781_v15 = vpack.c.bf16 %v3647_v54, %v3646_v60  ;;  %v9056_v22 = vunpack.i.h.bf16 %v13510_v8 }
 0x3ca   : > { %v13719_v52 = vpop.permute.xlu0 %4514  ;;  %4906 = vperm.xlu1 %9091, %v16529_v26   ;;  %v3712_v57 = vsel %vm3598_vm1, %v3680_v49, %v8970_v47  ;;  %v3713_v36 = vsel %vm3598_vm1, %v3681_v40, %v8971_v27  ;;  %v1407_v26 = vmul.f32 %v16539_v38, %v1183_v19  ;;  %v8650_v41 = vunpack.i.l.bf16 %v16542_v28  ;;  %v16545_v27 = vld [vmem:[#allocation120_spill] sm:$0xff]  ;;  %v2016_v54 = vld [vmem:[#allocation2 + $0xa0] sm:$0xff] }
 0x3cb   : > { %16528 = vst [vmem:[#allocation125_spill] sm:$0xff] %v13719_v52  ;;  %v13725_v13 = vpop.permute.xlu1 %4529  ;;  %v3744_v7 = vsel %vm3631_vm2, %v3712_v57, %v9050_v33  ;;  %v3745_v24 = vsel %vm3631_vm2, %v3713_v36, %v9051_v50  ;;  %v8730_v47 = vunpack.i.l.bf16 %v16543_v12  ;;  %v8895_v33 = vunpack.i.l.bf16 %v16547_v25  ;;  %v16549_v44 = vld [vmem:[#allocation112_spill] sm:$0xff]  ;;  %v2017_v36 = vld [vmem:[#allocation2 + $0xa8] sm:$0xff]  ;;  %v16554_v25 = vld [vmem:[#allocation33_spill] sm:$0xff] }
 0x3cc   : > { %16532 = vst [vmem:[#allocation135_spill] sm:$0xff] %v13725_v13  ;;  %v8976_v40 = vunpack.i.h.bf16 %v16549_v44  ;;  %v8975_v49 = vunpack.i.l.bf16 %v16549_v44  ;;  %v3785_v46 = vpack.c.bf16 %v3745_v24, %v3744_v7  ;;  %v9055_v19 = vunpack.i.l.bf16 %v13510_v8  ;;  %v9723_v12 = vld [vmem:[#allocation2 + $0x97] sm:$0xff]  ;;  %v2029_v13 = vld [vmem:[#allocation2 + $0x108] sm:$0xff] }
 0x3cd   : > { %4918 = vperm.xlu0 %9090, %v16534_v51   ;;  %4088 = vmatmul.mubr.bf16.gmra.mxu0 %v3778_v9  ;;  %v8651_v9 = vunpack.i.h.bf16 %v16542_v28  ;;  %v16546_v51 = vld [vmem:[#allocation38_spill] sm:$0xff]  ;;  %v3582_v60 = vsel %vm347_vm0, %v1406_v32, %v8650_v41  ;;  %v3682_v7 = vsel %vm347_vm0, %v2016_v54, %v8895_v33  ;;  %v16555_v33 = vld [vmem:[#allocation88_spill] sm:$0xff] }
 0x3ce   : > { %v13735_v63 = vpop.permute.xlu0 %4524  ;;  %4095 = vmatprep.mubr.bf16.mxu0 %v3782_v31  ;;  %4914 = vperm.xlu1 %9091, %v16536_v39   ;;  %v8811_v35 = vunpack.i.h.bf16 %v16546_v51  ;;  %v8810_v39 = vunpack.i.l.bf16 %v16546_v51  ;;  %v3615_v8 = vsel %vm3598_vm1, %v3582_v60, %v8730_v47  ;;  %v16559_v60 = vld [vmem:[#allocation41_spill] sm:$0xff] }
 0x3cf   : > { %16535 = vst [vmem:[#allocation154_spill] sm:$0xff] %v13735_v63  ;;  %v13743_v2 = vpop.permute.xlu1 %4539  ;;  %v3583_v57 = vsel %vm347_vm0, %v1407_v26, %v8651_v9  ;;  %v1185_v26 = vld [vmem:[#allocation2 + $0x9f] sm:$0xff]  ;;  %v3714_v9 = vsel %vm3598_vm1, %v3682_v7, %v8975_v49 }
 0x3d0   : > { %16538 = vst [vmem:[#allocation48_spill] sm:$0xff] %v13743_v2  ;;  %v3648_v32 = vsel %vm3631_vm2, %v3615_v8, %v8810_v39  ;;  %v8655_v39 = vunpack.i.l.bf16 %v16555_v33 }
 0x3d1   : > { %4926 = vperm.xlu0 %9090, %v16541_v55   ;;  %v3683_v55 = vsel %vm347_vm0, %v2017_v36, %v8896_v20  ;;  %v1409_v20 = vmul.f32 %v16554_v25, %v1185_v26 }
 0x3d2   : > { %v13758_v31 = vpop.permute.xlu0 %4534  ;;  %4922 = vperm.xlu1 %9091, %v16545_v27   ;;  %v3715_v41 = vsel %vm3598_vm1, %v3683_v55, %v8976_v40  ;;  %v16553_v27 = vld [vmem:[#allocation26_spill] sm:$0xff] }
 0x3d3   : > { %16544 = vst [vmem:[#allocation129_spill] sm:$0xff] %v13758_v31  ;;  %v13764_v50 = vpop.permute.xlu1 %4549  ;;  %v1408_v51 = vmul.f32 %v9723_v12, %v16553_v27  ;;  %v3747_v47 = vsel %vm3631_vm2, %v3715_v41, %v9056_v22  ;;  %v9724_v41 = vld [vmem:[#allocation2 + $0xb8] sm:$0xff]  ;;  %v2028_v31 = vld [vmem:[#allocation2 + $0x100] sm:$0xff] }
 0x3d4   : > { %16548 = vst [vmem:[#allocation139_spill] sm:$0xff] %v13764_v50 }
 0x3d5   : > { %4934 = vperm.xlu0 %9090, %v13270_v10   ;;  %4096 = vmatmul.mubr.bf16.gmra.mxu0 %v3781_v15  ;;  %v3616_v10 = vsel %vm3598_vm1, %v3583_v57, %v8731_v59  ;;  %v3746_v59 = vsel %vm3631_vm2, %v3714_v9, %v9055_v19  ;;  %v8656_v15 = vunpack.i.h.bf16 %v16555_v33  ;;  %v8900_v19 = vunpack.i.l.bf16 %v16559_v60  ;;  %v9725_v33 = vld [vmem:[#allocation2 + $0xa7] sm:$0xff] }
 0x3d6   : > { %v13774_v38 = vpop.permute.xlu0 %4544  ;;  %4103 = vmatprep.mubr.bf16.mxu0 %v3785_v46  ;;  %4930 = vperm.xlu1 %9091, %v16551_v29   ;;  %v3649_v28 = vsel %vm3631_vm2, %v3616_v10, %v8811_v35  ;;  %v16556_v35 = vld [vmem:[#allocation100_spill] sm:$0xff]  ;;  %v16558_v46 = vld [vmem:[#allocation105_spill] sm:$0xff]  ;;  %v16561_v29 = vld [vmem:[#allocation67_spill] sm:$0xff]  ;;  %v3788_v8 = vpack.c.bf16 %v3747_v47, %v3746_v59  ;;  %v9061_v10 = vunpack.i.h.bf16 %v13564_v14 }
 0x3d7   : > { %16550 = vst [vmem:[#allocation158_spill] sm:$0xff] %v13774_v38  ;;  %v13781_v24 = vpop.permute.xlu1 %4559  ;;  %v8736_v44 = vunpack.i.h.bf16 %v16556_v35  ;;  %v8735_v49 = vunpack.i.l.bf16 %v16556_v35  ;;  %v8816_v57 = vunpack.i.h.bf16 %v16558_v46  ;;  %v3784_v54 = vpack.c.bf16 %v3649_v28, %v3648_v32  ;;  %v2018_v28 = vld [vmem:[#allocation2 + $0xb0] sm:$0xff] }
 0x3d8   : > { %16552 = vst [vmem:[#allocation15_spill] sm:$0xff] %v13781_v24  ;;  %v8815_v36 = vunpack.i.l.bf16 %v16558_v46  ;;  %v8981_v55 = vunpack.i.h.bf16 %v16561_v29  ;;  %v8980_v7 = vunpack.i.l.bf16 %v16561_v29  ;;  %v3585_v26 = vsel %vm347_vm0, %v1409_v20, %v8656_v15  ;;  %v1187_v20 = vld [vmem:[#allocation2 + $0xaf] sm:$0xff] }
 0x3d9   : > { %4942 = vperm.xlu0 %9090, %v13286_v17   ;;  %v8901_v17 = vunpack.i.h.bf16 %v16559_v60  ;;  %v3584_v32 = vsel %vm347_vm0, %v1408_v51, %v8655_v39  ;;  %v3684_v27 = vsel %vm347_vm0, %v2018_v28, %v8900_v19  ;;  %v16564_v15 = vld [vmem:[#allocation28_spill] sm:$0xff]  ;;  %v16566_v60 = vld [vmem:[#allocation102_spill] sm:$0xff] }
 0x3da   : > { %v13796_v40 = vpop.permute.xlu0 %4554  ;;  %4938 = vperm.xlu1 %9091, %v13260_v37   ;;  %v9060_v37 = vunpack.i.l.bf16 %v13564_v14  ;;  %v3617_v14 = vsel %vm3598_vm1, %v3584_v32, %v8735_v49  ;;  %v3716_v47 = vsel %vm3598_vm1, %v3684_v27, %v8980_v7  ;;  %v1410_v39 = vmul.f32 %v9725_v33, %v16564_v15  ;;  %v16565_v35 = vld [vmem:[#allocation80_spill] sm:$0xff] }
 0x3db   : > { %16557 = vst [vmem:[#allocation133_spill] sm:$0xff] %v13796_v40  ;;  %v13802_v22 = vpop.permute.xlu1 %4569  ;;  %v3685_v12 = vsel %vm347_vm0, %v9724_v41, %v8901_v17  ;;  %v3650_v51 = vsel %vm3631_vm2, %v3617_v14, %v8815_v36  ;;  %v1411_v46 = vmul.f32 %v16565_v35, %v1187_v20  ;;  %v8661_v17 = vunpack.i.h.bf16 %v16566_v60  ;;  %v16572_v28 = vld [vmem:[#allocation68_spill] sm:$0xff]  ;;  %v1189_v35 = vld [vmem:[#allocation2 + $0xbf] sm:$0xff] }
 0x3dc   : > { %16560 = vst [vmem:[#allocation143_spill] sm:$0xff] %v13802_v22  ;;  %v8660_v19 = vunpack.i.l.bf16 %v16566_v60  ;;  %v8986_v41 = vunpack.i.h.bf16 %v16572_v28  ;;  %v9066_v14 = vunpack.i.h.bf16 %v13531_v53  ;;  %v2026_v22 = vld [vmem:[#allocation2 + $0xf0] sm:$0xff] }
 0x3dd   : > { %4950 = vperm.xlu0 %9090, %v13302_v43   ;;  %4104 = vmatmul.mubr.bf16.gmra.mxu0 %v3784_v54  ;;  %v3618_v43 = vsel %vm3598_vm1, %v3585_v26, %v8736_v44  ;;  %v3748_v44 = vsel %vm3631_vm2, %v3716_v47, %v9060_v37  ;;  %v16605_v40 = vld [vmem:[#allocation96_spill] sm:$0xff] }
 0x3de   : > { %v13812_v9 = vpop.permute.xlu0 %4564  ;;  %4111 = vmatprep.mubr.bf16.mxu0 %v3788_v8  ;;  %4946 = vperm.xlu1 %9091, %v13276_v6   ;;  %v3651_v59 = vsel %vm3631_vm2, %v3618_v43, %v8816_v57  ;;  %v3717_v6 = vsel %vm3598_vm1, %v3685_v12, %v8981_v55  ;;  %v16567_v57 = vld [vmem:[#allocation87_spill] sm:$0xff]  ;;  %v16569_v55 = vld [vmem:[#allocation132_spill] sm:$0xff]  ;;  %v8985_v12 = vunpack.i.l.bf16 %v16572_v28  ;;  %v3587_v43 = vsel %vm347_vm0, %v1411_v46, %v8661_v17 }
 0x3df   : > { %16562 = vst [vmem:[#allocation57_spill] sm:$0xff] %v13812_v9  ;;  %v13819_v25 = vpop.permute.xlu1 %4579  ;;  %v3749_v49 = vsel %vm3631_vm2, %v3717_v6, %v9061_v10  ;;  %v8741_v54 = vunpack.i.h.bf16 %v16567_v57  ;;  %v8740_v36 = vunpack.i.l.bf16 %v16567_v57  ;;  %v8821_v7 = vunpack.i.h.bf16 %v16569_v55  ;;  %v16570_v8 = vld [vmem:[#allocation63_spill] sm:$0xff]  ;;  %v13855_v6 = vld [vmem:[%s15802_s8 + $0xb0] sm:$0xff] }
 0x3e0   : > { %16563 = vst [vmem:[#allocation54_spill] sm:$0xff] %v13819_v25  ;;  %v8905_v37 = vunpack.i.l.bf16 %v16570_v8  ;;  %v3787_v26 = vpack.c.bf16 %v3651_v59, %v3650_v51  ;;  %v8820_v32 = vunpack.i.l.bf16 %v16569_v55  ;;  %v3791_v27 = vpack.c.bf16 %v3749_v49, %v3748_v44  ;;  %v2020_v51 = vld [vmem:[#allocation2 + $0xc0] sm:$0xff]  ;;  %v2021_v59 = vld [vmem:[#allocation2 + $0xc8] sm:$0xff]  ;;  %v9727_v17 = vld [vmem:[#allocation2 + $0xb7] sm:$0xff] }
 0x3e1   : > { %4958 = vperm.xlu0 %9090, %v13318_v21   ;;  %v8906_v21 = vunpack.i.h.bf16 %v16570_v8  ;;  %v3586_v20 = vsel %vm347_vm0, %v1410_v39, %v8660_v19  ;;  %v3620_v15 = vsel %vm3598_vm1, %v3587_v43, %v8741_v54  ;;  %v16575_v19 = vld [vmem:[#allocation32_spill] sm:$0xff]  ;;  %v16576_v55 = vld [vmem:[#allocation90_spill] sm:$0xff]  ;;  %v13873_v54 = vld [vmem:[%s15802_s8 + $0xc8] sm:$0xff]  ;;  %v16595_v25 = vmov 3  }
 0x3e2   : > { %v13834_v29 = vpop.permute.xlu0 %4574  ;;  %4954 = vperm.xlu1 %9091, %v13292_v5   ;;  %v9065_v5 = vunpack.i.l.bf16 %v13531_v53  ;;  %v3619_v33 = vsel %vm3598_vm1, %v3586_v20, %v8740_v36  ;;  %v3653_v44 = vsel %vm3631_vm2, %v3620_v15, %v8821_v7  ;;  %v1412_v57 = vmul.f32 %v9727_v17, %v16575_v19  ;;  %v13903_v19 = vld [vmem:[%s15802_s8 + $0xd8] sm:$0xff] }
 0x3e3   : > { %16568 = vst [vmem:[#allocation137_spill] sm:$0xff] %v13834_v29  ;;  %v13840_v10 = vpop.permute.xlu1 %4589  ;;  %v3687_v53 = vsel %vm347_vm0, %v2021_v59, %v8906_v21  ;;  %v3652_v46 = vsel %vm3631_vm2, %v3619_v33, %v8820_v32  ;;  %v1413_v8 = vmul.f32 %v16576_v55, %v1189_v35  ;;  %v16577_v21 = vld [vmem:[#allocation72_spill] sm:$0xff]  ;;  %v16583_v33 = vld [vmem:[#allocation123_spill] sm:$0xff]  ;;  %v9070_v17 = vunpack.i.l.bf16 %v13580_v4 }
 0x3e4   : > { %16571 = vst [vmem:[#allocation147_spill] sm:$0xff] %v13840_v10  ;;  %v3719_v60 = vsel %vm3598_vm1, %v3687_v53, %v8986_v41  ;;  %v16578_v32 = vld [vmem:[#allocation104_spill] sm:$0xff]  ;;  %v3790_v59 = vpack.c.bf16 %v3653_v44, %v3652_v46  ;;  %v8991_v15 = vunpack.i.h.bf16 %v16583_v33  ;;  %v8990_v35 = vunpack.i.l.bf16 %v16583_v33 }
 0x3e5   : > { %4966 = vperm.xlu0 %9090, %v13334_v56   ;;  %4112 = vmatmul.mubr.bf16.gmra.mxu0 %v3787_v26  ;;  %v3686_v56 = vsel %vm347_vm0, %v2020_v51, %v8905_v37  ;;  %v3751_v7 = vsel %vm3631_vm2, %v3719_v60, %v9066_v14  ;;  %v8666_v37 = vunpack.i.h.bf16 %v16577_v21  ;;  %v8665_v26 = vunpack.i.l.bf16 %v16577_v21  ;;  %v16581_v14 = vld [vmem:[#allocation116_spill] sm:$0xff] }
 0x3e6   : > { %v13850_v47 = vpop.permute.xlu0 %4584  ;;  %4119 = vmatprep.mubr.bf16.mxu0 %v3791_v27  ;;  %4962 = vperm.xlu1 %9091, %v13855_v6   ;;  %v3718_v49 = vsel %vm3598_vm1, %v3686_v56, %v8985_v12  ;;  %v8746_v28 = vunpack.i.h.bf16 %v16578_v32  ;;  %v8745_v41 = vunpack.i.l.bf16 %v16578_v32  ;;  %v13887_v27 = vld [vmem:[%s15802_s8 + $0xc0] sm:$0xff]  ;;  %v8911_v20 = vunpack.i.h.bf16 %v16581_v14  ;;  %v2022_v55 = vld [vmem:[#allocation2 + $0xd0] sm:$0xff] }
 0x3e7   : > { %16573 = vst [vmem:[#allocation62_spill] sm:$0xff] %v13850_v47  ;;  %v13862_v39 = vpop.permute.xlu1 %4599  ;;  %v3750_v36 = vsel %vm3631_vm2, %v3718_v49, %v9065_v5  ;;  %v16580_v5 = vld [vmem:[#allocation128_spill] sm:$0xff]  ;;  %v8910_v51 = vunpack.i.l.bf16 %v16581_v14  ;;  %v9071_v60 = vunpack.i.h.bf16 %v13580_v4  ;;  %v3589_v46 = vsel %vm347_vm0, %v1413_v8, %v8666_v37 }
 0x3e8   : > { %16574 = vst [vmem:[#allocation10_spill] sm:$0xff] %v13862_v39  ;;  %v8826_v43 = vunpack.i.h.bf16 %v16580_v5  ;;  %v8825_v56 = vunpack.i.l.bf16 %v16580_v5  ;;  %v3794_v49 = vpack.c.bf16 %v3751_v7, %v3750_v36  ;;  %v3588_v44 = vsel %vm347_vm0, %v1412_v57, %v8665_v26  ;;  %v13913_v4 = vld [vmem:[%s15802_s8 + $0xd0] sm:$0xff]  ;;  %v9732_v36 = vld [vmem:[#allocation2 + $0xd8] sm:$0xff] }
 0x3e9   : > { %4974 = vperm.xlu0 %9090, %v13873_v54   ;;  %v3689_v7 = vsel %vm347_vm0, %v9732_v36, %v8911_v20  ;;  %v3688_v32 = vsel %vm347_vm0, %v2022_v55, %v8910_v51  ;;  %v3621_v8 = vsel %vm3598_vm1, %v3588_v44, %v8745_v41  ;;  %v3622_v57 = vsel %vm3598_vm1, %v3589_v46, %v8746_v28  ;;  %v1191_v37 = vld [vmem:[#allocation2 + $0xcf] sm:$0xff]  ;;  %v13943_v55 = vld [vmem:[%s15802_s8 + $0xe0] sm:$0xff] }
 0x3ea   : > { %v13882_v12 = vpop.permute.xlu0 %4594  ;;  %4970 = vperm.xlu1 %9091, %v13887_v27   ;;  %v3654_v26 = vsel %vm3631_vm2, %v3621_v8, %v8825_v56  ;;  %v3655_v5 = vsel %vm3631_vm2, %v3622_v57, %v8826_v43  ;;  %v3720_v14 = vsel %vm3598_vm1, %v3688_v32, %v8990_v35  ;;  %v16586_v36 = vld [vmem:[#allocation27_spill] sm:$0xff]  ;;  %v16587_v56 = vld [vmem:[#allocation81_spill] sm:$0xff]  ;;  %v9075_v39 = vunpack.i.l.bf16 %v13548_v16 }
 0x3eb   : > { %16579 = vst [vmem:[#allocation141_spill] sm:$0xff] %v13882_v12  ;;  %v13893_v53 = vpop.permute.xlu1 %4609  ;;  %v1415_v51 = vmul.f32 %v16586_v36, %v1191_v37  ;;  %v13931_v28 = vld [vmem:[%s15802_s8 + $0xe8] sm:$0xff]  ;;  %v3752_v41 = vsel %vm3631_vm2, %v3720_v14, %v9070_v17  ;;  %v8670_v35 = vunpack.i.l.bf16 %v16587_v56  ;;  %v16590_v17 = vld [vmem:[#allocation140_spill] sm:$0xff]  ;;  %v3793_v37 = vpack.c.bf16 %v3655_v5, %v3654_v26 }
 0x3ec   : > { %16582 = vst [vmem:[#allocation151_spill] sm:$0xff] %v13893_v53  ;;  %v16585_v53 = vld [vmem:[#allocation36_spill] sm:$0xff]  ;;  %v16588_v46 = vld [vmem:[#allocation111_spill] sm:$0xff]  ;;  %v8916_v8 = vunpack.i.h.bf16 %v16590_v17  ;;  %v8681_v50 = vunpack.i.h.bf16 %v16605_v40 }
 0x3ed   : > { %4982 = vperm.xlu0 %9090, %v13903_v19   ;;  %4120 = vmatmul.mubr.bf16.gmra.mxu0 %v3790_v59  ;;  %v3721_v59 = vsel %vm3598_vm1, %v3689_v7, %v8991_v15  ;;  %v8671_v15 = vunpack.i.h.bf16 %v16587_v56  ;;  %v8751_v44 = vunpack.i.h.bf16 %v16588_v46  ;;  %v16589_v7 = vld [vmem:[#allocation110_spill] sm:$0xff] }
 0x3ee   : > { %v13908_v21 = vpop.permute.xlu0 %4604  ;;  %4127 = vmatprep.mubr.bf16.mxu0 %v3794_v49  ;;  %4978 = vperm.xlu1 %9091, %v13913_v4   ;;  %v9733_v49 = vld [vmem:[#allocation2 + $0xc7] sm:$0xff]  ;;  %v3753_v43 = vsel %vm3631_vm2, %v3721_v59, %v9071_v60  ;;  %v8831_v32 = vunpack.i.h.bf16 %v16589_v7  ;;  %v8915_v60 = vunpack.i.l.bf16 %v16590_v17  ;;  %v8830_v14 = vunpack.i.l.bf16 %v16589_v7  ;;  %v16592_v59 = vld [vmem:[#allocation148_spill] sm:$0xff]  ;;  %v13961_v17 = vld [vmem:[%s15802_s8 + $0xf8] sm:$0xff] }
 0x3ef   : > { %16584 = vst [vmem:[#allocation8_spill] sm:$0xff] %v13908_v21  ;;  %v1414_v20 = vmul.f32 %v9733_v49, %v16585_v53  ;;  %v8750_v53 = vunpack.i.l.bf16 %v16588_v46  ;;  %v8996_v49 = vunpack.i.h.bf16 %v16592_v59  ;;  %v8995_v36 = vunpack.i.l.bf16 %v16592_v59  ;;  %v2024_v7 = vld [vmem:[#allocation2 + $0xe0] sm:$0xff] }
 0x3f0   : > { %v13924_v33 = vpop.permute.xlu1 %4682  ;;  %v3797_v56 = vpack.c.bf16 %v3753_v43, %v3752_v41  ;;  %v9076_v21 = vunpack.i.h.bf16 %v13548_v16  ;;  %v3591_v26 = vsel %vm347_vm0, %v1415_v51, %v8671_v15  ;;  %v2025_v41 = vld [vmem:[#allocation2 + $0xe8] sm:$0xff]  ;;  %v13969_v43 = vld [vmem:[%s15802_s8 + $0xf0] sm:$0xff]  ;;  %v3690_v59 = vsel %vm347_vm0, %v2024_v7, %v8915_v60  ;;  %v1193_v15 = vld [vmem:[#allocation2 + $0xdf] sm:$0xff] }
 0x3f1   : > { %4990 = vperm.xlu0 %9090, %v13931_v28   ;;  %v3590_v5 = vsel %vm347_vm0, %v1414_v20, %v8670_v35  ;;  %v3691_v16 = vsel %vm347_vm0, %v2025_v41, %v8916_v8  ;;  %v3624_v20 = vsel %vm3598_vm1, %v3591_v26, %v8751_v44  ;;  %v9738_v8 = vld [vmem:[#allocation2 + $0xd7] sm:$0xff] }
 0x3f2   : > { %4986 = vperm.xlu1 %9091, %v13943_v55   ;;  %v13949_v57 = vpop.permute.xlu0 %4614  ;;  %v3623_v51 = vsel %vm3598_vm1, %v3590_v5, %v8750_v53  ;;  %v3723_v12 = vsel %vm3598_vm1, %v3691_v16, %v8996_v49  ;;  %v16593_v41 = vld [vmem:[#allocation40_spill] sm:$0xff]  ;;  %v13996_v16 = vld [vmem:[%s15802_s8 + $0x8] sm:$0xff] }
 0x3f3   : > { %16591 = vst [vmem:[#allocation7_spill] sm:$0xff] %v13949_v57  ;;  %v3656_v35 = vsel %vm3631_vm2, %v3623_v51, %v8830_v14  ;;  %v1416_v60 = vmul.f32 %v9738_v8, %v16593_v41  ;;  %v16594_v7 = vld [vmem:[#allocation44_spill] sm:$0xff]  ;;  %v3755_v53 = vsel %vm3631_vm2, %v3723_v12, %v9076_v21  ;;  %v16599_v12 = vld [vmem:[#allocation61_spill] sm:$0xff] }
 0x3f4   : > { %v13954_v46 = vpop.permute.xlu1 %4690  ;;  %v1417_v47 = vmul.f32 %v16594_v7, %v1193_v15  ;;  %v16596_v14 = vld [vmem:[#allocation92_spill] sm:$0xff]  ;;  %v8921_v21 = vunpack.i.h.bf16 %v16599_v12  ;;  %v8920_v51 = vunpack.i.l.bf16 %v16599_v12  ;;  %v16600_v41 = vld [vmem:[#allocation69_spill] sm:$0xff]  ;;  %v9081_v12 = vunpack.i.h.bf16 %v13603_v48 }
 0x3f5   : > { %4998 = vperm.xlu0 %9090, %v13961_v17   ;;  %4128 = vmatmul.mubr.bf16.gmra.mxu0 %v3793_v37  ;;  %v3657_v37 = vsel %vm3631_vm2, %v3624_v20, %v8831_v32  ;;  %v8676_v26 = vunpack.i.h.bf16 %v16596_v14  ;;  %v8675_v32 = vunpack.i.l.bf16 %v16596_v14  ;;  %v9000_v7 = vunpack.i.l.bf16 %v16600_v41 }
 0x3f6   : > { %4135 = vmatprep.mubr.bf16.mxu0 %v3797_v56  ;;  %4994 = vperm.xlu1 %9091, %v13969_v43   ;;  %v3722_v56 = vsel %vm3598_vm1, %v3690_v59, %v8995_v36  ;;  %v16597_v36 = vld [vmem:[#allocation108_spill] sm:$0xff]  ;;  %v3796_v15 = vpack.c.bf16 %v3657_v37, %v3656_v35  ;;  %v9080_v35 = vunpack.i.l.bf16 %v13603_v48 }
 0x3f7   : > { %v13974_v57 = vpop.permute.xlu0 %4686  ;;  %v3754_v44 = vsel %vm3631_vm2, %v3722_v56, %v9075_v39  ;;  %v8756_v5 = vunpack.i.h.bf16 %v16597_v36  ;;  %v8755_v49 = vunpack.i.l.bf16 %v16597_v36  ;;  %v16598_v39 = vld [vmem:[#allocation126_spill] sm:$0xff]  ;;  %v3593_v37 = vsel %vm347_vm0, %v1417_v47, %v8676_v26  ;;  %v14035_v26 = vld [vmem:[%s15802_s8 + $0x10] sm:$0xff] }
 0x3f8   : > { %v13982_v10 = vpop.permute.xlu1 %4694  ;;  %v8836_v59 = vunpack.i.h.bf16 %v16598_v39  ;;  %v14008_v56 = vld [vmem:[%s15802_s8] sm:$0xff]  ;;  %v8835_v8 = vunpack.i.l.bf16 %v16598_v39  ;;  %v3800_v14 = vpack.c.bf16 %v3755_v53, %v3754_v44  ;;  %v3592_v29 = vsel %vm347_vm0, %v1416_v60, %v8675_v32  ;;  %v9742_v44 = vld [vmem:[#allocation2 + $0xf8] sm:$0xff]  ;;  %v1195_v32 = vld [vmem:[#allocation2 + $0xef] sm:$0xff] }
 0x3f9   : > { %9093 = vset.pattern.permute.xlu0 %v16595_v25  ;;  %v14023_v39 = vld [vmem:[%s15802_s8 + $0x20] sm:$0xff]  ;;  %v3693_v53 = vsel %vm347_vm0, %v9742_v44, %v8921_v21  ;;  %v3625_v47 = vsel %vm3598_vm1, %v3592_v29, %v8755_v49  ;;  %v3626_v60 = vsel %vm3598_vm1, %v3593_v37, %v8756_v5  ;;  %v16603_v5 = vld [vmem:[#allocation43_spill] sm:$0xff]  ;;  %v16604_v37 = vld [vmem:[#allocation84_spill] sm:$0xff] }
 0x3fa   : > { %5070 = vperm.xlu0 %9093, %v13996_v16   ;;  %9092 = vset.pattern.permute.xlu1 %v16595_v25  ;;  %v9001_v25 = vunpack.i.h.bf16 %v16600_v41  ;;  %v3692_v41 = vsel %vm347_vm0, %v2026_v22, %v8920_v51  ;;  %v3659_v21 = vsel %vm3631_vm2, %v3626_v60, %v8836_v59  ;;  %v9744_v29 = vld [vmem:[#allocation2 + $0xe7] sm:$0xff]  ;;  %v1419_v44 = vmul.f32 %v16604_v37, %v1195_v32  ;;  %v16606_v59 = vld [vmem:[#allocation49_spill] sm:$0xff] }
 0x3fb   : > { %v14003_v20 = vpop.permute.xlu0 %4698  ;;  %5066 = vperm.xlu1 %9092, %v14008_v56   ;;  %v3724_v22 = vsel %vm3598_vm1, %v3692_v41, %v9000_v7  ;;  %v1418_v49 = vmul.f32 %v9744_v29, %v16603_v5  ;;  %v8760_v7 = vunpack.i.l.bf16 %v16606_v59  ;;  %v16610_v29 = vld [vmem:[#allocation115_spill] sm:$0xff] }
 0x3fc   : > { %v14014_v36 = vpop.permute.xlu1 %4702  ;;  %v3725_v51 = vsel %vm3598_vm1, %v3693_v53, %v9001_v25  ;;  %v3756_v9 = vsel %vm3631_vm2, %v3724_v22, %v9080_v35  ;;  %v14055_v25 = vld [vmem:[%s15802_s8 + $0x30] sm:$0xff]  ;;  %v16608_v35 = vld [vmem:[#allocation109_spill] sm:$0xff]  ;;  %v9006_v5 = vunpack.i.h.bf16 %v16610_v29  ;;  %v9005_v37 = vunpack.i.l.bf16 %v16610_v29 }
 0x3fd   : > { %4136 = vmatmul.mubr.bf16.gmra.mxu0 %v3796_v15  ;;  %v3658_v15 = vsel %vm3631_vm2, %v3625_v47, %v8835_v8  ;;  %v3757_v24 = vsel %vm3631_vm2, %v3725_v51, %v9081_v12  ;;  %v8680_v8 = vunpack.i.l.bf16 %v16605_v40  ;;  %v8761_v47 = vunpack.i.h.bf16 %v16606_v59  ;;  %v16607_v53 = vld [vmem:[#allocation136_spill] sm:$0xff]  ;;  %v14066_v22 = vld [vmem:[%s15802_s8 + $0x18] sm:$0xff] }
 0x3fe   : > { %5082 = vperm.xlu0 %9093, %v14023_v39   ;;  %4143 = vmatprep.mubr.bf16.mxu0 %v3800_v14  ;;  %v8841_v41 = vunpack.i.h.bf16 %v16607_v53  ;;  %v8926_v60 = vunpack.i.h.bf16 %v16608_v35  ;;  %v8925_v12 = vunpack.i.l.bf16 %v16608_v35  ;;  %v3799_v40 = vpack.c.bf16 %v3659_v21, %v3658_v15 }
 0x3ff   : > { %v14028_v48 = vpop.permute.xlu0 %4706  ;;  %5074 = vperm.xlu1 %9092, %v14035_v26   ;;  %v8840_v51 = vunpack.i.l.bf16 %v16607_v53  ;;  %v3803_v59 = vpack.c.bf16 %v3757_v24, %v3756_v9  ;;  %v9086_v35 = vunpack.i.h.bf16 %v13569_v30  ;;  %v9085_v15 = vunpack.i.l.bf16 %v13569_v30  ;;  %v14081_v53 = vld [vmem:[%s15802_s8 + $0x40] sm:$0xff] }
 0x400   : > { %16601 = vst [vmem:[#allocation145_spill] sm:$0xff] %v14028_v48  ;;  %v14042_v14 = vpop.permute.xlu1 %4710  ;;  %v3595_v21 = vsel %vm347_vm0, %v1419_v44, %v8681_v50  ;;  %v3594_v2 = vsel %vm347_vm0, %v1418_v49, %v8680_v8  ;;  %v3695_v24 = vsel %vm347_vm0, %v2029_v13, %v8926_v60  ;;  %v3694_v9 = vsel %vm347_vm0, %v2028_v31, %v8925_v12  ;;  %v14093_v44 = vld [vmem:[%s15802_s8 + $0x28] sm:$0xff] }
 0x401   : > { %16602 = vst [vmem:[#allocation155_spill] sm:$0xff] %v14042_v14  ;;  %v3627_v50 = vsel %vm3598_vm1, %v3594_v2, %v8760_v7  ;;  %v3628_v49 = vsel %vm3598_vm1, %v3595_v21, %v8761_v47  ;;  %v3726_v13 = vsel %vm3598_vm1, %v3694_v9, %v9005_v37  ;;  %v3727_v31 = vsel %vm3598_vm1, %v3695_v24, %v9006_v5  ;;  %v16614_v7 = vld [vmem:[#allocation73_spill] sm:$0xff]  ;;  %v16615_v37 = vld [vmem:[#allocation46_spill] sm:$0xff] }
 0x402   : > { %5090 = vperm.xlu0 %9093, %v14055_v25   ;;  %v3660_v8 = vsel %vm3631_vm2, %v3627_v50, %v8840_v51  ;;  %v3758_v2 = vsel %vm3631_vm2, %v3726_v13, %v9085_v15  ;;  %v3759_v47 = vsel %vm3631_vm2, %v3727_v31, %v9086_v35  ;;  %v8686_v12 = vunpack.i.h.bf16 %v16614_v7  ;;  %v14109_v51 = vld [vmem:[%s15802_s8 + $0x50] sm:$0xff]  ;;  %v16616_v21 = vld [vmem:[#allocation97_spill] sm:$0xff]  ;;  %v16619_v31 = vld [vmem:[#allocation42_spill] sm:$0xff] }
 0x403   : > { %v14061_v32 = vpop.permute.xlu0 %4714  ;;  %5078 = vperm.xlu1 %9092, %v14066_v22   ;;  %v8685_v29 = vunpack.i.l.bf16 %v16614_v7  ;;  %v8766_v24 = vunpack.i.h.bf16 %v16616_v21  ;;  %v8765_v15 = vunpack.i.l.bf16 %v16616_v21  ;;  %v14120_v50 = vld [vmem:[%s15802_s8 + $0x38] sm:$0xff]  ;;  %v8846_v7 = vunpack.i.h.bf16 %v16619_v31 }
 0x404   : > { %16609 = vst [vmem:[#allocation17_spill] sm:$0xff] %v14061_v32  ;;  %v14072_v38 = vpop.permute.xlu1 %4718 }
 0x405   : > { %16611 = vst [vmem:[#allocation9_spill] sm:$0xff] %v14072_v38  ;;  %4144 = vmatmul.mubr.bf16.gmra.mxu0 %v3799_v40  ;;  %v3661_v40 = vsel %vm3631_vm2, %v3628_v49, %v8841_v41  ;;  %v9750_v41 = vld [vmem:[#allocation2 + $0xf7] sm:$0xff]  ;;  %v16618_v49 = vld [vmem:[#allocation94_spill] sm:$0xff] }
 0x406   : > { %5098 = vperm.xlu0 %9093, %v14081_v53   ;;  %4151 = vmatprep.mubr.bf16.mxu0 %v3803_v59  ;;  %v1420_v5 = vmul.f32 %v9750_v41, %v16615_v37  ;;  %v1197_v59 = vld [vmem:[#allocation2 + $0xff] sm:$0xff]  ;;  %v3802_v9 = vpack.c.bf16 %v3661_v40, %v3660_v8  ;;  %v8845_v41 = vunpack.i.l.bf16 %v16619_v31  ;;  %v3806_v37 = vpack.c.bf16 %v3759_v47, %v3758_v2  ;;  %v14143_v47 = vld [vmem:[%s15802_s8 + $0x48] sm:$0xff] }
 0x407   : > { %v14086_v30 = vpop.permute.xlu0 %4722  ;;  %5086 = vperm.xlu1 %9092, %v14093_v44   ;;  %v1421_v13 = vmul.f32 %v16618_v49, %v1197_v59  ;;  %v14133_v40 = vld [vmem:[%s15802_s8 + $0x60] sm:$0xff] }
 0x408   : > { %16612 = vst [vmem:[#allocation149_spill] sm:$0xff] %v14086_v30  ;;  %v14100_v60 = vpop.permute.xlu1 %4726  ;;  %v3596_v8 = vsel %vm347_vm0, %v1420_v5, %v8685_v29 }
 0x409   : > { %16613 = vst [vmem:[#allocation159_spill] sm:$0xff] %v14100_v60  ;;  %v3597_v21 = vsel %vm347_vm0, %v1421_v13, %v8686_v12  ;;  %v3629_v49 = vsel %vm3598_vm1, %v3596_v8, %v8765_v15  ;;  %v14161_v13 = vld [vmem:[%s15802_s8 + $0x58] sm:$0xff]  ;;  %v14185_v8 = vld [vmem:[%s15802_s8 + $0x90] sm:$0xff] }
 0x40a   : > { %5106 = vperm.xlu0 %9093, %v14109_v51   ;;  %v3630_v2 = vsel %vm3598_vm1, %v3597_v21, %v8766_v24  ;;  %v3662_v12 = vsel %vm3631_vm2, %v3629_v49, %v8845_v41 }
 0x40b   : > { %v14115_v35 = vpop.permute.xlu0 %4730  ;;  %5094 = vperm.xlu1 %9092, %v14120_v50   ;;  %v3663_v29 = vsel %vm3631_vm2, %v3630_v2, %v8846_v7  ;;  %v14169_v7 = vld [vmem:[%s15802_s8 + $0x80] sm:$0xff]  ;;  %v14193_v2 = vld [vmem:[%s15802_s8 + $0x78] sm:$0xff] }
 0x40c   : > { %16617 = vst [vmem:[#allocation59_spill] sm:$0xff] %v14115_v35  ;;  %v14126_v63 = vpop.permute.xlu1 %4734  ;;  %v3805_v15 = vpack.c.bf16 %v3663_v29, %v3662_v12  ;;  %v14201_v29 = vld [vmem:[%s15802_s8 + $0xa0] sm:$0xff] }
 0x40d   : > { %16620 = vst [vmem:[#allocation13_spill] sm:$0xff] %v14126_v63  ;;  %4152 = vmatmul.mubr.bf16.gmra.mxu0 %v3802_v9  ;;  %v14153_v9 = vld [vmem:[%s15802_s8 + $0x70] sm:$0xff] }
 0x40e   : > { %5114 = vperm.xlu0 %9093, %v14133_v40   ;;  %4159 = vmatprep.mubr.bf16.mxu0 %v3806_v37  ;;  %v14177_v37 = vld [vmem:[%s15802_s8 + $0x68] sm:$0xff] }
 0x40f   : > { %v14136_v59 = vpop.permute.xlu0 %4738  ;;  %5102 = vperm.xlu1 %9092, %v14143_v47  }
 0x410   : > { %16621 = vst [vmem:[#allocation153_spill] sm:$0xff] %v14136_v59  ;;  %v14148_v5 = vpop.permute.xlu1 %4742 }
 0x411   : > { %16622 = vst [vmem:[#allocation19_spill] sm:$0xff] %v14148_v5 }
 0x412   : > { %5122 = vperm.xlu0 %9093, %v14153_v9  }
 0x413   : > { %v14156_v24 = vpop.permute.xlu0 %4746  ;;  %5110 = vperm.xlu1 %9092, %v14161_v13  }
 0x414   : > { %16623 = vst [vmem:[#allocation12_spill] sm:$0xff] %v14156_v24  ;;  %v14164_v31 = vpop.permute.xlu1 %4750 }
 0x415   : > { %16624 = vst [vmem:[#allocation157_spill] sm:$0xff] %v14164_v31  ;;  %4160 = vmatmul.mubr.bf16.gmra.mxu0 %v3805_v15 }
 0x416   : > { %5130 = vperm.xlu0 %9093, %v14169_v7  }
 0x417   : > { %v14172_v41 = vpop.permute.xlu0 %4754  ;;  %5118 = vperm.xlu1 %9092, %v14177_v37  }
 0x418   : > { %16625 = vst [vmem:[#allocation11_spill] sm:$0xff] %v14172_v41  ;;  %v14180_v21 = vpop.permute.xlu1 %4758 }
 0x419   : > { %16626 = vst [vmem:[#allocation50_spill] sm:$0xff] %v14180_v21 }
 0x41a   : > { %5138 = vperm.xlu0 %9093, %v14185_v8  }
 0x41b   : > { %v14188_v49 = vpop.permute.xlu0 %4762  ;;  %5126 = vperm.xlu1 %9092, %v14193_v2  }
 0x41c   : > { %16627 = vst [vmem:[#allocation31_spill] sm:$0xff] %v14188_v49  ;;  %v14196_v12 = vpop.permute.xlu1 %4766 }
 0x41d   : > { %16628 = vst [vmem:[#allocation16_spill] sm:$0xff] %v14196_v12 }
 0x41e   : > { %5146 = vperm.xlu0 %9093, %v14201_v29  }
 0x41f   : > { %v14204_v15 = vpop.permute.xlu0 %4770  ;;  %5134 = vperm.xlu1 %9092, %v14209_v3  }
 0x420   : > { %16629 = vst [vmem:[#allocation18_spill] sm:$0xff] %v14204_v15  ;;  %v14212_v52 = vpop.permute.xlu1 %4774 }
 0x421   : > { %16630 = vst [vmem:[#allocation64_spill] sm:$0xff] %v14212_v52 }
 0x422   : > { %5154 = vperm.xlu0 %9093, %v13855_v6  }
 0x423   : > { %v14215_v34 = vpop.permute.xlu0 %4778  ;;  %5142 = vperm.xlu1 %9092, %v14220_v58  }
 0x424   : > { %16631 = vst [vmem:[#allocation66_spill] sm:$0xff] %v14215_v34  ;;  %v14223_v1 = vpop.permute.xlu1 %4782 }
 0x425   : > { %16632 = vst [vmem:[#allocation20_spill] sm:$0xff] %v14223_v1 }
 0x426   : > { %5162 = vperm.xlu0 %9093, %v13887_v27  }
 0x427   : > { %v14226_v18 = vpop.permute.xlu0 %4786  ;;  %5150 = vperm.xlu1 %9092, %v14231_v45  }
 0x428   : > { %16633 = vst [vmem:[#allocation71_spill] sm:$0xff] %v14226_v18  ;;  %v14234_v61 = vpop.permute.xlu1 %4790 }
 0x429   : > { %16634 = vst [vmem:[#allocation21_spill] sm:$0xff] %v14234_v61 }
 0x42a   : > { %5170 = vperm.xlu0 %9093, %v13913_v4  }
 0x42b   : > { %v14237_v42 = vpop.permute.xlu0 %4794  ;;  %5158 = vperm.xlu1 %9092, %v14242_v0  }
 0x42c   : > { %16635 = vst [vmem:[#allocation74_spill] sm:$0xff] %v14237_v42  ;;  %v14245_v18 = vpop.permute.xlu1 %4798 }
 0x42d   : > { %16636 = vst [vmem:[#allocation6_spill] sm:$0xff] %v14245_v18 }
 0x42e   : > { %5178 = vperm.xlu0 %9093, %v13943_v55  }
 0x42f   : > { %v14248_v34 = vpop.permute.xlu0 %4802  ;;  %5166 = vperm.xlu1 %9092, %v13873_v54  }
 0x430   : > { %16637 = vst [vmem:[#allocation85_spill] sm:$0xff] %v14248_v34  ;;  %v14251_v61 = vpop.permute.xlu1 %4806 }
 0x431   : > { %16638 = vst [vmem:[#allocation95_spill] sm:$0xff] %v14251_v61 }
 0x432   : > { %5186 = vperm.xlu0 %9093, %v13969_v43  }
 0x433   : > { %5174 = vperm.xlu1 %9092, %v13903_v19  }
 0x434   : > { %v14255_v42 = vpop.permute.xlu0 %4874 }
 0x435   : > { %v14257_v1 = vpop.permute.xlu1 %4878 }
 0x436   : > { %9094 = vset.pattern.permute.xlu0 %v16639_v62 }
 0x437   : > { %5290 = vperm.xlu0 %9094, %v14008_v56   ;;  %5182 = vperm.xlu1 %9092, %v13931_v28  }
 0x438   : > { %v14262_v18 = vpop.permute.xlu0 %4886 }
 0x439   : > { %v14264_v34 = vpop.permute.xlu1 %4882 }
 0x43b   : > { %5302 = vperm.xlu0 %9094, %v14066_v22   ;;  %5190 = vperm.xlu1 %9092, %v13961_v17  }
 0x43c   : > { %v14268_v61 = vpop.permute.xlu0 %4894 }
 0x43d   : > { %v14270_v11 = vpop.permute.xlu1 %4890 }
 0x43f   : > { %5310 = vperm.xlu0 %9094, %v14093_v44   ;;  %9095 = vset.pattern.permute.xlu1 %v16639_v62 }
 0x440   : > { %v14274_v15 = vpop.permute.xlu0 %4902  ;;  %5294 = vperm.xlu1 %9095, %v13996_v16  }
 0x441   : > { %16640 = vst [vmem:[#allocation55_spill] sm:$0xff] %v14274_v15  ;;  %v14277_v52 = vpop.permute.xlu1 %4898 }
 0x442   : > { %16641 = vst [vmem:[#allocation144_spill] sm:$0xff] %v14277_v52 }
 0x443   : > { %5318 = vperm.xlu0 %9094, %v14120_v50  }
 0x444   : > { %v14280_v23 = vpop.permute.xlu0 %4910  ;;  %5298 = vperm.xlu1 %9095, %v14035_v26  }
 0x445   : > { %16642 = vst [vmem:[#allocation39_spill] sm:$0xff] %v14280_v23  ;;  %v14283_v49 = vpop.permute.xlu1 %4906 }
 0x446   : > { %16643 = vst [vmem:[#allocation134_spill] sm:$0xff] %v14283_v49 }
 0x447   : > { %5326 = vperm.xlu0 %9094, %v14143_v47  }
 0x448   : > { %v14286_v12 = vpop.permute.xlu0 %4918  ;;  %5306 = vperm.xlu1 %9095, %v14023_v39  }
 0x449   : > { %16644 = vst [vmem:[#allocation22_spill] sm:$0xff] %v14286_v12  ;;  %v14289_v62 = vpop.permute.xlu1 %4914 }
 0x44a   : > { %16645 = vst [vmem:[#allocation35_spill] sm:$0xff] %v14289_v62 }
 0x44b   : > { %5334 = vperm.xlu0 %9094, %v14161_v13  }
 0x44c   : > { %v14292_v41 = vpop.permute.xlu0 %4926  ;;  %5314 = vperm.xlu1 %9095, %v14055_v25  }
 0x44d   : > { %16646 = vst [vmem:[#allocation30_spill] sm:$0xff] %v14292_v41  ;;  %v14295_v21 = vpop.permute.xlu1 %4922  ;;  %v8398_v41 = vpop.f32.mrf.mxu1 }
 0x44e   : > { %16647 = vst [vmem:[#allocation29_spill] sm:$0xff] %v14295_v21 }
 0x44f   : > { %5342 = vperm.xlu0 %9094, %v14177_v37  }
 0x450   : > { %v14298_v24 = vpop.permute.xlu0 %4934  ;;  %5322 = vperm.xlu1 %9095, %v14081_v53  }
 0x451   : > { %16648 = vst [vmem:[#allocation106_spill] sm:$0xff] %v14298_v24  ;;  %v14301_v31 = vpop.permute.xlu1 %4930 }
 0x452   : > { %16649 = vst [vmem:[#allocation91_spill] sm:$0xff] %v14301_v31  ;;  %v4202_v31 = vpop.f32.mrf.mxu1 }
 0x453   : > { %5350 = vperm.xlu0 %9094, %v14193_v2  }
 0x454   : > { %v14304_v59 = vpop.permute.xlu0 %4942  ;;  %5330 = vperm.xlu1 %9095, %v14109_v51   ;;  %v8399_v62 = vpop.f32.mrf.mxu1 }
 0x455   : > { %16650 = vst [vmem:[#allocation51_spill] sm:$0xff] %v14304_v59  ;;  %v14307_v5 = vpop.permute.xlu1 %4938 }
 0x456   : > { %16651 = vst [vmem:[#allocation113_spill] sm:$0xff] %v14307_v5  ;;  %v4205_v49 = vpop.f32.mrf.mxu1 }
 0x457   : > { %5358 = vperm.xlu0 %9094, %v14209_v3  }
 0x458   : > { %v14310_v21 = vpop.permute.xlu0 %4950  ;;  %5338 = vperm.xlu1 %9095, %v14133_v40  }
 0x459   : > { %16652 = vst [vmem:[#allocation119_spill] sm:$0xff] %v14310_v21  ;;  %v14313_v24 = vpop.permute.xlu1 %4946  ;;  %v14325_v21 = vld [vmem:[%s15799_s5] ss:$0 sm:$0xff] }
 0x45a   : > { %16653 = vst [vmem:[#allocation122_spill] sm:$0xff] %v14313_v24 }
 0x45b   : > { %5366 = vperm.xlu0 %9094, %v14220_v58  }
 0x45c   : > { %v14316_v35 = vpop.permute.xlu0 %4958  ;;  %5346 = vperm.xlu1 %9095, %v14153_v9  }
 0x45d   : > { %16654 = vst [vmem:[#allocation101_spill] sm:$0xff] %v14316_v35  ;;  %v8148_v59 = vpop.f32.mrf.mxu0  ;;  %v14319_v63 = vpop.permute.xlu1 %4954 }
 0x45e   : > { %16655 = vst [vmem:[#allocation79_spill] sm:$0xff] %v14319_v63 }
 0x45f   : > { %5374 = vperm.xlu0 %9094, %v14231_v45   ;;  %v8149_v5 = vpop.f32.mrf.mxu0 }
 0x460   : > { %v8150_v24 = vadd.f32 %v8149_v5, %v8148_v59  ;;  %v14327_v12 = vpop.permute.xlu0 %4966  ;;  %5354 = vperm.xlu1 %9095, %v14169_v7  }
 0x461   : > { %16656 = vst [vmem:[#allocation77_spill] sm:$0xff] %v14327_v12  ;;  %v8151_v35 = vpop.f32.mrf.mxu0  ;;  %v14330_v30 = vpop.permute.xlu1 %4962 }
 0x462   : > { %16657 = vst [vmem:[#allocation23_spill] sm:$0xff] %v14330_v30  ;;  %v4042_v60 = vadd.f32 %v8150_v24, %v14325_v21  ;;  %v14341_v24 = vpop.f32.mrf.mxu1 }
 0x463   : > { %5382 = vperm.xlu0 %9094, %v14242_v0   ;;  %v8152_v63 = vpop.f32.mrf.mxu0 }
 0x464   : > { %v4203_v23 = vadd.f32 %v4202_v31, %v4042_v60  ;;  %v8153_v32 = vadd.f32 %v8152_v63, %v8151_v35  ;;  %v14334_v38 = vpop.permute.xlu0 %4974  ;;  %5362 = vperm.xlu1 %9095, %v14185_v8  }
 0x465   : > { %16658 = vst [vmem:[#allocation53_spill] sm:$0xff] %v14334_v38  ;;  %v8154_v59 = vpop.f32.mrf.mxu0  ;;  %v14337_v5 = vpop.permute.xlu1 %4970 }
 0x466   : > { %16659 = vst [vmem:[#allocation98_spill] sm:$0xff] %v14337_v5  ;;  %v4329_v12 = vmax.f32 %v4203_v23, 0.0  ;;  %v4045_v52 = vadd.f32 %v8153_v32, %v14325_v21  ;;  %v4218_v32 = vpop.f32.mrf.mxu1 }
 0x467   : > { %5390 = vperm.xlu0 %9094, %v13873_v54   ;;  %v8155_v30 = vpop.f32.mrf.mxu0 }
 0x468   : > { %4361 = vst.msk [vmem:[#allocation2 + $0x10] sm:$0xff] %vm347_vm0, %v4329_v12  ;;  %v4206_v15 = vadd.f32 %v4205_v49, %v4045_v52  ;;  %v14344_v60 = vpop.permute.xlu0 %4982  ;;  %v8156_v63 = vadd.f32 %v8155_v30, %v8154_v59  ;;  %5370 = vperm.xlu1 %9095, %v14201_v29  }
 0x469   : > { %16660 = vst [vmem:[#allocation89_spill] sm:$0xff] %v14344_v60  ;;  %v8157_v35 = vpop.f32.mrf.mxu0  ;;  %v14347_v31 = vpop.permute.xlu1 %4978 }
 0x46a   : > { %16661 = vst [vmem:[#allocation114_spill] sm:$0xff] %v14347_v31  ;;  %v4330_v5 = vmax.f32 %v4206_v15, 0.0  ;;  %v4050_v23 = vadd.f32 %v8156_v63, %v14325_v21 }
 0x46b   : > { %5398 = vperm.xlu0 %9094, %v13903_v19   ;;  %v8158_v54 = vpop.f32.mrf.mxu0  ;;  %v8403_v19 = vpop.f32.mrf.mxu1 }
 0x46c   : > { %4362 = vst.msk [vmem:[#allocation2 + $0x18] sm:$0xff] %vm347_vm0, %v4330_v5  ;;  %v14352_v38 = vpop.permute.xlu0 %4990  ;;  %v4211_v52 = vadd.f32 %v8398_v41, %v4050_v23  ;;  %v8159_v49 = vadd.f32 %v8158_v54, %v8157_v35  ;;  %5378 = vperm.xlu1 %9095, %v13855_v6  }
 0x46d   : > { %16662 = vst [vmem:[#allocation117_spill] sm:$0xff] %v14352_v38  ;;  %v8160_v30 = vpop.f32.mrf.mxu0  ;;  %v14355_v12 = vpop.permute.xlu1 %4986 }
 0x46e   : > { %16663 = vst [vmem:[#allocation107_spill] sm:$0xff] %v14355_v12  ;;  %v4331_v59 = vmax.f32 %v4211_v52, 0.0  ;;  %v4053_v15 = vadd.f32 %v8159_v49, %v14325_v21 }
 0x46f   : > { %5406 = vperm.xlu0 %9094, %v13931_v28   ;;  %v8161_v63 = vpop.f32.mrf.mxu0  ;;  %v4221_v28 = vpop.f32.mrf.mxu1 }
 0x470   : > { %v14359_v31 = vpop.permute.xlu0 %4998  ;;  %4363 = vst.msk [vmem:[#allocation2 + $0x20] sm:$0xff] %vm347_vm0, %v4331_v59  ;;  %v4214_v5 = vadd.f32 %v8399_v62, %v4053_v15  ;;  %v8162_v38 = vadd.f32 %v8161_v63, %v8160_v30  ;;  %5386 = vperm.xlu1 %9095, %v13887_v27  }
 0x471   : > { %16664 = vst [vmem:[#allocation37_spill] sm:$0xff] %v14359_v31  ;;  %v8163_v41 = vpop.f32.mrf.mxu0  ;;  %v14363_v35 = vpop.permute.xlu1 %4994 }
 0x472   : > { %16665 = vst [vmem:[#allocation34_spill] sm:$0xff] %v14363_v35  ;;  %v4332_v23 = vmax.f32 %v4214_v5, 0.0  ;;  %v4058_v54 = vadd.f32 %v8162_v38, %v14325_v21  ;;  %v16666_v5 = vmov 6   ;;  %v14375_v35 = vpop.f32.mrf.mxu1 }
 0x473   : > { %5414 = vperm.xlu0 %9094, %v13961_v17   ;;  %v8164_v52 = vpop.f32.mrf.mxu0 }
 0x474   : > { %4364 = vst.msk [vmem:[#allocation2 + $0x28] sm:$0xff] %vm347_vm0, %v4332_v23  ;;  %v4219_v49 = vadd.f32 %v4218_v32, %v4058_v54  ;;  %v8165_v31 = vadd.f32 %v8164_v52, %v8163_v41  ;;  %5394 = vperm.xlu1 %9095, %v13913_v4   ;;  %v4234_v60 = vpop.f32.mrf.mxu1 }
 0x475   : > { %v14369_v62 = vpop.permute.xlu0 %5070  ;;  %v8166_v30 = vpop.f32.mrf.mxu0 }
 0x476   : > { %v4333_v59 = vmax.f32 %v4219_v49, 0.0  ;;  %v4061_v15 = vadd.f32 %v8165_v31, %v14325_v21  ;;  %v14372_v63 = vpop.permute.xlu1 %5066  ;;  %v8407_v14 = vpop.f32.mrf.mxu1 }
 0x477   : > { %9097 = vset.pattern.permute.xlu0 %v16666_v5  ;;  %v8167_v38 = vpop.f32.mrf.mxu0 }
 0x478   : > { %5486 = vperm.xlu0 %9097, %v13996_v16   ;;  %4365 = vst.msk [vmem:[#allocation2 + $0x30] sm:$0xff] %vm347_vm0, %v4333_v59  ;;  %v4222_v32 = vadd.f32 %v4221_v28, %v4061_v15  ;;  %v8168_v41 = vadd.f32 %v8167_v38, %v8166_v30  ;;  %5402 = vperm.xlu1 %9095, %v13943_v55  }
 0x479   : > { %v14380_v23 = vpop.permute.xlu0 %5082  ;;  %v8169_v54 = vpop.f32.mrf.mxu0 }
 0x47a   : > { %16667 = vst [vmem:[#allocation14_spill] sm:$0xff] %v14380_v23  ;;  %v4334_v52 = vmax.f32 %v4222_v32, 0.0  ;;  %v4066_v31 = vadd.f32 %v8168_v41, %v14325_v21  ;;  %v14383_v49 = vpop.permute.xlu1 %5074 }
 0x47b   : > { %v8170_v12 = vpop.f32.mrf.mxu0 }
 0x47c   : > { %5498 = vperm.xlu0 %9097, %v14023_v39   ;;  %4366 = vst.msk [vmem:[#allocation2 + $0x38] sm:$0xff] %vm347_vm0, %v4334_v52  ;;  %v4227_v59 = vadd.f32 %v14341_v24, %v4066_v31  ;;  %v8171_v28 = vadd.f32 %v8170_v12, %v8169_v54  ;;  %5410 = vperm.xlu1 %9095, %v13969_v43  }
 0x47d   : > { %v14389_v30 = vpop.permute.xlu0 %5090  ;;  %v8172_v15 = vpop.f32.mrf.mxu0 }
 0x47e   : > { %16668 = vst [vmem:[#allocation86_spill] sm:$0xff] %v14389_v30  ;;  %v4335_v38 = vmax.f32 %v4227_v59, 0.0  ;;  %v4069_v32 = vadd.f32 %v8171_v28, %v14325_v21  ;;  %v14392_v41 = vpop.permute.xlu1 %5078  ;;  %v4237_v30 = vpop.f32.mrf.mxu1 }
 0x47f   : > { %v8173_v48 = vpop.f32.mrf.mxu0 }
 0x480   : > { %5506 = vperm.xlu0 %9097, %v14055_v25   ;;  %4367 = vst.msk [vmem:[#allocation2 + $0x40] sm:$0xff] %vm347_vm0, %v4335_v38  ;;  %v4230_v52 = vadd.f32 %v8403_v19, %v4069_v32  ;;  %v8174_v23 = vadd.f32 %v8173_v48, %v8172_v15  ;;  %9096 = vset.pattern.permute.xlu1 %v16666_v5 }
 0x481   : > { %v14397_v24 = vpop.permute.xlu0 %5098  ;;  %v8175_v12 = vpop.f32.mrf.mxu0  ;;  %5482 = vperm.xlu1 %9096, %v14008_v56  }
 0x482   : > { %16669 = vst [vmem:[#allocation24_spill] sm:$0xff] %v14397_v24  ;;  %v4336_v54 = vmax.f32 %v4230_v52, 0.0  ;;  %v4074_v31 = vadd.f32 %v8174_v23, %v14325_v21  ;;  %v14401_v59 = vpop.permute.xlu1 %5086  ;;  %v14411_v24 = vpop.f32.mrf.mxu1 }
 0x483   : > { %16670 = vst [vmem:[#allocation58_spill] sm:$0xff] %v14401_v59  ;;  %v8176_v28 = vpop.f32.mrf.mxu0 }
 0x484   : > { %5514 = vperm.xlu0 %9097, %v14081_v53   ;;  %4368 = vst.msk [vmem:[#allocation2 + $0x48] sm:$0xff] %vm347_vm0, %v4336_v54  ;;  %v4235_v19 = vadd.f32 %v4234_v60, %v4074_v31  ;;  %v8177_v48 = vadd.f32 %v8176_v28, %v8175_v12 }
 0x485   : > { %v14405_v15 = vpop.permute.xlu0 %5106  ;;  %v8178_v5 = vpop.f32.mrf.mxu0  ;;  %5490 = vperm.xlu1 %9096, %v14035_v26  }
 0x486   : > { %16671 = vst [vmem:[#allocation75_spill] sm:$0xff] %v14405_v15  ;;  %v4337_v38 = vmax.f32 %v4235_v19, 0.0  ;;  %v4077_v32 = vadd.f32 %v8177_v48, %v14325_v21  ;;  %v14409_v52 = vpop.permute.xlu1 %5094 }
 0x487   : > { %16672 = vst [vmem:[#allocation76_spill] sm:$0xff] %v14409_v52  ;;  %v8179_v23 = vpop.f32.mrf.mxu0  ;;  %v4250_v52 = vpop.f32.mrf.mxu1 }
 0x488   : > { %5522 = vperm.xlu0 %9097, %v14109_v51   ;;  %4369 = vst.msk [vmem:[#allocation2 + $0x50] sm:$0xff] %vm347_vm0, %v4337_v38  ;;  %v4238_v54 = vadd.f32 %v4237_v30, %v4077_v32  ;;  %v8180_v60 = vadd.f32 %v8179_v23, %v8178_v5 }
 0x489   : > { %v14415_v12 = vpop.permute.xlu0 %5114  ;;  %v8181_v31 = vpop.f32.mrf.mxu0  ;;  %5494 = vperm.xlu1 %9096, %v14066_v22  }
 0x48a   : > { %16673 = vst [vmem:[#allocation45_spill] sm:$0xff] %v14415_v12  ;;  %v4338_v28 = vmax.f32 %v4238_v54, 0.0  ;;  %v4082_v19 = vadd.f32 %v8180_v60, %v14325_v21  ;;  %v14419_v48 = vpop.permute.xlu1 %5102 }
 0x48b   : > { %16674 = vst [vmem:[#allocation47_spill] sm:$0xff] %v14419_v48  ;;  %v8182_v15 = vpop.f32.mrf.mxu0  ;;  %v8411_v48 = vpop.f32.mrf.mxu1 }
 0x48c   : > { %5530 = vperm.xlu0 %9097, %v14133_v40   ;;  %4370 = vst.msk [vmem:[#allocation2 + $0x58] sm:$0xff] %vm347_vm0, %v4338_v28  ;;  %v4243_v38 = vadd.f32 %v14375_v35, %v4082_v19  ;;  %v8183_v30 = vadd.f32 %v8182_v15, %v8181_v31 }
 0x48d   : > { %v14424_v5 = vpop.permute.xlu0 %5122  ;;  %v8184_v32 = vpop.f32.mrf.mxu0  ;;  %5502 = vperm.xlu1 %9096, %v14093_v44  }
 0x48e   : > { %16675 = vst [vmem:[#allocation130_spill] sm:$0xff] %v14424_v5  ;;  %v4339_v23 = vmax.f32 %v4243_v38, 0.0  ;;  %v4085_v54 = vadd.f32 %v8183_v30, %v14325_v21  ;;  %v14428_v60 = vpop.permute.xlu1 %5110  ;;  %v4253_v5 = vpop.f32.mrf.mxu1 }
 0x48f   : > { %16676 = vst [vmem:[#allocation138_spill] sm:$0xff] %v14428_v60  ;;  %v8185_v12 = vpop.f32.mrf.mxu0 }
 0x490   : > { %5538 = vperm.xlu0 %9097, %v14153_v9   ;;  %4371 = vst.msk [vmem:[#allocation2 + $0x60] sm:$0xff] %vm347_vm0, %v4339_v23  ;;  %v4246_v28 = vadd.f32 %v8407_v14, %v4085_v54  ;;  %v8186_v59 = vadd.f32 %v8185_v12, %v8184_v32 }
 0x491   : > { %v14432_v35 = vpop.permute.xlu0 %5130  ;;  %v8187_v15 = vpop.f32.mrf.mxu0  ;;  %5510 = vperm.xlu1 %9096, %v14120_v50  }
 0x492   : > { %16677 = vst [vmem:[#allocation103_spill] sm:$0xff] %v14432_v35  ;;  %v4340_v31 = vmax.f32 %v4246_v28, 0.0  ;;  %v4090_v19 = vadd.f32 %v8186_v59, %v14325_v21  ;;  %v14436_v38 = vpop.permute.xlu1 %5118  ;;  %v14446_v35 = vpop.f32.mrf.mxu1 }
 0x493   : > { %16678 = vst [vmem:[#allocation99_spill] sm:$0xff] %v14436_v38  ;;  %v8188_v30 = vpop.f32.mrf.mxu0 }
 0x494   : > { %5546 = vperm.xlu0 %9097, %v14169_v7   ;;  %4372 = vst.msk [vmem:[#allocation2 + $0x68] sm:$0xff] %vm347_vm0, %v4340_v31  ;;  %v4251_v60 = vadd.f32 %v4250_v52, %v4090_v19  ;;  %v8189_v23 = vadd.f32 %v8188_v30, %v8187_v15 }
 0x495   : > { %v14440_v14 = vpop.permute.xlu0 %5138  ;;  %v8190_v12 = vpop.f32.mrf.mxu0  ;;  %5518 = vperm.xlu1 %9096, %v14143_v47  }
 0x496   : > { %16679 = vst [vmem:[#allocation83_spill] sm:$0xff] %v14440_v14  ;;  %v4341_v32 = vmax.f32 %v4251_v60, 0.0  ;;  %v4093_v54 = vadd.f32 %v8189_v23, %v14325_v21  ;;  %v14444_v28 = vpop.permute.xlu1 %5126 }
 0x497   : > { %16680 = vst [vmem:[#allocation70_spill] sm:$0xff] %v14444_v28  ;;  %v8191_v59 = vpop.f32.mrf.mxu0  ;;  %v4266_v28 = vpop.f32.mrf.mxu1 }
 0x498   : > { %5554 = vperm.xlu0 %9097, %v14185_v8   ;;  %4373 = vst.msk [vmem:[#allocation2 + $0x70] sm:$0xff] %vm347_vm0, %v4341_v32  ;;  %v4254_v31 = vadd.f32 %v4253_v5, %v4093_v54  ;;  %v8192_v52 = vadd.f32 %v8191_v59, %v8190_v12 }
 0x499   : > { %v14450_v15 = vpop.permute.xlu0 %5146  ;;  %v8193_v19 = vpop.f32.mrf.mxu0  ;;  %5526 = vperm.xlu1 %9096, %v14161_v13  }
 0x49a   : > { %16681 = vst [vmem:[#allocation25_spill] sm:$0xff] %v14450_v15  ;;  %v4342_v30 = vmax.f32 %v4254_v31, 0.0  ;;  %v4098_v60 = vadd.f32 %v8192_v52, %v14325_v21  ;;  %v14454_v23 = vpop.permute.xlu1 %5134 }
 0x49b   : > { %16682 = vst [vmem:[#allocation124_spill] sm:$0xff] %v14454_v23  ;;  %v8194_v14 = vpop.f32.mrf.mxu0  ;;  %v8415_v23 = vpop.f32.mrf.mxu1 }
 0x49c   : > { %5562 = vperm.xlu0 %9097, %v14201_v29   ;;  %4374 = vst.msk [vmem:[#allocation2 + $0x78] sm:$0xff] %vm347_vm0, %v4342_v30  ;;  %v4259_v32 = vadd.f32 %v14411_v24, %v4098_v60  ;;  %v8195_v5 = vadd.f32 %v8194_v14, %v8193_v19 }
 0x49d   : > { %v14459_v12 = vpop.permute.xlu0 %5154  ;;  %v8196_v54 = vpop.f32.mrf.mxu0  ;;  %5534 = vperm.xlu1 %9096, %v14177_v37  }
 0x49e   : > { %16683 = vst [vmem:[#allocation78_spill] sm:$0xff] %v14459_v12  ;;  %v4343_v59 = vmax.f32 %v4259_v32, 0.0  ;;  %v4101_v31 = vadd.f32 %v8195_v5, %v14325_v21  ;;  %v14463_v52 = vpop.permute.xlu1 %5142  ;;  %v4269_v12 = vpop.f32.mrf.mxu1 }
 0x49f   : > { %16684 = vst [vmem:[#allocation93_spill] sm:$0xff] %v14463_v52  ;;  %v8197_v15 = vpop.f32.mrf.mxu0 }
 0x4a0   : > { %5570 = vperm.xlu0 %9097, %v13855_v6   ;;  %4375 = vst.msk [vmem:[#allocation2 + $0x80] sm:$0xff] %vm347_vm0, %v4343_v59  ;;  %v4262_v30 = vadd.f32 %v8411_v48, %v4101_v31  ;;  %v8198_v38 = vadd.f32 %v8197_v15, %v8196_v54 }
 0x4a1   : > { %v14467_v24 = vpop.permute.xlu0 %5162  ;;  %v8199_v14 = vpop.f32.mrf.mxu0  ;;  %5542 = vperm.xlu1 %9096, %v14193_v2  }
 0x4a2   : > { %16685 = vst [vmem:[#allocation120_spill] sm:$0xff] %v14467_v24  ;;  %v4344_v19 = vmax.f32 %v4262_v30, 0.0  ;;  %v4106_v60 = vadd.f32 %v8198_v38, %v14325_v21  ;;  %v14471_v32 = vpop.permute.xlu1 %5150  ;;  %v14481_v24 = vpop.f32.mrf.mxu1 }
 0x4a3   : > { %16686 = vst [vmem:[#allocation38_spill] sm:$0xff] %v14471_v32  ;;  %v8200_v5 = vpop.f32.mrf.mxu0 }
 0x4a4   : > { %5578 = vperm.xlu0 %9097, %v13887_v27   ;;  %4376 = vst.msk [vmem:[#allocation2 + $0x88] sm:$0xff] %vm347_vm0, %v4344_v19  ;;  %v4267_v6 = vadd.f32 %v4266_v28, %v4106_v60  ;;  %v8201_v59 = vadd.f32 %v8200_v5, %v8199_v14 }
 0x4a5   : > { %v14475_v48 = vpop.permute.xlu0 %5170  ;;  %v8202_v15 = vpop.f32.mrf.mxu0  ;;  %5550 = vperm.xlu1 %9096, %v14209_v3  }
 0x4a6   : > { %16687 = vst [vmem:[#allocation65_spill] sm:$0xff] %v14475_v48  ;;  %v4345_v54 = vmax.f32 %v4267_v6, 0.0  ;;  %v4109_v31 = vadd.f32 %v8201_v59, %v14325_v21  ;;  %v14479_v30 = vpop.permute.xlu1 %5158  ;;  %v4282_v48 = vpop.f32.mrf.mxu1 }
 0x4a7   : > { %16688 = vst [vmem:[#allocation112_spill] sm:$0xff] %v14479_v30  ;;  %v8203_v38 = vpop.f32.mrf.mxu0 }
 0x4a8   : > { %5586 = vperm.xlu0 %9097, %v13913_v4   ;;  %4377 = vst.msk [vmem:[#allocation2 + $0x90] sm:$0xff] %vm347_vm0, %v4345_v54  ;;  %v4270_v27 = vadd.f32 %v4269_v12, %v4109_v31  ;;  %v8204_v28 = vadd.f32 %v8203_v38, %v8202_v15 }
 0x4a9   : > { %v14485_v14 = vpop.permute.xlu0 %5178  ;;  %v8205_v19 = vpop.f32.mrf.mxu0  ;;  %5558 = vperm.xlu1 %9096, %v14220_v58  }
 0x4aa   : > { %16689 = vst [vmem:[#allocation60_spill] sm:$0xff] %v14485_v14  ;;  %v4346_v60 = vmax.f32 %v4270_v27, 0.0  ;;  %v4114_v5 = vadd.f32 %v8204_v28, %v14325_v21  ;;  %v14489_v6 = vpop.permute.xlu1 %5166  ;;  %v8419_v14 = vpop.f32.mrf.mxu1 }
 0x4ab   : > { %16690 = vst [vmem:[#allocation26_spill] sm:$0xff] %v14489_v6  ;;  %v8206_v59 = vpop.f32.mrf.mxu0 }
 0x4ac   : > { %5594 = vperm.xlu0 %9097, %v13943_v55   ;;  %4378 = vst.msk [vmem:[#allocation2 + $0x98] sm:$0xff] %vm347_vm0, %v4346_v60  ;;  %v4275_v4 = vadd.f32 %v14446_v35, %v4114_v5  ;;  %v8207_v12 = vadd.f32 %v8206_v59, %v8205_v19 }
 0x4ad   : > { %v14494_v15 = vpop.permute.xlu0 %5186  ;;  %v8208_v54 = vpop.f32.mrf.mxu0  ;;  %5566 = vperm.xlu1 %9096, %v14231_v45  }
 0x4ae   : > { %16691 = vst [vmem:[#allocation33_spill] sm:$0xff] %v14494_v15  ;;  %v4347_v31 = vmax.f32 %v4275_v4, 0.0  ;;  %v4117_v38 = vadd.f32 %v8207_v12, %v14325_v21  ;;  %v14498_v27 = vpop.permute.xlu1 %5174  ;;  %v16694_v15 = vmov 7  }
 0x4af   : > { %16692 = vst [vmem:[#allocation88_spill] sm:$0xff] %v14498_v27  ;;  %v8209_v28 = vpop.f32.mrf.mxu0 }
 0x4b0   : > { %5602 = vperm.xlu0 %9097, %v13969_v43   ;;  %4379 = vst.msk [vmem:[#allocation2 + $0xa0] sm:$0xff] %vm347_vm0, %v4347_v31  ;;  %v4278_v55 = vadd.f32 %v8415_v23, %v4117_v38  ;;  %v8210_v60 = vadd.f32 %v8209_v28, %v8208_v54  ;;  %v4285_v23 = vpop.f32.mrf.mxu1  ;;  %v14514_v38 = vld [vmem:[%s15802_s8 + $0xc8] sm:$0xff] }
 0x4b1   : > { %v8211_v35 = vpop.f32.mrf.mxu0  ;;  %5574 = vperm.xlu1 %9096, %v14242_v0  }
 0x4b2   : > { %v14503_v19 = vpop.permute.xlu0 %5290  ;;  %v4348_v5 = vmax.f32 %v4278_v55, 0.0  ;;  %v4122_v59 = vadd.f32 %v8210_v60, %v14325_v21  ;;  %v14506_v4 = vpop.permute.xlu1 %5182 }
 0x4b3   : > { %16693 = vst [vmem:[#allocation100_spill] sm:$0xff] %v14506_v4  ;;  %v8212_v12 = vpop.f32.mrf.mxu0 }
 0x4b4   : > { %9098 = vset.pattern.permute.xlu0 %v16694_v15  ;;  %4380 = vst.msk [vmem:[#allocation2 + $0xa8] sm:$0xff] %vm347_vm0, %v4348_v5  ;;  %v4283_v43 = vadd.f32 %v4282_v48, %v4122_v59  ;;  %v8213_v31 = vadd.f32 %v8212_v12, %v8211_v35  ;;  %v14527_v59 = vld [vmem:[%s15802_s8 + $0xd8] sm:$0xff]  ;;  %v8422_v12 = vpop.f32.mrf.mxu1 }
 0x4b5   : > { %5674 = vperm.xlu0 %9098, %v14008_v56   ;;  %v8214_v54 = vpop.f32.mrf.mxu0  ;;  %5582 = vperm.xlu1 %9096, %v14514_v38  }
 0x4b6   : > { %v14517_v28 = vpop.permute.xlu0 %5302  ;;  %v4349_v55 = vmax.f32 %v4283_v43, 0.0  ;;  %v4125_v60 = vadd.f32 %v8213_v31, %v14325_v21  ;;  %v14520_v4 = vpop.permute.xlu1 %5190 }
 0x4b7   : > { %16695 = vst [vmem:[#allocation105_spill] sm:$0xff] %v14520_v4  ;;  %v8215_v48 = vpop.f32.mrf.mxu0 }
 0x4b8   : > { %4381 = vst.msk [vmem:[#allocation2 + $0xb0] sm:$0xff] %vm347_vm0, %v4349_v55  ;;  %v4286_v35 = vadd.f32 %v4285_v23, %v4125_v60  ;;  %v8216_v56 = vadd.f32 %v8215_v48, %v8214_v54  ;;  %v14541_v60 = vld [vmem:[%s15802_s8 + $0xe8] sm:$0xff]  ;;  %v4298_v48 = vpop.f32.mrf.mxu1 }
 0x4b9   : > { %5686 = vperm.xlu0 %9098, %v14066_v22   ;;  %v8217_v5 = vpop.f32.mrf.mxu0  ;;  %5590 = vperm.xlu1 %9096, %v14527_v59  }
 0x4ba   : > { %v14530_v43 = vpop.permute.xlu0 %5310  ;;  %v4350_v31 = vmax.f32 %v4286_v35, 0.0  ;;  %v4130_v4 = vadd.f32 %v8216_v56, %v14325_v21 }
 0x4bb   : > { %v8218_v27 = vpop.f32.mrf.mxu0  ;;  %v14533_v55 = vpop.permute.xlu1 %5294 }
 0x4bc   : > { %4382 = vst.msk [vmem:[#allocation2 + $0xb8] sm:$0xff] %vm347_vm0, %v4350_v31  ;;  %v4291_v22 = vadd.f32 %v14481_v24, %v4130_v4  ;;  %v8219_v23 = vadd.f32 %v8218_v27, %v8217_v5  ;;  %v8423_v4 = vpop.f32.mrf.mxu1 }
 0x4bd   : > { %5694 = vperm.xlu0 %9098, %v14093_v44   ;;  %v8220_v54 = vpop.f32.mrf.mxu0  ;;  %5598 = vperm.xlu1 %9096, %v14541_v60  }
 0x4be   : > { %v14544_v35 = vpop.permute.xlu0 %5318  ;;  %v4351_v56 = vmax.f32 %v4291_v22, 0.0  ;;  %v4133_v6 = vadd.f32 %v8219_v23, %v14325_v21 }
 0x4bf   : > { %16696 = vst [vmem:[#allocation41_spill] sm:$0xff] %v14544_v35  ;;  %v8221_v31 = vpop.f32.mrf.mxu0  ;;  %v14547_v30 = vpop.permute.xlu1 %5298 }
 0x4c0   : > { %4383 = vst.msk [vmem:[#allocation2 + $0xc0] sm:$0xff] %vm347_vm0, %v4351_v56  ;;  %v4294_v44 = vadd.f32 %v8419_v14, %v4133_v6  ;;  %v8222_v24 = vadd.f32 %v8221_v31, %v8220_v54 }
 0x4c1   : > { %5702 = vperm.xlu0 %9098, %v14120_v50   ;;  %v8223_v27 = vpop.f32.mrf.mxu0  ;;  %5606 = vperm.xlu1 %9096, %v13961_v17   ;;  %v4301_v50 = vpop.f32.mrf.mxu1 }
 0x4c2   : > { %v14552_v5 = vpop.permute.xlu0 %5326  ;;  %v4352_v32 = vmax.f32 %v4294_v44, 0.0  ;;  %v4138_v22 = vadd.f32 %v8222_v24, %v14325_v21 }
 0x4c3   : > { %v8224_v52 = vpop.f32.mrf.mxu0  ;;  %v14555_v23 = vpop.permute.xlu1 %5306 }
 0x4c4   : > { %4384 = vst.msk [vmem:[#allocation2 + $0xc8] sm:$0xff] %vm347_vm0, %v4352_v32  ;;  %v4299_v35 = vadd.f32 %v4298_v48, %v4138_v22  ;;  %v8225_v56 = vadd.f32 %v8224_v52, %v8223_v27  ;;  %v8426_v48 = vpop.f32.mrf.mxu1 }
 0x4c5   : > { %5710 = vperm.xlu0 %9098, %v14143_v47   ;;  %v8226_v14 = vpop.f32.mrf.mxu0  ;;  %9099 = vset.pattern.permute.xlu1 %v16694_v15 }
 0x4c6   : > { %v14560_v17 = vpop.permute.xlu0 %5334  ;;  %v4353_v6 = vmax.f32 %v4299_v35, 0.0  ;;  %v4141_v54 = vadd.f32 %v8225_v56, %v14325_v21  ;;  %5678 = vperm.xlu1 %9099, %v13996_v16  }
 0x4c7   : > { %v8227_v31 = vpop.f32.mrf.mxu0  ;;  %v14564_v44 = vpop.permute.xlu1 %5314 }
 0x4c8   : > { %4385 = vst.msk [vmem:[#allocation2 + $0xd0] sm:$0xff] %vm347_vm0, %v4353_v6  ;;  %v4302_v32 = vadd.f32 %v4301_v50, %v4141_v54  ;;  %v8228_v52 = vadd.f32 %v8227_v31, %v8226_v14 }
 0x4c9   : > { %5718 = vperm.xlu0 %9098, %v14161_v13   ;;  %v8229_v47 = vpop.f32.mrf.mxu0  ;;  %v4314_v13 = vpop.f32.mrf.mxu1 }
 0x4ca   : > { %v14568_v15 = vpop.permute.xlu0 %5342  ;;  %v4354_v24 = vmax.f32 %v4302_v32, 0.0  ;;  %v4146_v35 = vadd.f32 %v8228_v52, %v14325_v21  ;;  %5682 = vperm.xlu1 %9099, %v14035_v26  }
 0x4cb   : > { %v8230_v27 = vpop.f32.mrf.mxu0  ;;  %v14572_v16 = vpop.permute.xlu1 %5322 }
 0x4cc   : > { %4386 = vst.msk [vmem:[#allocation2 + $0xd8] sm:$0xff] %vm347_vm0, %v4354_v24  ;;  %v4307_v22 = vadd.f32 %v8422_v12, %v4146_v35  ;;  %v8231_v56 = vadd.f32 %v8230_v27, %v8229_v47 }
 0x4cd   : > { %5726 = vperm.xlu0 %9098, %v14177_v37   ;;  %v8232_v14 = vpop.f32.mrf.mxu0  ;;  %v8427_v37 = vpop.f32.mrf.mxu1 }
 0x4ce   : > { %v14576_v50 = vpop.permute.xlu0 %5350  ;;  %v4355_v6 = vmax.f32 %v4307_v22, 0.0  ;;  %v4149_v54 = vadd.f32 %v8231_v56, %v14325_v21  ;;  %5690 = vperm.xlu1 %9099, %v14023_v39  }
 0x4cf   : > { %v8233_v31 = vpop.f32.mrf.mxu0  ;;  %v14580_v26 = vpop.permute.xlu1 %5330 }
 0x4d0   : > { %4387 = vst.msk [vmem:[#allocation2 + $0xe0] sm:$0xff] %vm347_vm0, %v4355_v6  ;;  %v4310_v32 = vadd.f32 %v8423_v4, %v4149_v54  ;;  %v8234_v52 = vadd.f32 %v8233_v31, %v8232_v14 }
 0x4d1   : > { %5734 = vperm.xlu0 %9098, %v14193_v2   ;;  %v8235_v12 = vpop.f32.mrf.mxu0  ;;  %v4317_v2 = vpop.f32.mrf.mxu1 }
 0x4d2   : > { %v14584_v47 = vpop.permute.xlu0 %5358  ;;  %v4356_v24 = vmax.f32 %v4310_v32, 0.0  ;;  %v4154_v35 = vadd.f32 %v8234_v52, %v14325_v21  ;;  %5698 = vperm.xlu1 %9099, %v14055_v25  }
 0x4d3   : > { %v8236_v27 = vpop.f32.mrf.mxu0  ;;  %v14588_v39 = vpop.permute.xlu1 %5338 }
 0x4d4   : > { %4388 = vst.msk [vmem:[#allocation2 + $0xe8] sm:$0xff] %vm347_vm0, %v4356_v24  ;;  %v4315_v22 = vadd.f32 %v4314_v13, %v4154_v35  ;;  %v8237_v56 = vadd.f32 %v8236_v27, %v8235_v12 }
 0x4d5   : > { %5742 = vperm.xlu0 %9098, %v14209_v3   ;;  %v8238_v4 = vpop.f32.mrf.mxu0 }
 0x4d6   : > { %v14592_v14 = vpop.permute.xlu0 %5366  ;;  %v4357_v6 = vmax.f32 %v4315_v22, 0.0  ;;  %v4157_v54 = vadd.f32 %v8237_v56, %v14325_v21  ;;  %5706 = vperm.xlu1 %9099, %v14081_v53  }
 0x4d7   : > { %16697 = vst [vmem:[#allocation67_spill] sm:$0xff] %v14592_v14  ;;  %v8239_v31 = vpop.f32.mrf.mxu0  ;;  %v14596_v25 = vpop.permute.xlu1 %5346 }
 0x4d8   : > { %4389 = vst.msk [vmem:[#allocation2 + $0xf0] sm:$0xff] %vm347_vm0, %v4357_v6  ;;  %v4318_v32 = vadd.f32 %v4317_v2, %v4157_v54  ;;  %v8240_v52 = vadd.f32 %v8239_v31, %v8238_v4  ;;  %v16710_v31 = vmov 8  }
 0x4d9   : > { %5750 = vperm.xlu0 %9098, %v14220_v58   ;;  %v8241_v13 = vpop.f32.mrf.mxu0 }
 0x4da   : > { %v14600_v3 = vpop.permute.xlu0 %5374  ;;  %v4358_v12 = vmax.f32 %v4318_v32, 0.0  ;;  %v4162_v24 = vadd.f32 %v8240_v52, %v14325_v21  ;;  %5714 = vperm.xlu1 %9099, %v14109_v51   ;;  %v14660_v32 = vld [vmem:[%s15802_s8 + $0xc0] sm:$0xff] }
 0x4db   : > { %16698 = vst [vmem:[#allocation28_spill] sm:$0xff] %v14600_v3  ;;  %v8242_v35 = vpop.f32.mrf.mxu0  ;;  %v14604_v27 = vpop.permute.xlu1 %5354  ;;  %v5257_v3 = vld [vmem:[#allocation2 + $0x11] sm:$0xff] }
 0x4dc   : > { %4390 = vst.msk [vmem:[#allocation2 + $0xf8] sm:$0xff] %vm347_vm0, %v4358_v12  ;;  %v4323_v53 = vadd.f32 %v8426_v48, %v4162_v24  ;;  %v8243_v22 = vadd.f32 %v8242_v35, %v8241_v13  ;;  %v9772_v12 = vld [vmem:[%s15802_s8 + $0x20] sm:$0xff]  ;;  %v9773_v24 = vld [vmem:[%s15802_s8 + $0xd0] sm:$0xff] }
 0x4dd   : > { %5758 = vperm.xlu0 %9098, %v14231_v45  }
 0x4de   : > { %v14608_v56 = vpop.permute.xlu0 %5382  ;;  %v4359_v58 = vmax.f32 %v4323_v53, 0.0  ;;  %v4165_v4 = vadd.f32 %v8243_v22, %v14325_v21  ;;  %5722 = vperm.xlu1 %9099, %v14133_v40   ;;  %v9774_v22 = vld [vmem:[%s15802_s8 + $0x30] sm:$0xff] }
 0x4df   : > { %16699 = vst [vmem:[#allocation80_spill] sm:$0xff] %v14608_v56  ;;  %v14612_v2 = vpop.permute.xlu1 %5362 }
 0x4e0   : > { %16700 = vst [vmem:[#allocation102_spill] sm:$0xff] %v14612_v2  ;;  %4391 = vst.msk [vmem:[#allocation2 + $0x100] sm:$0xff] %vm347_vm0, %v4359_v58  ;;  %v4326_v51 = vadd.f32 %v8427_v37, %v4165_v4  ;;  %v9775_v58 = vld [vmem:[%s15802_s8 + $0xe0] sm:$0xff] }
 0x4e1   : > { %5766 = vperm.xlu0 %9098, %v14242_v0  }
 0x4e2   : > { %v14616_v6 = vpop.permute.xlu0 %5390  ;;  %v4360_v48 = vmax.f32 %v4326_v51, 0.0  ;;  %5730 = vperm.xlu1 %9099, %v14153_v9  }
 0x4e3   : > { %16701 = vst [vmem:[#allocation87_spill] sm:$0xff] %v14616_v6  ;;  %v14619_v45 = vpop.permute.xlu1 %5370 }
 0x4e4   : > { %16702 = vst [vmem:[#allocation132_spill] sm:$0xff] %v14619_v45  ;;  %4392 = vst.msk [vmem:[#allocation2 + $0x108] sm:$0xff] %vm347_vm0, %v4360_v48  ;;  %v9776_v48 = vld [vmem:[%s15802_s8 + $0x40] sm:$0xff]  ;;  %v5417_v45 = vmul.f32 %v14503_v19, %v5257_v3  ;;  %v14785_v19 = vld [vmem:[%s15800_s6 + $0x88] sm:$0xff]  }
 0x4e5   : > { %5774 = vperm.xlu0 %9098, %v14514_v38   ;;  %v9601_v3 = vld [vmem:[%s15800_s6 + $0x80] sm:$0xff]   ;;  %8428 = vmatprep.subr.bf16.mxu0 %v14785_v19 }
 0x4e6   : > { %v14623_v21 = vpop.permute.xlu0 %5398  ;;  %5738 = vperm.xlu1 %9099, %v14169_v7   ;;  %v9768_v7 = vld [vmem:[%s15802_s8 + $0xf8] sm:$0xff]  ;;  %8429 = vmatpush3.bf16.msra.mxu0 %v14785_v19 }
 0x4e7   : > { %16703 = vst [vmem:[#allocation63_spill] sm:$0xff] %v14623_v21  ;;  %v14626_v40 = vpop.permute.xlu1 %5378  ;;  %8430 = vmatprep.subr.bf16.mxu0 %v9601_v3 }
 0x4e8   : > { %16704 = vst [vmem:[#allocation68_spill] sm:$0xff] %v14626_v40  ;;  %v14757_v40 = vld [vmem:[#allocation2 + $0x19] sm:$0xff] }
 0x4e9   : > { %5782 = vperm.xlu0 %9098, %v14527_v59   ;;  %v14646_v59 = vld [vmem:[%s15802_s8 + $0xb0] sm:$0xff] }
 0x4ea   : > { %v14629_v0 = vpop.permute.xlu0 %5406  ;;  %5746 = vperm.xlu1 %9099, %v14185_v8   ;;  %8431 = vmatpush3.bf16.msra.mxu0 %v9601_v3  ;;  %v9606_v3 = vld [vmem:[%s15800_s6 + $0x68] sm:$0xff]  }
 0x4eb   : > { %16705 = vst [vmem:[#allocation32_spill] sm:$0xff] %v14629_v0  ;;  %v14632_v37 = vpop.permute.xlu1 %5386 }
 0x4ec   : > { %16706 = vst [vmem:[#allocation90_spill] sm:$0xff] %v14632_v37 }
 0x4ed   : > { %5790 = vperm.xlu0 %9098, %v14541_v60  }
 0x4ee   : > { %v14635_v9 = vpop.permute.xlu0 %5414  ;;  %5754 = vperm.xlu1 %9099, %v14201_v29   ;;  %v9770_v29 = vld [vmem:[%s15802_s8 + $0x8] sm:$0xff] }
 0x4ef   : > { %16707 = vst [vmem:[#allocation72_spill] sm:$0xff] %v14635_v9  ;;  %v14638_v54 = vpop.permute.xlu1 %5394 }
 0x4f0   : > { %16708 = vst [vmem:[#allocation104_spill] sm:$0xff] %v14638_v54 }
 0x4f1   : > { %5798 = vperm.xlu0 %9098, %v9768_v7   ;;  %v9777_v7 = vld [vmem:[%s15802_s8 + $0xf0] sm:$0xff] }
 0x4f2   : > { %5762 = vperm.xlu1 %9099, %v14646_v59  }
 0x4f3   : > { %v14649_v8 = vpop.permute.xlu0 %5486  ;;  %v14651_v60 = vpop.permute.xlu1 %5402 }
 0x4f4   : > { %16709 = vst [vmem:[#allocation128_spill] sm:$0xff] %v14651_v60 }
 0x4f5   : > { %9101 = vset.pattern.permute.xlu0 %v16710_v31 }
 0x4f6   : > { %5870 = vperm.xlu0 %9101, %v9770_v29   ;;  %5770 = vperm.xlu1 %9099, %v14660_v32  }
 0x4f7   : > { %v14663_v52 = vpop.permute.xlu0 %5498  ;;  %v14665_v13 = vpop.permute.xlu1 %5410 }
 0x4f8   : > { %16711 = vst [vmem:[#allocation116_spill] sm:$0xff] %v14665_v13 }
 0x4fa   : > { %5882 = vperm.xlu0 %9101, %v9772_v12   ;;  %5778 = vperm.xlu1 %9099, %v9773_v24   ;;  %v9778_v24 = vld [vmem:[%s15802_s8 + $0x50] sm:$0xff] }
 0x4fb   : > { %v14673_v35 = vpop.permute.xlu0 %5506 }
 0x4fc   : > { %v5483_v53 = vpop.permute.xlu1 %5482 }
 0x4fe   : > { %5890 = vperm.xlu0 %9101, %v9774_v22   ;;  %5786 = vperm.xlu1 %9099, %v9775_v58   ;;  %v9779_v58 = vld [vmem:[%s15802_s8] sm:$0xff] }
 0x4ff   : > { %v14681_v4 = vpop.permute.xlu0 %5514 }
 0x500   : > { %v14683_v51 = vpop.permute.xlu1 %5490 }
 0x502   : > { %5898 = vperm.xlu0 %9101, %v9776_v48   ;;  %5794 = vperm.xlu1 %9099, %v9777_v7   ;;  %v9780_v7 = vld [vmem:[%s15802_s8 + $0x60] sm:$0xff] }
 0x503   : > { %v14691_v29 = vpop.permute.xlu0 %5522 }
 0x504   : > { %v14693_v12 = vpop.permute.xlu1 %5494 }
 0x506   : > { %5906 = vperm.xlu0 %9101, %v9778_v24   ;;  %9100 = vset.pattern.permute.xlu1 %v16710_v31  ;;  %v9781_v31 = vld [vmem:[%s15802_s8 + $0x10] sm:$0xff] }
 0x507   : > { %v14699_v22 = vpop.permute.xlu0 %5530  ;;  %5866 = vperm.xlu1 %9100, %v9779_v58   ;;  %v9782_v58 = vld [vmem:[%s15802_s8 + $0x70] sm:$0xff] }
 0x508   : > { %v14704_v48 = vpop.permute.xlu1 %5502 }
 0x50a   : > { %5914 = vperm.xlu0 %9101, %v9780_v7   ;;  %v9783_v7 = vld [vmem:[%s15802_s8 + $0x18] sm:$0xff] }
 0x50b   : > { %v14709_v9 = vpop.permute.xlu0 %5538  ;;  %5874 = vperm.xlu1 %9100, %v9781_v31   ;;  %v9784_v31 = vld [vmem:[%s15802_s8 + $0x80] sm:$0xff] }
 0x50c   : > { %v14714_v24 = vpop.permute.xlu1 %5510 }
 0x50e   : > { %5922 = vperm.xlu0 %9101, %v9782_v58   ;;  %v9785_v58 = vld [vmem:[%s15802_s8 + $0x28] sm:$0xff] }
 0x50f   : > { %v14719_v13 = vpop.permute.xlu0 %5546  ;;  %5878 = vperm.xlu1 %9100, %v9783_v7   ;;  %v9786_v7 = vld [vmem:[%s15802_s8 + $0x90] sm:$0xff] }
 0x510   : > { %16712 = vst [vmem:[#allocation123_spill] sm:$0xff] %v14719_v13  ;;  %v14724_v0 = vpop.permute.xlu1 %5518 }
 0x512   : > { %5930 = vperm.xlu0 %9101, %v9784_v31   ;;  %v9787_v31 = vld [vmem:[%s15802_s8 + $0x38] sm:$0xff] }
 0x513   : > { %v14729_v60 = vpop.permute.xlu0 %5554  ;;  %5886 = vperm.xlu1 %9100, %v9785_v58   ;;  %v9788_v58 = vld [vmem:[%s15802_s8 + $0xa0] sm:$0xff] }
 0x514   : > { %16713 = vst [vmem:[#allocation36_spill] sm:$0xff] %v14729_v60  ;;  %v14734_v21 = vpop.permute.xlu1 %5526  ;;  %v14770_v60 = vld [vmem:[#allocation2 + $0x1f] sm:$0xff] }
 0x516   : > { %5938 = vperm.xlu0 %9101, %v9786_v7   ;;  %v9789_v7 = vld [vmem:[%s15802_s8 + $0x48] sm:$0xff] }
 0x517   : > { %v14739_v54 = vpop.permute.xlu0 %5562  ;;  %5894 = vperm.xlu1 %9100, %v9787_v31  }
 0x518   : > { %16714 = vst [vmem:[#allocation27_spill] sm:$0xff] %v14739_v54  ;;  %v14744_v6 = vpop.permute.xlu1 %5534  ;;  %v9790_v54 = vld [vmem:[%s15802_s8 + $0x58] sm:$0xff] }
 0x51a   : > { %5946 = vperm.xlu0 %9101, %v9788_v58   ;;  %v5418_v58 = vmul.f32 %v14533_v55, %v14757_v40  ;;  %v5610_v55 = vmul.f32 %v14649_v8, %v14770_v60 }
 0x51b   : > { %v14749_v37 = vpop.permute.xlu0 %5570  ;;  %5902 = vperm.xlu1 %9100, %v9789_v7   ;;  %v5449_v7 = vld [vmem:[#allocation2 + $0x17] sm:$0xff] }
 0x51c   : > { %16715 = vst [vmem:[#allocation81_spill] sm:$0xff] %v14749_v37  ;;  %v14754_v56 = vpop.permute.xlu1 %5542  ;;  %v9102_v14 = vpack.i.bf16 %v5418_v58, %v5417_v45  ;;  %v9792_v45 = vld [vmem:[%s15802_s8 + $0x78] sm:$0xff] }
 0x51e   : > { %5954 = vperm.xlu0 %9101, %v14646_v59   ;;  %v5609_v59 = vmul.f32 %v5483_v53, %v5449_v7  ;;  %v9603_v53 = vld [vmem:[%s15800_s6 + $0x38] sm:$0xff]   ;;  %v9793_v7 = vld [vmem:[%s15802_s8 + $0x88] sm:$0xff] }
 0x51f   : > { %v14759_v31 = vpop.permute.xlu0 %5578  ;;  %5910 = vperm.xlu1 %9100, %v9790_v54   ;;  %v9791_v54 = vld [vmem:[%s15802_s8 + $0x68] sm:$0xff] }
 0x520   : > { %16716 = vst [vmem:[#allocation111_spill] sm:$0xff] %v14759_v31  ;;  %v14766_v37 = vpop.permute.xlu1 %5550  ;;  %v9112_v13 = vpack.i.bf16 %v5610_v55, %v5609_v59  ;;  %v9794_v55 = vld [vmem:[%s15802_s8 + $0x98] sm:$0xff] }
 0x521   : > { %16717 = vst [vmem:[#allocation110_spill] sm:$0xff] %v14766_v37  ;;  %v14888_v37 = vld [vmem:[#allocation2 + $0x21] sm:$0xff] }
 0x522   : > { %5962 = vperm.xlu0 %9101, %v14660_v32  }
 0x523   : > { %v14772_v31 = vpop.permute.xlu0 %5586  ;;  %5918 = vperm.xlu1 %9100, %v9791_v54   ;;  %v9604_v54 = vld [vmem:[%s15800_s6 + $0x70] sm:$0xff]  }
 0x524   : > { %16718 = vst [vmem:[#allocation140_spill] sm:$0xff] %v14772_v31  ;;  %v14779_v2 = vpop.permute.xlu1 %5558 }
 0x525   : > { %16719 = vst [vmem:[#allocation148_spill] sm:$0xff] %v14779_v2  ;;  %v9612_v2 = vld [vmem:[%s15800_s6 + $0x50] sm:$0xff]  }
 0x526   : > { %9103 = vrot.lane.b32.xlu0 %v9102_v14, %s9891_s27  ;;  %v9602_v14 = vld [vmem:[%s15800_s6 + $0x78] sm:$0xff]  }
 0x527   : > { %v14790_v32 = vpop.permute.xlu0 %5594  ;;  %5926 = vperm.xlu1 %9100, %v9792_v45   ;;  %8262 = vmatprep.subr.bf16.mxu1 %v9602_v14 }
 0x528   : > { %16720 = vst [vmem:[#allocation40_spill] sm:$0xff] %v14790_v32  ;;  %v14795_v8 = vpop.permute.xlu1 %5566  ;;  %8263 = vmatpush3.bf16.msra.mxu1 %v9603_v53  ;;  %v9607_v53 = vld [vmem:[%s15800_s6 + $0x28] sm:$0xff]   ;;  %v14843_v32 = vld [vmem:[#allocation2 + $0x10] sm:$0xff] }
 0x529   : > { %16721 = vst [vmem:[#allocation44_spill] sm:$0xff] %v14795_v8  ;;  %8264 = vmatprep.subr.bf16.mxu1 %v9604_v54  ;;  %16726 = vst [vmem:[#allocation69_spill] sm:$0xff] %v14843_v32  ;;  %v4842_v8 = vld [vmem:[#allocation2 + $0x11] sm:$0xff] }
 0x52a   : > { %9113 = vrot.lane.b32.xlu0 %v9112_v13, %s9892_s28  ;;  %v9605_v13 = vld [vmem:[%s15800_s6 + $0x30] sm:$0xff]  }
 0x52b   : > { %v14806_v58 = vpop.permute.xlu0 %5602  ;;  %5934 = vperm.xlu1 %9100, %v9793_v7   ;;  %v9795_v7 = vld [vmem:[%s15802_s8 + $0xa8] sm:$0xff] }
 0x52c   : > { %16722 = vst [vmem:[#allocation92_spill] sm:$0xff] %v14806_v58  ;;  %v14811_v59 = vpop.permute.xlu1 %5574  ;;  %8265 = vmatpush3.bf16.msra.mxu1 %v9605_v13  ;;  %v9608_v13 = vld [vmem:[%s15800_s6 + $0x60] sm:$0xff]  }
 0x52d   : > { %16723 = vst [vmem:[#allocation108_spill] sm:$0xff] %v14811_v59  ;;  %8266 = vmatprep.subr.bf16.mxu1 %v9606_v3  ;;  %v9609_v58 = vld [vmem:[%s15800_s6 + $0x20] sm:$0xff]   ;;  %v4649_v3 = vld [vmem:[#allocation2 + $0x8] sm:$0xff]  ;;  %v9611_v59 = vld [vmem:[%s15800_s6 + $0x18] sm:$0xff]  }
 0x52f   : > { %5942 = vperm.xlu1 %9100, %v9794_v55  }
 0x530   : > { %v5675_v45 = vpop.permute.xlu0 %5674  ;;  %v14822_v14 = vpop.permute.xlu1 %5582  ;;  %8267 = vmatpush3.bf16.msra.mxu1 %v9607_v53 }
 0x531   : > { %16724 = vst [vmem:[#allocation126_spill] sm:$0xff] %v14822_v14  ;;  %8268 = vmatprep.subr.bf16.mxu1 %v9608_v13  ;;  %v9610_v14 = vld [vmem:[%s15800_s6 + $0x58] sm:$0xff]   ;;  %v4809_v13 = vmul.f32 %v13924_v33, %v4649_v3 }
 0x533   : > { %5950 = vperm.xlu1 %9100, %v9795_v7   ;;  %v9796_v7 = vld [vmem:[%s15802_s8 + $0xb8] sm:$0xff] }
 0x534   : > { %v14833_v55 = vpop.permute.xlu0 %5686  ;;  %v14835_v54 = vpop.permute.xlu1 %5590  ;;  %8269 = vmatpush3.bf16.msra.mxu1 %v9609_v58 }
 0x535   : > { %16725 = vst [vmem:[#allocation61_spill] sm:$0xff] %v14835_v54  ;;  %v4810_v54 = vmul.f32 %v13974_v57, %v14843_v32  ;;  %8270 = vmatprep.subr.bf16.mxu1 %v9610_v14  ;;  %v5002_v32 = vmul.f32 %v14257_v1, %v4842_v8  ;;  %v5033_v14 = vld [vmem:[#allocation2 + $0xf] sm:$0xff]  ;;  %v14880_v8 = vld [vmem:[#allocation2 + $0x20] sm:$0xff] }
 0x537   : > { %5958 = vperm.xlu1 %9100, %v9796_v7   ;;  %v9107_v57 = vpack.i.bf16 %v4810_v54, %v4809_v13  ;;  %v14878_v54 = vld [vmem:[#allocation2 + $0x18] sm:$0xff] }
 0x538   : > { %v14848_v31 = vpop.permute.xlu0 %5694  ;;  %v14850_v53 = vpop.permute.xlu1 %5598  ;;  %8271 = vmatpush3.bf16.msra.mxu1 %v9611_v59  ;;  %v5193_v59 = vmul.f32 %v14372_v63, %v5033_v14  ;;  %v9615_v63 = vld [vmem:[%s15800_s6 + $0x8] sm:$0xff]  }
 0x539   : > { %16727 = vst [vmem:[#allocation43_spill] sm:$0xff] %v14850_v53  ;;  %v4841_v53 = vld [vmem:[#allocation2 + $0x9] sm:$0xff]  ;;  %8272 = vmatprep.subr.bf16.mxu1 %v9612_v2  ;;  %v5034_v2 = vld [vmem:[#allocation2 + $0x17] sm:$0xff] }
 0x53a   : > { %v5001_v33 = vmul.f32 %v14255_v42, %v4841_v53  ;;  %v9614_v42 = vld [vmem:[%s15800_s6 + $0x48] sm:$0xff]   ;;  %v5801_v53 = vmul.f32 %v5675_v45, %v14878_v54 }
 0x53b   : > { %5966 = vperm.xlu1 %9100, %v14514_v38   ;;  %v9613_v38 = vld [vmem:[%s15800_s6 + $0x10] sm:$0xff]  }
 0x53c   : > { %v14862_v7 = vpop.permute.xlu0 %5702  ;;  %v14864_v58 = vpop.permute.xlu1 %5606  ;;  %v9117_v13 = vpack.i.bf16 %v5002_v32, %v5001_v33  ;;  %8273 = vmatpush3.bf16.msra.mxu1 %v9613_v38  ;;  %v5419_v32 = vmul.f32 %v14547_v30, %v14888_v37  ;;  %v5260_v14 = vld [vmem:[#allocation2 + $0x29] sm:$0xff]  ;;  %v9617_v30 = vld [vmem:[%s15800_s6] sm:$0xff]  }
 0x53d   : > { %16728 = vst [vmem:[#allocation84_spill] sm:$0xff] %v14864_v58  ;;  %v5194_v58 = vmul.f32 %v14369_v62, %v5034_v2  ;;  %8274 = vmatprep.subr.bf16.mxu1 %v9614_v42  ;;  %v4812_v62 = vmul.f32 %v14880_v8, %v13982_v10  ;;  %v9616_v42 = vld [vmem:[%s15800_s6 + $0x40] sm:$0xff]   ;;  %v14908_v2 = vld [vmem:[#allocation2 + $0x2f] sm:$0xff]  ;;  %v4811_v10 = vmul.f32 %v14878_v54, %v13954_v46 }
 0x53e   : > { %v14922_v46 = vld [vmem:[#allocation2 + $0x28] sm:$0xff] }
 0x53f   : > { %9108 = vrot.lane.b32.xlu1 %v9107_v57, %s9891_s27  ;;  %v9127_v45 = vpack.i.bf16 %v5194_v58, %v5193_v59 }
 0x540   : > { %v14875_v3 = vpop.permute.xlu0 %5710  ;;  %8275 = vmatpush3.bf16.msra.mxu1 %v9615_v63  ;;  %v9137_v63 = vpack.i.bf16 %v4812_v62, %v4811_v10  ;;  %v5261_v10 = vld [vmem:[#allocation2 + $0x31] sm:$0xff] }
 0x541   : > { %v5679_v1 = vpop.permute.xlu1 %5678  ;;  %8276 = vmatprep.subr.bf16.mxu1 %v9616_v42 }
 0x542   : > { %v5802_v57 = vmul.f32 %v5679_v1, %v14880_v8 }
 0x543   : > { %9118 = vrot.lane.b32.xlu1 %v9117_v13, %s9892_s28  ;;  %v5420_v13 = vmul.f32 %v14517_v28, %v5260_v14  ;;  %v5612_v28 = vmul.f32 %v14693_v12, %v14908_v2  ;;  %v5003_v12 = vmul.f32 %v14757_v40, %v14264_v34  ;;  %v5421_v34 = vmul.f32 %v14555_v23, %v5261_v10 }
 0x544   : > { %v14896_v33 = vpop.permute.xlu0 %5718  ;;  %v9122_v38 = vpack.i.bf16 %v5802_v57, %v5801_v53  ;;  %v5036_v53 = vld [vmem:[#allocation2 + $0x27] sm:$0xff]  ;;  %8277 = vmatpush3.bf16.msra.mxu1 %v9617_v30  ;;  %v5195_v30 = vmul.f32 %v14383_v49, %v14770_v60  ;;  %v5039_v49 = vld [vmem:[#allocation2 + $0x3f] sm:$0xff]  ;;  %v4813_v23 = vmul.f32 %v14922_v46, %v14003_v20 }
 0x545   : > { %v5683_v1 = vpop.permute.xlu1 %5682  ;;  %v9132_v58 = vpack.i.bf16 %v5420_v13, %v5419_v32  ;;  %v5611_v14 = vmul.f32 %v14683_v51, %v5036_v53  ;;  %8464 = vmatprep.subr.bf16.mxu1 %v14785_v19  ;;  %v5644_v13 = vld [vmem:[#allocation2 + $0x30] sm:$0xff] }
 0x546   : > { %9123 = vrot.lane.b32.xlu0 %v9122_v38, %s9893_s14  ;;  %v5004_v38 = vmul.f32 %v14888_v37, %v14262_v18  ;;  %v5803_v62 = vmul.f32 %v5683_v1, %v14922_v46  ;;  %v5196_v18 = vmul.f32 %v14392_v41, %v5036_v53  ;;  %v5804_v19 = vmul.f32 %v14833_v55, %v5644_v13 }
 0x547   : > { %9128 = vrot.lane.b32.xlu1 %v9127_v45, %s9893_s14  ;;  %v9142_v32 = vpack.i.bf16 %v5612_v28, %v5611_v14  ;;  %v4814_v55 = vmul.f32 %v5644_v13, %v14014_v36  ;;  %v14955_v14 = vld [vmem:[#allocation2 + $0x29] sm:$0xff] }
 0x548   : > { %v14915_v59 = vpop.permute.xlu0 %5726  ;;  %v9147_v42 = vpack.i.bf16 %v5004_v38, %v5003_v12  ;;  %v9152_v1 = vpack.i.bf16 %v5804_v19, %v5803_v62  ;;  %v9157_v41 = vpack.i.bf16 %v5196_v18, %v5195_v30  ;;  %v5038_v12 = vld [vmem:[#allocation2 + $0x37] sm:$0xff]  ;;  %v5005_v20 = vmul.f32 %v14270_v11, %v14955_v14  ;;  %v16729_v19 = vld [vmem:[#allocation58_spill] sm:$0xff] }
 0x549   : > { %v5691_v57 = vpop.permute.xlu1 %5690  ;;  %v5613_v62 = vmul.f32 %v14663_v52, %v5038_v12  ;;  %v14962_v18 = vld [vmem:[#allocation2 + $0x38] sm:$0xff]  ;;  %v5198_v30 = vmul.f32 %v16729_v19, %v5038_v12  ;;  %v16731_v12 = vld [vmem:[#allocation155_spill] sm:$0xff] }
 0x54a   : > { %9133 = vrot.lane.b32.xlu0 %v9132_v58, %s9891_s27  ;;  %v14941_v58 = vld [vmem:[#allocation2 + $0x39] sm:$0xff] }
 0x54b   : > { %9138 = vrot.lane.b32.xlu1 %v9137_v63, %s9891_s27  ;;  %v5422_v53 = vmul.f32 %v14530_v43, %v14941_v58  ;;  %v5614_v63 = vmul.f32 %v14704_v48, %v5039_v49  ;;  %v5006_v43 = vmul.f32 %v5261_v10, %v14268_v61  ;;  %v4847_v19 = vld [vmem:[#allocation2 + $0x39] sm:$0xff] }
 0x54c   : > { %v14927_v45 = vpop.permute.xlu0 %5734 }
 0x54d   : > { %v14931_v51 = vpop.permute.xlu1 %5698  ;;  %v9162_v60 = vpack.i.bf16 %v5422_v53, %v5421_v34  ;;  %v9172_v48 = vpack.i.bf16 %v5614_v63, %v5613_v62  ;;  %v5646_v34 = vld [vmem:[#allocation2 + $0x40] sm:$0xff]  ;;  %v9177_v52 = vpack.i.bf16 %v5006_v43, %v5005_v20  ;;  %v16733_v62 = vld [vmem:[#allocation145_spill] sm:$0xff] }
 0x54e   : > { %9143 = vrot.lane.b32.xlu0 %v9142_v32, %s9892_s28  ;;  %v9167_v32 = vpack.i.bf16 %v4814_v55, %v4813_v23  ;;  %v5806_v10 = vmul.f32 %v14848_v31, %v5646_v34  ;;  %v5263_v55 = vld [vmem:[#allocation2 + $0x41] sm:$0xff]  ;;  %v4816_v31 = vmul.f32 %v5646_v34, %v16731_v12 }
 0x54f   : > { %9148 = vrot.lane.b32.xlu1 %v9147_v42, %s9892_s28  ;;  %v5805_v42 = vmul.f32 %v5691_v57, %v14962_v18  ;;  %v5423_v11 = vmul.f32 %v14564_v44, %v5263_v55  ;;  %v4815_v44 = vmul.f32 %v14962_v18, %v16733_v62 }
 0x550   : > { %v14939_v40 = vpop.permute.xlu0 %5742 }
 0x551   : > { %v14943_v28 = vpop.permute.xlu1 %5706  ;;  %v9182_v57 = vpack.i.bf16 %v5806_v10, %v5805_v42  ;;  %v9197_v34 = vpack.i.bf16 %v4816_v31, %v4815_v44  ;;  %v16735_v10 = vld [vmem:[#allocation55_spill] sm:$0xff]  ;;  %v16738_v44 = vld [vmem:[#allocation86_spill] sm:$0xff] }
 0x552   : > { %9153 = vrot.lane.b32.xlu0 %v9152_v1, %s9893_s14  ;;  %v16730_v1 = vld [vmem:[#allocation14_spill] sm:$0xff] }
 0x553   : > { %9158 = vrot.lane.b32.xlu1 %v9157_v41, %s9893_s14  ;;  %v5197_v41 = vmul.f32 %v16730_v1, %v14908_v2  ;;  %v5041_v2 = vld [vmem:[#allocation2 + $0x4f] sm:$0xff]  ;;  %v5008_v1 = vmul.f32 %v5263_v55, %v16735_v10  ;;  %v15018_v10 = vld [vmem:[#allocation2 + $0x59] sm:$0xff] }
 0x554   : > { %v14953_v38 = vpop.permute.xlu0 %5750 }
 0x555   : > { %v14957_v36 = vpop.permute.xlu1 %5714  ;;  %v9187_v23 = vpack.i.bf16 %v5198_v30, %v5197_v41  ;;  %v5040_v30 = vld [vmem:[#allocation2 + $0x47] sm:$0xff] }
 0x556   : > { %9163 = vrot.lane.b32.xlu0 %v9162_v60, %s9891_s27  ;;  %v14981_v60 = vld [vmem:[#allocation2 + $0x49] sm:$0xff]  ;;  %v5615_v41 = vmul.f32 %v14673_v35, %v5040_v30 }
 0x557   : > { %9168 = vrot.lane.b32.xlu1 %v9167_v32, %s9891_s27  ;;  %v16732_v32 = vld [vmem:[#allocation41_spill] sm:$0xff] }
 0x558   : > { %v14967_v13 = vpop.permute.xlu0 %5758  ;;  %v5424_v43 = vmul.f32 %v16732_v32, %v14981_v60 }
 0x559   : > { %v14971_v61 = vpop.permute.xlu1 %5722 }
 0x55a   : > { %9173 = vrot.lane.b32.xlu0 %v9172_v48, %s9892_s28  ;;  %v9192_v20 = vpack.i.bf16 %v5424_v43, %v5423_v11  ;;  %v5616_v48 = vmul.f32 %v14714_v24, %v5041_v2  ;;  %v16737_v43 = vld [vmem:[#allocation76_spill] sm:$0xff] }
 0x55b   : > { %9178 = vrot.lane.b32.xlu1 %v9177_v52, %s9892_s28  ;;  %v5200_v62 = vmul.f32 %v16737_v43, %v5040_v30 }
 0x55c   : > { %v14979_v53 = vpop.permute.xlu0 %5766  ;;  %v9202_v12 = vpack.i.bf16 %v5616_v48, %v5615_v41 }
 0x55d   : > { %v14983_v63 = vpop.permute.xlu1 %5730 }
 0x55e   : > { %9183 = vrot.lane.b32.xlu0 %v9182_v57, %s9893_s14  ;;  %v5647_v57 = vld [vmem:[#allocation2 + $0x48] sm:$0xff] }
 0x55f   : > { %9188 = vrot.lane.b32.xlu1 %v9187_v23, %s9893_s14  ;;  %v16736_v23 = vld [vmem:[#allocation144_spill] sm:$0xff]  ;;  %v5807_v32 = vmul.f32 %v14931_v51, %v5647_v57 }
 0x560   : > { %v14993_v42 = vpop.permute.xlu0 %5774  ;;  %v5007_v11 = vmul.f32 %v16736_v23, %v4847_v19  ;;  %v5043_v23 = vld [vmem:[#allocation2 + $0x5f] sm:$0xff] }
 0x561   : > { %16734 = vst [vmem:[#allocation96_spill] sm:$0xff] %v14993_v42  ;;  %v14995_v52 = vpop.permute.xlu1 %5738  ;;  %v5648_v42 = vld [vmem:[#allocation2 + $0x50] sm:$0xff] }
 0x562   : > { %9193 = vrot.lane.b32.xlu0 %v9192_v20, %s9891_s27  ;;  %v9207_v55 = vpack.i.bf16 %v5008_v1, %v5007_v11  ;;  %v5808_v35 = vmul.f32 %v14862_v7, %v5648_v42  ;;  %v5199_v20 = vmul.f32 %v16738_v44, %v5039_v49  ;;  %v16740_v7 = vld [vmem:[#allocation9_spill] sm:$0xff]  ;;  %v5426_v49 = vmul.f32 %v14552_v5, %v15018_v10  ;;  %v16743_v44 = vld [vmem:[#allocation39_spill] sm:$0xff] }
 0x563   : > { %9198 = vrot.lane.b32.xlu1 %v9197_v34, %s9891_s27  ;;  %v15011_v34 = vld [vmem:[#allocation2 + $0x51] sm:$0xff]  ;;  %v4818_v41 = vmul.f32 %v5648_v42, %v16740_v7  ;;  %v16745_v7 = vld [vmem:[#allocation47_spill] sm:$0xff] }
 0x564   : > { %v15002_v24 = vpop.permute.xlu0 %5782  ;;  %v5425_v48 = vmul.f32 %v14572_v16, %v15011_v34  ;;  %v9212_v19 = vpack.i.bf16 %v5808_v35, %v5807_v32  ;;  %v9217_v30 = vpack.i.bf16 %v5200_v62, %v5199_v20  ;;  %v16741_v11 = vld [vmem:[#allocation17_spill] sm:$0xff]  ;;  %v5618_v32 = vmul.f32 %v14724_v0, %v5043_v23  ;;  %v4849_v62 = vld [vmem:[#allocation2 + $0x49] sm:$0xff] }
 0x565   : > { %v15006_v31 = vpop.permute.xlu1 %5746  ;;  %v4817_v16 = vmul.f32 %v5647_v57, %v16741_v11  ;;  %v5010_v5 = vmul.f32 %v15011_v34, %v16743_v44  ;;  %v16744_v57 = vld [vmem:[#allocation134_spill] sm:$0xff] }
 0x566   : > { %9203 = vrot.lane.b32.xlu0 %v9202_v12, %s9892_s28  ;;  %v9222_v12 = vpack.i.bf16 %v5426_v49, %v5425_v48  ;;  %v5009_v48 = vmul.f32 %v16744_v57, %v4849_v62  ;;  %v5650_v11 = vld [vmem:[#allocation2 + $0x60] sm:$0xff]  ;;  %v15061_v57 = vld [vmem:[#allocation2 + $0x6f] sm:$0xff] }
 0x567   : > { %9208 = vrot.lane.b32.xlu1 %v9207_v55, %s9892_s28  ;;  %v5042_v55 = vld [vmem:[#allocation2 + $0x57] sm:$0xff]  ;;  %v9227_v42 = vpack.i.bf16 %v4818_v41, %v4817_v16  ;;  %v5810_v44 = vmul.f32 %v14875_v3, %v5650_v11  ;;  %v16747_v3 = vld [vmem:[#allocation159_spill] sm:$0xff] }
 0x568   : > { %v15016_v51 = vpop.permute.xlu0 %5790  ;;  %v5617_v20 = vmul.f32 %v14681_v4, %v5042_v55  ;;  %v5202_v49 = vmul.f32 %v16745_v7, %v5042_v55  ;;  %v9237_v16 = vpack.i.bf16 %v5010_v5, %v5009_v48  ;;  %v16746_v4 = vld [vmem:[#allocation24_spill] sm:$0xff]  ;;  %v4851_v7 = vld [vmem:[#allocation2 + $0x59] sm:$0xff] }
 0x569   : > { %16739 = vst [vmem:[#allocation49_spill] sm:$0xff] %v15016_v51  ;;  %v15020_v1 = vpop.permute.xlu1 %5754  ;;  %v15046_v51 = vld [vmem:[#allocation2 + $0x61] sm:$0xff]  ;;  %v15051_v55 = vld [vmem:[#allocation2 + $0x69] sm:$0xff] }
 0x56a   : > { %9213 = vrot.lane.b32.xlu0 %v9212_v19, %s9893_s14  ;;  %v5649_v19 = vld [vmem:[#allocation2 + $0x58] sm:$0xff]  ;;  %v9232_v0 = vpack.i.bf16 %v5618_v32, %v5617_v20  ;;  %v4820_v20 = vmul.f32 %v5650_v11, %v16747_v3  ;;  %v16752_v3 = vld [vmem:[#allocation138_spill] sm:$0xff] }
 0x56b   : > { %9218 = vrot.lane.b32.xlu1 %v9217_v30, %s9893_s14  ;;  %v5809_v30 = vmul.f32 %v14943_v28, %v5649_v19  ;;  %v5427_v28 = vmul.f32 %v14580_v26, %v15046_v51  ;;  %v16748_v26 = vld [vmem:[#allocation149_spill] sm:$0xff] }
 0x56c   : > { %v15029_v43 = vpop.permute.xlu0 %5798  ;;  %v4819_v48 = vmul.f32 %v5649_v19, %v16748_v26  ;;  %v16751_v19 = vld [vmem:[#allocation35_spill] sm:$0xff]  ;;  %v5652_v26 = vld [vmem:[#allocation2 + $0x70] sm:$0xff] }
 0x56d   : > { %16742 = vst [vmem:[#allocation136_spill] sm:$0xff] %v15029_v43  ;;  %v15031_v35 = vpop.permute.xlu1 %5762  ;;  %v9242_v32 = vpack.i.bf16 %v5810_v44, %v5809_v30  ;;  %v5620_v30 = vmul.f32 %v14734_v21, %v15061_v57 }
 0x56e   : > { %9223 = vrot.lane.b32.xlu0 %v9222_v12, %s9891_s27  ;;  %v5201_v12 = vmul.f32 %v16746_v4, %v5041_v2  ;;  %v5428_v2 = vmul.f32 %v14560_v17, %v15051_v55  ;;  %v9257_v44 = vpack.i.bf16 %v4820_v20, %v4819_v48  ;;  %v16750_v17 = vld [vmem:[#allocation22_spill] sm:$0xff] }
 0x56f   : > { %9228 = vrot.lane.b32.xlu1 %v9227_v42, %s9891_s27  ;;  %v5012_v4 = vmul.f32 %v15046_v51, %v16750_v17 }
 0x570   : > { %v9247_v62 = vpack.i.bf16 %v5202_v49, %v5201_v12  ;;  %v5044_v49 = vld [vmem:[#allocation2 + $0x67] sm:$0xff] }
 0x571   : > { %v5871_v43 = vpop.permute.xlu0 %5870  ;;  %v15041_v41 = vpop.permute.xlu1 %5770  ;;  %v5619_v12 = vmul.f32 %v14691_v29, %v5044_v49  ;;  %v5812_v29 = vmul.f32 %v14896_v33, %v5652_v26 }
 0x572   : > { %9233 = vrot.lane.b32.xlu0 %v9232_v0, %s9892_s28  ;;  %v9252_v0 = vpack.i.bf16 %v5428_v2, %v5427_v28  ;;  %v5011_v28 = vmul.f32 %v16751_v19, %v4851_v7  ;;  %v5204_v2 = vmul.f32 %v16752_v3, %v5044_v49  ;;  %v15091_v49 = vld [vmem:[#allocation2 + $0x79] sm:$0xff]  ;;  %v5994_v3 = vmul.f32 %v5871_v43, %v14888_v37 }
 0x573   : > { %9238 = vrot.lane.b32.xlu1 %v9237_v16, %s9892_s28  ;;  %v9262_v21 = vpack.i.bf16 %v5620_v30, %v5619_v12  ;;  %v5430_v33 = vmul.f32 %v14568_v15, %v15091_v49 }
 0x574   : > { %v9267_v48 = vpack.i.bf16 %v5012_v4, %v5011_v28  ;;  %v16755_v4 = vld [vmem:[#allocation13_spill] sm:$0xff] }
 0x575   : > { %v15053_v42 = vpop.permute.xlu0 %5882  ;;  %v15055_v5 = vpop.permute.xlu1 %5778  ;;  %v4822_v19 = vmul.f32 %v5652_v26, %v16755_v4 }
 0x576   : > { %9243 = vrot.lane.b32.xlu0 %v9242_v32, %s9893_s14  ;;  %v5651_v32 = vld [vmem:[#allocation2 + $0x68] sm:$0xff] }
 0x577   : > { %9248 = vrot.lane.b32.xlu1 %v9247_v62, %s9893_s14  ;;  %v5811_v62 = vmul.f32 %v14957_v36, %v5651_v32 }
 0x579   : > { %v15067_v16 = vpop.permute.xlu0 %5890  ;;  %v15069_v11 = vpop.permute.xlu1 %5786  ;;  %v9272_v30 = vpack.i.bf16 %v5812_v29, %v5811_v62  ;;  %v16756_v62 = vld [vmem:[#allocation59_spill] sm:$0xff] }
 0x57a   : > { %16749 = vst [vmem:[#allocation109_spill] sm:$0xff] %v15069_v11  ;;  %9253 = vrot.lane.b32.xlu0 %v9252_v0, %s9891_s27  ;;  %v16754_v0 = vld [vmem:[#allocation75_spill] sm:$0xff] }
 0x57b   : > { %9258 = vrot.lane.b32.xlu1 %v9257_v44, %s9891_s27  ;;  %v5203_v17 = vmul.f32 %v16754_v0, %v5043_v23  ;;  %v15086_v44 = vld [vmem:[#allocation2 + $0x71] sm:$0xff]  ;;  %v5833_v23 = vld [vmem:[#allocation2 + $0x19] sm:$0xff]  ;;  %v4853_v29 = vld [vmem:[#allocation2 + $0x69] sm:$0xff] }
 0x57c   : > { %v5429_v36 = vmul.f32 %v14588_v39, %v15086_v44  ;;  %v5046_v0 = vld [vmem:[#allocation2 + $0x77] sm:$0xff] }
 0x57d   : > { %v15079_v11 = vpop.permute.xlu0 %5898  ;;  %v15081_v20 = vpop.permute.xlu1 %5794  ;;  %v9277_v7 = vpack.i.bf16 %v5204_v2, %v5203_v17  ;;  %v4821_v2 = vmul.f32 %v5651_v32, %v16756_v62  ;;  %v5621_v37 = vmul.f32 %v14699_v22, %v5046_v0 }
 0x57e   : > { %16753 = vst [vmem:[#allocation115_spill] sm:$0xff] %v15081_v20  ;;  %9263 = vrot.lane.b32.xlu0 %v9262_v21, %s9892_s28  ;;  %v15099_v21 = vld [vmem:[#allocation2 + $0x7f] sm:$0xff] }
 0x57f   : > { %9268 = vrot.lane.b32.xlu1 %v9267_v48, %s9892_s28  ;;  %v9282_v48 = vpack.i.bf16 %v5430_v33, %v5429_v36  ;;  %v5622_v26 = vmul.f32 %v14744_v6, %v15099_v21  ;;  %v9287_v4 = vpack.i.bf16 %v4822_v19, %v4821_v2  ;;  %v16758_v6 = vld [vmem:[#allocation29_spill] sm:$0xff] }
 0x580   : > { %v5013_v32 = vmul.f32 %v16758_v6, %v4853_v29  ;;  %v5836_v2 = vld [vmem:[#allocation2 + $0x31] sm:$0xff] }
 0x581   : > { %v15093_v12 = vpop.permute.xlu0 %5906  ;;  %v9292_v36 = vpack.i.bf16 %v5622_v26, %v5621_v37  ;;  %v16761_v37 = vld [vmem:[#allocation19_spill] sm:$0xff] }
 0x582   : > { %v5867_v28 = vpop.permute.xlu1 %5866  ;;  %9273 = vrot.lane.b32.xlu0 %v9272_v30, %s9893_s14  ;;  %v16757_v30 = vld [vmem:[#allocation30_spill] sm:$0xff] }
 0x583   : > { %v5993_v39 = vmul.f32 %v5867_v28, %v5833_v23  ;;  %9278 = vrot.lane.b32.xlu1 %v9277_v7, %s9893_s14  ;;  %v5014_v20 = vmul.f32 %v15086_v44, %v16757_v30  ;;  %v5653_v7 = vld [vmem:[#allocation2 + $0x78] sm:$0xff]  ;;  %v16759_v28 = vld [vmem:[#allocation99_spill] sm:$0xff]  ;;  %v5654_v23 = vld [vmem:[#allocation2 + $0x80] sm:$0xff] }
 0x584   : > { %v5813_v33 = vmul.f32 %v14971_v61, %v5653_v7  ;;  %v5206_v19 = vmul.f32 %v16759_v28, %v5046_v0  ;;  %v5814_v22 = vmul.f32 %v14915_v59, %v5654_v23  ;;  %v15129_v59 = vld [vmem:[#allocation2 + $0x89] sm:$0xff]  ;;  %v4824_v6 = vmul.f32 %v5654_v23, %v16761_v37  ;;  %v16762_v28 = vld [vmem:[#allocation153_spill] sm:$0xff] }
 0x585   : > { %v15106_v15 = vpop.permute.xlu0 %5914  ;;  %v6987_v17 = vpack.c.bf16 %v5994_v3, %v5993_v39  ;;  %v9297_v39 = vpack.i.bf16 %v5014_v20, %v5013_v32  ;;  %v5656_v37 = vld [vmem:[#allocation2 + $0x90] sm:$0xff] }
 0x586   : > { %v5875_v43 = vpop.permute.xlu1 %5874  ;;  %9283 = vrot.lane.b32.xlu0 %v9282_v48, %s9891_s27  ;;  %v16760_v48 = vld [vmem:[#allocation45_spill] sm:$0xff]  ;;  %v9302_v20 = vpack.i.bf16 %v5814_v22, %v5813_v33  ;;  %v5048_v22 = vld [vmem:[#allocation2 + $0x87] sm:$0xff] }
 0x587   : > { %8432 = vmatprep.mubr.msk.bf16.mxu0 %vm347_vm0, %v6987_v17  ;;  %9288 = vrot.lane.b32.xlu1 %v9287_v4, %s9891_s27  ;;  %v5205_v17 = vmul.f32 %v16760_v48, %v15061_v57  ;;  %v15123_v4 = vld [vmem:[#allocation2 + $0x81] sm:$0xff]  ;;  %v5995_v26 = vmul.f32 %v5875_v43, %v14955_v14  ;;  %v5432_v57 = vmul.f32 %v14576_v50, %v15129_v59  ;;  %v15135_v14 = vld [vmem:[#allocation2 + $0x8f] sm:$0xff] }
 0x588   : > { %v5431_v29 = vmul.f32 %v14596_v25, %v15123_v4  ;;  %v5997_v43 = vmul.f32 %v15053_v42, %v14941_v58  ;;  %v5624_v50 = vmul.f32 %v14754_v56, %v15135_v14  ;;  %v16763_v48 = vld [vmem:[#allocation106_spill] sm:$0xff]  ;;  %v5623_v42 = vmul.f32 %v14709_v9, %v5048_v22  ;;  %v16764_v56 = vld [vmem:[#allocation91_spill] sm:$0xff] }
 0x589   : > { %v15117_v3 = vpop.permute.xlu0 %5922  ;;  %v9307_v0 = vpack.i.bf16 %v5206_v19, %v5205_v17  ;;  %v4823_v19 = vmul.f32 %v5653_v7, %v16762_v28  ;;  %v5016_v58 = vmul.f32 %v15123_v4, %v16763_v48  ;;  %v5655_v7 = vld [vmem:[#allocation2 + $0x88] sm:$0xff] }
 0x58a   : > { %v5879_v62 = vpop.permute.xlu1 %5878  ;;  %9293 = vrot.lane.b32.xlu0 %v9292_v36, %s9892_s28  ;;  %v5838_v36 = vld [vmem:[#allocation2 + $0x41] sm:$0xff]  ;;  %v9312_v23 = vpack.i.bf16 %v5432_v57, %v5431_v29 }
 0x58b   : > { %v5996_v61 = vmul.f32 %v5879_v62, %v5836_v2  ;;  %9298 = vrot.lane.b32.xlu1 %v9297_v39, %s9892_s28  ;;  %v4855_v39 = vld [vmem:[#allocation2 + $0x79] sm:$0xff]  ;;  %v9317_v2 = vpack.i.bf16 %v4824_v6, %v4823_v19 }
 0x58c   : > { %v5015_v29 = vmul.f32 %v16764_v56, %v4855_v39  ;;  %v16767_v39 = vld [vmem:[#allocation157_spill] sm:$0xff] }
 0x58d   : > { %v6990_v30 = vpack.c.bf16 %v5996_v61, %v5995_v26  ;;  %v15139_v25 = vpop.permute.xlu0 %5930  ;;  %v5999_v26 = vmul.f32 %v15067_v16, %v14981_v60  ;;  %v5816_v60 = vmul.f32 %v14927_v45, %v5656_v37 }
 0x58e   : > { %v5887_v32 = vpop.permute.xlu1 %5886  ;;  %9303 = vrot.lane.b32.xlu0 %v9302_v20, %s9893_s14  ;;  %v9322_v20 = vpack.i.bf16 %v5624_v50, %v5623_v42 }
 0x58f   : > { %v5998_v33 = vmul.f32 %v5887_v32, %v5838_v36  ;;  %8433 = vmatmul.mubr.msk.bf16.vlgmr.msra.gmra.mxu0 %vm347_vm0, %v6990_v30  ;;  %9308 = vrot.lane.b32.xlu1 %v9307_v0, %s9893_s14  ;;  %v5815_v0 = vmul.f32 %v14983_v63, %v5655_v7  ;;  %v16765_v30 = vld [vmem:[#allocation70_spill] sm:$0xff]  ;;  %v9327_v32 = vpack.i.bf16 %v5016_v58, %v5015_v29  ;;  %v16770_v29 = vld [vmem:[#allocation51_spill] sm:$0xff] }
 0x590   : > { %v5208_v9 = vmul.f32 %v16765_v30, %v5048_v22  ;;  %v6001_v63 = vmul.f32 %v15079_v11, %v15018_v10  ;;  %v4826_v22 = vmul.f32 %v5656_v37, %v16767_v39  ;;  %v15176_v10 = vld [vmem:[#allocation2 + $0x9f] sm:$0xff] }
 0x591   : > { %v6993_v62 = vpack.c.bf16 %v5998_v33, %v5997_v43  ;;  %v15158_v6 = vpop.permute.xlu0 %5938  ;;  %v15164_v43 = vld [vmem:[#allocation2 + $0x99] sm:$0xff]  ;;  %v5273_v33 = vld [vmem:[#allocation2 + $0x91] sm:$0xff]  ;;  %v9332_v19 = vpack.i.bf16 %v5816_v60, %v5815_v0 }
 0x592   : > { %v5895_v17 = vpop.permute.xlu1 %5894  ;;  %9313 = vrot.lane.b32.xlu0 %v9312_v23, %s9891_s27  ;;  %v5433_v45 = vmul.f32 %v14604_v27, %v5273_v33  ;;  %v5657_v30 = vld [vmem:[#allocation2 + $0x98] sm:$0xff]  ;;  %v16773_v60 = vld [vmem:[#allocation124_spill] sm:$0xff]  ;;  %v16775_v39 = vld [vmem:[#allocation102_spill] sm:$0xff] }
 0x593   : > { %v6000_v61 = vmul.f32 %v5895_v17, %v15011_v34  ;;  %8436 = vmatprep.mubr.msk.bf16.mxu0 %vm347_vm0, %v6993_v62  ;;  %9318 = vrot.lane.b32.xlu1 %v9317_v2, %s9891_s27  ;;  %v16766_v34 = vld [vmem:[#allocation130_spill] sm:$0xff]  ;;  %v16768_v2 = vld [vmem:[#allocation12_spill] sm:$0xff] }
 0x594   : > { %v5207_v36 = vmul.f32 %v16766_v34, %v15099_v21  ;;  %v5434_v21 = vmul.f32 %v14584_v47, %v15164_v43  ;;  %v4825_v48 = vmul.f32 %v5655_v7, %v16768_v2  ;;  %v16769_v47 = vld [vmem:[#allocation110_spill] sm:$0xff]  ;;  %v4857_v17 = vld [vmem:[#allocation2 + $0x89] sm:$0xff] }
 0x595   : > { %v6996_v57 = vpack.c.bf16 %v6000_v61, %v5999_v26  ;;  %v15180_v11 = vpop.permute.xlu0 %5946  ;;  %v5626_v42 = vmul.f32 %v16769_v47, %v15176_v10  ;;  %v5050_v26 = vld [vmem:[#allocation2 + $0x97] sm:$0xff]  ;;  %v5658_v34 = vld [vmem:[#allocation2 + $0xa0] sm:$0xff]  ;;  %v16777_v2 = vld [vmem:[#allocation67_spill] sm:$0xff] }
 0x596   : > { %v5903_v16 = vpop.permute.xlu1 %5902  ;;  %9323 = vrot.lane.b32.xlu0 %v9322_v20, %s9892_s28  ;;  %v9337_v23 = vpack.i.bf16 %v5208_v9, %v5207_v36  ;;  %v9342_v58 = vpack.i.bf16 %v5434_v21, %v5433_v45  ;;  %v9347_v56 = vpack.i.bf16 %v4826_v22, %v4825_v48  ;;  %v16772_v9 = vld [vmem:[#allocation113_spill] sm:$0xff]  ;;  %v15213_v47 = vld [vmem:[#allocation2 + $0xaf] sm:$0xff] }
 0x597   : > { %v6002_v28 = vmul.f32 %v5903_v16, %v15046_v51  ;;  %8437 = vmatmul.mubr.msk.bf16.gmra.mxu0 %vm347_vm0, %v6996_v57  ;;  %9328 = vrot.lane.b32.xlu1 %v9327_v32, %s9892_s28  ;;  %v6003_v51 = vmul.f32 %v15093_v12, %v15051_v55  ;;  %v5018_v55 = vmul.f32 %v5273_v33, %v16770_v29  ;;  %v16771_v12 = vld [vmem:[#allocation123_spill] sm:$0xff]  ;;  %v4859_v29 = vld [vmem:[#allocation2 + $0x99] sm:$0xff] }
 0x598   : > { %v5625_v20 = vmul.f32 %v16771_v12, %v5050_v26  ;;  %v5017_v37 = vmul.f32 %v16772_v9, %v4857_v17  ;;  %v5817_v32 = vmul.f32 %v14995_v52, %v5657_v30  ;;  %v5210_v16 = vmul.f32 %v16773_v60, %v5050_v26  ;;  %v5852_v9 = vld [vmem:[#allocation2 + $0xb1] sm:$0xff] }
 0x599   : > { %v6999_v50 = vpack.c.bf16 %v6002_v28, %v6001_v63  ;;  %v15199_v36 = vpop.permute.xlu0 %5954  ;;  %v6007_v52 = vmul.f32 %v15117_v3, %v15129_v59  ;;  %v6009_v3 = vmul.f32 %v15139_v25, %v15164_v43  ;;  %v16781_v25 = vld [vmem:[#allocation36_spill] sm:$0xff] }
 0x59a   : > { %v5911_v62 = vpop.permute.xlu1 %5910  ;;  %9333 = vrot.lane.b32.xlu0 %v9332_v19, %s9893_s14  ;;  %v9352_v57 = vpack.i.bf16 %v5626_v42, %v5625_v20  ;;  %v9357_v28 = vpack.i.bf16 %v5018_v55, %v5017_v37  ;;  %v5276_v19 = vld [vmem:[#allocation2 + $0xa9] sm:$0xff] }
 0x59b   : > { %v6004_v27 = vmul.f32 %v5911_v62, %v15086_v44  ;;  %8440 = vmatprep.mubr.msk.bf16.mxu0 %vm347_vm0, %v6999_v50  ;;  %9338 = vrot.lane.b32.xlu1 %v9337_v23, %s9893_s14  ;;  %v6005_v44 = vmul.f32 %v15106_v15, %v15091_v49  ;;  %v5818_v49 = vmul.f32 %v14939_v40, %v5658_v34  ;;  %v5275_v23 = vld [vmem:[#allocation2 + $0xa1] sm:$0xff] }
 0x59c   : > { %v5435_v22 = vmul.f32 %v16775_v39, %v5275_v23  ;;  %v5436_v48 = vmul.f32 %v16777_v2, %v5276_v19  ;;  %v16778_v42 = vld [vmem:[#allocation11_spill] sm:$0xff]  ;;  %v16786_v2 = vld [vmem:[#allocation16_spill] sm:$0xff] }
 0x59d   : > { %v7002_v61 = vpack.c.bf16 %v6004_v27, %v6003_v51  ;;  %v9362_v21 = vpack.i.bf16 %v5818_v49, %v5817_v32  ;;  %v16776_v51 = vld [vmem:[#allocation50_spill] sm:$0xff]  ;;  %v15217_v59 = vpop.permute.xlu0 %5962  ;;  %v4827_v17 = vmul.f32 %v5657_v30, %v16778_v42  ;;  %v5659_v37 = vld [vmem:[#allocation2 + $0xa8] sm:$0xff]  ;;  %v5660_v49 = vld [vmem:[#allocation2 + $0xb0] sm:$0xff] }
 0x59e   : > { %v5919_v0 = vpop.permute.xlu1 %5918  ;;  %9343 = vrot.lane.b32.xlu0 %v9342_v58, %s9891_s27  ;;  %v4828_v27 = vmul.f32 %v5658_v34, %v16776_v51  ;;  %v4860_v58 = vld [vmem:[#allocation2 + $0xa1] sm:$0xff]  ;;  %v9372_v26 = vpack.i.bf16 %v5436_v48, %v5435_v22  ;;  %v5819_v34 = vmul.f32 %v15006_v31, %v5659_v37  ;;  %v5277_v22 = vld [vmem:[#allocation2 + $0xb1] sm:$0xff]  ;;  %v4830_v48 = vmul.f32 %v5660_v49, %v16786_v2 }
 0x59f   : > { %v6006_v7 = vmul.f32 %v5919_v0, %v15123_v4  ;;  %8441 = vmatmul.mubr.msk.bf16.gmra.mxu0 %vm347_vm0, %v7002_v61  ;;  %9348 = vrot.lane.b32.xlu1 %v9347_v56, %s9891_s27  ;;  %v16774_v4 = vld [vmem:[#allocation103_spill] sm:$0xff]  ;;  %v16779_v61 = vld [vmem:[#allocation148_spill] sm:$0xff]  ;;  %v16782_v32 = vld [vmem:[#allocation122_spill] sm:$0xff] }
 0x5a0   : > { %v5209_v45 = vmul.f32 %v16774_v4, %v15135_v14  ;;  %v5628_v56 = vmul.f32 %v16779_v61, %v15213_v47  ;;  %v5052_v55 = vld [vmem:[#allocation2 + $0xa7] sm:$0xff]  ;;  %v9377_v20 = vpack.i.bf16 %v4828_v27, %v4827_v17  ;;  %v5019_v60 = vmul.f32 %v16782_v32, %v4859_v29  ;;  %v15263_v32 = vld [vmem:[#allocation2 + $0xd9] sm:$0xff] }
 0x5a1   : > { %v7005_v63 = vpack.c.bf16 %v6006_v7, %v6005_v44  ;;  %v16780_v0 = vld [vmem:[#allocation119_spill] sm:$0xff]  ;;  %v5627_v43 = vmul.f32 %v16781_v25, %v5052_v55 }
 0x5a2   : > { %v5927_v15 = vpop.permute.xlu1 %5926  ;;  %9353 = vrot.lane.b32.xlu0 %v9352_v57, %s9892_s28  ;;  %v9367_v40 = vpack.i.bf16 %v5210_v16, %v5209_v45  ;;  %v5020_v44 = vmul.f32 %v16780_v0, %v4860_v58  ;;  %v6011_v57 = vmul.f32 %v15158_v6, %v5276_v19  ;;  %v5820_v6 = vmul.f32 %v14953_v38, %v5660_v49  ;;  %v16788_v61 = vld [vmem:[#allocation31_spill] sm:$0xff] }
 0x5a3   : > { %v6008_v50 = vmul.f32 %v5927_v15, %v5273_v33  ;;  %8444 = vmatprep.mubr.msk.bf16.mxu0 %vm347_vm0, %v7005_v63  ;;  %9358 = vrot.lane.b32.xlu1 %v9357_v28, %s9892_s28  ;;  %v9382_v16 = vpack.i.bf16 %v5628_v56, %v5627_v43  ;;  %v16783_v63 = vld [vmem:[#allocation93_spill] sm:$0xff]  ;;  %v15233_v15 = vpop.permute.xlu0 %9103  ;;  %v4829_v56 = vmul.f32 %v5659_v37, %v16788_v61  ;;  %v4861_v29 = vld [vmem:[#allocation2 + $0xa9] sm:$0xff]  ;;  %v5279_v2 = vld [vmem:[#allocation2 + $0xc1] sm:$0xff] }
 0x5a4   : > { %v5212_v28 = vmul.f32 %v16783_v63, %v5052_v55  ;;  %v9387_v45 = vpack.i.bf16 %v5020_v44, %v5019_v60  ;;  %v9392_v38 = vpack.i.bf16 %v5820_v6, %v5819_v34  ;;  %v9106_v0 = vunpack.i.h.bf16 %v15233_v15  ;;  %v16790_v44 = vld [vmem:[#allocation101_spill] sm:$0xff]  ;;  %v16791_v60 = vld [vmem:[#allocation27_spill] sm:$0xff]  ;;  %v16797_v61 = vld [vmem:[#allocation118_spill] sm:$0xff] }
 0x5a5   : > { %v7008_v62 = vpack.c.bf16 %v6008_v50, %v6007_v52  ;;  %v15236_v52 = vld [vmem:[#allocation2 + $0xc1] sm:$0xff]  ;;  %v5022_v25 = vmul.f32 %v5852_v9, %v16790_v44  ;;  %v5054_v43 = vld [vmem:[#allocation2 + $0xb7] sm:$0xff] }
 0x5a6   : > { %v5935_v14 = vpop.permute.xlu1 %5934  ;;  %9363 = vrot.lane.b32.xlu0 %v9362_v21, %s9893_s14  ;;  %v16784_v50 = vld [vmem:[#allocation83_spill] sm:$0xff] }
 0x5a7   : > { %v6010_v33 = vmul.f32 %v5935_v14, %v5275_v23  ;;  %8445 = vmatmul.mubr.msk.bf16.gmra.mxu0 %vm347_vm0, %v7008_v62  ;;  %9368 = vrot.lane.b32.xlu1 %v9367_v40, %s9893_s14  ;;  %v5278_v23 = vld [vmem:[#allocation2 + $0xb9] sm:$0xff]  ;;  %v5211_v39 = vmul.f32 %v16784_v50, %v15176_v10  ;;  %v16785_v40 = vld [vmem:[#allocation132_spill] sm:$0xff]  ;;  %v9114_v17 = vpop.permute.xlu0 %9113  ;;  %v16792_v49 = vld [vmem:[#allocation79_spill] sm:$0xff] }
 0x5a8   : > { %v6013_v31 = vmul.f32 %v15180_v11, %v5278_v23  ;;  %v5437_v62 = vmul.f32 %v16785_v40, %v5277_v22  ;;  %v16787_v14 = vld [vmem:[#allocation28_spill] sm:$0xff]  ;;  %v5470_v11 = vld [vmem:[#allocation2 + $0xbf] sm:$0xff]  ;;  %v9116_v34 = vunpack.i.h.bf16 %v9114_v17  ;;  %v9115_v37 = vunpack.i.l.bf16 %v9114_v17 }
 0x5a9   : > { %v7011_v12 = vpack.c.bf16 %v6010_v33, %v6009_v3  ;;  %v9397_v51 = vpack.i.bf16 %v5212_v28, %v5211_v39  ;;  %v5438_v58 = vmul.f32 %v16787_v14, %v5278_v23  ;;  %v15248_v3 = vld [vmem:[#allocation2 + $0xc9] sm:$0xff]  ;;  %v15250_v33 = vld [vmem:[#allocation2 + $0xd1] sm:$0xff]  ;;  %v15266_v28 = vld [vmem:[#allocation2 + $0xe1] sm:$0xff]  ;;  %v6890_v39 = vsel %vm347_vm0, %v14878_v54, %v9106_v0 }
 0x5aa   : > { %v5943_v7 = vpop.permute.xlu1 %5942  ;;  %9373 = vrot.lane.b32.xlu0 %v9372_v26, %s9891_s27  ;;  %v6015_v42 = vmul.f32 %v15199_v36, %v15248_v3  ;;  %v9105_v36 = vunpack.i.l.bf16 %v15233_v15  ;;  %v16793_v23 = vld [vmem:[#allocation38_spill] sm:$0xff]  ;;  %v6922_v54 = vsel %vm3598_vm1, %v6890_v39, %v9116_v34 }
 0x5ab   : > { %v6012_v30 = vmul.f32 %v5943_v7, %v5852_v9  ;;  %8448 = vmatprep.mubr.msk.bf16.mxu0 %vm347_vm0, %v7011_v12  ;;  %9378 = vrot.lane.b32.xlu1 %v9377_v20, %s9891_s27  ;;  %v9402_v55 = vpack.i.bf16 %v5438_v58, %v5437_v62  ;;  %v16789_v12 = vld [vmem:[#allocation44_spill] sm:$0xff]  ;;  %v5661_v9 = vld [vmem:[#allocation2 + $0xb8] sm:$0xff]  ;;  %v5214_v6 = vmul.f32 %v16793_v23, %v5054_v43  ;;  %v5662_v40 = vld [vmem:[#allocation2 + $0xc0] sm:$0xff] }
 0x5ac   : > { %v5630_v20 = vmul.f32 %v16789_v12, %v5470_v11  ;;  %v5469_v7 = vld [vmem:[#allocation2 + $0xb7] sm:$0xff]  ;;  %v5821_v50 = vmul.f32 %v15020_v1, %v5661_v9 }
 0x5ad   : > { %v7014_v4 = vpack.c.bf16 %v6012_v30, %v6011_v57  ;;  %v9407_v30 = vpack.i.bf16 %v4830_v48, %v4829_v56  ;;  %v16794_v62 = vld [vmem:[#allocation69_spill] sm:$0xff]  ;;  %v5822_v48 = vmul.f32 %v14967_v13, %v5662_v40  ;;  %v16796_v11 = vld [vmem:[#allocation68_spill] sm:$0xff] }
 0x5ae   : > { %v5951_v19 = vpop.permute.xlu1 %5950  ;;  %9383 = vrot.lane.b32.xlu0 %v9382_v16, %s9892_s28  ;;  %v5629_v16 = vmul.f32 %v16791_v60, %v5469_v7  ;;  %v16795_v58 = vld [vmem:[#allocation25_spill] sm:$0xff] }
 0x5af   : > { %v6014_v21 = vmul.f32 %v5951_v19, %v15236_v52  ;;  %8449 = vmatmul.mubr.msk.bf16.gmra.mxu0 %vm347_vm0, %v7014_v4  ;;  %9388 = vrot.lane.b32.xlu1 %v9387_v45, %s9892_s28  ;;  %v5021_v4 = vmul.f32 %v16792_v49, %v4861_v29  ;;  %v6017_v45 = vmul.f32 %v15217_v59, %v15263_v32  ;;  %v16800_v7 = vld [vmem:[#allocation77_spill] sm:$0xff]  ;;  %v16803_v49 = vld [vmem:[#allocation23_spill] sm:$0xff] }
 0x5b0   : > { %v9412_v19 = vpack.i.bf16 %v5630_v20, %v5629_v16  ;;  %v6889_v59 = vsel %vm347_vm0, %v16794_v62, %v9105_v36  ;;  %v9422_v29 = vpack.i.bf16 %v5822_v48, %v5821_v50  ;;  %v16798_v20 = vld [vmem:[#allocation80_spill] sm:$0xff]  ;;  %v5024_v36 = vmul.f32 %v15236_v52, %v16800_v7 }
 0x5b1   : > { %v7017_v27 = vpack.c.bf16 %v6014_v21, %v6013_v31  ;;  %v9417_v31 = vpack.i.bf16 %v5022_v25, %v5021_v4  ;;  %v4393_v21 = vld [vmem:[#allocation2 + $0x7] sm:$0xff]  ;;  %v6921_v1 = vsel %vm3598_vm1, %v6889_v59, %v9115_v37  ;;  %v5440_v0 = vmul.f32 %v16798_v20, %v15248_v3  ;;  %v16799_v25 = vld [vmem:[#allocation64_spill] sm:$0xff] }
 0x5b2   : > { %v5959_v10 = vpop.permute.xlu1 %5958  ;;  %9393 = vrot.lane.b32.xlu0 %v9392_v38, %s9893_s14  ;;  %v4617_v56 = vmul.f32 %v16797_v61, %v4393_v21  ;;  %v4832_v43 = vmul.f32 %v5662_v40, %v16799_v25  ;;  %v4394_v16 = vld [vmem:[#allocation2 + $0xf] sm:$0xff]  ;;  %v16802_v37 = vld [vmem:[#allocation18_spill] sm:$0xff] }
 0x5b3   : > { %v6016_v26 = vmul.f32 %v5959_v10, %v15250_v33  ;;  %8452 = vmatprep.mubr.msk.bf16.mxu0 %vm347_vm0, %v7017_v27  ;;  %9398 = vrot.lane.b32.xlu1 %v9397_v51, %s9893_s14  ;;  %v5213_v10 = vmul.f32 %v15213_v47, %v16795_v58  ;;  %v5472_v47 = vld [vmem:[#allocation2 + $0xcf] sm:$0xff]  ;;  %v5056_v3 = vld [vmem:[#allocation2 + $0xc7] sm:$0xff]  ;;  %v5055_v61 = vld [vmem:[#allocation2 + $0xbf] sm:$0xff] }
 0x5b4   : > { %v5663_v21 = vld [vmem:[#allocation2 + $0xc8] sm:$0xff]  ;;  %v16805_v40 = vld [vmem:[#allocation142_spill] sm:$0xff]  ;;  %v4674_v7 = vld [vmem:[#allocation2 + $0xd0] sm:$0xff] }
 0x5b5   : > { %v7020_v57 = vpack.c.bf16 %v6016_v26, %v6015_v42  ;;  %v5439_v42 = vmul.f32 %v16796_v11, %v5279_v2  ;;  %v4863_v26 = vld [vmem:[#allocation2 + $0xb9] sm:$0xff]  ;;  %v9427_v44 = vpack.i.bf16 %v5214_v6, %v5213_v10  ;;  %v4618_v62 = vmul.f32 %v16805_v40, %v4394_v16 }
 0x5b6   : > { %v5967_v63 = vpop.permute.xlu1 %5966  ;;  %9403 = vrot.lane.b32.xlu0 %v9402_v55, %s9891_s27  ;;  %v5023_v4 = vmul.f32 %v16803_v49, %v4863_v26  ;;  %v5823_v2 = vmul.f32 %v15031_v35, %v5663_v21  ;;  %v16808_v16 = vld [vmem:[#allocation78_spill] sm:$0xff] }
 0x5b7   : > { %v6018_v15 = vmul.f32 %v5967_v63, %v15266_v28  ;;  %8453 = vmatmul.mubr.msk.bf16.gmra.mxu0 %vm347_vm0, %v7020_v57  ;;  %9408 = vrot.lane.b32.xlu1 %v9407_v30, %s9891_s27  ;;  %v5471_v57 = vld [vmem:[#allocation2 + $0xc7] sm:$0xff]  ;;  %v16801_v30 = vld [vmem:[#allocation108_spill] sm:$0xff]  ;;  %v4831_v63 = vmul.f32 %v5661_v9, %v16802_v37 }
 0x5b8   : > { %v9124_v22 = vpop.permute.xlu0 %9123  ;;  %v5632_v60 = vmul.f32 %v16801_v30, %v5472_v47  ;;  %v9447_v9 = vpack.i.bf16 %v5024_v36, %v5023_v4  ;;  %v5281_v47 = vld [vmem:[#allocation2 + $0xd1] sm:$0xff]  ;;  %v16807_v36 = vld [vmem:[#allocation90_spill] sm:$0xff] }
 0x5b9   : > { %v7023_v38 = vpack.c.bf16 %v6018_v15, %v6017_v45  ;;  %v9126_v51 = vunpack.i.h.bf16 %v9124_v22  ;;  %v9125_v27 = vunpack.i.l.bf16 %v9124_v22  ;;  %v9432_v45 = vpack.i.bf16 %v5440_v0, %v5439_v42  ;;  %v16804_v15 = vld [vmem:[#allocation81_spill] sm:$0xff]  ;;  %v16813_v40 = vld [vmem:[#allocation126_spill] sm:$0xff] }
 0x5ba   : > { %9413 = vrot.lane.b32.xlu0 %v9412_v19, %s9892_s28  ;;  %v9109_v14 = vpop.permute.xlu1 %9108  ;;  %v5631_v23 = vmul.f32 %v16804_v15, %v5471_v57  ;;  %v9437_v59 = vpack.i.bf16 %v4832_v43, %v4831_v63  ;;  %v4395_v0 = vld [vmem:[#allocation2 + $0x17] sm:$0xff]  ;;  %v5441_v57 = vmul.f32 %v16807_v36, %v5281_v47 }
 0x5bb   : > { %8456 = vmatprep.mubr.msk.bf16.mxu0 %vm347_vm0, %v7023_v38  ;;  %9418 = vrot.lane.b32.xlu1 %v9417_v31, %s9892_s28  ;;  %v6953_v17 = vsel %vm3631_vm2, %v6921_v1, %v9125_v27  ;;  %v6954_v13 = vsel %vm3631_vm2, %v6922_v54, %v9126_v51  ;;  %v9111_v6 = vunpack.i.h.bf16 %v9109_v14  ;;  %v9110_v19 = vunpack.i.l.bf16 %v9109_v14  ;;  %v16806_v38 = vld [vmem:[#allocation112_spill] sm:$0xff] }
 0x5bc   : > { %v9134_v55 = vpop.permute.xlu0 %9133  ;;  %v6986_v12 = vpack.c.bf16 %v6954_v13, %v6953_v17  ;;  %v15306_v51 = vmul.f32 %v16806_v38, %v5056_v3  ;;  %v9442_v27 = vpack.i.bf16 %v5632_v60, %v5631_v23  ;;  %v16809_v63 = vld [vmem:[#allocation152_spill] sm:$0xff]  ;;  %v5474_v23 = vld [vmem:[#allocation2 + $0xdf] sm:$0xff] }
 0x5bd   : > { %v9136_v52 = vunpack.i.h.bf16 %v9134_v55  ;;  %v9135_v50 = vunpack.i.l.bf16 %v9134_v55  ;;  %v6793_v54 = vsel %vm347_vm0, %v4617_v56, %v9110_v19  ;;  %v6794_v58 = vsel %vm347_vm0, %v4618_v62, %v9111_v6  ;;  %v16811_v19 = vld [vmem:[#allocation20_spill] sm:$0xff] }
 0x5be   : > { %9423 = vrot.lane.b32.xlu0 %v9422_v29, %s9893_s14  ;;  %7264 = vmatprep.mubr.bf16.mxu1 %v6986_v12  ;;  %v9119_v34 = vpop.permute.xlu1 %9118  ;;  %v5664_v29 = vld [vmem:[#allocation2 + $0xd0] sm:$0xff]  ;;  %v4619_v49 = vmul.f32 %v16809_v63, %v4395_v0  ;;  %v5634_v62 = vmul.f32 %v16813_v40, %v5474_v23  ;;  %v4397_v63 = vld [vmem:[#allocation2 + $0x27] sm:$0xff] }
 0x5bf   : > { %9428 = vrot.lane.b32.xlu1 %v9427_v44, %s9893_s14  ;;  %v9121_v39 = vunpack.i.h.bf16 %v9119_v34  ;;  %v9120_v22 = vunpack.i.l.bf16 %v9119_v34  ;;  %v6892_v42 = vsel %vm347_vm0, %v14922_v46, %v9136_v52  ;;  %v6891_v17 = vsel %vm347_vm0, %v14880_v8, %v9135_v50  ;;  %v16812_v50 = vld [vmem:[#allocation53_spill] sm:$0xff] }
 0x5c0   : > { %v9144_v31 = vpop.permute.xlu0 %9143  ;;  %v5824_v46 = vmul.f32 %v14979_v53, %v5664_v29  ;;  %v5215_v34 = vmul.f32 %v16808_v16, %v5055_v61  ;;  %v4865_v53 = vld [vmem:[#allocation2 + $0xc9] sm:$0xff]  ;;  %v4834_v52 = vmul.f32 %v16811_v19, %v4674_v7 }
 0x5c1   : > { %v9146_v48 = vunpack.i.h.bf16 %v9144_v31  ;;  %v9145_v14 = vunpack.i.l.bf16 %v9144_v31  ;;  %v6825_v35 = vsel %vm3598_vm1, %v6793_v54, %v9120_v22  ;;  %v6826_v13 = vsel %vm3598_vm1, %v6794_v58, %v9121_v39  ;;  %v9797_v22 = vld [vmem:[%s15800_s6 + $0x88] sm:$0xff]   ;;  %v5473_v31 = vld [vmem:[#allocation2 + $0xd7] sm:$0xff]  ;;  %v9798_v58 = vld [vmem:[%s15800_s6 + $0x80] sm:$0xff]  }
 0x5c2   : > { %9433 = vrot.lane.b32.xlu0 %v9432_v45, %s9891_s27  ;;  %v9129_v1 = vpop.permute.xlu1 %9128  ;;  %v9452_v37 = vpack.i.bf16 %v5824_v46, %v5823_v2  ;;  %v16810_v45 = vld [vmem:[#allocation87_spill] sm:$0xff]  ;;  %v9457_v6 = vpack.i.bf16 %v15306_v51, %v5215_v34  ;;  %v15337_v39 = vmul.f32 %v15250_v33, %v16812_v50  ;;  %v16815_v51 = vld [vmem:[#allocation98_spill] sm:$0xff]  ;;  %v5058_v2 = vld [vmem:[#allocation2 + $0xd7] sm:$0xff] }
 0x5c3   : > { %v9131_v10 = vunpack.i.h.bf16 %v9129_v1  ;;  %v9130_v11 = vunpack.i.l.bf16 %v9129_v1  ;;  %9438 = vrot.lane.b32.xlu1 %v9437_v59, %s9891_s27  ;;  %v6923_v44 = vsel %vm3598_vm1, %v6891_v17, %v9145_v14  ;;  %v6924_v8 = vsel %vm3598_vm1, %v6892_v42, %v9146_v48  ;;  %v4396_v59 = vld [vmem:[#allocation2 + $0x1f] sm:$0xff]  ;;  %v16816_v48 = vld [vmem:[#allocation111_spill] sm:$0xff] }
 0x5c4   : > { %v9154_v26 = vpop.permute.xlu0 %9153  ;;  %v5442_v15 = vmul.f32 %v16810_v45, %v15263_v32  ;;  %v5633_v14 = vmul.f32 %v16816_v48, %v5473_v31  ;;  %v5057_v16 = vld [vmem:[#allocation2 + $0xcf] sm:$0xff]  ;;  %v5666_v34 = vld [vmem:[#allocation2 + $0xe0] sm:$0xff] }
 0x5c5   : > { %v6857_v56 = vsel %vm3631_vm2, %v6825_v35, %v9130_v11  ;;  %v6858_v55 = vsel %vm3631_vm2, %v6826_v13, %v9131_v10  ;;  %v9156_v12 = vunpack.i.h.bf16 %v9154_v26  ;;  %v9155_v20 = vunpack.i.l.bf16 %v9154_v26  ;;  %v5665_v35 = vld [vmem:[#allocation2 + $0xd8] sm:$0xff]  ;;  %v16817_v13 = vld [vmem:[#allocation146_spill] sm:$0xff]  ;;  %v5284_v45 = vld [vmem:[#allocation2 + $0xe9] sm:$0xff] }
 0x5c6   : > { %v6985_v25 = vpack.c.bf16 %v6858_v55, %v6857_v56  ;;  %9443 = vrot.lane.b32.xlu0 %v9442_v27, %s9892_s28  ;;  %v9139_v43 = vpop.permute.xlu1 %9138  ;;  %v5025_v27 = vmul.f32 %v16815_v51, %v4865_v53  ;;  %v9462_v33 = vpack.i.bf16 %v5442_v15, %v5441_v57  ;;  %v4620_v26 = vmul.f32 %v16817_v13, %v4396_v59  ;;  %v16818_v56 = vld [vmem:[#allocation26_spill] sm:$0xff]  ;;  %v16819_v15 = vld [vmem:[#allocation96_spill] sm:$0xff] }
 0x5c7   : > { %9448 = vrot.lane.b32.xlu1 %v9447_v9, %s9892_s28  ;;  %v6955_v30 = vsel %vm3631_vm2, %v6923_v44, %v9155_v20  ;;  %v6956_v60 = vsel %vm3631_vm2, %v6924_v8, %v9156_v12  ;;  %v16814_v9 = vld [vmem:[#allocation66_spill] sm:$0xff]  ;;  %v9141_v1 = vunpack.i.h.bf16 %v9139_v43  ;;  %v9140_v54 = vunpack.i.l.bf16 %v9139_v43  ;;  %v4398_v13 = vld [vmem:[#allocation2 + $0x2f] sm:$0xff] }
 0x5c8   : > { %v9164_v4 = vpop.permute.xlu0 %9163  ;;  %7265 = vmatmul.mubr.bf16.vlgmr.msra.gmra.mxu1 %v6985_v25  ;;  %v6989_v3 = vpack.c.bf16 %v6956_v60, %v6955_v30  ;;  %v4833_v38 = vmul.f32 %v5663_v21, %v16814_v9  ;;  %v9477_v29 = vpack.i.bf16 %v15337_v39, %v5025_v27  ;;  %v15354_v55 = vmul.f32 %v16818_v56, %v5058_v2  ;;  %v5229_v25 = vld [vmem:[#allocation2 + $0x30] sm:$0xff]  ;;  %v4676_v50 = vld [vmem:[#allocation2 + $0xe0] sm:$0xff] }
 0x5c9   : > { %8466 = vmatpush3.bf16.msra.mxu1 %v9797_v22  ;;  %v9166_v10 = vunpack.i.h.bf16 %v9164_v4  ;;  %v9165_v11 = vunpack.i.l.bf16 %v9164_v4  ;;  %v9472_v12 = vpack.i.bf16 %v5634_v62, %v5633_v14  ;;  %v5825_v20 = vmul.f32 %v15041_v41, %v5665_v35  ;;  %v16820_v39 = vld [vmem:[#allocation104_spill] sm:$0xff]  ;;  %v16828_v56 = vld [vmem:[#allocation114_spill] sm:$0xff] }
 0x5ca   : > { %9453 = vrot.lane.b32.xlu0 %v9452_v37, %s9893_s14  ;;  %v9149_v32 = vpop.permute.xlu1 %9148  ;;  %7272 = vmatprep.mubr.bf16.mxu1 %v6989_v3  ;;  %v9467_v61 = vpack.i.bf16 %v4834_v52, %v4833_v38  ;;  %v6796_v44 = vsel %vm347_vm0, %v4620_v26, %v9141_v1  ;;  %v6795_v8 = vsel %vm347_vm0, %v4619_v49, %v9140_v54  ;;  %v5283_v3 = vld [vmem:[#allocation2 + $0xe1] sm:$0xff]  ;;  %v16821_v62 = vld [vmem:[#allocation120_spill] sm:$0xff]  ;;  %v16824_v54 = vld [vmem:[#allocation21_spill] sm:$0xff] }
 0x5cb   : > { %9458 = vrot.lane.b32.xlu1 %v9457_v6, %s9893_s14  ;;  %8465 = vmatprep.subr.bf16.mxu1 %v9798_v58  ;;  %v9151_v42 = vunpack.i.h.bf16 %v9149_v32  ;;  %v9150_v17 = vunpack.i.l.bf16 %v9149_v32  ;;  %v6894_v36 = vsel %vm347_vm0, %v14962_v18, %v9166_v10  ;;  %v6893_v57 = vsel %vm347_vm0, %v5229_v25, %v9165_v11  ;;  %v4867_v32 = vld [vmem:[#allocation2 + $0xd9] sm:$0xff]  ;;  %v16822_v38 = vld [vmem:[#allocation127_spill] sm:$0xff] }
 0x5cc   : > { %v9174_v21 = vpop.permute.xlu0 %9173  ;;  %v5826_v18 = vmul.f32 %v16819_v15, %v5666_v34  ;;  %v5443_v22 = vmul.f32 %v16820_v39, %v5283_v3  ;;  %v5217_v59 = vmul.f32 %v16821_v62, %v5057_v16  ;;  %v4621_v51 = vmul.f32 %v16822_v38, %v4397_v63  ;;  %v5476_v14 = vld [vmem:[#allocation2 + $0xef] sm:$0xff]  ;;  %v16825_v10 = vld [vmem:[#allocation89_spill] sm:$0xff] }
 0x5cd   : > { %8467 = vmatpush3.bf16.msra.mxu1 %v9798_v58  ;;  %v9176_v0 = vunpack.i.h.bf16 %v9174_v21  ;;  %v9175_v47 = vunpack.i.l.bf16 %v9174_v21  ;;  %v6827_v41 = vsel %vm3598_vm1, %v6795_v8, %v9150_v17  ;;  %v6828_v30 = vsel %vm3598_vm1, %v6796_v44, %v9151_v42  ;;  %v5475_v42 = vld [vmem:[#allocation2 + $0xe7] sm:$0xff]  ;;  %v16826_v17 = vld [vmem:[#allocation61_spill] sm:$0xff] }
 0x5ce   : > { %9463 = vrot.lane.b32.xlu0 %v9462_v33, %s9891_s27  ;;  %v9159_v46 = vpop.permute.xlu1 %9158  ;;  %v9482_v9 = vpack.i.bf16 %v5826_v18, %v5825_v20  ;;  %v16823_v33 = vld [vmem:[#allocation63_spill] sm:$0xff]  ;;  %v9487_v1 = vpack.i.bf16 %v15354_v55, %v5217_v59  ;;  %v4836_v58 = vmul.f32 %v16824_v54, %v4676_v50  ;;  %v5028_v11 = vmul.f32 %v15266_v28, %v16825_v10  ;;  %v16829_v55 = vld [vmem:[#allocation140_spill] sm:$0xff]  ;;  %v15402_v39 = vld [vmem:[#allocation2 + $0xdf] sm:$0xff] }
 0x5cf   : > { %v9161_v43 = vunpack.i.h.bf16 %v9159_v46  ;;  %v9160_v7 = vunpack.i.l.bf16 %v9159_v46  ;;  %9468 = vrot.lane.b32.xlu1 %v9467_v61, %s9891_s27  ;;  %v6925_v23 = vsel %vm3598_vm1, %v6893_v57, %v9175_v47  ;;  %v6926_v6 = vsel %vm3598_vm1, %v6894_v36, %v9176_v0  ;;  %v16827_v61 = vld [vmem:[#allocation71_spill] sm:$0xff]  ;;  %v16830_v57 = vld [vmem:[#allocation121_spill] sm:$0xff]  ;;  %v16832_v54 = vld [vmem:[#allocation128_spill] sm:$0xff] }
 0x5d0   : > { %v9184_v60 = vpop.permute.xlu0 %9183  ;;  %v5444_v48 = vmul.f32 %v16823_v33, %v5284_v45  ;;  %v5636_v21 = vmul.f32 %v16826_v17, %v5476_v14  ;;  %v5060_v20 = vld [vmem:[#allocation2 + $0xe7] sm:$0xff]  ;;  %v5635_v47 = vmul.f32 %v16829_v55, %v5475_v42  ;;  %v4399_v62 = vld [vmem:[#allocation2 + $0x37] sm:$0xff] }
 0x5d1   : > { %v9186_v53 = vunpack.i.h.bf16 %v9184_v60  ;;  %v9185_v37 = vunpack.i.l.bf16 %v9184_v60  ;;  %v6859_v49 = vsel %vm3631_vm2, %v6827_v41, %v9160_v7  ;;  %v6860_v4 = vsel %vm3631_vm2, %v6828_v30, %v9161_v43  ;;  %v5667_v36 = vld [vmem:[#allocation2 + $0xe8] sm:$0xff]  ;;  %v16831_v60 = vld [vmem:[#allocation88_spill] sm:$0xff]  ;;  %v5231_v45 = vld [vmem:[#allocation2 + $0x40] sm:$0xff] }
 0x5d2   : > { %9473 = vrot.lane.b32.xlu0 %v9472_v12, %s9892_s28  ;;  %v9169_v19 = vpop.permute.xlu1 %9168  ;;  %v6988_v52 = vpack.c.bf16 %v6860_v4, %v6859_v49  ;;  %v5027_v12 = vmul.f32 %v16828_v56, %v4867_v32  ;;  %v9492_v0 = vpack.i.bf16 %v5444_v48, %v5443_v22  ;;  %v4622_v41 = vmul.f32 %v16830_v57, %v4398_v13  ;;  %v5232_v15 = vld [vmem:[#allocation2 + $0x48] sm:$0xff]  ;;  %v5668_v22 = vld [vmem:[#allocation2 + $0xf0] sm:$0xff]  ;;  %v16833_v42 = vld [vmem:[#allocation65_spill] sm:$0xff] }
 0x5d3   : > { %9478 = vrot.lane.b32.xlu1 %v9477_v29, %s9892_s28  ;;  %v6957_v31 = vsel %vm3631_vm2, %v6925_v23, %v9185_v37  ;;  %v6958_v40 = vsel %vm3631_vm2, %v6926_v6, %v9186_v53  ;;  %v4835_v29 = vmul.f32 %v5665_v35, %v16827_v61  ;;  %v9171_v46 = vunpack.i.h.bf16 %v9169_v19  ;;  %v5285_v38 = vld [vmem:[#allocation2 + $0xf1] sm:$0xff]  ;;  %v4869_v17 = vld [vmem:[#allocation2 + $0xe9] sm:$0xff]  ;;  %v16836_v55 = vld [vmem:[#allocation6_spill] sm:$0xff] }
 0x5d4   : > { %v9194_v27 = vpop.permute.xlu0 %9193  ;;  %7273 = vmatmul.mubr.bf16.gmra.mxu1 %v6988_v52  ;;  %v6992_v2 = vpack.c.bf16 %v6958_v40, %v6957_v31  ;;  %v9170_v44 = vunpack.i.l.bf16 %v9169_v19  ;;  %v9507_v35 = vpack.i.bf16 %v5028_v11, %v5027_v12  ;;  %v15391_v16 = vmul.f32 %v16831_v60, %v5060_v20  ;;  %v16834_v13 = vld [vmem:[#allocation156_spill] sm:$0xff]  ;;  %v5478_v20 = vld [vmem:[#allocation2 + $0xff] sm:$0xff] }
 0x5d5   : > { %v9196_v28 = vunpack.i.h.bf16 %v9194_v27  ;;  %v9195_v8 = vunpack.i.l.bf16 %v9194_v27  ;;  %v9497_v30 = vpack.i.bf16 %v4836_v58, %v4835_v29  ;;  %v9502_v34 = vpack.i.bf16 %v5636_v21, %v5635_v47  ;;  %v16835_v56 = vld [vmem:[#allocation32_spill] sm:$0xff]  ;;  %v16839_v57 = vld [vmem:[#allocation74_spill] sm:$0xff] }
 0x5d6   : > { %9483 = vrot.lane.b32.xlu0 %v9482_v9, %s9893_s14  ;;  %v9179_v26 = vpop.permute.xlu1 %9178  ;;  %7280 = vmatprep.mubr.bf16.mxu1 %v6992_v2  ;;  %v5827_v53 = vmul.f32 %v15055_v5, %v5667_v36  ;;  %v6798_v4 = vsel %vm347_vm0, %v4622_v41, %v9171_v46  ;;  %v6797_v3 = vsel %vm347_vm0, %v4621_v51, %v9170_v44  ;;  %v15406_v9 = vld [vmem:[#allocation2 + $0xf0] sm:$0xff]  ;;  %v5286_v51 = vld [vmem:[#allocation2 + $0xf9] sm:$0xff] }
 0x5d7   : > { %9488 = vrot.lane.b32.xlu1 %v9487_v1, %s9893_s14  ;;  %v9181_v25 = vunpack.i.h.bf16 %v9179_v26  ;;  %v9180_v43 = vunpack.i.l.bf16 %v9179_v26  ;;  %v6896_v6 = vsel %vm347_vm0, %v5232_v15, %v9196_v28  ;;  %v6895_v19 = vsel %vm347_vm0, %v5231_v45, %v9195_v8  ;;  %v4870_v1 = vld [vmem:[#allocation2 + $0xf1] sm:$0xff]  ;;  %v16838_v8 = vld [vmem:[#allocation43_spill] sm:$0xff] }
 0x5d8   : > { %v9204_v7 = vpop.permute.xlu0 %9203  ;;  %v5828_v27 = vmul.f32 %v15002_v24, %v5668_v22  ;;  %v5445_v58 = vmul.f32 %v16832_v54, %v5285_v38  ;;  %v5219_v24 = vmul.f32 %v16833_v42, %v15402_v39  ;;  %v4623_v26 = vmul.f32 %v16834_v13, %v4399_v62  ;;  %v16837_v46 = vld [vmem:[#allocation117_spill] sm:$0xff] }
 0x5d9   : > { %v9206_v37 = vunpack.i.h.bf16 %v9204_v7  ;;  %v9205_v63 = vunpack.i.l.bf16 %v9204_v7  ;;  %v6829_v5 = vsel %vm3598_vm1, %v6797_v3, %v9180_v43  ;;  %v6830_v52 = vsel %vm3598_vm1, %v6798_v4, %v9181_v25  ;;  %v5477_v28 = vld [vmem:[#allocation2 + $0xf7] sm:$0xff]  ;;  %v4400_v43 = vld [vmem:[#allocation2 + $0x3f] sm:$0xff] }
 0x5da   : > { %9493 = vrot.lane.b32.xlu0 %v9492_v0, %s9891_s27  ;;  %v9189_v49 = vpop.permute.xlu1 %9188  ;;  %v9512_v21 = vpack.i.bf16 %v5828_v27, %v5827_v53  ;;  %v5446_v12 = vmul.f32 %v16835_v56, %v5286_v51  ;;  %v9517_v0 = vpack.i.bf16 %v15391_v16, %v5219_v24  ;;  %v4838_v47 = vmul.f32 %v16836_v55, %v15406_v9  ;;  %v5062_v60 = vld [vmem:[#allocation2 + $0xf7] sm:$0xff] }
 0x5db   : > { %v9191_v18 = vunpack.i.h.bf16 %v9189_v49  ;;  %v9190_v23 = vunpack.i.l.bf16 %v9189_v49  ;;  %9498 = vrot.lane.b32.xlu1 %v9497_v30, %s9891_s27  ;;  %v6927_v2 = vsel %vm3598_vm1, %v6895_v19, %v9205_v63  ;;  %v6928_v33 = vsel %vm3598_vm1, %v6896_v6, %v9206_v37  ;;  %v16840_v30 = vld [vmem:[#allocation107_spill] sm:$0xff]  ;;  %v16841_v16 = vld [vmem:[#allocation40_spill] sm:$0xff]  ;;  %v16844_v22 = vld [vmem:[#allocation109_spill] sm:$0xff] }
 0x5dc   : > { %v9214_v50 = vpop.permute.xlu0 %9213  ;;  %v5030_v44 = vmul.f32 %v16837_v46, %v4870_v1  ;;  %v5638_v25 = vmul.f32 %v16838_v8, %v5478_v20  ;;  %v4837_v41 = vmul.f32 %v5667_v36, %v16839_v57  ;;  %v5637_v53 = vmul.f32 %v16841_v16, %v5477_v28  ;;  %v5233_v51 = vld [vmem:[#allocation2 + $0x50] sm:$0xff]  ;;  %v5234_v27 = vld [vmem:[#allocation2 + $0x58] sm:$0xff]  ;;  %v15453_v46 = vld [vmem:[#allocation2 + $0x101] sm:$0xff] }
 0x5dd   : > { %v9216_v31 = vunpack.i.h.bf16 %v9214_v50  ;;  %v9215_v40 = vunpack.i.l.bf16 %v9214_v50  ;;  %v6861_v59 = vsel %vm3631_vm2, %v6829_v5, %v9190_v23  ;;  %v6862_v32 = vsel %vm3631_vm2, %v6830_v52, %v9191_v18  ;;  %v5669_v18 = vld [vmem:[#allocation2 + $0xf8] sm:$0xff]  ;;  %v16842_v23 = vld [vmem:[#allocation131_spill] sm:$0xff]  ;;  %v16843_v5 = vld [vmem:[#allocation100_spill] sm:$0xff] }
 0x5de   : > { %9503 = vrot.lane.b32.xlu0 %v9502_v34, %s9892_s28  ;;  %v9199_v48 = vpop.permute.xlu1 %9198  ;;  %v6991_v14 = vpack.c.bf16 %v6862_v32, %v6861_v59  ;;  %v9522_v34 = vpack.i.bf16 %v5446_v12, %v5445_v58  ;;  %v4624_v6 = vmul.f32 %v16842_v23, %v4400_v43  ;;  %v9527_v19 = vpack.i.bf16 %v4838_v47, %v4837_v41  ;;  %v16845_v56 = vld [vmem:[#allocation49_spill] sm:$0xff]  ;;  %v16847_v43 = vld [vmem:[#allocation60_spill] sm:$0xff] }
 0x5df   : > { %9508 = vrot.lane.b32.xlu1 %v9507_v35, %s9892_s28  ;;  %v6959_v10 = vsel %vm3631_vm2, %v6927_v2, %v9215_v40  ;;  %v6960_v11 = vsel %vm3631_vm2, %v6928_v33, %v9216_v31  ;;  %v5029_v35 = vmul.f32 %v16840_v30, %v4869_v17  ;;  %v9201_v37 = vunpack.i.h.bf16 %v9199_v48  ;;  %v4401_v17 = vld [vmem:[#allocation2 + $0x47] sm:$0xff]  ;;  %v15461_v57 = vld [vmem:[#allocation2 + $0xf8] sm:$0xff]  ;;  %v16852_v23 = vld [vmem:[#allocation84_spill] sm:$0xff] }
 0x5e0   : > { %v9224_v61 = vpop.permute.xlu0 %9223  ;;  %7281 = vmatmul.mubr.bf16.gmra.mxu1 %v6991_v14  ;;  %v6995_v29 = vpack.c.bf16 %v6960_v11, %v6959_v10  ;;  %v9200_v63 = vunpack.i.l.bf16 %v9199_v48  ;;  %v15432_v52 = vmul.f32 %v16843_v5, %v5062_v60  ;;  %v9532_v50 = vpack.i.bf16 %v5638_v25, %v5637_v53  ;;  %v15443_v10 = vld [vmem:[#allocation2 + $0xef] sm:$0xff]  ;;  %v5670_v11 = vld [vmem:[#allocation2 + $0x100] sm:$0xff]  ;;  %v16853_v5 = vld [vmem:[#allocation85_spill] sm:$0xff] }
 0x5e1   : > { %v9226_v49 = vunpack.i.h.bf16 %v9224_v61  ;;  %v9225_v4 = vunpack.i.l.bf16 %v9224_v61  ;;  %v9537_v36 = vpack.i.bf16 %v5030_v44, %v5029_v35  ;;  %v5829_v31 = vmul.f32 %v16844_v22, %v5669_v18  ;;  %v5287_v61 = vld [vmem:[#allocation2 + $0x101] sm:$0xff]  ;;  %v16846_v44 = vld [vmem:[#allocation116_spill] sm:$0xff]  ;;  %v15463_v41 = vld [vmem:[#allocation2 + $0xf9] sm:$0xff] }
 0x5e2   : > { %9513 = vrot.lane.b32.xlu0 %v9512_v21, %s9893_s14  ;;  %v9209_v7 = vpop.permute.xlu1 %9208  ;;  %7288 = vmatprep.mubr.bf16.mxu1 %v6995_v29  ;;  %v6800_v32 = vsel %vm347_vm0, %v4624_v6, %v9201_v37  ;;  %v6799_v38 = vsel %vm347_vm0, %v4623_v26, %v9200_v63  ;;  %v15447_v26 = vld [vmem:[#allocation2 + $0x100] sm:$0xff]  ;;  %v5288_v29 = vld [vmem:[#allocation2 + $0x109] sm:$0xff]  ;;  %v5830_v12 = vmul.f32 %v16845_v56, %v5670_v11 }
 0x5e3   : > { %9518 = vrot.lane.b32.xlu1 %v9517_v0, %s9893_s14  ;;  %v9211_v3 = vunpack.i.h.bf16 %v9209_v7  ;;  %v9210_v45 = vunpack.i.l.bf16 %v9209_v7  ;;  %v6898_v48 = vsel %vm347_vm0, %v5234_v27, %v9226_v49  ;;  %v6897_v14 = vsel %vm347_vm0, %v5233_v51, %v9225_v4  ;;  %v16848_v35 = vld [vmem:[#allocation56_spill] sm:$0xff]  ;;  %v16850_v4 = vld [vmem:[#allocation95_spill] sm:$0xff]  ;;  %v16854_v22 = vld [vmem:[#allocation34_spill] sm:$0xff] }
 0x5e4   : > { %v9234_v15 = vpop.permute.xlu0 %9233  ;;  %v5447_v28 = vmul.f32 %v16846_v44, %v5287_v61  ;;  %v5221_v7 = vmul.f32 %v16847_v43, %v15443_v10  ;;  %v9542_v30 = vpack.i.bf16 %v5830_v12, %v5829_v31  ;;  %v4625_v60 = vmul.f32 %v16848_v35, %v4401_v17  ;;  %v16849_v53 = vld [vmem:[#allocation72_spill] sm:$0xff]  ;;  %v5479_v18 = vld [vmem:[#allocation2 + $0x107] sm:$0xff]  ;;  %v15491_v35 = vld [vmem:[#allocation2 + $0xff] sm:$0xff] }
 0x5e5   : > { %v9236_v40 = vunpack.i.h.bf16 %v9234_v15  ;;  %v9235_v62 = vunpack.i.l.bf16 %v9234_v15  ;;  %v6831_v1 = vsel %vm3598_vm1, %v6799_v38, %v9210_v45  ;;  %v6832_v54 = vsel %vm3598_vm1, %v6800_v32, %v9211_v3  ;;  %v5480_v63 = vld [vmem:[#allocation2 + $0x10f] sm:$0xff]  ;;  %v16851_v45 = vld [vmem:[#allocation37_spill] sm:$0xff]  ;;  %v5064_v31 = vld [vmem:[#allocation2 + $0x107] sm:$0xff] }
 0x5e6   : > { %9523 = vrot.lane.b32.xlu0 %v9522_v34, %s9891_s27  ;;  %v9219_v59 = vpop.permute.xlu1 %9218  ;;  %v5448_v37 = vmul.f32 %v16849_v53, %v5288_v29  ;;  %v9547_v49 = vpack.i.bf16 %v15432_v52, %v5221_v7  ;;  %v4840_v3 = vmul.f32 %v16850_v4, %v15447_v26  ;;  %v5032_v15 = vmul.f32 %v16851_v45, %v15453_v46  ;;  %v5672_v12 = vld [vmem:[#allocation2 + $0x110] sm:$0xff] }
 0x5e7   : > { %v9221_v2 = vunpack.i.h.bf16 %v9219_v59  ;;  %v9220_v33 = vunpack.i.l.bf16 %v9219_v59  ;;  %9528 = vrot.lane.b32.xlu1 %v9527_v19, %s9891_s27  ;;  %v6929_v20 = vsel %vm3598_vm1, %v6897_v14, %v9235_v62  ;;  %v6930_v0 = vsel %vm3598_vm1, %v6898_v48, %v9236_v40  ;;  %v4402_v19 = vld [vmem:[#allocation2 + $0x4f] sm:$0xff] }
 0x5e8   : > { %v9244_v58 = vpop.permute.xlu0 %9243  ;;  %v5640_v6 = vmul.f32 %v16852_v23, %v5480_v63  ;;  %v5031_v52 = vmul.f32 %v16854_v22, %v15463_v41  ;;  %v9552_v40 = vpack.i.bf16 %v5448_v37, %v5447_v28  ;;  %v16855_v62 = vld [vmem:[#allocation92_spill] sm:$0xff]  ;;  %v5671_v14 = vld [vmem:[#allocation2 + $0x108] sm:$0xff]  ;;  %v16860_v23 = vld [vmem:[#allocation33_spill] sm:$0xff] }
 0x5e9   : > { %v9246_v42 = vunpack.i.h.bf16 %v9244_v58  ;;  %v9245_v24 = vunpack.i.l.bf16 %v9244_v58  ;;  %v6863_v21 = vsel %vm3631_vm2, %v6831_v1, %v9220_v33  ;;  %v6864_v13 = vsel %vm3631_vm2, %v6832_v54, %v9221_v2  ;;  %v16856_v1 = vld [vmem:[#allocation150_spill] sm:$0xff]  ;;  %v16859_v37 = vld [vmem:[#allocation136_spill] sm:$0xff] }
 0x5ea   : > { %9533 = vrot.lane.b32.xlu0 %v9532_v50, %s9892_s28  ;;  %v9229_v55 = vpop.permute.xlu1 %9228  ;;  %v6994_v47 = vpack.c.bf16 %v6864_v13, %v6863_v21  ;;  %v4839_v50 = vmul.f32 %v16853_v5, %v15461_v57  ;;  %v5639_v59 = vmul.f32 %v16855_v62, %v5479_v18  ;;  %v4626_v54 = vmul.f32 %v16856_v1, %v4402_v19  ;;  %v16858_v21 = vld [vmem:[#allocation115_spill] sm:$0xff]  ;;  %v4403_v22 = vld [vmem:[#allocation2 + $0x57] sm:$0xff] }
 0x5eb   : > { %9538 = vrot.lane.b32.xlu1 %v9537_v36, %s9892_s28  ;;  %v6961_v8 = vsel %vm3631_vm2, %v6929_v20, %v9245_v24  ;;  %v6962_v25 = vsel %vm3631_vm2, %v6930_v0, %v9246_v42  ;;  %v9231_v32 = vunpack.i.h.bf16 %v9229_v55  ;;  %v9230_v38 = vunpack.i.l.bf16 %v9229_v55  ;;  %v16857_v42 = vld [vmem:[#allocation105_spill] sm:$0xff]  ;;  %v5235_v55 = vld [vmem:[#allocation2 + $0x60] sm:$0xff] }
 0x5ec   : > { %v9254_v34 = vpop.permute.xlu0 %9253  ;;  %7289 = vmatmul.mubr.bf16.gmra.mxu1 %v6994_v47  ;;  %v6998_v16 = vpack.c.bf16 %v6962_v25, %v6961_v8  ;;  %v9557_v58 = vpack.i.bf16 %v4840_v3, %v4839_v50  ;;  %v9567_v11 = vpack.i.bf16 %v5032_v15, %v5031_v52  ;;  %v5224_v24 = vmul.f32 %v16857_v42, %v5064_v31  ;;  %v5236_v47 = vld [vmem:[#allocation2 + $0x68] sm:$0xff]  ;;  %v4404_v52 = vld [vmem:[#allocation2 + $0x5f] sm:$0xff] }
 0x5ed   : > { %v9256_v51 = vunpack.i.h.bf16 %v9254_v34  ;;  %v9255_v27 = vunpack.i.l.bf16 %v9254_v34  ;;  %v9562_v17 = vpack.i.bf16 %v5640_v6, %v5639_v59  ;;  %v5831_v13 = vmul.f32 %v16858_v21, %v5671_v14  ;;  %v5238_v21 = vld [vmem:[#allocation2 + $0x78] sm:$0xff] }
 0x5ee   : > { %9543 = vrot.lane.b32.xlu0 %v9542_v30, %s9893_s14  ;;  %v9239_v36 = vpop.permute.xlu1 %9238  ;;  %7296 = vmatprep.mubr.bf16.mxu1 %v6998_v16  ;;  %v6802_v20 = vsel %vm347_vm0, %v4626_v54, %v9231_v32  ;;  %v6801_v0 = vsel %vm347_vm0, %v4625_v60, %v9230_v38  ;;  %v5832_v63 = vmul.f32 %v16859_v37, %v5672_v12 }
 0x5ef   : > { %9548 = vrot.lane.b32.xlu1 %v9547_v49, %s9893_s14  ;;  %v9241_v2 = vunpack.i.h.bf16 %v9239_v36  ;;  %v9240_v33 = vunpack.i.l.bf16 %v9239_v36  ;;  %v6900_v8 = vsel %vm347_vm0, %v5236_v47, %v9256_v51  ;;  %v6899_v25 = vsel %vm347_vm0, %v5235_v55, %v9255_v27 }
 0x5f0   : > { %v9264_v48 = vpop.permute.xlu0 %9263  ;;  %v5223_v6 = vmul.f32 %v16860_v23, %v15491_v35  ;;  %v9572_v19 = vpack.i.bf16 %v5832_v63, %v5831_v13  ;;  %v9804_v23 = vld [vmem:[%s15802_s8 + $0xf8] sm:$0xff] }
 0x5f1   : > { %v9266_v61 = vunpack.i.h.bf16 %v9264_v48  ;;  %v9265_v29 = vunpack.i.l.bf16 %v9264_v48  ;;  %v6833_v43 = vsel %vm3598_vm1, %v6801_v0, %v9240_v33  ;;  %v6834_v7 = vsel %vm3598_vm1, %v6802_v20, %v9241_v2  ;;  %v16861_v2 = vld [vmem:[#allocation82_spill] sm:$0xff]  ;;  %v16862_v48 = vld [vmem:[#allocation125_spill] sm:$0xff] }
 0x5f2   : > { %9553 = vrot.lane.b32.xlu0 %v9552_v40, %s9891_s27  ;;  %v9249_v56 = vpop.permute.xlu1 %9248  ;;  %v9577_v50 = vpack.i.bf16 %v5224_v24, %v5223_v6  ;;  %v4627_v33 = vmul.f32 %v16861_v2, %v4403_v22  ;;  %v4628_v14 = vmul.f32 %v16862_v48, %v4404_v52  ;;  %v16863_v22 = vld [vmem:[#allocation52_spill] sm:$0xff]  ;;  %v5240_v2 = vld [vmem:[#allocation2 + $0x88] sm:$0xff] }
 0x5f3   : > { %v9251_v44 = vunpack.i.h.bf16 %v9249_v56  ;;  %v9250_v28 = vunpack.i.l.bf16 %v9249_v56  ;;  %9558 = vrot.lane.b32.xlu1 %v9557_v58, %s9891_s27  ;;  %v6931_v49 = vsel %vm3598_vm1, %v6899_v25, %v9265_v29  ;;  %v6932_v4 = vsel %vm3598_vm1, %v6900_v8, %v9266_v61  ;;  %v9799_v58 = vld [vmem:[%s15802_s8 + $0xe0] sm:$0xff]  ;;  %v9800_v29 = vld [vmem:[%s15802_s8 + $0xe8] sm:$0xff]  ;;  %s9813_s27 = scalar_lea.vmem %s15747_s25, 2048 }
 0x5f4   : > { %v9274_v30 = vpop.permute.xlu0 %9273  ;;  %p9814_p11 = scmp.ne.s32.totalorder %s15747_s25, %s9813_s27 }
 0x5f5   : > { %v9276_v34 = vunpack.i.h.bf16 %v9274_v30  ;;  %v9275_v16 = vunpack.i.l.bf16 %v9274_v30  ;;  %v6865_v60 = vsel %vm3631_vm2, %v6833_v43, %v9250_v28  ;;  %v6866_v53 = vsel %vm3631_vm2, %v6834_v7, %v9251_v44  ;;  %v9801_v7 = vld [vmem:[%s15802_s8 + $0xd0] sm:$0xff] }
 0x5f6   : > { %9563 = vrot.lane.b32.xlu0 %v9562_v17, %s9892_s28  ;;  %v9259_v3 = vpop.permute.xlu1 %9258  ;;  %v6997_v45 = vpack.c.bf16 %v6866_v53, %v6865_v60  ;;  %v5237_v17 = vld [vmem:[#allocation2 + $0x70] sm:$0xff]  ;;  %p9815_p12 = pnand %p9814_p11, %p9984_p5 }
 0x5f7   : > { %9568 = vrot.lane.b32.xlu1 %v9567_v11, %s9892_s28  ;;  %v6963_v15 = vsel %vm3631_vm2, %v6931_v49, %v9275_v16  ;;  %v6964_v18 = vsel %vm3631_vm2, %v6932_v4, %v9276_v34  ;;  %v9261_v40 = vunpack.i.h.bf16 %v9259_v3  ;;  %v9260_v62 = vunpack.i.l.bf16 %v9259_v3  ;;  %v9802_v16 = vld [vmem:[%s15802_s8 + $0xd8] sm:$0xff]  ;;  %v4405_v49 = vld [vmem:[#allocation2 + $0x67] sm:$0xff]  ;;  %v4406_v4 = vld [vmem:[#allocation2 + $0x6f] sm:$0xff] }
 0x5f8   : > { %v9284_v36 = vpop.permute.xlu0 %9283  ;;  %7297 = vmatmul.mubr.bf16.gmra.mxu1 %v6997_v45  ;;  %v7001_v5 = vpack.c.bf16 %v6964_v18, %v6963_v15  ;;  %v9803_v3 = vld [vmem:[%s15802_s8 + $0xf0] sm:$0xff]  ;;  %v4629_v52 = vmul.f32 %v16863_v22, %v4405_v49  ;;  %p9816_p13 = pneg %p9815_p12 }
 0x5f9   : > { %v9286_v59 = vunpack.i.h.bf16 %v9284_v36  ;;  %v9285_v32 = vunpack.i.l.bf16 %v9284_v36  ;;  %v6804_v42 = vsel %vm347_vm0, %v4628_v14, %v9261_v40  ;;  %v6803_v24 = vsel %vm347_vm0, %v4627_v33, %v9260_v62 }
 0x5fa   : > { %9573 = vrot.lane.b32.xlu0 %v9572_v19, %s9893_s14  ;;  %v9269_v31 = vpop.permute.xlu1 %9268  ;;  %7304 = vmatprep.mubr.bf16.mxu1 %v7001_v5 }
 0x5fb   : > { %9578 = vrot.lane.b32.xlu1 %v9577_v50, %s9893_s14  ;;  %v9271_v38 = vunpack.i.h.bf16 %v9269_v31  ;;  %v9270_v51 = vunpack.i.l.bf16 %v9269_v31  ;;  %v6902_v56 = vsel %vm347_vm0, %v5238_v21, %v9286_v59  ;;  %v6901_v12 = vsel %vm347_vm0, %v5237_v17, %v9285_v32  ;;  %v16864_v31 = vld [vmem:[#allocation154_spill] sm:$0xff]  ;;  %s9817_s14 = sshll.u32 %s9894_s23, 4  ;;  %s9818_s14 = int_to_ptr.vmem [resolvable:$false] %s9817_s14 }
 0x5fc   : > { %v9294_v27 = vpop.permute.xlu0 %9293  ;;  %v4630_v40 = vmul.f32 %v16864_v31, %v4406_v4  ;;  %s9819_s26 = scalar_lea.vmem %s9818_s14, 4096  ;;  %p9820_p0 = scmp.lt.s32.totalorder %s15747_s25, %s9818_s14 }
 0x5fd   : > { %v9296_v1 = vunpack.i.h.bf16 %v9294_v27  ;;  %v9295_v54 = vunpack.i.l.bf16 %v9294_v27  ;;  %v6835_v20 = vsel %vm3598_vm1, %v6803_v24, %v9270_v51  ;;  %v6836_v0 = vsel %vm3598_vm1, %v6804_v42, %v9271_v38  ;;  %v5239_v27 = vld [vmem:[#allocation2 + $0x80] sm:$0xff]  ;;  %p9821_p1 = scmp.lt.s32.totalorder %s9819_s26, %s9813_s27 }
 0x5fe   : > { %5978 = vperm.xlu0 %9101, %v9799_v58   ;;  %v9279_v11 = vpop.permute.xlu1 %9278 }
 0x5ff   : > { %v9281_v13 = vunpack.i.h.bf16 %v9279_v11  ;;  %v9280_v61 = vunpack.i.l.bf16 %v9279_v11  ;;  %5982 = vperm.xlu1 %9100, %v9800_v29   ;;  %v6933_v25 = vsel %vm3598_vm1, %v6901_v12, %v9295_v54  ;;  %v6934_v43 = vsel %vm3598_vm1, %v6902_v56, %v9296_v1  ;;  %p9822_p2 = por %p9821_p1, %p9820_p0 }
 0x600   : > { %v9304_v55 = vpop.permute.xlu0 %9303 }
 0x601   : > { %v9306_v47 = vunpack.i.h.bf16 %v9304_v55  ;;  %v9305_v44 = vunpack.i.l.bf16 %v9304_v55  ;;  %v6867_v28 = vsel %vm3631_vm2, %v6835_v20, %v9280_v61  ;;  %v6868_v8 = vsel %vm3631_vm2, %v6836_v0, %v9281_v13  ;;  %p9823_p3 = pnand %p9822_p2, %p9816_p13 }
 0x602   : > { %5970 = vperm.xlu0 %9101, %v9801_v7   ;;  %v9289_v30 = vpop.permute.xlu1 %9288  ;;  %v7000_v34 = vpack.c.bf16 %v6868_v8, %v6867_v28 }
 0x603   : > { %5974 = vperm.xlu1 %9100, %v9802_v16   ;;  %v6965_v60 = vsel %vm3631_vm2, %v6933_v25, %v9305_v44  ;;  %v6966_v53 = vsel %vm3631_vm2, %v6934_v43, %v9306_v47  ;;  %v9291_v15 = vunpack.i.h.bf16 %v9289_v30  ;;  %v9290_v18 = vunpack.i.l.bf16 %v9289_v30  ;;  %v4407_v47 = vld [vmem:[#allocation2 + $0x77] sm:$0xff]  ;;  %v4408_v44 = vld [vmem:[#allocation2 + $0x7f] sm:$0xff] }
 0x604   : > { %v9314_v37 = vpop.permute.xlu0 %9313  ;;  %7305 = vmatmul.mubr.bf16.gmra.mxu1 %v7000_v34  ;;  %v7004_v63 = vpack.c.bf16 %v6966_v53, %v6965_v60  ;;  %v16865_v60 = vld [vmem:[#allocation135_spill] sm:$0xff] }
 0x605   : > { %v9316_v6 = vunpack.i.h.bf16 %v9314_v37  ;;  %v9315_v19 = vunpack.i.l.bf16 %v9314_v37  ;;  %v6806_v38 = vsel %vm347_vm0, %v4630_v40, %v9291_v15  ;;  %v6805_v51 = vsel %vm347_vm0, %v4629_v52, %v9290_v18  ;;  %v16866_v37 = vld [vmem:[#allocation129_spill] sm:$0xff]  ;;  %v5241_v18 = vld [vmem:[#allocation2 + $0x90] sm:$0xff] }
 0x606   : > { %5986 = vperm.xlu0 %9101, %v9803_v3   ;;  %v9299_v45 = vpop.permute.xlu1 %9298  ;;  %7312 = vmatprep.mubr.bf16.mxu1 %v7004_v63  ;;  %v4631_v53 = vmul.f32 %v16865_v60, %v4407_v47  ;;  %v4632_v63 = vmul.f32 %v16866_v37, %v4408_v44 }
 0x607   : > { %5990 = vperm.xlu1 %9100, %v9804_v23   ;;  %v9301_v36 = vunpack.i.h.bf16 %v9299_v45  ;;  %v9300_v5 = vunpack.i.l.bf16 %v9299_v45  ;;  %v6904_v14 = vsel %vm347_vm0, %v5240_v2, %v9316_v6  ;;  %v6903_v1 = vsel %vm347_vm0, %v5239_v27, %v9315_v19  ;;  %v5242_v23 = vld [vmem:[#allocation2 + $0x98] sm:$0xff] }
 0x608   : > { %v9324_v50 = vpop.permute.xlu0 %9323 }
 0x609   : > { %v9326_v62 = vunpack.i.h.bf16 %v9324_v50  ;;  %v9325_v59 = vunpack.i.l.bf16 %v9324_v50  ;;  %v6837_v54 = vsel %vm3598_vm1, %v6805_v51, %v9300_v5  ;;  %v6838_v58 = vsel %vm3598_vm1, %v6806_v38, %v9301_v36 }
 0x60a   : > { %v9309_v32 = vpop.permute.xlu1 %9308 }
 0x60b   : > { %v9311_v33 = vunpack.i.h.bf16 %v9309_v32  ;;  %v9310_v48 = vunpack.i.l.bf16 %v9309_v32  ;;  %v6935_v13 = vsel %vm3598_vm1, %v6903_v1, %v9325_v59  ;;  %v6936_v61 = vsel %vm3598_vm1, %v6904_v14, %v9326_v62  ;;  %v4409_v1 = vld [vmem:[#allocation2 + $0x87] sm:$0xff] }
 0x60c   : > { %v9334_v11 = vpop.permute.xlu0 %9333 }
 0x60d   : > { %v9336_v42 = vunpack.i.h.bf16 %v9334_v11  ;;  %v9335_v24 = vunpack.i.l.bf16 %v9334_v11  ;;  %v6869_v17 = vsel %vm3631_vm2, %v6837_v54, %v9310_v48  ;;  %v6870_v21 = vsel %vm3631_vm2, %v6838_v58, %v9311_v33  ;;  %v4410_v54 = vld [vmem:[#allocation2 + $0x8f] sm:$0xff] }
 0x60e   : > { %v9319_v29 = vpop.permute.xlu1 %9318  ;;  %v7003_v56 = vpack.c.bf16 %v6870_v21, %v6869_v17 }
 0x60f   : > { %v6967_v12 = vsel %vm3631_vm2, %v6935_v13, %v9335_v24  ;;  %v6968_v20 = vsel %vm3631_vm2, %v6936_v61, %v9336_v42  ;;  %v9321_v8 = vunpack.i.h.bf16 %v9319_v29  ;;  %v9320_v25 = vunpack.i.l.bf16 %v9319_v29  ;;  %v16867_v29 = vld [vmem:[#allocation48_spill] sm:$0xff] }
 0x610   : > { %v9344_v0 = vpop.permute.xlu0 %9343  ;;  %7313 = vmatmul.mubr.bf16.gmra.mxu1 %v7003_v56  ;;  %v7007_v55 = vpack.c.bf16 %v6968_v20, %v6967_v12  ;;  %v4633_v56 = vmul.f32 %v16867_v29, %v4409_v1  ;;  %v16868_v12 = vld [vmem:[#allocation158_spill] sm:$0xff] }
 0x611   : > { %v9346_v43 = vunpack.i.h.bf16 %v9344_v0  ;;  %v9345_v7 = vunpack.i.l.bf16 %v9344_v0  ;;  %v6808_v45 = vsel %vm347_vm0, %v4632_v63, %v9321_v8  ;;  %v6807_v15 = vsel %vm347_vm0, %v4631_v53, %v9320_v25  ;;  %v5243_v8 = vld [vmem:[#allocation2 + $0xa0] sm:$0xff]  ;;  %v5244_v25 = vld [vmem:[#allocation2 + $0xa8] sm:$0xff] }
 0x612   : > { %v9329_v28 = vpop.permute.xlu1 %9328  ;;  %7320 = vmatprep.mubr.bf16.mxu1 %v7007_v55  ;;  %v4634_v20 = vmul.f32 %v16868_v12, %v4410_v54 }
 0x613   : > { %v9331_v30 = vunpack.i.h.bf16 %v9329_v28  ;;  %v9330_v34 = vunpack.i.l.bf16 %v9329_v28  ;;  %v6906_v36 = vsel %vm347_vm0, %v5242_v23, %v9346_v43  ;;  %v6905_v5 = vsel %vm347_vm0, %v5241_v18, %v9345_v7 }
 0x614   : > { %v9354_v16 = vpop.permute.xlu0 %9353 }
 0x615   : > { %v9356_v49 = vunpack.i.h.bf16 %v9354_v16  ;;  %v9355_v4 = vunpack.i.l.bf16 %v9354_v16  ;;  %v6839_v50 = vsel %vm3598_vm1, %v6807_v15, %v9330_v34  ;;  %v6840_v22 = vsel %vm3598_vm1, %v6808_v45, %v9331_v30 }
 0x616   : > { %v9339_v3 = vpop.permute.xlu1 %9338 }
 0x617   : > { %v9341_v6 = vunpack.i.h.bf16 %v9339_v3  ;;  %v9340_v19 = vunpack.i.l.bf16 %v9339_v3  ;;  %v6937_v32 = vsel %vm3598_vm1, %v6905_v5, %v9355_v4  ;;  %v6938_v38 = vsel %vm3598_vm1, %v6906_v36, %v9356_v49  ;;  %v4411_v5 = vld [vmem:[#allocation2 + $0x97] sm:$0xff] }
 0x618   : > { %v9364_v52 = vpop.permute.xlu0 %9363 }
 0x619   : > { %v9366_v31 = vunpack.i.h.bf16 %v9364_v52  ;;  %v9365_v40 = vunpack.i.l.bf16 %v9364_v52  ;;  %v6871_v62 = vsel %vm3631_vm2, %v6839_v50, %v9340_v19  ;;  %v6872_v59 = vsel %vm3631_vm2, %v6840_v22, %v9341_v6  ;;  %v4412_v50 = vld [vmem:[#allocation2 + $0x9f] sm:$0xff] }
 0x61a   : > { %v9349_v51 = vpop.permute.xlu1 %9348  ;;  %v7006_v27 = vpack.c.bf16 %v6872_v59, %v6871_v62 }
 0x61b   : > { %v6969_v2 = vsel %vm3631_vm2, %v6937_v32, %v9365_v40  ;;  %v6970_v33 = vsel %vm3631_vm2, %v6938_v38, %v9366_v31  ;;  %v9351_v11 = vunpack.i.h.bf16 %v9349_v51  ;;  %v9350_v42 = vunpack.i.l.bf16 %v9349_v51  ;;  %v16869_v51 = vld [vmem:[#allocation139_spill] sm:$0xff] }
 0x61c   : > { %v9374_v48 = vpop.permute.xlu0 %9373  ;;  %7321 = vmatmul.mubr.bf16.gmra.mxu1 %v7006_v27  ;;  %v7010_v14 = vpack.c.bf16 %v6970_v33, %v6969_v2  ;;  %v4635_v27 = vmul.f32 %v16869_v51, %v4411_v5  ;;  %v16870_v2 = vld [vmem:[#allocation133_spill] sm:$0xff] }
 0x61d   : > { %v9376_v24 = vunpack.i.h.bf16 %v9374_v48  ;;  %v9375_v17 = vunpack.i.l.bf16 %v9374_v48  ;;  %v6810_v44 = vsel %vm347_vm0, %v4634_v20, %v9351_v11  ;;  %v6809_v28 = vsel %vm347_vm0, %v4633_v56, %v9350_v42  ;;  %v5245_v11 = vld [vmem:[#allocation2 + $0xb0] sm:$0xff]  ;;  %v5246_v42 = vld [vmem:[#allocation2 + $0xb8] sm:$0xff] }
 0x61e   : > { %v9359_v58 = vpop.permute.xlu1 %9358  ;;  %7328 = vmatprep.mubr.bf16.mxu1 %v7010_v14  ;;  %v4636_v33 = vmul.f32 %v16870_v2, %v4412_v50 }
 0x61f   : > { %v9361_v21 = vunpack.i.h.bf16 %v9359_v58  ;;  %v9360_v13 = vunpack.i.l.bf16 %v9359_v58  ;;  %v6908_v30 = vsel %vm347_vm0, %v5244_v25, %v9376_v24  ;;  %v6907_v34 = vsel %vm347_vm0, %v5243_v8, %v9375_v17 }
 0x620   : > { %v9384_v61 = vpop.permute.xlu0 %9383 }
 0x621   : > { %v9386_v0 = vunpack.i.h.bf16 %v9384_v61  ;;  %v9385_v55 = vunpack.i.l.bf16 %v9384_v61  ;;  %v6841_v16 = vsel %vm3598_vm1, %v6809_v28, %v9360_v13  ;;  %v6842_v60 = vsel %vm3598_vm1, %v6810_v44, %v9361_v21 }
 0x622   : > { %v9369_v47 = vpop.permute.xlu1 %9368 }
 0x623   : > { %v9371_v43 = vunpack.i.h.bf16 %v9369_v47  ;;  %v9370_v7 = vunpack.i.l.bf16 %v9369_v47  ;;  %v6939_v3 = vsel %vm3598_vm1, %v6907_v34, %v9385_v55  ;;  %v6940_v45 = vsel %vm3598_vm1, %v6908_v30, %v9386_v0  ;;  %v4413_v34 = vld [vmem:[#allocation2 + $0xa7] sm:$0xff] }
 0x624   : > { %v9394_v53 = vpop.permute.xlu0 %9393 }
 0x625   : > { %v9396_v37 = vunpack.i.h.bf16 %v9394_v53  ;;  %v9395_v63 = vunpack.i.l.bf16 %v9394_v53  ;;  %v6873_v49 = vsel %vm3631_vm2, %v6841_v16, %v9370_v7  ;;  %v6874_v4 = vsel %vm3631_vm2, %v6842_v60, %v9371_v43  ;;  %v4414_v16 = vld [vmem:[#allocation2 + $0xaf] sm:$0xff] }
 0x626   : > { %v9379_v15 = vpop.permute.xlu1 %9378  ;;  %v7009_v18 = vpack.c.bf16 %v6874_v4, %v6873_v49 }
 0x627   : > { %v6971_v23 = vsel %vm3631_vm2, %v6939_v3, %v9395_v63  ;;  %v6972_v6 = vsel %vm3631_vm2, %v6940_v45, %v9396_v37  ;;  %v9381_v52 = vunpack.i.h.bf16 %v9379_v15  ;;  %v9380_v31 = vunpack.i.l.bf16 %v9379_v15  ;;  %v16871_v15 = vld [vmem:[#allocation15_spill] sm:$0xff] }
 0x628   : > { %v9404_v19 = vpop.permute.xlu0 %9403  ;;  %7329 = vmatmul.mubr.bf16.gmra.mxu1 %v7009_v18  ;;  %v7013_v36 = vpack.c.bf16 %v6972_v6, %v6971_v23  ;;  %v4637_v18 = vmul.f32 %v16871_v15, %v4413_v34  ;;  %v16872_v23 = vld [vmem:[#allocation57_spill] sm:$0xff] }
 0x629   : > { %v9406_v40 = vunpack.i.h.bf16 %v9404_v19  ;;  %v9405_v62 = vunpack.i.l.bf16 %v9404_v19  ;;  %v6812_v54 = vsel %vm347_vm0, %v4636_v33, %v9381_v52  ;;  %v6811_v58 = vsel %vm347_vm0, %v4635_v27, %v9380_v31  ;;  %v5247_v52 = vld [vmem:[#allocation2 + $0xc0] sm:$0xff]  ;;  %v5248_v31 = vld [vmem:[#allocation2 + $0xc8] sm:$0xff] }
 0x62a   : > { %v9389_v22 = vpop.permute.xlu1 %9388  ;;  %7336 = vmatprep.mubr.bf16.mxu1 %v7013_v36  ;;  %v4638_v6 = vmul.f32 %v16872_v23, %v4414_v16 }
 0x62b   : > { %v9391_v59 = vunpack.i.h.bf16 %v9389_v22  ;;  %v9390_v32 = vunpack.i.l.bf16 %v9389_v22  ;;  %v6910_v21 = vsel %vm347_vm0, %v5246_v42, %v9406_v40  ;;  %v6909_v13 = vsel %vm347_vm0, %v5245_v11, %v9405_v62 }
 0x62c   : > { %v9414_v38 = vpop.permute.xlu0 %9413 }
 0x62d   : > { %v9416_v48 = vunpack.i.h.bf16 %v9414_v38  ;;  %v9415_v14 = vunpack.i.l.bf16 %v9414_v38  ;;  %v6843_v61 = vsel %vm3598_vm1, %v6811_v58, %v9390_v32  ;;  %v6844_v29 = vsel %vm3598_vm1, %v6812_v54, %v9391_v59 }
 0x62e   : > { %v9399_v1 = vpop.permute.xlu1 %9398 }
 0x62f   : > { %v9401_v24 = vunpack.i.h.bf16 %v9399_v1  ;;  %v9400_v17 = vunpack.i.l.bf16 %v9399_v1  ;;  %v6941_v47 = vsel %vm3598_vm1, %v6909_v13, %v9415_v14  ;;  %v6942_v44 = vsel %vm3598_vm1, %v6910_v21, %v9416_v48  ;;  %v4415_v13 = vld [vmem:[#allocation2 + $0xb7] sm:$0xff] }
 0x630   : > { %v9424_v56 = vpop.permute.xlu0 %9423 }
 0x631   : > { %v9426_v12 = vunpack.i.h.bf16 %v9424_v56  ;;  %v9425_v20 = vunpack.i.l.bf16 %v9424_v56  ;;  %v6875_v0 = vsel %vm3631_vm2, %v6843_v61, %v9400_v17  ;;  %v6876_v55 = vsel %vm3631_vm2, %v6844_v29, %v9401_v24 }
 0x632   : > { %v9409_v28 = vpop.permute.xlu1 %9408  ;;  %v7012_v8 = vpack.c.bf16 %v6876_v55, %v6875_v0 }
 0x633   : > { %v6973_v25 = vsel %vm3631_vm2, %v6941_v47, %v9425_v20  ;;  %v6974_v43 = vsel %vm3631_vm2, %v6942_v44, %v9426_v12  ;;  %v9411_v53 = vunpack.i.h.bf16 %v9409_v28  ;;  %v9410_v37 = vunpack.i.l.bf16 %v9409_v28  ;;  %v16873_v44 = vld [vmem:[#allocation143_spill] sm:$0xff] }
 0x634   : > { %v9434_v7 = vpop.permute.xlu0 %9433  ;;  %7337 = vmatmul.mubr.bf16.gmra.mxu1 %v7012_v8  ;;  %v7016_v30 = vpack.c.bf16 %v6974_v43, %v6973_v25  ;;  %v4639_v28 = vmul.f32 %v16873_v44, %v4415_v13  ;;  %v9805_v8 = vld [vmem:[#allocation2 + $0xbf] sm:$0xff] }
 0x635   : > { %v9436_v63 = vunpack.i.h.bf16 %v9434_v7  ;;  %v9435_v49 = vunpack.i.l.bf16 %v9434_v7  ;;  %v6814_v50 = vsel %vm347_vm0, %v4638_v6, %v9411_v53  ;;  %v6813_v22 = vsel %vm347_vm0, %v4637_v18, %v9410_v37  ;;  %v16874_v25 = vld [vmem:[#allocation137_spill] sm:$0xff] }
 0x636   : > { %v9419_v60 = vpop.permute.xlu1 %9418  ;;  %7344 = vmatprep.mubr.bf16.mxu1 %v7016_v30  ;;  %v4640_v43 = vmul.f32 %v9805_v8, %v16874_v25  ;;  %v5250_v53 = vld [vmem:[#allocation2 + $0xd8] sm:$0xff] }
 0x637   : > { %v9421_v4 = vunpack.i.h.bf16 %v9419_v60  ;;  %v9420_v3 = vunpack.i.l.bf16 %v9419_v60  ;;  %v6912_v59 = vsel %vm347_vm0, %v5248_v31, %v9436_v63  ;;  %v6911_v32 = vsel %vm347_vm0, %v5247_v52, %v9435_v49 }
 0x638   : > { %v9444_v45 = vpop.permute.xlu0 %9443 }
 0x639   : > { %v9446_v19 = vunpack.i.h.bf16 %v9444_v45  ;;  %v9445_v36 = vunpack.i.l.bf16 %v9444_v45  ;;  %v6845_v38 = vsel %vm3598_vm1, %v6813_v22, %v9420_v3  ;;  %v6846_v51 = vsel %vm3598_vm1, %v6814_v50, %v9421_v4  ;;  %v9806_v4 = vld [vmem:[#allocation2 + $0xd0] sm:$0xff] }
 0x63a   : > { %v9429_v5 = vpop.permute.xlu1 %9428 }
 0x63b   : > { %v9431_v40 = vunpack.i.h.bf16 %v9429_v5  ;;  %v9430_v62 = vunpack.i.l.bf16 %v9429_v5  ;;  %v6943_v1 = vsel %vm3598_vm1, %v6911_v32, %v9445_v36  ;;  %v6944_v54 = vsel %vm3598_vm1, %v6912_v59, %v9446_v19 }
 0x63c   : > { %v9454_v27 = vpop.permute.xlu0 %9453 }
 0x63d   : > { %v9456_v2 = vunpack.i.h.bf16 %v9454_v27  ;;  %v9455_v33 = vunpack.i.l.bf16 %v9454_v27  ;;  %v6877_v48 = vsel %vm3631_vm2, %v6845_v38, %v9430_v62  ;;  %v6878_v14 = vsel %vm3631_vm2, %v6846_v51, %v9431_v40 }
 0x63e   : > { %v9439_v58 = vpop.permute.xlu1 %9438  ;;  %v7015_v11 = vpack.c.bf16 %v6878_v14, %v6877_v48 }
 0x63f   : > { %v6975_v42 = vsel %vm3631_vm2, %v6943_v1, %v9455_v33  ;;  %v6976_v24 = vsel %vm3631_vm2, %v6944_v54, %v9456_v2  ;;  %v9441_v29 = vunpack.i.h.bf16 %v9439_v58  ;;  %v9440_v56 = vunpack.i.l.bf16 %v9439_v58  ;;  %v9807_v1 = vld [vmem:[#allocation2 + $0xc7] sm:$0xff] }
 0x640   : > { %v9464_v17 = vpop.permute.xlu0 %9463  ;;  %7345 = vmatmul.mubr.bf16.gmra.mxu1 %v7015_v11  ;;  %v7019_v21 = vpack.c.bf16 %v6976_v24, %v6975_v42  ;;  %v16875_v54 = vld [vmem:[#allocation54_spill] sm:$0xff]  ;;  %v9808_v11 = vld [vmem:[#allocation2 + $0xcf] sm:$0xff] }
 0x641   : > { %v9466_v12 = vunpack.i.h.bf16 %v9464_v17  ;;  %v9465_v20 = vunpack.i.l.bf16 %v9464_v17  ;;  %v6816_v16 = vsel %vm347_vm0, %v4640_v43, %v9441_v29  ;;  %v6815_v60 = vsel %vm347_vm0, %v4639_v28, %v9440_v56  ;;  %v16876_v42 = vld [vmem:[#allocation62_spill] sm:$0xff]  ;;  %v5252_v56 = vld [vmem:[#allocation2 + $0xe8] sm:$0xff] }
 0x642   : > { %v9449_v61 = vpop.permute.xlu1 %9448  ;;  %7352 = vmatprep.mubr.bf16.mxu1 %v7019_v21  ;;  %v4641_v58 = vmul.f32 %v9807_v1, %v16875_v54  ;;  %v4642_v24 = vmul.f32 %v9808_v11, %v16876_v42 }
 0x643   : > { %v9451_v0 = vunpack.i.h.bf16 %v9449_v61  ;;  %v9450_v55 = vunpack.i.l.bf16 %v9449_v61  ;;  %v6914_v49 = vsel %vm347_vm0, %v5250_v53, %v9466_v12  ;;  %v6913_v3 = vsel %vm347_vm0, %v9806_v4, %v9465_v20 }
 0x644   : > { %v9474_v47 = vpop.permute.xlu0 %9473 }
 0x645   : > { %v9476_v7 = vunpack.i.h.bf16 %v9474_v47  ;;  %v9475_v30 = vunpack.i.l.bf16 %v9474_v47  ;;  %v6847_v45 = vsel %vm3598_vm1, %v6815_v60, %v9450_v55  ;;  %v6848_v15 = vsel %vm3598_vm1, %v6816_v16, %v9451_v0  ;;  %v9809_v55 = vld [vmem:[#allocation2 + $0xe0] sm:$0xff] }
 0x646   : > { %v9459_v34 = vpop.permute.xlu1 %9458 }
 0x647   : > { %v9461_v37 = vunpack.i.h.bf16 %v9459_v34  ;;  %v9460_v63 = vunpack.i.l.bf16 %v9459_v34  ;;  %v6945_v5 = vsel %vm3598_vm1, %v6913_v3, %v9475_v30  ;;  %v6946_v50 = vsel %vm3598_vm1, %v6914_v49, %v9476_v7 }
 0x648   : > { %v9484_v18 = vpop.permute.xlu0 %9483 }
 0x649   : > { %v9486_v23 = vunpack.i.h.bf16 %v9484_v18  ;;  %v9485_v6 = vunpack.i.l.bf16 %v9484_v18  ;;  %v6879_v19 = vsel %vm3631_vm2, %v6847_v45, %v9460_v63  ;;  %v6880_v36 = vsel %vm3631_vm2, %v6848_v15, %v9461_v37 }
 0x64a   : > { %v9469_v22 = vpop.permute.xlu1 %9468  ;;  %v7018_v52 = vpack.c.bf16 %v6880_v36, %v6879_v19 }
 0x64b   : > { %v6977_v31 = vsel %vm3631_vm2, %v6945_v5, %v9485_v6  ;;  %v6978_v40 = vsel %vm3631_vm2, %v6946_v50, %v9486_v23  ;;  %v9471_v38 = vunpack.i.h.bf16 %v9469_v22  ;;  %v9470_v51 = vunpack.i.l.bf16 %v9469_v22  ;;  %v9810_v5 = vld [vmem:[#allocation2 + $0xd7] sm:$0xff]  ;;  %v16877_v50 = vld [vmem:[#allocation147_spill] sm:$0xff] }
 0x64c   : > { %v9494_v62 = vpop.permute.xlu0 %9493  ;;  %7353 = vmatmul.mubr.bf16.gmra.mxu1 %v7018_v52  ;;  %v7022_v59 = vpack.c.bf16 %v6978_v40, %v6977_v31  ;;  %v4643_v22 = vmul.f32 %v9810_v5, %v16877_v50  ;;  %v16878_v52 = vld [vmem:[#allocation141_spill] sm:$0xff] }
 0x64d   : > { %v9496_v27 = vunpack.i.h.bf16 %v9494_v62  ;;  %v9495_v2 = vunpack.i.l.bf16 %v9494_v62  ;;  %v6818_v61 = vsel %vm347_vm0, %v4642_v24, %v9471_v38  ;;  %v6817_v29 = vsel %vm347_vm0, %v4641_v58, %v9470_v51 }
 0x64e   : > { %v9479_v32 = vpop.permute.xlu1 %9478  ;;  %7360 = vmatprep.mubr.bf16.mxu1 %v7022_v59  ;;  %v4644_v31 = vmul.f32 %v15402_v39, %v16878_v52 }
 0x64f   : > { %v9481_v33 = vunpack.i.h.bf16 %v9479_v32  ;;  %v9480_v48 = vunpack.i.l.bf16 %v9479_v32  ;;  %v6916_v0 = vsel %vm347_vm0, %v5252_v56, %v9496_v27  ;;  %v6915_v47 = vsel %vm347_vm0, %v9809_v55, %v9495_v2 }
 0x650   : > { %v9504_v14 = vpop.permute.xlu0 %9503 }
 0x651   : > { %v9506_v17 = vunpack.i.h.bf16 %v9504_v14  ;;  %v9505_v21 = vunpack.i.l.bf16 %v9504_v14  ;;  %v6849_v44 = vsel %vm3598_vm1, %v6817_v29, %v9480_v48  ;;  %v6850_v28 = vsel %vm3598_vm1, %v6818_v61, %v9481_v33 }
 0x652   : > { %v9489_v13 = vpop.permute.xlu1 %9488 }
 0x653   : > { %v9491_v12 = vunpack.i.h.bf16 %v9489_v13  ;;  %v9490_v20 = vunpack.i.l.bf16 %v9489_v13  ;;  %v6947_v34 = vsel %vm3598_vm1, %v6915_v47, %v9505_v21  ;;  %v6948_v16 = vsel %vm3598_vm1, %v6916_v0, %v9506_v17 }
 0x654   : > { %v9514_v8 = vpop.permute.xlu0 %9513 }
 0x655   : > { %v9516_v25 = vunpack.i.h.bf16 %v9514_v8  ;;  %v9515_v43 = vunpack.i.l.bf16 %v9514_v8  ;;  %v6881_v7 = vsel %vm3631_vm2, %v6849_v44, %v9490_v20  ;;  %v6882_v30 = vsel %vm3631_vm2, %v6850_v28, %v9491_v12  ;;  %v9811_v28 = vld [vmem:[#allocation2 + $0xe7] sm:$0xff] }
 0x656   : > { %v9499_v60 = vpop.permute.xlu1 %9498  ;;  %v7021_v53 = vpack.c.bf16 %v6882_v30, %v6881_v7  ;;  %v16879_v8 = vld [vmem:[#allocation10_spill] sm:$0xff] }
 0x657   : > { %v6979_v37 = vsel %vm3631_vm2, %v6947_v34, %v9515_v43  ;;  %v6980_v63 = vsel %vm3631_vm2, %v6948_v16, %v9516_v25  ;;  %v9501_v45 = vunpack.i.h.bf16 %v9499_v60  ;;  %v9500_v15 = vunpack.i.l.bf16 %v9499_v60  ;;  %v16880_v43 = vld [vmem:[#allocation8_spill] sm:$0xff] }
 0x658   : > { %v9524_v49 = vpop.permute.xlu0 %9523  ;;  %7361 = vmatmul.mubr.bf16.gmra.mxu1 %v7021_v53  ;;  %v7025_v4 = vpack.c.bf16 %v6980_v63, %v6979_v37  ;;  %v4645_v25 = vmul.f32 %v9811_v28, %v16879_v8  ;;  %v4646_v7 = vmul.f32 %v15443_v10, %v16880_v43  ;;  %v5256_v37 = vld [vmem:[#allocation2 + $0x108] sm:$0xff] }
 0x659   : > { %v9526_v18 = vunpack.i.h.bf16 %v9524_v49  ;;  %v9525_v23 = vunpack.i.l.bf16 %v9524_v49  ;;  %v6820_v32 = vsel %vm347_vm0, %v4644_v31, %v9501_v45  ;;  %v6819_v38 = vsel %vm347_vm0, %v4643_v22, %v9500_v15  ;;  %v5863_v28 = vld [vmem:[#allocation2 + $0x109] sm:$0xff] }
 0x65a   : > { %v9509_v3 = vpop.permute.xlu1 %9508  ;;  %7368 = vmatprep.mubr.bf16.mxu1 %v7025_v4 }
 0x65b   : > { %v9511_v6 = vunpack.i.h.bf16 %v9509_v3  ;;  %v9510_v19 = vunpack.i.l.bf16 %v9509_v3  ;;  %v6918_v2 = vsel %vm347_vm0, %v15461_v57, %v9526_v18  ;;  %v6917_v33 = vsel %vm347_vm0, %v15406_v9, %v9525_v23 }
 0x65c   : > { %v9534_v36 = vpop.permute.xlu0 %9533 }
 0x65d   : > { %v9536_v40 = vunpack.i.h.bf16 %v9534_v36  ;;  %v9535_v62 = vunpack.i.l.bf16 %v9534_v36  ;;  %v6851_v48 = vsel %vm3598_vm1, %v6819_v38, %v9510_v19  ;;  %v6852_v14 = vsel %vm3598_vm1, %v6820_v32, %v9511_v6 }
 0x65e   : > { %v9519_v59 = vpop.permute.xlu1 %9518 }
 0x65f   : > { %v9521_v51 = vunpack.i.h.bf16 %v9519_v59  ;;  %v9520_v27 = vunpack.i.l.bf16 %v9519_v59  ;;  %v6949_v42 = vsel %vm3598_vm1, %v6917_v33, %v9535_v62  ;;  %v6950_v24 = vsel %vm3598_vm1, %v6918_v2, %v9536_v40  ;;  %v16882_v33 = vld [vmem:[#allocation7_spill] sm:$0xff] }
 0x660   : > { %v9544_v39 = vpop.permute.xlu0 %9543 }
 0x661   : > { %v9546_v1 = vunpack.i.h.bf16 %v9544_v39  ;;  %v9545_v54 = vunpack.i.l.bf16 %v9544_v39  ;;  %v6883_v58 = vsel %vm3631_vm2, %v6851_v48, %v9520_v27  ;;  %v6884_v11 = vsel %vm3631_vm2, %v6852_v14, %v9521_v51  ;;  %v9812_v51 = vld [vmem:[#allocation2 + $0xf7] sm:$0xff]  ;;  %v16881_v27 = vld [vmem:[#allocation151_spill] sm:$0xff] }
 0x662   : > { %v9529_v17 = vpop.permute.xlu1 %9528  ;;  %v7024_v57 = vpack.c.bf16 %v6884_v11, %v6883_v58  ;;  %v4647_v2 = vmul.f32 %v9812_v51, %v16881_v27  ;;  %v4648_v48 = vmul.f32 %v15491_v35, %v16882_v33 }
 0x663   : > { %v6981_v21 = vsel %vm3631_vm2, %v6949_v42, %v9545_v54  ;;  %v6982_v9 = vsel %vm3631_vm2, %v6950_v24, %v9546_v1  ;;  %v9531_v56 = vunpack.i.h.bf16 %v9529_v17  ;;  %v9530_v12 = vunpack.i.l.bf16 %v9529_v17 }
 0x664   : > { %v9554_v13 = vpop.permute.xlu0 %9553  ;;  %7369 = vmatmul.mubr.bf16.gmra.mxu1 %v7024_v57  ;;  %v7028_v61 = vpack.c.bf16 %v6982_v9, %v6981_v21 }
 0x665   : > { %v9556_v20 = vunpack.i.h.bf16 %v9554_v13  ;;  %v9555_v0 = vunpack.i.l.bf16 %v9554_v13  ;;  %v6822_v60 = vsel %vm347_vm0, %v4646_v7, %v9531_v56  ;;  %v6821_v53 = vsel %vm347_vm0, %v4645_v25, %v9530_v12  ;;  %v8434_v7 = vpop.f32.mrf.mxu0 }
 0x666   : > { %v9539_v29 = vpop.permute.xlu1 %9538  ;;  %7376 = vmatprep.mubr.bf16.mxu1 %v7028_v61 }
 0x667   : > { %v9541_v55 = vunpack.i.h.bf16 %v9539_v29  ;;  %v9540_v47 = vunpack.i.l.bf16 %v9539_v29  ;;  %v6920_v4 = vsel %vm347_vm0, %v5256_v37, %v9556_v20  ;;  %v6919_v3 = vsel %vm347_vm0, %v15447_v26, %v9555_v0  ;;  %v5859_v29 = vld [vmem:[#allocation2 + $0xe9] sm:$0xff]  ;;  %v5860_v20 = vld [vmem:[#allocation2 + $0xf1] sm:$0xff] }
 0x668   : > { %v9564_v44 = vpop.permute.xlu0 %9563 }
 0x669   : > { %v9566_v30 = vunpack.i.h.bf16 %v9564_v44  ;;  %v9565_v34 = vunpack.i.l.bf16 %v9564_v44  ;;  %v6853_v45 = vsel %vm3598_vm1, %v6821_v53, %v9540_v47  ;;  %v6854_v15 = vsel %vm3598_vm1, %v6822_v60, %v9541_v55  ;;  %v5864_v47 = vld [vmem:[#allocation2 + $0x111] sm:$0xff] }
 0x66a   : > { %v9549_v16 = vpop.permute.xlu1 %9548 }
 0x66b   : > { %v9551_v63 = vunpack.i.h.bf16 %v9549_v16  ;;  %v9550_v49 = vunpack.i.l.bf16 %v9549_v16  ;;  %v6951_v36 = vsel %vm3598_vm1, %v6919_v3, %v9565_v34  ;;  %v6952_v5 = vsel %vm3598_vm1, %v6920_v4, %v9566_v30  ;;  %v7427_v34 = vpop.f32.mrf.mxu0  ;;  %v15686_v16 = vld [vmem:[%s15801_s7] ss:$0 sm:$0xff] }
 0x66c   : > { %v9574_v10 = vpop.permute.xlu0 %9573 }
 0x66d   : > { %v9576_v18 = vunpack.i.h.bf16 %v9574_v10  ;;  %v9575_v23 = vunpack.i.l.bf16 %v9574_v10  ;;  %v6885_v6 = vsel %vm3631_vm2, %v6853_v45, %v9550_v49  ;;  %v6886_v19 = vsel %vm3631_vm2, %v6854_v15, %v9551_v63  ;;  %v8435_v49 = vpop.f32.mrf.mxu0 }
 0x66e   : > { %v9559_v50 = vpop.permute.xlu1 %9558  ;;  %v7027_v22 = vpack.c.bf16 %v6886_v19, %v6885_v6 }
 0x66f   : > { %v6983_v52 = vsel %vm3631_vm2, %v6951_v36, %v9575_v23  ;;  %v6984_v26 = vsel %vm3631_vm2, %v6952_v5, %v9576_v18  ;;  %v9561_v62 = vunpack.i.h.bf16 %v9559_v50  ;;  %v9560_v59 = vunpack.i.l.bf16 %v9559_v50  ;;  %v7430_v10 = vpop.f32.mrf.mxu0 }
 0x670   : > { %7377 = vmatmul.mubr.bf16.gmra.mxu1 %v7027_v22  ;;  %v7031_v31 = vpack.c.bf16 %v6984_v26, %v6983_v52 }
 0x671   : > { %v6824_v39 = vsel %vm347_vm0, %v4648_v48, %v9561_v62  ;;  %v6823_v1 = vsel %vm347_vm0, %v4647_v2, %v9560_v59 }
 0x672   : > { %v9569_v40 = vpop.permute.xlu1 %9568  ;;  %7384 = vmatprep.mubr.bf16.mxu1 %v7031_v31  ;;  %v8438_v31 = vpop.f32.mrf.mxu0 }
 0x673   : > { %v9571_v32 = vunpack.i.h.bf16 %v9569_v40  ;;  %v9570_v38 = vunpack.i.l.bf16 %v9569_v40 }
 0x675   : > { %v6855_v11 = vsel %vm3598_vm1, %v6823_v1, %v9570_v38  ;;  %v6856_v42 = vsel %vm3598_vm1, %v6824_v39, %v9571_v32  ;;  %v7443_v38 = vpop.f32.mrf.mxu0 }
 0x676   : > { %v9579_v14 = vpop.permute.xlu1 %9578 }
 0x677   : > { %v9581_v54 = vunpack.i.h.bf16 %v9579_v14  ;;  %v9580_v58 = vunpack.i.l.bf16 %v9579_v14  ;;  %v8439_v14 = vpop.f32.mrf.mxu0 }
 0x679   : > { %v5979_v24 = vpop.permute.xlu0 %5978  ;;  %v6887_v17 = vsel %vm3631_vm2, %v6855_v11, %v9580_v58  ;;  %v6888_v57 = vsel %vm3631_vm2, %v6856_v42, %v9581_v54  ;;  %v7446_v11 = vpop.f32.mrf.mxu0 }
 0x67a   : > { %v6021_v21 = vmul.f32 %v5979_v24, %v15463_v41  ;;  %v5983_v9 = vpop.permute.xlu1 %5982  ;;  %v7030_v35 = vpack.c.bf16 %v6888_v57, %v6887_v17 }
 0x67b   : > { %v6022_v13 = vmul.f32 %v5983_v9, %v15453_v46 }
 0x67c   : > { %7385 = vmatmul.mubr.bf16.gmra.mxu1 %v7030_v35 }
 0x67d   : > { %v7029_v61 = vpack.c.bf16 %v6022_v13, %v6021_v21  ;;  %v5971_v56 = vpop.permute.xlu0 %5970 }
 0x67e   : > { %v6019_v12 = vmul.f32 %v5971_v56, %v5859_v29  ;;  %v5975_v0 = vpop.permute.xlu1 %5974 }
 0x67f   : > { %v6020_v55 = vmul.f32 %v5975_v0, %v5860_v20  ;;  %8460 = vmatprep.mubr.msk.bf16.mxu1 %vm347_vm0, %v7029_v61  ;;  %v8442_v0 = vpop.f32.mrf.mxu0 }
 0x681   : > { %v7026_v44 = vpack.c.bf16 %v6020_v55, %v6019_v12  ;;  %v5987_v8 = vpop.permute.xlu0 %5986 }
 0x682   : > { %v6023_v25 = vmul.f32 %v5987_v8, %v5863_v28  ;;  %v5991_v41 = vpop.permute.xlu1 %5990  ;;  %v7459_v8 = vpop.f32.mrf.mxu0 }
 0x683   : > { %v6024_v43 = vmul.f32 %v5991_v41, %v5864_v47  ;;  %8457 = vmatmul.mubr.msk.bf16.gmra.mxu0 %vm347_vm0, %v7026_v44 }
 0x685   : > { %v7032_v46 = vpack.c.bf16 %v6024_v43, %v6023_v25 }
 0x687   : > { %8461 = vmatmul.mubr.msk.bf16.vlgmr.msra.gmra.mxu1 %vm347_vm0, %v7032_v46 }
 0x688   : > { %v8278_v30 = vpop.f32.mrf.mxu1 }
 0x68a   : > { %v8279_v60 = vpop.f32.mrf.mxu1 }
 0x68b   : > { %v8280_v53 = vadd.f32 %v8279_v60, %v8278_v30  ;;  %v8443_v30 = vpop.f32.mrf.mxu0 }
 0x68c   : > { %v8281_v37 = vpop.f32.mrf.mxu1 }
 0x68d   : > { %v7267_v63 = vadd.f32 %v8280_v53, %v15686_v16 }
 0x68e   : > { %v8282_v4 = vpop.f32.mrf.mxu1 }
 0x68f   : > { %v8283_v3 = vadd.f32 %v8282_v4, %v8281_v37  ;;  %v7428_v45 = vadd.f32 %v7427_v34, %v7267_v63  ;;  %v7462_v63 = vpop.f32.mrf.mxu0 }
 0x691   : > { %v7270_v15 = vadd.f32 %v8283_v3, %v15686_v16  ;;  %9618 = vtanh.f32 %v7428_v45 }
 0x693   : > { %v7431_v18 = vadd.f32 %v7430_v10, %v7270_v15 }
 0x694   : > { %v8284_v23 = vpop.f32.mrf.mxu1 }
 0x695   : > { %9620 = vtanh.f32 %v7431_v18 }
 0x696   : > { %v8285_v6 = vpop.f32.mrf.mxu1 }
 0x697   : > { %v8286_v19 = vadd.f32 %v8285_v6, %v8284_v23 }
 0x698   : > { %v8287_v36 = vpop.f32.mrf.mxu1 }
 0x699   : > { %v7275_v5 = vadd.f32 %v8286_v19, %v15686_v16 }
 0x69a   : > { %v8288_v50 = vpop.f32.mrf.mxu1 }
 0x69b   : > { %v8289_v22 = vadd.f32 %v8288_v50, %v8287_v36  ;;  %v7436_v52 = vadd.f32 %v8434_v7, %v7275_v5 }
 0x69d   : > { %v7278_v26 = vadd.f32 %v8289_v22, %v15686_v16  ;;  %9622 = vtanh.f32 %v7436_v52  ;;  %v8446_v22 = vpop.f32.mrf.mxu0 }
 0x69e   : > { %v9619_v59 = vpop.eup %9618 }
 0x69f   : > { %v7439_v40 = vadd.f32 %v8435_v49, %v7278_v26 }
 0x6a0   : > { %v8290_v62 = vpop.f32.mrf.mxu1 }
 0x6a1   : > { %9624 = vtanh.f32 %v7439_v40 }
 0x6a2   : > { %v9621_v32 = vpop.eup %9620  ;;  %v8291_v51 = vpop.f32.mrf.mxu1 }
 0x6a3   : > { %v8040_v27 = vpack.c.bf16 %v9621_v32, %v9619_v59  ;;  %v8292_v2 = vadd.f32 %v8291_v51, %v8290_v62  ;;  %v7475_v62 = vpop.f32.mrf.mxu0 }
 0x6a4   : > { %v8293_v33 = vpop.f32.mrf.mxu1 }
 0x6a5   : > { %8041 = vst [vmem:[%s15695_s29] sm:$0xff] %v8040_v27   ;;  %v7283_v48 = vadd.f32 %v8292_v2, %v15686_v16  ;;  %v8447_v2 = vpop.f32.mrf.mxu0 }
 0x6a6   : > { %v8294_v39 = vpop.f32.mrf.mxu1 }
 0x6a7   : > { %v8295_v1 = vadd.f32 %v8294_v39, %v8293_v33  ;;  %v7444_v54 = vadd.f32 %v7443_v38, %v7283_v48 }
 0x6a9   : > { %v7286_v58 = vadd.f32 %v8295_v1, %v15686_v16  ;;  %9626 = vtanh.f32 %v7444_v54  ;;  %v7478_v1 = vpop.f32.mrf.mxu0 }
 0x6aa   : > { %v9623_v17 = vpop.eup %9622 }
 0x6ab   : > { %v7447_v42 = vadd.f32 %v7446_v11, %v7286_v58 }
 0x6ac   : > { %v8296_v24 = vpop.f32.mrf.mxu1 }
 0x6ad   : > { %9628 = vtanh.f32 %v7447_v42 }
 0x6ae   : > { %v9625_v57 = vpop.eup %9624  ;;  %v8297_v21 = vpop.f32.mrf.mxu1 }
 0x6af   : > { %v8045_v9 = vpack.c.bf16 %v9625_v57, %v9623_v17  ;;  %v8298_v35 = vadd.f32 %v8297_v21, %v8296_v24 }
 0x6b0   : > { %v8299_v13 = vpop.f32.mrf.mxu1 }
 0x6b1   : > { %8117 = vst [vmem:[%s15695_s29 + $0x8] sm:$0xff] %v8045_v9   ;;  %v7291_v61 = vadd.f32 %v8298_v35, %v15686_v16 }
 0x6b2   : > { %v8300_v29 = vpop.f32.mrf.mxu1 }
 0x6b3   : > { %v8301_v56 = vadd.f32 %v8300_v29, %v8299_v13  ;;  %v7452_v12 = vadd.f32 %v8438_v31, %v7291_v61 }
 0x6b5   : > { %v7294_v20 = vadd.f32 %v8301_v56, %v15686_v16  ;;  %9630 = vtanh.f32 %v7452_v12  ;;  %v8450_v56 = vpop.f32.mrf.mxu0 }
 0x6b6   : > { %v9627_v44 = vpop.eup %9626 }
 0x6b7   : > { %v7455_v55 = vadd.f32 %v8439_v14, %v7294_v20 }
 0x6b8   : > { %v8302_v47 = vpop.f32.mrf.mxu1 }
 0x6b9   : > { %9632 = vtanh.f32 %v7455_v55 }
 0x6ba   : > { %v9629_v28 = vpop.eup %9628  ;;  %v8303_v25 = vpop.f32.mrf.mxu1 }
 0x6bb   : > { %v8050_v41 = vpack.c.bf16 %v9629_v28, %v9627_v44  ;;  %v8304_v43 = vadd.f32 %v8303_v25, %v8302_v47  ;;  %v7491_v47 = vpop.f32.mrf.mxu0 }
 0x6bc   : > { %v8305_v46 = vpop.f32.mrf.mxu1 }
 0x6bd   : > { %8118 = vst [vmem:[%s15695_s29 + $0x10] sm:$0xff] %v8050_v41   ;;  %v7299_v7 = vadd.f32 %v8304_v43, %v15686_v16  ;;  %v8451_v43 = vpop.f32.mrf.mxu0 }
 0x6be   : > { %v8306_v34 = vpop.f32.mrf.mxu1 }
 0x6bf   : > { %v8307_v60 = vadd.f32 %v8306_v34, %v8305_v46  ;;  %v7460_v53 = vadd.f32 %v7459_v8, %v7299_v7 }
 0x6c1   : > { %v7302_v37 = vadd.f32 %v8307_v60, %v15686_v16  ;;  %9634 = vtanh.f32 %v7460_v53  ;;  %v7494_v60 = vpop.f32.mrf.mxu0 }
 0x6c2   : > { %v9631_v3 = vpop.eup %9630 }
 0x6c3   : > { %v7463_v49 = vadd.f32 %v7462_v63, %v7302_v37 }
 0x6c4   : > { %v8308_v4 = vpop.f32.mrf.mxu1 }
 0x6c5   : > { %9636 = vtanh.f32 %v7463_v49 }
 0x6c6   : > { %v9633_v45 = vpop.eup %9632  ;;  %v8309_v15 = vpop.f32.mrf.mxu1 }
 0x6c7   : > { %v8055_v10 = vpack.c.bf16 %v9633_v45, %v9631_v3  ;;  %v8310_v18 = vadd.f32 %v8309_v15, %v8308_v4 }
 0x6c8   : > { %v8311_v23 = vpop.f32.mrf.mxu1 }
 0x6c9   : > { %8119 = vst [vmem:[%s15695_s29 + $0x18] sm:$0xff] %v8055_v10   ;;  %v7307_v6 = vadd.f32 %v8310_v18, %v15686_v16 }
 0x6ca   : > { %v8312_v19 = vpop.f32.mrf.mxu1 }
 0x6cb   : > { %v8313_v36 = vadd.f32 %v8312_v19, %v8311_v23  ;;  %v7468_v5 = vadd.f32 %v8442_v0, %v7307_v6 }
 0x6cd   : > { %v7310_v50 = vadd.f32 %v8313_v36, %v15686_v16  ;;  %9638 = vtanh.f32 %v7468_v5  ;;  %v8454_v36 = vpop.f32.mrf.mxu0 }
 0x6ce   : > { %v9635_v31 = vpop.eup %9634 }
 0x6cf   : > { %v7471_v52 = vadd.f32 %v8443_v30, %v7310_v50 }
 0x6d0   : > { %v8314_v26 = vpop.f32.mrf.mxu1 }
 0x6d1   : > { %9640 = vtanh.f32 %v7471_v52 }
 0x6d2   : > { %v9637_v40 = vpop.eup %9636  ;;  %v8315_v59 = vpop.f32.mrf.mxu1 }
 0x6d3   : > { %v8060_v32 = vpack.c.bf16 %v9637_v40, %v9635_v31  ;;  %v8316_v38 = vadd.f32 %v8315_v59, %v8314_v26  ;;  %v7507_v26 = vpop.f32.mrf.mxu0 }
 0x6d4   : > { %v8317_v51 = vpop.f32.mrf.mxu1 }
 0x6d5   : > { %8120 = vst [vmem:[%s15695_s29 + $0x20] sm:$0xff] %v8060_v32   ;;  %v7315_v27 = vadd.f32 %v8316_v38, %v15686_v16  ;;  %v8455_v38 = vpop.f32.mrf.mxu0 }
 0x6d6   : > { %v8318_v33 = vpop.f32.mrf.mxu1 }
 0x6d7   : > { %v8319_v48 = vadd.f32 %v8318_v33, %v8317_v51  ;;  %v7476_v14 = vadd.f32 %v7475_v62, %v7315_v27 }
 0x6d9   : > { %v7318_v39 = vadd.f32 %v8319_v48, %v15686_v16  ;;  %9642 = vtanh.f32 %v7476_v14  ;;  %v7510_v48 = vpop.f32.mrf.mxu0 }
 0x6da   : > { %v9639_v11 = vpop.eup %9638 }
 0x6db   : > { %v7479_v54 = vadd.f32 %v7478_v1, %v7318_v39 }
 0x6dc   : > { %v8320_v58 = vpop.f32.mrf.mxu1 }
 0x6dd   : > { %9644 = vtanh.f32 %v7479_v54 }
 0x6de   : > { %v9641_v42 = vpop.eup %9640  ;;  %v8321_v24 = vpop.f32.mrf.mxu1 }
 0x6df   : > { %v8065_v17 = vpack.c.bf16 %v9641_v42, %v9639_v11  ;;  %v8322_v57 = vadd.f32 %v8321_v24, %v8320_v58 }
 0x6e0   : > { %v8323_v21 = vpop.f32.mrf.mxu1 }
 0x6e1   : > { %8121 = vst [vmem:[%s15695_s29 + $0x28] sm:$0xff] %v8065_v17   ;;  %v7323_v9 = vadd.f32 %v8322_v57, %v15686_v16 }
 0x6e2   : > { %v8324_v35 = vpop.f32.mrf.mxu1 }
 0x6e3   : > { %v8325_v13 = vadd.f32 %v8324_v35, %v8323_v21  ;;  %v7484_v61 = vadd.f32 %v8446_v22, %v7323_v9 }
 0x6e5   : > { %v7326_v29 = vadd.f32 %v8325_v13, %v15686_v16  ;;  %9646 = vtanh.f32 %v7484_v61 }
 0x6e6   : > { %v9643_v0 = vpop.eup %9642 }
 0x6e7   : > { %v7487_v12 = vadd.f32 %v8447_v2, %v7326_v29 }
 0x6e8   : > { %v8326_v20 = vpop.f32.mrf.mxu1 }
 0x6e9   : > { %9648 = vtanh.f32 %v7487_v12 }
 0x6ea   : > { %v9645_v55 = vpop.eup %9644  ;;  %v8327_v44 = vpop.f32.mrf.mxu1 }
 0x6eb   : > { %v8070_v28 = vpack.c.bf16 %v9645_v55, %v9643_v0  ;;  %v8328_v8 = vadd.f32 %v8327_v44, %v8326_v20 }
 0x6ec   : > { %v8329_v25 = vpop.f32.mrf.mxu1 }
 0x6ed   : > { %8122 = vst [vmem:[%s15695_s29 + $0x30] sm:$0xff] %v8070_v28   ;;  %v7331_v41 = vadd.f32 %v8328_v8, %v15686_v16 }
 0x6ee   : > { %v8330_v46 = vpop.f32.mrf.mxu1 }
 0x6ef   : > { %v8331_v7 = vadd.f32 %v8330_v46, %v8329_v25  ;;  %v7492_v30 = vadd.f32 %v7491_v47, %v7331_v41 }
 0x6f1   : > { %v7334_v34 = vadd.f32 %v8331_v7, %v15686_v16  ;;  %9650 = vtanh.f32 %v7492_v30 }
 0x6f2   : > { %v9647_v63 = vpop.eup %9646 }
 0x6f3   : > { %v7495_v53 = vadd.f32 %v7494_v60, %v7334_v34 }
 0x6f4   : > { %v8332_v37 = vpop.f32.mrf.mxu1 }
 0x6f5   : > { %9652 = vtanh.f32 %v7495_v53 }
 0x6f6   : > { %v9649_v49 = vpop.eup %9648  ;;  %v8333_v4 = vpop.f32.mrf.mxu1 }
 0x6f7   : > { %v8075_v3 = vpack.c.bf16 %v9649_v49, %v9647_v63  ;;  %v8334_v45 = vadd.f32 %v8333_v4, %v8332_v37 }
 0x6f8   : > { %v8335_v15 = vpop.f32.mrf.mxu1 }
 0x6f9   : > { %8123 = vst [vmem:[%s15695_s29 + $0x38] sm:$0xff] %v8075_v3   ;;  %v7339_v10 = vadd.f32 %v8334_v45, %v15686_v16 }
 0x6fa   : > { %v8336_v18 = vpop.f32.mrf.mxu1 }
 0x6fb   : > { %v8337_v23 = vadd.f32 %v8336_v18, %v8335_v15  ;;  %v7500_v6 = vadd.f32 %v8450_v56, %v7339_v10 }
 0x6fd   : > { %v7342_v19 = vadd.f32 %v8337_v23, %v15686_v16  ;;  %9654 = vtanh.f32 %v7500_v6 }
 0x6fe   : > { %v9651_v22 = vpop.eup %9650 }
 0x6ff   : > { %v7503_v5 = vadd.f32 %v8451_v43, %v7342_v19 }
 0x700   : > { %v8338_v50 = vpop.f32.mrf.mxu1 }
 0x701   : > { %9656 = vtanh.f32 %v7503_v5 }
 0x702   : > { %v9653_v52 = vpop.eup %9652  ;;  %v8339_v31 = vpop.f32.mrf.mxu1 }
 0x703   : > { %v8080_v40 = vpack.c.bf16 %v9653_v52, %v9651_v22  ;;  %v8340_v62 = vadd.f32 %v8339_v31, %v8338_v50 }
 0x704   : > { %v8341_v59 = vpop.f32.mrf.mxu1 }
 0x705   : > { %8124 = vst [vmem:[%s15695_s29 + $0x40] sm:$0xff] %v8080_v40   ;;  %v7347_v32 = vadd.f32 %v8340_v62, %v15686_v16 }
 0x706   : > { %v8342_v51 = vpop.f32.mrf.mxu1 }
 0x707   : > { %v8343_v27 = vadd.f32 %v8342_v51, %v8341_v59  ;;  %v7508_v2 = vadd.f32 %v7507_v26, %v7347_v32 }
 0x709   : > { %v7350_v33 = vadd.f32 %v8343_v27, %v15686_v16  ;;  %9658 = vtanh.f32 %v7508_v2 }
 0x70a   : > { %v9655_v1 = vpop.eup %9654 }
 0x70b   : > { %v7511_v14 = vadd.f32 %v7510_v48, %v7350_v33 }
 0x70c   : > { %v8344_v39 = vpop.f32.mrf.mxu1 }
 0x70d   : > { %9660 = vtanh.f32 %v7511_v14 }
 0x70e   : > { %v9657_v54 = vpop.eup %9656  ;;  %v8345_v58 = vpop.f32.mrf.mxu1 }
 0x70f   : > { %v8085_v11 = vpack.c.bf16 %v9657_v54, %v9655_v1  ;;  %v8346_v42 = vadd.f32 %v8345_v58, %v8344_v39 }
 0x710   : > { %v8347_v24 = vpop.f32.mrf.mxu1 }
 0x711   : > { %8125 = vst [vmem:[%s15695_s29 + $0x48] sm:$0xff] %v8085_v11   ;;  %v7355_v17 = vadd.f32 %v8346_v42, %v15686_v16 }
 0x712   : > { %v8348_v57 = vpop.f32.mrf.mxu1 }
 0x713   : > { %v8349_v21 = vadd.f32 %v8348_v57, %v8347_v24  ;;  %v7516_v9 = vadd.f32 %v8454_v36, %v7355_v17 }
 0x715   : > { %v7358_v35 = vadd.f32 %v8349_v21, %v15686_v16  ;;  %9662 = vtanh.f32 %v7516_v9 }
 0x716   : > { %v9659_v29 = vpop.eup %9658 }
 0x717   : > { %v7519_v13 = vadd.f32 %v8455_v38, %v7358_v35 }
 0x718   : > { %v8350_v61 = vpop.f32.mrf.mxu1 }
 0x719   : > { %9664 = vtanh.f32 %v7519_v13 }
 0x71a   : > { %v9661_v56 = vpop.eup %9660  ;;  %v8351_v12 = vpop.f32.mrf.mxu1 }
 0x71b   : > { %v8090_v20 = vpack.c.bf16 %v9661_v56, %v9659_v29  ;;  %v8352_v49 = vadd.f32 %v8351_v12, %v8350_v61 }
 0x71c   : > { %v8353_v0 = vpop.f32.mrf.mxu1 }
 0x71d   : > { %8126 = vst [vmem:[%s15695_s29 + $0x50] sm:$0xff] %v8090_v20   ;;  %v7363_v19 = vadd.f32 %v8352_v49, %v15686_v16 }
 0x71e   : > { %v8354_v55 = vpop.f32.mrf.mxu1 }
 0x71f   : > { %v8355_v18 = vadd.f32 %v8354_v55, %v8353_v0 }
 0x721   : > { %v7366_v59 = vadd.f32 %v8355_v18, %v15686_v16 }
 0x722   : > { %v9663_v44 = vpop.eup %9662 }
 0x724   : > { %v8356_v47 = vpop.f32.mrf.mxu1 }
 0x726   : > { %v9665_v28 = vpop.eup %9664  ;;  %v8357_v8 = vpop.f32.mrf.mxu1 }
 0x727   : > { %v8095_v25 = vpack.c.bf16 %v9665_v28, %v9663_v44  ;;  %v8358_v37 = vadd.f32 %v8357_v8, %v8356_v47 }
 0x728   : > { %v8359_v41 = vpop.f32.mrf.mxu1 }
 0x729   : > { %8127 = vst [vmem:[%s15695_s29 + $0x58] sm:$0xff] %v8095_v25   ;;  %v7371_v15 = vadd.f32 %v8358_v37, %v15686_v16 }
 0x72a   : > { %v8360_v43 = vpop.f32.mrf.mxu1 }
 0x72b   : > { %v8361_v4 = vadd.f32 %v8360_v43, %v8359_v41 }
 0x72d   : > { %v7374_v50 = vadd.f32 %v8361_v4, %v15686_v16 }
 0x730   : > { %v8362_v46 = vpop.f32.mrf.mxu1 }
 0x732   : > { %v8363_v7 = vpop.f32.mrf.mxu1 }
 0x733   : > { %v8364_v23 = vadd.f32 %v8363_v7, %v8362_v46 }
 0x734   : > { %v8365_v30 = vpop.f32.mrf.mxu1 }
 0x735   : > { %v7379_v51 = vadd.f32 %v8364_v23, %v15686_v16 }
 0x736   : > { %v8366_v34 = vpop.f32.mrf.mxu1 }
 0x737   : > { %v8367_v40 = vadd.f32 %v8366_v34, %v8365_v30 }
 0x739   : > { %v7382_v1 = vadd.f32 %v8367_v40, %v15686_v16 }
 0x73c   : > { %v8368_v60 = vpop.f32.mrf.mxu1 }
 0x73e   : > { %v8369_v53 = vpop.f32.mrf.mxu1 }
 0x73f   : > { %v8370_v3 = vadd.f32 %v8369_v53, %v8368_v60 }
 0x740   : > { %v8371_v63 = vpop.f32.mrf.mxu1 }
 0x741   : > { %v7387_v26 = vadd.f32 %v8370_v3, %v15686_v16 }
 0x742   : > { %v8372_v45 = vpop.f32.mrf.mxu1 }
 0x743   : > { %v8458_v10 = vpop.f32.mrf.mxu0  ;;  %v8373_v5 = vadd.f32 %v8372_v45, %v8371_v63 }
 0x744   : > { %v7532_v6 = vadd.f32 %v8458_v10, %v7371_v15 }
 0x745   : > { %v7523_v36 = vpop.f32.mrf.mxu0  ;;  %v7390_v33 = vadd.f32 %v8373_v5, %v15686_v16 }
 0x746   : > { %v7524_v22 = vadd.f32 %v7523_v36, %v7363_v19  ;;  %9666 = vtanh.f32 %v7532_v6 }
 0x747   : > { %v8459_v52 = vpop.f32.mrf.mxu0  ;;  %v8462_v31 = vpop.f32.mrf.mxu1 }
 0x748   : > { %v7535_v62 = vadd.f32 %v8459_v52, %v7374_v50  ;;  %v7548_v32 = vadd.f32 %v8462_v31, %v7387_v26 }
 0x749   : > { %v7526_v38 = vpop.f32.mrf.mxu0  ;;  %v7539_v27 = vpop.f32.mrf.mxu1 }
 0x74a   : > { %9668 = vtanh.f32 %v7535_v62  ;;  %v7527_v2 = vadd.f32 %v7526_v38, %v7366_v59  ;;  %v7540_v48 = vadd.f32 %v7539_v27, %v7379_v51 }
 0x74b   : > { %9670 = vtanh.f32 %v7524_v22  ;;  %v8463_v14 = vpop.f32.mrf.mxu1 }
 0x74c   : > { %9672 = vtanh.f32 %v7527_v2  ;;  %v7551_v39 = vadd.f32 %v8463_v14, %v7390_v33 }
 0x74d   : > { %9674 = vtanh.f32 %v7548_v32  ;;  %v7542_v54 = vpop.f32.mrf.mxu1 }
 0x74e   : > { %9676 = vtanh.f32 %v7551_v39  ;;  %v7543_v58 = vadd.f32 %v7542_v54, %v7382_v1 }
 0x74f   : > { %9678 = vtanh.f32 %v7540_v48 }
 0x750   : > { %9680 = vtanh.f32 %v7543_v58 }
 0x753   : > { %v9667_v11 = vpop.eup %9666 }
 0x757   : > { %v9669_v42 = vpop.eup %9668 }
 0x758   : > { %v9671_v24 = vpop.eup %9670  ;;  %v8105_v17 = vpack.c.bf16 %v9669_v42, %v9667_v11 }
 0x759   : > { %v9673_v57 = vpop.eup %9672 }
 0x75a   : > { %v9675_v21 = vpop.eup %9674  ;;  %8129 = vst [vmem:[%s15695_s29 + $0x68] sm:$0xff] %v8105_v17   ;;  %v8100_v9 = vpack.c.bf16 %v9673_v57, %v9671_v24 }
 0x75b   : > { %v9677_v16 = vpop.eup %9676 }
 0x75c   : > { %v9679_v35 = vpop.eup %9678  ;;  %8128 = vst [vmem:[%s15695_s29 + $0x60] sm:$0xff] %v8100_v9   ;;  %v8115_v13 = vpack.c.bf16 %v9677_v16, %v9675_v21 }
 0x75d   : > { %v9681_v61 = vpop.eup %9680 }
 0x75e   : > { %8131 = vst [vmem:[%s15695_s29 + $0x78] sm:$0xff] %v8115_v13   ;;  %v8110_v29 = vpack.c.bf16 %v9681_v61, %v9679_v35 }
 0x760   : > { %8130 = vst [vmem:[%s15695_s29 + $0x70] sm:$0xff] %v8110_v29  }
 0x761   : > { %9826 = shalt.err (!%p9823_p3)
}
 0x762   : > { %s9827_s24 = scalar_lea.hbm %s15744_s22, 2048  ;;  %s9831_s17 = scalar_lea.hbm %s15803_s9, 4096 }
 0x763   : > { %p9828_p4 = scmp.ne.s32.totalorder %s15744_s22, %s9827_s24  ;;  %p9832_p9 = scmp.lt.s32.totalorder %s15744_s22, %s15803_s9 }
 0x764   : > { %p9833_p10 = scmp.lt.s32.totalorder %s9831_s17, %s9827_s24 }
 0x765   : > { %p9829_p7 = pnand %p9828_p4, %p9984_p5 }
 0x766   : > { %p9834_p11 = por %p9833_p10, %p9832_p9 }
 0x767   : > { %p9830_p8 = pneg %p9829_p7 }
 0x769   : > { %p9835_p12 = pnand %p9834_p11, %p9830_p8 }
 0x76b   : > { %9838 = shalt.err (!%p9835_p12)
}
 0x76c   : > { %s9895_s27 = smov 4  }
 0x76d   : > { %8532 = dma.vmem_to_hbm [thread:$0]  (%p9984_p5), %s15747_s25, 2048, %s15744_s22, %s15752_s13, %s9892_s28, %s9892_s28, %s9895_s27  }
 0x76e PF: > { %p8538_p13 = scmp.ge.s32.totalorder %s9873_s12, 2  ;;  %s7775_s14 = sand.u32 1, %s9861_s30  }
 0x76f   : > { %s7776_s26 = scalar_lea.sflag [#allocation4], %s7775_s14 }
 0x770   : > { %p8535_p0 = pnand %p8538_p13, %p9988_p6 }
 0x772   : > { %p8536_p1 = pneg %p8535_p0 }
 0x774   : > { %9856 = dma.done.wait (%p8536_p1), %s7776_s26, 2048  }
 0x775   : > { %9858 = vsyncadd (%p8536_p1), %s7776_s26, 4294965248  ;;  %p19_p2 = scmp.ge.s32.totalorder %s9971_s15, 4   ;;  %s16883_s30 = smov %s9865_s10 }
 0x776   : > { %s16884_s10 = smov %s9869_s11  ;;  %s16885_s11 = smov %s9982_s18 }
 0x777   : > { %s16886_s12 = smov %s9971_s15  ;;  %21 = sbr.rel (!%p19_p2) target bundleno = 3 (0x3), region = 101 }
 0x77c   :  { %7781 = vsyncpa [#allocation4], 1 }
 0x77d   :  { %7783 = vsyncpa [#allocation4 + $0x1], 1 }

</bundles_post_ra>
